<compile_context>
chip_gen: v7x
topology: tpu7x:2x2x1
jax: 0.10.0
libtpu: 0.0.40
codegen_flags: <defaults>
</compile_context>

<pallas_src>
import functools

import jax
import jax.numpy as jnp
from jax.experimental import pallas as pl
from jax.experimental.pallas import tpu as pltpu

_LANES = 128  # lane-dense padding for the flow_make weight slabs (MXU N dim)


# ----------------------------------------------------------------------------
# helpers
# ----------------------------------------------------------------------------
def _round_up(a, b):
    return (a + b - 1) // b * b


def _pick_row_tile(m, bytes_per_row, target_bytes=2 << 20):
    """Row tile targeting ~2 MiB blocks; keeps >= 2 grid steps when m allows."""
    tm = max(8, min(4096, target_bytes // max(int(bytes_per_row), 1)))
    tm = tm // 8 * 8
    if m > tm:
        return _round_up(m, tm), tm
    if m >= 16:
        half = _round_up((m + 1) // 2, 8)
        return 2 * half, half
    mp = _round_up(m, 8)
    return mp, mp


def _bn_fold(p):
    scale = p['gamma'] / jnp.sqrt(p['var'] + 1e-5)
    bias = (p['b'] - p['mean']) * scale + p['beta']
    return scale, bias


# ----------------------------------------------------------------------------
# Pallas kernels
# ----------------------------------------------------------------------------
def _dw_conv_bn_relu_kernel(xee_ref, xeo_ref, xoe_ref, xoo_ref,
                            w_ref, s_ref, b_ref, o_ref, *, oh, ow):
    """Depthwise 3x3 stride-2 conv + folded BN + ReLU for one NHWC image.

    The stride-2 taps are contiguous slices of the four row/col parity planes
    (even/even, even/odd, odd/even, odd/odd): no 9x tap tensor in HBM, no
    strided or halo reads. Pure VPU FMA with f32 epilogue.
    """
    planes = {(0, 0): xee_ref, (0, 1): xeo_ref,
              (1, 0): xoe_ref, (1, 1): xoo_ref}
    acc = None
    for di in range(3):
        ai, bi = di // 2, di % 2
        for dj in range(3):
            aj, bj = dj // 2, dj % 2
            ref = planes[(bi, bj)]
            tap = ref[0, ai:ai + oh, aj:aj + ow, :].astype(jnp.float32)
            term = tap * w_ref[di * 3 + dj]           # (1, C) broadcast
            acc = term if acc is None else acc + term
    y = acc * s_ref[...] + b_ref[...]                 # folded BatchNorm
    o_ref[0] = jnp.maximum(y, 0.0)                    # ReLU


def _flow_make_kernel(xf_ref, sf_ref, wx_ref, ws_ref, o_ref, *, wp, rows):
    """flow_make: 3x3 conv (pad=1, bias=False) on cat([x, seg_down]), one image.

    Inputs are the spatially padded planes flattened to (rows_pad, C) bf16; the
    im2col is fused: each of the 9 taps is a contiguous (rows, C) slice fed to
    the MXU against a (C, 128) weight slab, accumulated in f32. cat() is fused
    away by keeping separate weight slabs for x and seg_down. Rows with
    col >= W are wrap-around junk that the wrapper discards.
    """
    acc = jnp.zeros((rows, _LANES), jnp.float32)
    for di in range(3):
        for dj in range(3):
            t = di * 3 + dj
            s = di * wp + dj
            tx = xf_ref[0, s:s + rows, :]
            ts = sf_ref[0, s:s + rows, :]
            acc = acc + jnp.dot(tx, wx_ref[t], preferred_element_type=jnp.float32)
            acc = acc + jnp.dot(ts, ws_ref[t], preferred_element_type=jnp.float32)
    o_ref[0] = acc[:, :2]      # only 2 real output channels -> small f32 store


def _warp_blend_kernel(x_ref, v_ref, w_ref, e_ref, b_ref):
    """Fused bilinear blend of the 4 gathered corners + edge = x - body."""
    body = (v_ref[0].astype(jnp.float32) * w_ref[:, 0:1] +
            v_ref[1].astype(jnp.float32) * w_ref[:, 1:2] +
            v_ref[2].astype(jnp.float32) * w_ref[:, 2:3] +
            v_ref[3].astype(jnp.float32) * w_ref[:, 3:4])
    b_ref[...] = body
    e_ref[...] = x_ref[...].astype(jnp.float32) - body


# ----------------------------------------------------------------------------
# Pallas wrappers
# ----------------------------------------------------------------------------
def dw_conv_bn_relu(x, p):
    """Depthwise 3x3 stride-2 (no pad) + folded BN + ReLU. x: (n, H, W, C) NHWC."""
    n, H, W, C = x.shape
    oh, ow = (H - 3) // 2 + 1, (W - 3) // 2 + 1
    He, We = _round_up(H, 2), _round_up(W, 2)
    xp = jnp.pad(x, ((0, 0), (0, He - H), (0, We - W), (0, 0))).astype(jnp.bfloat16)
    H2, W2 = He // 2, We // 2
    xr = xp.reshape(n, H2, 2, W2, 2, C)
    # One ~1x parity repack (replaces the previous 9x tap tensor in HBM).
    xee, xeo = xr[:, :, 0, :, 0, :], xr[:, :, 0, :, 1, :]
    xoe, xoo = xr[:, :, 1, :, 0, :], xr[:, :, 1, :, 1, :]

    # torch weight (C, 1, 3, 3) -> (9, 1, C) with tap index t = di*3 + dj
    w_taps = jnp.transpose(p['w'].reshape(C, 9), (1, 0)).reshape(9, 1, C)
    scale, bias = _bn_fold(p)

    plane_spec = pl.BlockSpec((1, H2, W2, C), lambda i: (i, 0, 0, 0))
    kernel = functools.partial(_dw_conv_bn_relu_kernel, oh=oh, ow=ow)
    return pl.pallas_call(
        kernel,
        out_shape=jax.ShapeDtypeStruct((n, oh, ow, C), jnp.float32),
        grid_spec=pltpu.PrefetchScalarGridSpec(
            num_scalar_prefetch=0, grid=(n,),
            in_specs=[plane_spec, plane_spec, plane_spec, plane_spec,
                      pl.BlockSpec((9, 1, C), lambda i: (0, 0, 0)),
                      pl.BlockSpec((1, C), lambda i: (0, 0)),
                      pl.BlockSpec((1, C), lambda i: (0, 0))],
            out_specs=pl.BlockSpec((1, oh, ow, C), lambda i: (i, 0, 0, 0))),
        compiler_params=pltpu.CompilerParams(
            dimension_semantics=("parallel",)),
    )(xee, xeo, xoe, xoo, w_taps, scale.reshape(1, C), bias.reshape(1, C))


def flow_make_pallas(x_nhwc, seg_nhwc, w):
    """flow_make conv on cat([x, seg_down]) without materializing cat or im2col."""
    n, H, W, C = x_nhwc.shape
    wp = W + 2
    rows = H * wp
    rows_pad = (H + 3) * wp   # 2 extra bottom pad rows keep the last tap slice in bounds

    def prep(t):              # conv pad=1 + bf16 + free flatten of (H+3, W+2)
        tp = jnp.pad(t.astype(jnp.bfloat16), ((0, 0), (1, 2), (1, 1), (0, 0)))
        return tp.reshape(n, rows_pad, C)

    xf, sf = prep(x_nhwc), prep(seg_nhwc)

    def prep_w(wi):           # (2, C, 3, 3) -> (9, C, 128) bf16, t = di*3 + dj
        wt = jnp.transpose(wi, (2, 3, 1, 0)).reshape(9, C, 2)
        return jnp.pad(wt, ((0, 0), (0, 0), (0, _LANES - 2))).astype(jnp.bfloat16)

    wx9, ws9 = prep_w(w[:, :C]), prep_w(w[:, C:])

    kernel = functools.partial(_flow_make_kernel, wp=wp, rows=rows)
    out = pl.pallas_call(
        kernel,
        out_shape=jax.ShapeDtypeStruct((n, rows, 2), jnp.float32),
        grid_spec=pltpu.PrefetchScalarGridSpec(
            num_scalar_prefetch=0, grid=(n,),
            in_specs=[pl.BlockSpec((1, rows_pad, C), lambda i: (i, 0, 0)),
                      pl.BlockSpec((1, rows_pad, C), lambda i: (i, 0, 0)),
                      pl.BlockSpec((9, C, _LANES), lambda i: (0, 0, 0)),
                      pl.BlockSpec((9, C, _LANES), lambda i: (0, 0, 0))],
            out_specs=pl.BlockSpec((1, rows, 2), lambda i: (i, 0, 0))),
        compiler_params=pltpu.CompilerParams(
            dimension_semantics=("parallel",)),
    )(xf, sf, wx9, ws9)
    # drop the wrap-around junk columns (col >= W)
    return out.reshape(n, H, wp, 2)[:, :, :W, :]      # (n, H, W, 2) NHWC flow


def flow_warp_edge(x_nhwc, flow):
    """grid_sample(x, base_grid + flow/[W,H]) + edge = x - body. NHWC in/out."""
    n, H, W, C = x_nhwc.shape
    M = n * H * W
    hg = jnp.linspace(-1.0, 1.0, H, dtype=jnp.float32)
    wg = jnp.linspace(-1.0, 1.0, W, dtype=jnp.float32)
    gx = wg[None, None, :] + flow[..., 0] / float(W)
    gy = hg[None, :, None] + flow[..., 1] / float(H)
    # grid_sample default: bilinear, zeros padding, align_corners=False
    ix = ((gx + 1.0) * W - 1.0) * 0.5
    iy = ((gy + 1.0) * H - 1.0) * 0.5
    ix0, iy0 = jnp.floor(ix), jnp.floor(iy)

    xg = x_nhwc.astype(jnp.bfloat16).reshape(n, H * W, C)   # bf16 gather source
    vs, ws = [], []
    for dy in (0, 1):
        for dx in (0, 1):
            cx, cy = ix0 + dx, iy0 + dy
            wgt = (1.0 - jnp.abs(ix - cx)) * (1.0 - jnp.abs(iy - cy))
            valid = (cx >= 0) & (cx <= W - 1) & (cy >= 0) & (cy <= H - 1)
            wgt = jnp.where(valid, wgt, 0.0)                 # zeros padding mode
            cxi = jnp.clip(cx, 0, W - 1).astype(jnp.int32)
            cyi = jnp.clip(cy, 0, H - 1).astype(jnp.int32)
            idx = (cyi * W + cxi).reshape(n, H * W)
            vv = jnp.take_along_axis(xg, idx[..., None], axis=1)   # XLA gather
            vs.append(vv.reshape(M, C))
            ws.append(wgt.reshape(M))
    v = jnp.stack(vs, axis=0)                 # (4, M, C) bf16 corner stream
    wts = jnp.stack(ws, axis=-1)              # (M, 4) f32 weights (validity folded)
    x_flat = xg.reshape(M, C)

    bytes_per_row = 2 * C + 4 * 2 * C + 4 * 4 + 2 * 4 * C
    Mp, tm = _pick_row_tile(M, bytes_per_row)
    pad = Mp - M
    if pad:
        x_flat = jnp.pad(x_flat, ((0, pad), (0, 0)))
        v = jnp.pad(v, ((0, 0), (0, pad), (0, 0)))
        wts = jnp.pad(wts, ((0, pad), (0, 0)))

    edge, body = pl.pallas_call(
        _warp_blend_kernel,
        out_shape=(jax.ShapeDtypeStruct((Mp, C), jnp.float32),
                   jax.ShapeDtypeStruct((Mp, C), jnp.float32)),
        grid_spec=pltpu.PrefetchScalarGridSpec(
            num_scalar_prefetch=0, grid=(Mp // tm,),
            in_specs=[pl.BlockSpec((tm, C), lambda i: (i, 0)),
                      pl.BlockSpec((4, tm, C), lambda i: (0, i, 0)),
                      pl.BlockSpec((tm, 4), lambda i: (i, 0))],
            out_specs=[pl.BlockSpec((tm, C), lambda i: (i, 0)),
                       pl.BlockSpec((tm, C), lambda i: (i, 0))]),
        compiler_params=pltpu.CompilerParams(
            dimension_semantics=("parallel",)),
    )(x_flat, v, wts)
    edge = edge[:M].reshape(n, H, W, C)
    body = body[:M].reshape(n, H, W, C)
    return edge, body


# ----------------------------------------------------------------------------
# JAX glue
# ----------------------------------------------------------------------------
def resize_bilinear_align_corners(x, oh, ow):
    """NHWC bilinear resize, align_corners=True (matches F.upsample)."""
    n, h, w, c = x.shape

    def axis(o, i):
        if o == 1 or i == 1:
            z = jnp.zeros((o,), jnp.int32)
            return z, z, jnp.zeros((o,), jnp.float32)
        src = jnp.arange(o, dtype=jnp.float32) * ((i - 1) / (o - 1))
        lo = jnp.clip(jnp.floor(src).astype(jnp.int32), 0, i - 1)
        hi = jnp.clip(lo + 1, 0, i - 1)
        return lo, hi, src - lo.astype(jnp.float32)

    y0, y1, fy = axis(oh, h)
    x0, x1, fx = axis(ow, w)
    rows = (jnp.take(x, y0, axis=1) * (1.0 - fy)[None, :, None, None] +
            jnp.take(x, y1, axis=1) * fy[None, :, None, None])
    out = (jnp.take(rows, x0, axis=2) * (1.0 - fx)[None, None, :, None] +
           jnp.take(rows, x1, axis=2) * fx[None, None, :, None])
    return out


# ----------------------------------------------------------------------------
# SqueezeBodyEdge_high forward
# ----------------------------------------------------------------------------
def squeeze_body_edge_high_forward(params, x):
    """x: (n, C, H, W) NCHW (PyTorch convention). Internals run NHWC."""
    n, C, H, W = x.shape
    xh = jnp.transpose(x, (0, 2, 3, 1))                         # boundary transpose
    d1 = dw_conv_bn_relu(xh, params['down1'])                   # (n, h1, w1, C)
    d2 = dw_conv_bn_relu(d1, params['down2'])                   # (n, h2, w2, C)
    seg_down = resize_bilinear_align_corners(d2, H, W)          # (n, H, W, C)
    flow = flow_make_pallas(xh, seg_down, params['flow_make']['w'])  # (n, H, W, 2)
    edge, body = flow_warp_edge(xh, flow)
    to_nchw = lambda t: jnp.transpose(t, (0, 3, 1, 2))          # boundary transpose
    return to_nchw(edge), to_nchw(body)


# ----------------------------------------------------------------------------
# Deterministic synthetic parameters (shapes follow SqueezeBodyEdge_high.__init__)
# ----------------------------------------------------------------------------
def init_params(key, inplane):
    keys = iter(jax.random.split(key, 32))

    def nrm(shape, scale=0.1):
        return scale * jax.random.normal(next(keys), shape, jnp.float32)

    def bn(c):
        return dict(
            gamma=1.0 + 0.1 * jax.random.normal(next(keys), (c,), jnp.float32),
            beta=0.1 * jax.random.normal(next(keys), (c,), jnp.float32),
            mean=0.1 * jax.random.normal(next(keys), (c,), jnp.float32),
            var=1.0 + 0.1 * jnp.abs(jax.random.normal(next(keys), (c,), jnp.float32)))

    def dwblk(c):
        d = dict(w=nrm((c, 1, 3, 3)), b=nrm((c,)))   # depthwise conv weight + bias
        d.update(bn(c))
        return d

    return dict(
        down1=dwblk(inplane),
        down2=dwblk(inplane),
        flow_make=dict(w=nrm((2, 2 * inplane, 3, 3))),   # bias=False
    )


if __name__ == "__main__":
    key = jax.random.PRNGKey(0)
    inplane = 4
    n, H, W = 2, 16, 16
    kx, kp = jax.random.split(key)
    x = jax.random.normal(kx, (n, inplane, H, W), jnp.float32)
    params = init_params(kp, inplane)

    fwd = jax.jit(squeeze_body_edge_high_forward)
    flow_edge, flow_body = jax.block_until_ready(fwd(params, x))

    assert flow_edge.shape == (n, inplane, H, W), flow_edge.shape
    assert flow_body.shape == (n, inplane, H, W), flow_body.shape
    assert bool(jnp.all(jnp.isfinite(flow_edge)))
    assert bool(jnp.all(jnp.isfinite(flow_body)))
    print("KERNEL_OK")
</pallas_src>

<mosaic_0001>
module attributes {stable_mosaic.version = 11 : i64} {
  func.func @_dw_conv_bn_relu_kernel(%arg0: i32, %arg1: memref<1x8x8x4xbf16, #tpu.memory_space<vmem>>, %arg2: memref<1x8x8x4xbf16, #tpu.memory_space<vmem>>, %arg3: memref<1x8x8x4xbf16, #tpu.memory_space<vmem>>, %arg4: memref<1x8x8x4xbf16, #tpu.memory_space<vmem>>, %arg5: memref<9x1x4xf32, #tpu.memory_space<vmem>>, %arg6: memref<1x4xf32, #tpu.memory_space<vmem>>, %arg7: memref<1x4xf32, #tpu.memory_space<vmem>>, %arg8: memref<1x7x7x4xf32, #tpu.memory_space<vmem>>) attributes {dimension_semantics = [#tpu.dimension_semantics<parallel>], iteration_bounds = array<i64: 2>, scalar_prefetch = 0 : i64, scratch_operands = 0 : i64, tpu.core_type = #tpu.core_type<tc>, window_params = [{transform_indices = @transform_0, window_bounds = array<i64: 1, 8, 8, 4>}, {transform_indices = @transform_1, window_bounds = array<i64: 1, 8, 8, 4>}, {transform_indices = @transform_2, window_bounds = array<i64: 1, 8, 8, 4>}, {transform_indices = @transform_3, window_bounds = array<i64: 1, 8, 8, 4>}, {pipeline_mode = #tpu.pipeline_mode<synchronous>, transform_indices = @transform_4, window_bounds = array<i64: 9, 1, 4>}, {pipeline_mode = #tpu.pipeline_mode<synchronous>, transform_indices = @transform_5, window_bounds = array<i64: 1, 4>}, {pipeline_mode = #tpu.pipeline_mode<synchronous>, transform_indices = @transform_6, window_bounds = array<i64: 1, 4>}, {transform_indices = @transform_7, window_bounds = array<i64: 1, 7, 7, 4>}]} {
    %c0 = arith.constant 0 : index
    %c0_0 = arith.constant 0 : index
    %c0_1 = arith.constant 0 : index
    %c0_2 = arith.constant 0 : index
    %0 = vector.load %arg1[%c0, %c0_0, %c0_1, %c0_2] : memref<1x8x8x4xbf16, #tpu.memory_space<vmem>>, vector<1x7x7x4xbf16>
    %1 = vector.shape_cast %0 : vector<1x7x7x4xbf16> to vector<7x7x4xbf16>
    %2 = arith.extf %1 : vector<7x7x4xbf16> to vector<7x7x4xf32>
    %c0_3 = arith.constant 0 : index
    %c0_4 = arith.constant 0 : index
    %c0_5 = arith.constant 0 : index
    %3 = vector.load %arg5[%c0_3, %c0_4, %c0_5] : memref<9x1x4xf32, #tpu.memory_space<vmem>>, vector<1x1x4xf32>
    %4 = vector.shape_cast %3 : vector<1x1x4xf32> to vector<1x4xf32>
    %5 = vector.shape_cast %4 : vector<1x4xf32> to vector<1x1x4xf32>
    %6 = vector.broadcast %5 : vector<1x1x4xf32> to vector<7x7x4xf32>
    %7 = arith.mulf %2, %6 : vector<7x7x4xf32>
    %c0_6 = arith.constant 0 : index
    %c0_7 = arith.constant 0 : index
    %c0_8 = arith.constant 0 : index
    %c0_9 = arith.constant 0 : index
    %8 = vector.load %arg2[%c0_6, %c0_7, %c0_8, %c0_9] : memref<1x8x8x4xbf16, #tpu.memory_space<vmem>>, vector<1x7x7x4xbf16>
    %9 = vector.shape_cast %8 : vector<1x7x7x4xbf16> to vector<7x7x4xbf16>
    %10 = arith.extf %9 : vector<7x7x4xbf16> to vector<7x7x4xf32>
    %c1 = arith.constant 1 : index
    %c0_10 = arith.constant 0 : index
    %c0_11 = arith.constant 0 : index
    %11 = vector.load %arg5[%c1, %c0_10, %c0_11] : memref<9x1x4xf32, #tpu.memory_space<vmem>>, vector<1x1x4xf32>
    %12 = vector.shape_cast %11 : vector<1x1x4xf32> to vector<1x4xf32>
    %13 = vector.shape_cast %12 : vector<1x4xf32> to vector<1x1x4xf32>
    %14 = vector.broadcast %13 : vector<1x1x4xf32> to vector<7x7x4xf32>
    %15 = arith.mulf %10, %14 : vector<7x7x4xf32>
    %16 = arith.addf %7, %15 : vector<7x7x4xf32>
    %c0_12 = arith.constant 0 : index
    %c0_13 = arith.constant 0 : index
    %c1_14 = arith.constant 1 : index
    %c0_15 = arith.constant 0 : index
    %17 = vector.load %arg1[%c0_12, %c0_13, %c1_14, %c0_15] : memref<1x8x8x4xbf16, #tpu.memory_space<vmem>>, vector<1x7x7x4xbf16>
    %18 = vector.shape_cast %17 : vector<1x7x7x4xbf16> to vector<7x7x4xbf16>
    %19 = arith.extf %18 : vector<7x7x4xbf16> to vector<7x7x4xf32>
    %c2 = arith.constant 2 : index
    %c0_16 = arith.constant 0 : index
    %c0_17 = arith.constant 0 : index
    %20 = vector.load %arg5[%c2, %c0_16, %c0_17] : memref<9x1x4xf32, #tpu.memory_space<vmem>>, vector<1x1x4xf32>
    %21 = vector.shape_cast %20 : vector<1x1x4xf32> to vector<1x4xf32>
    %22 = vector.shape_cast %21 : vector<1x4xf32> to vector<1x1x4xf32>
    %23 = vector.broadcast %22 : vector<1x1x4xf32> to vector<7x7x4xf32>
    %24 = arith.mulf %19, %23 : vector<7x7x4xf32>
    %25 = arith.addf %16, %24 : vector<7x7x4xf32>
    %c0_18 = arith.constant 0 : index
    %c0_19 = arith.constant 0 : index
    %c0_20 = arith.constant 0 : index
    %c0_21 = arith.constant 0 : index
    %26 = vector.load %arg3[%c0_18, %c0_19, %c0_20, %c0_21] : memref<1x8x8x4xbf16, #tpu.memory_space<vmem>>, vector<1x7x7x4xbf16>
    %27 = vector.shape_cast %26 : vector<1x7x7x4xbf16> to vector<7x7x4xbf16>
    %28 = arith.extf %27 : vector<7x7x4xbf16> to vector<7x7x4xf32>
    %c3 = arith.constant 3 : index
    %c0_22 = arith.constant 0 : index
    %c0_23 = arith.constant 0 : index
    %29 = vector.load %arg5[%c3, %c0_22, %c0_23] : memref<9x1x4xf32, #tpu.memory_space<vmem>>, vector<1x1x4xf32>
    %30 = vector.shape_cast %29 : vector<1x1x4xf32> to vector<1x4xf32>
    %31 = vector.shape_cast %30 : vector<1x4xf32> to vector<1x1x4xf32>
    %32 = vector.broadcast %31 : vector<1x1x4xf32> to vector<7x7x4xf32>
    %33 = arith.mulf %28, %32 : vector<7x7x4xf32>
    %34 = arith.addf %25, %33 : vector<7x7x4xf32>
    %c0_24 = arith.constant 0 : index
    %c0_25 = arith.constant 0 : index
    %c0_26 = arith.constant 0 : index
    %c0_27 = arith.constant 0 : index
    %35 = vector.load %arg4[%c0_24, %c0_25, %c0_26, %c0_27] : memref<1x8x8x4xbf16, #tpu.memory_space<vmem>>, vector<1x7x7x4xbf16>
    %36 = vector.shape_cast %35 : vector<1x7x7x4xbf16> to vector<7x7x4xbf16>
    %37 = arith.extf %36 : vector<7x7x4xbf16> to vector<7x7x4xf32>
    %c4 = arith.constant 4 : index
    %c0_28 = arith.constant 0 : index
    %c0_29 = arith.constant 0 : index
    %38 = vector.load %arg5[%c4, %c0_28, %c0_29] : memref<9x1x4xf32, #tpu.memory_space<vmem>>, vector<1x1x4xf32>
    %39 = vector.shape_cast %38 : vector<1x1x4xf32> to vector<1x4xf32>
    %40 = vector.shape_cast %39 : vector<1x4xf32> to vector<1x1x4xf32>
    %41 = vector.broadcast %40 : vector<1x1x4xf32> to vector<7x7x4xf32>
    %42 = arith.mulf %37, %41 : vector<7x7x4xf32>
    %43 = arith.addf %34, %42 : vector<7x7x4xf32>
    %c0_30 = arith.constant 0 : index
    %c0_31 = arith.constant 0 : index
    %c1_32 = arith.constant 1 : index
    %c0_33 = arith.constant 0 : index
    %44 = vector.load %arg3[%c0_30, %c0_31, %c1_32, %c0_33] : memref<1x8x8x4xbf16, #tpu.memory_space<vmem>>, vector<1x7x7x4xbf16>
    %45 = vector.shape_cast %44 : vector<1x7x7x4xbf16> to vector<7x7x4xbf16>
    %46 = arith.extf %45 : vector<7x7x4xbf16> to vector<7x7x4xf32>
    %c5 = arith.constant 5 : index
    %c0_34 = arith.constant 0 : index
    %c0_35 = arith.constant 0 : index
    %47 = vector.load %arg5[%c5, %c0_34, %c0_35] : memref<9x1x4xf32, #tpu.memory_space<vmem>>, vector<1x1x4xf32>
    %48 = vector.shape_cast %47 : vector<1x1x4xf32> to vector<1x4xf32>
    %49 = vector.shape_cast %48 : vector<1x4xf32> to vector<1x1x4xf32>
    %50 = vector.broadcast %49 : vector<1x1x4xf32> to vector<7x7x4xf32>
    %51 = arith.mulf %46, %50 : vector<7x7x4xf32>
    %52 = arith.addf %43, %51 : vector<7x7x4xf32>
    %c0_36 = arith.constant 0 : index
    %c1_37 = arith.constant 1 : index
    %c0_38 = arith.constant 0 : index
    %c0_39 = arith.constant 0 : index
    %53 = vector.load %arg1[%c0_36, %c1_37, %c0_38, %c0_39] : memref<1x8x8x4xbf16, #tpu.memory_space<vmem>>, vector<1x7x7x4xbf16>
    %54 = vector.shape_cast %53 : vector<1x7x7x4xbf16> to vector<7x7x4xbf16>
    %55 = arith.extf %54 : vector<7x7x4xbf16> to vector<7x7x4xf32>
    %c6 = arith.constant 6 : index
    %c0_40 = arith.constant 0 : index
    %c0_41 = arith.constant 0 : index
    %56 = vector.load %arg5[%c6, %c0_40, %c0_41] : memref<9x1x4xf32, #tpu.memory_space<vmem>>, vector<1x1x4xf32>
    %57 = vector.shape_cast %56 : vector<1x1x4xf32> to vector<1x4xf32>
    %58 = vector.shape_cast %57 : vector<1x4xf32> to vector<1x1x4xf32>
    %59 = vector.broadcast %58 : vector<1x1x4xf32> to vector<7x7x4xf32>
    %60 = arith.mulf %55, %59 : vector<7x7x4xf32>
    %61 = arith.addf %52, %60 : vector<7x7x4xf32>
    %c0_42 = arith.constant 0 : index
    %c1_43 = arith.constant 1 : index
    %c0_44 = arith.constant 0 : index
    %c0_45 = arith.constant 0 : index
    %62 = vector.load %arg2[%c0_42, %c1_43, %c0_44, %c0_45] : memref<1x8x8x4xbf16, #tpu.memory_space<vmem>>, vector<1x7x7x4xbf16>
    %63 = vector.shape_cast %62 : vector<1x7x7x4xbf16> to vector<7x7x4xbf16>
    %64 = arith.extf %63 : vector<7x7x4xbf16> to vector<7x7x4xf32>
    %c7 = arith.constant 7 : index
    %c0_46 = arith.constant 0 : index
    %c0_47 = arith.constant 0 : index
    %65 = vector.load %arg5[%c7, %c0_46, %c0_47] : memref<9x1x4xf32, #tpu.memory_space<vmem>>, vector<1x1x4xf32>
    %66 = vector.shape_cast %65 : vector<1x1x4xf32> to vector<1x4xf32>
    %67 = vector.shape_cast %66 : vector<1x4xf32> to vector<1x1x4xf32>
    %68 = vector.broadcast %67 : vector<1x1x4xf32> to vector<7x7x4xf32>
    %69 = arith.mulf %64, %68 : vector<7x7x4xf32>
    %70 = arith.addf %61, %69 : vector<7x7x4xf32>
    %c0_48 = arith.constant 0 : index
    %c1_49 = arith.constant 1 : index
    %c1_50 = arith.constant 1 : index
    %c0_51 = arith.constant 0 : index
    %71 = vector.load %arg1[%c0_48, %c1_49, %c1_50, %c0_51] : memref<1x8x8x4xbf16, #tpu.memory_space<vmem>>, vector<1x7x7x4xbf16>
    %72 = vector.shape_cast %71 : vector<1x7x7x4xbf16> to vector<7x7x4xbf16>
    %73 = arith.extf %72 : vector<7x7x4xbf16> to vector<7x7x4xf32>
    %c8 = arith.constant 8 : index
    %c0_52 = arith.constant 0 : index
    %c0_53 = arith.constant 0 : index
    %74 = vector.load %arg5[%c8, %c0_52, %c0_53] : memref<9x1x4xf32, #tpu.memory_space<vmem>>, vector<1x1x4xf32>
    %75 = vector.shape_cast %74 : vector<1x1x4xf32> to vector<1x4xf32>
    %76 = vector.shape_cast %75 : vector<1x4xf32> to vector<1x1x4xf32>
    %77 = vector.broadcast %76 : vector<1x1x4xf32> to vector<7x7x4xf32>
    %78 = arith.mulf %73, %77 : vector<7x7x4xf32>
    %79 = arith.addf %70, %78 : vector<7x7x4xf32>
    %c0_54 = arith.constant 0 : index
    %c0_55 = arith.constant 0 : index
    %80 = vector.load %arg6[%c0_54, %c0_55] : memref<1x4xf32, #tpu.memory_space<vmem>>, vector<1x4xf32>
    %81 = vector.shape_cast %80 : vector<1x4xf32> to vector<1x1x4xf32>
    %82 = vector.broadcast %81 : vector<1x1x4xf32> to vector<7x7x4xf32>
    %83 = arith.mulf %79, %82 : vector<7x7x4xf32>
    %c0_56 = arith.constant 0 : index
    %c0_57 = arith.constant 0 : index
    %84 = vector.load %arg7[%c0_56, %c0_57] : memref<1x4xf32, #tpu.memory_space<vmem>>, vector<1x4xf32>
    %85 = vector.shape_cast %84 : vector<1x4xf32> to vector<1x1x4xf32>
    %86 = vector.broadcast %85 : vector<1x1x4xf32> to vector<7x7x4xf32>
    %87 = arith.addf %83, %86 : vector<7x7x4xf32>
    %cst = arith.constant 0.000000e+00 : f32
    %88 = vector.broadcast %cst : f32 to vector<7x7x4xf32>
    %89 = arith.maximumf %87, %88 : vector<7x7x4xf32>
    %c0_58 = arith.constant 0 : index
    %c0_59 = arith.constant 0 : index
    %c0_60 = arith.constant 0 : index
    %c0_61 = arith.constant 0 : index
    %90 = vector.load %arg8[%c0_58, %c0_59, %c0_60, %c0_61] : memref<1x7x7x4xf32, #tpu.memory_space<vmem>>, vector<1x7x7x4xf32>
    %91 = vector.shape_cast %90 : vector<1x7x7x4xf32> to vector<7x7x4xf32>
    %92 = vector.shape_cast %89 : vector<7x7x4xf32> to vector<1x7x7x4xf32>
    tpu.vector_store %arg8[%c0_58, %c0_59, %c0_60, %c0_61], %92 {strides = array<i32>} : memref<1x7x7x4xf32, #tpu.memory_space<vmem>>, vector<1x7x7x4xf32>,
    return
  }
  func.func @transform_0(%arg0: i32) -> (i32, i32, i32, i32) {
    %c0_i32 = arith.constant 0 : i32
    %c0_i32_0 = arith.constant 0 : i32
    %c0_i32_1 = arith.constant 0 : i32
    %c0_i32_2 = arith.constant 0 : i32
    return %arg0, %c0_i32, %c0_i32_0, %c0_i32_1 : i32, i32, i32, i32
  }
  func.func @transform_1(%arg0: i32) -> (i32, i32, i32, i32) {
    %c0_i32 = arith.constant 0 : i32
    %c0_i32_0 = arith.constant 0 : i32
    %c0_i32_1 = arith.constant 0 : i32
    %c0_i32_2 = arith.constant 0 : i32
    return %arg0, %c0_i32, %c0_i32_0, %c0_i32_1 : i32, i32, i32, i32
  }
  func.func @transform_2(%arg0: i32) -> (i32, i32, i32, i32) {
    %c0_i32 = arith.constant 0 : i32
    %c0_i32_0 = arith.constant 0 : i32
    %c0_i32_1 = arith.constant 0 : i32
    %c0_i32_2 = arith.constant 0 : i32
    return %arg0, %c0_i32, %c0_i32_0, %c0_i32_1 : i32, i32, i32, i32
  }
  func.func @transform_3(%arg0: i32) -> (i32, i32, i32, i32) {
    %c0_i32 = arith.constant 0 : i32
    %c0_i32_0 = arith.constant 0 : i32
    %c0_i32_1 = arith.constant 0 : i32
    %c0_i32_2 = arith.constant 0 : i32
    return %arg0, %c0_i32, %c0_i32_0, %c0_i32_1 : i32, i32, i32, i32
  }
  func.func @transform_4(%arg0: i32) -> (i32, i32, i32) {
    %c0_i32 = arith.constant 0 : i32
    %c0_i32_0 = arith.constant 0 : i32
    %c0_i32_1 = arith.constant 0 : i32
    %c0_i32_2 = arith.constant 0 : i32
    return %c0_i32, %c0_i32_0, %c0_i32_1 : i32, i32, i32
  }
  func.func @transform_5(%arg0: i32) -> (i32, i32) {
    %c0_i32 = arith.constant 0 : i32
    %c0_i32_0 = arith.constant 0 : i32
    %c0_i32_1 = arith.constant 0 : i32
    return %c0_i32, %c0_i32_0 : i32, i32
  }
  func.func @transform_6(%arg0: i32) -> (i32, i32) {
    %c0_i32 = arith.constant 0 : i32
    %c0_i32_0 = arith.constant 0 : i32
    %c0_i32_1 = arith.constant 0 : i32
    return %c0_i32, %c0_i32_0 : i32, i32
  }
  func.func @transform_7(%arg0: i32) -> (i32, i32, i32, i32) {
    %c0_i32 = arith.constant 0 : i32
    %c0_i32_0 = arith.constant 0 : i32
    %c0_i32_1 = arith.constant 0 : i32
    %c0_i32_2 = arith.constant 0 : i32
    return %arg0, %c0_i32, %c0_i32_0, %c0_i32_1 : i32, i32, i32, i32
  }
}

module attributes {stable_mosaic.version = 11 : i64} {
  func.func @_dw_conv_bn_relu_kernel(%arg0: i32, %arg1: memref<1x4x4x4xbf16, #tpu.memory_space<vmem>>, %arg2: memref<1x4x4x4xbf16, #tpu.memory_space<vmem>>, %arg3: memref<1x4x4x4xbf16, #tpu.memory_space<vmem>>, %arg4: memref<1x4x4x4xbf16, #tpu.memory_space<vmem>>, %arg5: memref<9x1x4xf32, #tpu.memory_space<vmem>>, %arg6: memref<1x4xf32, #tpu.memory_space<vmem>>, %arg7: memref<1x4xf32, #tpu.memory_space<vmem>>, %arg8: memref<1x3x3x4xf32, #tpu.memory_space<vmem>>) attributes {dimension_semantics = [#tpu.dimension_semantics<parallel>], iteration_bounds = array<i64: 2>, scalar_prefetch = 0 : i64, scratch_operands = 0 : i64, tpu.core_type = #tpu.core_type<tc>, window_params = [{transform_indices = @transform_0, window_bounds = array<i64: 1, 4, 4, 4>}, {transform_indices = @transform_1, window_bounds = array<i64: 1, 4, 4, 4>}, {transform_indices = @transform_2, window_bounds = array<i64: 1, 4, 4, 4>}, {transform_indices = @transform_3, window_bounds = array<i64: 1, 4, 4, 4>}, {pipeline_mode = #tpu.pipeline_mode<synchronous>, transform_indices = @transform_4, window_bounds = array<i64: 9, 1, 4>}, {pipeline_mode = #tpu.pipeline_mode<synchronous>, transform_indices = @transform_5, window_bounds = array<i64: 1, 4>}, {pipeline_mode = #tpu.pipeline_mode<synchronous>, transform_indices = @transform_6, window_bounds = array<i64: 1, 4>}, {transform_indices = @transform_7, window_bounds = array<i64: 1, 3, 3, 4>}]} {
    %c0 = arith.constant 0 : index
    %c0_0 = arith.constant 0 : index
    %c0_1 = arith.constant 0 : index
    %c0_2 = arith.constant 0 : index
    %0 = vector.load %arg1[%c0, %c0_0, %c0_1, %c0_2] : memref<1x4x4x4xbf16, #tpu.memory_space<vmem>>, vector<1x3x3x4xbf16>
    %1 = vector.shape_cast %0 : vector<1x3x3x4xbf16> to vector<3x3x4xbf16>
    %2 = arith.extf %1 : vector<3x3x4xbf16> to vector<3x3x4xf32>
    %c0_3 = arith.constant 0 : index
    %c0_4 = arith.constant 0 : index
    %c0_5 = arith.constant 0 : index
    %3 = vector.load %arg5[%c0_3, %c0_4, %c0_5] : memref<9x1x4xf32, #tpu.memory_space<vmem>>, vector<1x1x4xf32>
    %4 = vector.shape_cast %3 : vector<1x1x4xf32> to vector<1x4xf32>
    %5 = vector.shape_cast %4 : vector<1x4xf32> to vector<1x1x4xf32>
    %6 = vector.broadcast %5 : vector<1x1x4xf32> to vector<3x3x4xf32>
    %7 = arith.mulf %2, %6 : vector<3x3x4xf32>
    %c0_6 = arith.constant 0 : index
    %c0_7 = arith.constant 0 : index
    %c0_8 = arith.constant 0 : index
    %c0_9 = arith.constant 0 : index
    %8 = vector.load %arg2[%c0_6, %c0_7, %c0_8, %c0_9] : memref<1x4x4x4xbf16, #tpu.memory_space<vmem>>, vector<1x3x3x4xbf16>
    %9 = vector.shape_cast %8 : vector<1x3x3x4xbf16> to vector<3x3x4xbf16>
    %10 = arith.extf %9 : vector<3x3x4xbf16> to vector<3x3x4xf32>
    %c1 = arith.constant 1 : index
    %c0_10 = arith.constant 0 : index
    %c0_11 = arith.constant 0 : index
    %11 = vector.load %arg5[%c1, %c0_10, %c0_11] : memref<9x1x4xf32, #tpu.memory_space<vmem>>, vector<1x1x4xf32>
    %12 = vector.shape_cast %11 : vector<1x1x4xf32> to vector<1x4xf32>
    %13 = vector.shape_cast %12 : vector<1x4xf32> to vector<1x1x4xf32>
    %14 = vector.broadcast %13 : vector<1x1x4xf32> to vector<3x3x4xf32>
    %15 = arith.mulf %10, %14 : vector<3x3x4xf32>
    %16 = arith.addf %7, %15 : vector<3x3x4xf32>
    %c0_12 = arith.constant 0 : index
    %c0_13 = arith.constant 0 : index
    %c1_14 = arith.constant 1 : index
    %c0_15 = arith.constant 0 : index
    %17 = vector.load %arg1[%c0_12, %c0_13, %c1_14, %c0_15] : memref<1x4x4x4xbf16, #tpu.memory_space<vmem>>, vector<1x3x3x4xbf16>
    %18 = vector.shape_cast %17 : vector<1x3x3x4xbf16> to vector<3x3x4xbf16>
    %19 = arith.extf %18 : vector<3x3x4xbf16> to vector<3x3x4xf32>
    %c2 = arith.constant 2 : index
    %c0_16 = arith.constant 0 : index
    %c0_17 = arith.constant 0 : index
    %20 = vector.load %arg5[%c2, %c0_16, %c0_17] : memref<9x1x4xf32, #tpu.memory_space<vmem>>, vector<1x1x4xf32>
    %21 = vector.shape_cast %20 : vector<1x1x4xf32> to vector<1x4xf32>
    %22 = vector.shape_cast %21 : vector<1x4xf32> to vector<1x1x4xf32>
    %23 = vector.broadcast %22 : vector<1x1x4xf32> to vector<3x3x4xf32>
    %24 = arith.mulf %19, %23 : vector<3x3x4xf32>
    %25 = arith.addf %16, %24 : vector<3x3x4xf32>
    %c0_18 = arith.constant 0 : index
    %c0_19 = arith.constant 0 : index
    %c0_20 = arith.constant 0 : index
    %c0_21 = arith.constant 0 : index
    %26 = vector.load %arg3[%c0_18, %c0_19, %c0_20, %c0_21] : memref<1x4x4x4xbf16, #tpu.memory_space<vmem>>, vector<1x3x3x4xbf16>
    %27 = vector.shape_cast %26 : vector<1x3x3x4xbf16> to vector<3x3x4xbf16>
    %28 = arith.extf %27 : vector<3x3x4xbf16> to vector<3x3x4xf32>
    %c3 = arith.constant 3 : index
    %c0_22 = arith.constant 0 : index
    %c0_23 = arith.constant 0 : index
    %29 = vector.load %arg5[%c3, %c0_22, %c0_23] : memref<9x1x4xf32, #tpu.memory_space<vmem>>, vector<1x1x4xf32>
    %30 = vector.shape_cast %29 : vector<1x1x4xf32> to vector<1x4xf32>
    %31 = vector.shape_cast %30 : vector<1x4xf32> to vector<1x1x4xf32>
    %32 = vector.broadcast %31 : vector<1x1x4xf32> to vector<3x3x4xf32>
    %33 = arith.mulf %28, %32 : vector<3x3x4xf32>
    %34 = arith.addf %25, %33 : vector<3x3x4xf32>
    %c0_24 = arith.constant 0 : index
    %c0_25 = arith.constant 0 : index
    %c0_26 = arith.constant 0 : index
    %c0_27 = arith.constant 0 : index
    %35 = vector.load %arg4[%c0_24, %c0_25, %c0_26, %c0_27] : memref<1x4x4x4xbf16, #tpu.memory_space<vmem>>, vector<1x3x3x4xbf16>
    %36 = vector.shape_cast %35 : vector<1x3x3x4xbf16> to vector<3x3x4xbf16>
    %37 = arith.extf %36 : vector<3x3x4xbf16> to vector<3x3x4xf32>
    %c4 = arith.constant 4 : index
    %c0_28 = arith.constant 0 : index
    %c0_29 = arith.constant 0 : index
    %38 = vector.load %arg5[%c4, %c0_28, %c0_29] : memref<9x1x4xf32, #tpu.memory_space<vmem>>, vector<1x1x4xf32>
    %39 = vector.shape_cast %38 : vector<1x1x4xf32> to vector<1x4xf32>
    %40 = vector.shape_cast %39 : vector<1x4xf32> to vector<1x1x4xf32>
    %41 = vector.broadcast %40 : vector<1x1x4xf32> to vector<3x3x4xf32>
    %42 = arith.mulf %37, %41 : vector<3x3x4xf32>
    %43 = arith.addf %34, %42 : vector<3x3x4xf32>
    %c0_30 = arith.constant 0 : index
    %c0_31 = arith.constant 0 : index
    %c1_32 = arith.constant 1 : index
    %c0_33 = arith.constant 0 : index
    %44 = vector.load %arg3[%c0_30, %c0_31, %c1_32, %c0_33] : memref<1x4x4x4xbf16, #tpu.memory_space<vmem>>, vector<1x3x3x4xbf16>
    %45 = vector.shape_cast %44 : vector<1x3x3x4xbf16> to vector<3x3x4xbf16>
    %46 = arith.extf %45 : vector<3x3x4xbf16> to vector<3x3x4xf32>
    %c5 = arith.constant 5 : index
    %c0_34 = arith.constant 0 : index
    %c0_35 = arith.constant 0 : index
    %47 = vector.load %arg5[%c5, %c0_34, %c0_35] : memref<9x1x4xf32, #tpu.memory_space<vmem>>, vector<1x1x4xf32>
    %48 = vector.shape_cast %47 : vector<1x1x4xf32> to vector<1x4xf32>
    %49 = vector.shape_cast %48 : vector<1x4xf32> to vector<1x1x4xf32>
    %50 = vector.broadcast %49 : vector<1x1x4xf32> to vector<3x3x4xf32>
    %51 = arith.mulf %46, %50 : vector<3x3x4xf32>
    %52 = arith.addf %43, %51 : vector<3x3x4xf32>
    %c0_36 = arith.constant 0 : index
    %c1_37 = arith.constant 1 : index
    %c0_38 = arith.constant 0 : index
    %c0_39 = arith.constant 0 : index
    %53 = vector.load %arg1[%c0_36, %c1_37, %c0_38, %c0_39] : memref<1x4x4x4xbf16, #tpu.memory_space<vmem>>, vector<1x3x3x4xbf16>
    %54 = vector.shape_cast %53 : vector<1x3x3x4xbf16> to vector<3x3x4xbf16>
    %55 = arith.extf %54 : vector<3x3x4xbf16> to vector<3x3x4xf32>
    %c6 = arith.constant 6 : index
    %c0_40 = arith.constant 0 : index
    %c0_41 = arith.constant 0 : index
    %56 = vector.load %arg5[%c6, %c0_40, %c0_41] : memref<9x1x4xf32, #tpu.memory_space<vmem>>, vector<1x1x4xf32>
    %57 = vector.shape_cast %56 : vector<1x1x4xf32> to vector<1x4xf32>
    %58 = vector.shape_cast %57 : vector<1x4xf32> to vector<1x1x4xf32>
    %59 = vector.broadcast %58 : vector<1x1x4xf32> to vector<3x3x4xf32>
    %60 = arith.mulf %55, %59 : vector<3x3x4xf32>
    %61 = arith.addf %52, %60 : vector<3x3x4xf32>
    %c0_42 = arith.constant 0 : index
    %c1_43 = arith.constant 1 : index
    %c0_44 = arith.constant 0 : index
    %c0_45 = arith.constant 0 : index
    %62 = vector.load %arg2[%c0_42, %c1_43, %c0_44, %c0_45] : memref<1x4x4x4xbf16, #tpu.memory_space<vmem>>, vector<1x3x3x4xbf16>
    %63 = vector.shape_cast %62 : vector<1x3x3x4xbf16> to vector<3x3x4xbf16>
    %64 = arith.extf %63 : vector<3x3x4xbf16> to vector<3x3x4xf32>
    %c7 = arith.constant 7 : index
    %c0_46 = arith.constant 0 : index
    %c0_47 = arith.constant 0 : index
    %65 = vector.load %arg5[%c7, %c0_46, %c0_47] : memref<9x1x4xf32, #tpu.memory_space<vmem>>, vector<1x1x4xf32>
    %66 = vector.shape_cast %65 : vector<1x1x4xf32> to vector<1x4xf32>
    %67 = vector.shape_cast %66 : vector<1x4xf32> to vector<1x1x4xf32>
    %68 = vector.broadcast %67 : vector<1x1x4xf32> to vector<3x3x4xf32>
    %69 = arith.mulf %64, %68 : vector<3x3x4xf32>
    %70 = arith.addf %61, %69 : vector<3x3x4xf32>
    %c0_48 = arith.constant 0 : index
    %c1_49 = arith.constant 1 : index
    %c1_50 = arith.constant 1 : index
    %c0_51 = arith.constant 0 : index
    %71 = vector.load %arg1[%c0_48, %c1_49, %c1_50, %c0_51] : memref<1x4x4x4xbf16, #tpu.memory_space<vmem>>, vector<1x3x3x4xbf16>
    %72 = vector.shape_cast %71 : vector<1x3x3x4xbf16> to vector<3x3x4xbf16>
    %73 = arith.extf %72 : vector<3x3x4xbf16> to vector<3x3x4xf32>
    %c8 = arith.constant 8 : index
    %c0_52 = arith.constant 0 : index
    %c0_53 = arith.constant 0 : index
    %74 = vector.load %arg5[%c8, %c0_52, %c0_53] : memref<9x1x4xf32, #tpu.memory_space<vmem>>, vector<1x1x4xf32>
    %75 = vector.shape_cast %74 : vector<1x1x4xf32> to vector<1x4xf32>
    %76 = vector.shape_cast %75 : vector<1x4xf32> to vector<1x1x4xf32>
    %77 = vector.broadcast %76 : vector<1x1x4xf32> to vector<3x3x4xf32>
    %78 = arith.mulf %73, %77 : vector<3x3x4xf32>
    %79 = arith.addf %70, %78 : vector<3x3x4xf32>
    %c0_54 = arith.constant 0 : index
    %c0_55 = arith.constant 0 : index
    %80 = vector.load %arg6[%c0_54, %c0_55] : memref<1x4xf32, #tpu.memory_space<vmem>>, vector<1x4xf32>
    %81 = vector.shape_cast %80 : vector<1x4xf32> to vector<1x1x4xf32>
    %82 = vector.broadcast %81 : vector<1x1x4xf32> to vector<3x3x4xf32>
    %83 = arith.mulf %79, %82 : vector<3x3x4xf32>
    %c0_56 = arith.constant 0 : index
    %c0_57 = arith.constant 0 : index
    %84 = vector.load %arg7[%c0_56, %c0_57] : memref<1x4xf32, #tpu.memory_space<vmem>>, vector<1x4xf32>
    %85 = vector.shape_cast %84 : vector<1x4xf32> to vector<1x1x4xf32>
    %86 = vector.broadcast %85 : vector<1x1x4xf32> to vector<3x3x4xf32>
    %87 = arith.addf %83, %86 : vector<3x3x4xf32>
    %cst = arith.constant 0.000000e+00 : f32
    %88 = vector.broadcast %cst : f32 to vector<3x3x4xf32>
    %89 = arith.maximumf %87, %88 : vector<3x3x4xf32>
    %c0_58 = arith.constant 0 : index
    %c0_59 = arith.constant 0 : index
    %c0_60 = arith.constant 0 : index
    %c0_61 = arith.constant 0 : index
    %90 = vector.load %arg8[%c0_58, %c0_59, %c0_60, %c0_61] : memref<1x3x3x4xf32, #tpu.memory_space<vmem>>, vector<1x3x3x4xf32>
    %91 = vector.shape_cast %90 : vector<1x3x3x4xf32> to vector<3x3x4xf32>
    %92 = vector.shape_cast %89 : vector<3x3x4xf32> to vector<1x3x3x4xf32>
    tpu.vector_store %arg8[%c0_58, %c0_59, %c0_60, %c0_61], %92 {strides = array<i32>} : memref<1x3x3x4xf32, #tpu.memory_space<vmem>>, vector<1x3x3x4xf32>,
    return
  }
  func.func @transform_0(%arg0: i32) -> (i32, i32, i32, i32) {
    %c0_i32 = arith.constant 0 : i32
    %c0_i32_0 = arith.constant 0 : i32
    %c0_i32_1 = arith.constant 0 : i32
    %c0_i32_2 = arith.constant 0 : i32
    return %arg0, %c0_i32, %c0_i32_0, %c0_i32_1 : i32, i32, i32, i32
  }
  func.func @transform_1(%arg0: i32) -> (i32, i32, i32, i32) {
    %c0_i32 = arith.constant 0 : i32
    %c0_i32_0 = arith.constant 0 : i32
    %c0_i32_1 = arith.constant 0 : i32
    %c0_i32_2 = arith.constant 0 : i32
    return %arg0, %c0_i32, %c0_i32_0, %c0_i32_1 : i32, i32, i32, i32
  }
  func.func @transform_2(%arg0: i32) -> (i32, i32, i32, i32) {
    %c0_i32 = arith.constant 0 : i32
    %c0_i32_0 = arith.constant 0 : i32
    %c0_i32_1 = arith.constant 0 : i32
    %c0_i32_2 = arith.constant 0 : i32
    return %arg0, %c0_i32, %c0_i32_0, %c0_i32_1 : i32, i32, i32, i32
  }
  func.func @transform_3(%arg0: i32) -> (i32, i32, i32, i32) {
    %c0_i32 = arith.constant 0 : i32
    %c0_i32_0 = arith.constant 0 : i32
    %c0_i32_1 = arith.constant 0 : i32
    %c0_i32_2 = arith.constant 0 : i32
    return %arg0, %c0_i32, %c0_i32_0, %c0_i32_1 : i32, i32, i32, i32
  }
  func.func @transform_4(%arg0: i32) -> (i32, i32, i32) {
    %c0_i32 = arith.constant 0 : i32
    %c0_i32_0 = arith.constant 0 : i32
    %c0_i32_1 = arith.constant 0 : i32
    %c0_i32_2 = arith.constant 0 : i32
    return %c0_i32, %c0_i32_0, %c0_i32_1 : i32, i32, i32
  }
  func.func @transform_5(%arg0: i32) -> (i32, i32) {
    %c0_i32 = arith.constant 0 : i32
    %c0_i32_0 = arith.constant 0 : i32
    %c0_i32_1 = arith.constant 0 : i32
    return %c0_i32, %c0_i32_0 : i32, i32
  }
  func.func @transform_6(%arg0: i32) -> (i32, i32) {
    %c0_i32 = arith.constant 0 : i32
    %c0_i32_0 = arith.constant 0 : i32
    %c0_i32_1 = arith.constant 0 : i32
    return %c0_i32, %c0_i32_0 : i32, i32
  }
  func.func @transform_7(%arg0: i32) -> (i32, i32, i32, i32) {
    %c0_i32 = arith.constant 0 : i32
    %c0_i32_0 = arith.constant 0 : i32
    %c0_i32_1 = arith.constant 0 : i32
    %c0_i32_2 = arith.constant 0 : i32
    return %arg0, %c0_i32, %c0_i32_0, %c0_i32_1 : i32, i32, i32, i32
  }
}

module attributes {stable_mosaic.version = 11 : i64} {
  func.func @_flow_make_kernel(%arg0: i32, %arg1: memref<1x342x4xbf16, #tpu.memory_space<vmem>>, %arg2: memref<1x342x4xbf16, #tpu.memory_space<vmem>>, %arg3: memref<9x4x128xbf16, #tpu.memory_space<vmem>>, %arg4: memref<9x4x128xbf16, #tpu.memory_space<vmem>>, %arg5: memref<1x288x2xf32, #tpu.memory_space<vmem>>) attributes {dimension_semantics = [#tpu.dimension_semantics<parallel>], iteration_bounds = array<i64: 2>, scalar_prefetch = 0 : i64, scratch_operands = 0 : i64, tpu.core_type = #tpu.core_type<tc>, window_params = [{transform_indices = @transform_0, window_bounds = array<i64: 1, 342, 4>}, {transform_indices = @transform_1, window_bounds = array<i64: 1, 342, 4>}, {pipeline_mode = #tpu.pipeline_mode<synchronous>, transform_indices = @transform_2, window_bounds = array<i64: 9, 4, 128>}, {pipeline_mode = #tpu.pipeline_mode<synchronous>, transform_indices = @transform_3, window_bounds = array<i64: 9, 4, 128>}, {transform_indices = @transform_4, window_bounds = array<i64: 1, 288, 2>}]} {
    %cst = arith.constant 0.000000e+00 : f32
    %0 = vector.broadcast %cst : f32 to vector<288x128xf32>
    %c0 = arith.constant 0 : index
    %c0_0 = arith.constant 0 : index
    %c0_1 = arith.constant 0 : index
    %1 = vector.load %arg1[%c0, %c0_0, %c0_1] : memref<1x342x4xbf16, #tpu.memory_space<vmem>>, vector<1x288x4xbf16>
    %2 = vector.shape_cast %1 : vector<1x288x4xbf16> to vector<288x4xbf16>
    %c0_2 = arith.constant 0 : index
    %c0_3 = arith.constant 0 : index
    %c0_4 = arith.constant 0 : index
    %3 = vector.load %arg2[%c0_2, %c0_3, %c0_4] : memref<1x342x4xbf16, #tpu.memory_space<vmem>>, vector<1x288x4xbf16>
    %4 = vector.shape_cast %3 : vector<1x288x4xbf16> to vector<288x4xbf16>
    %c0_5 = arith.constant 0 : index
    %c0_6 = arith.constant 0 : index
    %c0_7 = arith.constant 0 : index
    %5 = vector.load %arg3[%c0_5, %c0_6, %c0_7] : memref<9x4x128xbf16, #tpu.memory_space<vmem>>, vector<1x4x128xbf16>
    %6 = vector.shape_cast %5 : vector<1x4x128xbf16> to vector<4x128xbf16>
    %cst_8 = arith.constant dense<0.000000e+00> : vector<288x128xf32>
    %7 = tpu.matmul %2, %6, %cst_8 {dimension_numbers = #tpu.dot_dimension_numbers<[1], [0], [0], [1], [0, 0, 1, 1], [], []>} : vector<288x4xbf16>, vector<4x128xbf16>, vector<288x128xf32> -> vector<288x128xf32>
    %8 = arith.addf %0, %7 : vector<288x128xf32>
    %c0_9 = arith.constant 0 : index
    %c0_10 = arith.constant 0 : index
    %c0_11 = arith.constant 0 : index
    %9 = vector.load %arg4[%c0_9, %c0_10, %c0_11] : memref<9x4x128xbf16, #tpu.memory_space<vmem>>, vector<1x4x128xbf16>
    %10 = vector.shape_cast %9 : vector<1x4x128xbf16> to vector<4x128xbf16>
    %cst_12 = arith.constant dense<0.000000e+00> : vector<288x128xf32>
    %11 = tpu.matmul %4, %10, %cst_12 {dimension_numbers = #tpu.dot_dimension_numbers<[1], [0], [0], [1], [0, 0, 1, 1], [], []>} : vector<288x4xbf16>, vector<4x128xbf16>, vector<288x128xf32> -> vector<288x128xf32>
    %12 = arith.addf %8, %11 : vector<288x128xf32>
    %c0_13 = arith.constant 0 : index
    %c1 = arith.constant 1 : index
    %c0_14 = arith.constant 0 : index
    %13 = vector.load %arg1[%c0_13, %c1, %c0_14] : memref<1x342x4xbf16, #tpu.memory_space<vmem>>, vector<1x288x4xbf16>
    %14 = vector.shape_cast %13 : vector<1x288x4xbf16> to vector<288x4xbf16>
    %c0_15 = arith.constant 0 : index
    %c1_16 = arith.constant 1 : index
    %c0_17 = arith.constant 0 : index
    %15 = vector.load %arg2[%c0_15, %c1_16, %c0_17] : memref<1x342x4xbf16, #tpu.memory_space<vmem>>, vector<1x288x4xbf16>
    %16 = vector.shape_cast %15 : vector<1x288x4xbf16> to vector<288x4xbf16>
    %c1_18 = arith.constant 1 : index
    %c0_19 = arith.constant 0 : index
    %c0_20 = arith.constant 0 : index
    %17 = vector.load %arg3[%c1_18, %c0_19, %c0_20] : memref<9x4x128xbf16, #tpu.memory_space<vmem>>, vector<1x4x128xbf16>
    %18 = vector.shape_cast %17 : vector<1x4x128xbf16> to vector<4x128xbf16>
    %cst_21 = arith.constant dense<0.000000e+00> : vector<288x128xf32>
    %19 = tpu.matmul %14, %18, %cst_21 {dimension_numbers = #tpu.dot_dimension_numbers<[1], [0], [0], [1], [0, 0, 1, 1], [], []>} : vector<288x4xbf16>, vector<4x128xbf16>, vector<288x128xf32> -> vector<288x128xf32>
    %20 = arith.addf %12, %19 : vector<288x128xf32>
    %c1_22 = arith.constant 1 : index
    %c0_23 = arith.constant 0 : index
    %c0_24 = arith.constant 0 : index
    %21 = vector.load %arg4[%c1_22, %c0_23, %c0_24] : memref<9x4x128xbf16, #tpu.memory_space<vmem>>, vector<1x4x128xbf16>
    %22 = vector.shape_cast %21 : vector<1x4x128xbf16> to vector<4x128xbf16>
    %cst_25 = arith.constant dense<0.000000e+00> : vector<288x128xf32>
    %23 = tpu.matmul %16, %22, %cst_25 {dimension_numbers = #tpu.dot_dimension_numbers<[1], [0], [0], [1], [0, 0, 1, 1], [], []>} : vector<288x4xbf16>, vector<4x128xbf16>, vector<288x128xf32> -> vector<288x128xf32>
    %24 = arith.addf %20, %23 : vector<288x128xf32>
    %c0_26 = arith.constant 0 : index
    %c2 = arith.constant 2 : index
    %c0_27 = arith.constant 0 : index
    %25 = vector.load %arg1[%c0_26, %c2, %c0_27] : memref<1x342x4xbf16, #tpu.memory_space<vmem>>, vector<1x288x4xbf16>
    %26 = vector.shape_cast %25 : vector<1x288x4xbf16> to vector<288x4xbf16>
    %c0_28 = arith.constant 0 : index
    %c2_29 = arith.constant 2 : index
    %c0_30 = arith.constant 0 : index
    %27 = vector.load %arg2[%c0_28, %c2_29, %c0_30] : memref<1x342x4xbf16, #tpu.memory_space<vmem>>, vector<1x288x4xbf16>
    %28 = vector.shape_cast %27 : vector<1x288x4xbf16> to vector<288x4xbf16>
    %c2_31 = arith.constant 2 : index
    %c0_32 = arith.constant 0 : index
    %c0_33 = arith.constant 0 : index
    %29 = vector.load %arg3[%c2_31, %c0_32, %c0_33] : memref<9x4x128xbf16, #tpu.memory_space<vmem>>, vector<1x4x128xbf16>
    %30 = vector.shape_cast %29 : vector<1x4x128xbf16> to vector<4x128xbf16>
    %cst_34 = arith.constant dense<0.000000e+00> : vector<288x128xf32>
    %31 = tpu.matmul %26, %30, %cst_34 {dimension_numbers = #tpu.dot_dimension_numbers<[1], [0], [0], [1], [0, 0, 1, 1], [], []>} : vector<288x4xbf16>, vector<4x128xbf16>, vector<288x128xf32> -> vector<288x128xf32>
    %32 = arith.addf %24, %31 : vector<288x128xf32>
    %c2_35 = arith.constant 2 : index
    %c0_36 = arith.constant 0 : index
    %c0_37 = arith.constant 0 : index
    %33 = vector.load %arg4[%c2_35, %c0_36, %c0_37] : memref<9x4x128xbf16, #tpu.memory_space<vmem>>, vector<1x4x128xbf16>
    %34 = vector.shape_cast %33 : vector<1x4x128xbf16> to vector<4x128xbf16>
    %cst_38 = arith.constant dense<0.000000e+00> : vector<288x128xf32>
    %35 = tpu.matmul %28, %34, %cst_38 {dimension_numbers = #tpu.dot_dimension_numbers<[1], [0], [0], [1], [0, 0, 1, 1], [], []>} : vector<288x4xbf16>, vector<4x128xbf16>, vector<288x128xf32> -> vector<288x128xf32>
    %36 = arith.addf %32, %35 : vector<288x128xf32>
    %c0_39 = arith.constant 0 : index
    %c18 = arith.constant 18 : index
    %c0_40 = arith.constant 0 : index
    %37 = vector.load %arg1[%c0_39, %c18, %c0_40] : memref<1x342x4xbf16, #tpu.memory_space<vmem>>, vector<1x288x4xbf16>
    %38 = vector.shape_cast %37 : vector<1x288x4xbf16> to vector<288x4xbf16>
    %c0_41 = arith.constant 0 : index
    %c18_42 = arith.constant 18 : index
    %c0_43 = arith.constant 0 : index
    %39 = vector.load %arg2[%c0_41, %c18_42, %c0_43] : memref<1x342x4xbf16, #tpu.memory_space<vmem>>, vector<1x288x4xbf16>
    %40 = vector.shape_cast %39 : vector<1x288x4xbf16> to vector<288x4xbf16>
    %c3 = arith.constant 3 : index
    %c0_44 = arith.constant 0 : index
    %c0_45 = arith.constant 0 : index
    %41 = vector.load %arg3[%c3, %c0_44, %c0_45] : memref<9x4x128xbf16, #tpu.memory_space<vmem>>, vector<1x4x128xbf16>
    %42 = vector.shape_cast %41 : vector<1x4x128xbf16> to vector<4x128xbf16>
    %cst_46 = arith.constant dense<0.000000e+00> : vector<288x128xf32>
    %43 = tpu.matmul %38, %42, %cst_46 {dimension_numbers = #tpu.dot_dimension_numbers<[1], [0], [0], [1], [0, 0, 1, 1], [], []>} : vector<288x4xbf16>, vector<4x128xbf16>, vector<288x128xf32> -> vector<288x128xf32>
    %44 = arith.addf %36, %43 : vector<288x128xf32>
    %c3_47 = arith.constant 3 : index
    %c0_48 = arith.constant 0 : index
    %c0_49 = arith.constant 0 : index
    %45 = vector.load %arg4[%c3_47, %c0_48, %c0_49] : memref<9x4x128xbf16, #tpu.memory_space<vmem>>, vector<1x4x128xbf16>
    %46 = vector.shape_cast %45 : vector<1x4x128xbf16> to vector<4x128xbf16>
    %cst_50 = arith.constant dense<0.000000e+00> : vector<288x128xf32>
    %47 = tpu.matmul %40, %46, %cst_50 {dimension_numbers = #tpu.dot_dimension_numbers<[1], [0], [0], [1], [0, 0, 1, 1], [], []>} : vector<288x4xbf16>, vector<4x128xbf16>, vector<288x128xf32> -> vector<288x128xf32>
    %48 = arith.addf %44, %47 : vector<288x128xf32>
    %c0_51 = arith.constant 0 : index
    %c19 = arith.constant 19 : index
    %c0_52 = arith.constant 0 : index
    %49 = vector.load %arg1[%c0_51, %c19, %c0_52] : memref<1x342x4xbf16, #tpu.memory_space<vmem>>, vector<1x288x4xbf16>
    %50 = vector.shape_cast %49 : vector<1x288x4xbf16> to vector<288x4xbf16>
    %c0_53 = arith.constant 0 : index
    %c19_54 = arith.constant 19 : index
    %c0_55 = arith.constant 0 : index
    %51 = vector.load %arg2[%c0_53, %c19_54, %c0_55] : memref<1x342x4xbf16, #tpu.memory_space<vmem>>, vector<1x288x4xbf16>
    %52 = vector.shape_cast %51 : vector<1x288x4xbf16> to vector<288x4xbf16>
    %c4 = arith.constant 4 : index
    %c0_56 = arith.constant 0 : index
    %c0_57 = arith.constant 0 : index
    %53 = vector.load %arg3[%c4, %c0_56, %c0_57] : memref<9x4x128xbf16, #tpu.memory_space<vmem>>, vector<1x4x128xbf16>
    %54 = vector.shape_cast %53 : vector<1x4x128xbf16> to vector<4x128xbf16>
    %cst_58 = arith.constant dense<0.000000e+00> : vector<288x128xf32>
    %55 = tpu.matmul %50, %54, %cst_58 {dimension_numbers = #tpu.dot_dimension_numbers<[1], [0], [0], [1], [0, 0, 1, 1], [], []>} : vector<288x4xbf16>, vector<4x128xbf16>, vector<288x128xf32> -> vector<288x128xf32>
    %56 = arith.addf %48, %55 : vector<288x128xf32>
    %c4_59 = arith.constant 4 : index
    %c0_60 = arith.constant 0 : index
    %c0_61 = arith.constant 0 : index
    %57 = vector.load %arg4[%c4_59, %c0_60, %c0_61] : memref<9x4x128xbf16, #tpu.memory_space<vmem>>, vector<1x4x128xbf16>
    %58 = vector.shape_cast %57 : vector<1x4x128xbf16> to vector<4x128xbf16>
    %cst_62 = arith.constant dense<0.000000e+00> : vector<288x128xf32>
    %59 = tpu.matmul %52, %58, %cst_62 {dimension_numbers = #tpu.dot_dimension_numbers<[1], [0], [0], [1], [0, 0, 1, 1], [], []>} : vector<288x4xbf16>, vector<4x128xbf16>, vector<288x128xf32> -> vector<288x128xf32>
    %60 = arith.addf %56, %59 : vector<288x128xf32>
    %c0_63 = arith.constant 0 : index
    %c20 = arith.constant 20 : index
    %c0_64 = arith.constant 0 : index
    %61 = vector.load %arg1[%c0_63, %c20, %c0_64] : memref<1x342x4xbf16, #tpu.memory_space<vmem>>, vector<1x288x4xbf16>
    %62 = vector.shape_cast %61 : vector<1x288x4xbf16> to vector<288x4xbf16>
    %c0_65 = arith.constant 0 : index
    %c20_66 = arith.constant 20 : index
    %c0_67 = arith.constant 0 : index
    %63 = vector.load %arg2[%c0_65, %c20_66, %c0_67] : memref<1x342x4xbf16, #tpu.memory_space<vmem>>, vector<1x288x4xbf16>
    %64 = vector.shape_cast %63 : vector<1x288x4xbf16> to vector<288x4xbf16>
    %c5 = arith.constant 5 : index
    %c0_68 = arith.constant 0 : index
    %c0_69 = arith.constant 0 : index
    %65 = vector.load %arg3[%c5, %c0_68, %c0_69] : memref<9x4x128xbf16, #tpu.memory_space<vmem>>, vector<1x4x128xbf16>
    %66 = vector.shape_cast %65 : vector<1x4x128xbf16> to vector<4x128xbf16>
    %cst_70 = arith.constant dense<0.000000e+00> : vector<288x128xf32>
    %67 = tpu.matmul %62, %66, %cst_70 {dimension_numbers = #tpu.dot_dimension_numbers<[1], [0], [0], [1], [0, 0, 1, 1], [], []>} : vector<288x4xbf16>, vector<4x128xbf16>, vector<288x128xf32> -> vector<288x128xf32>
    %68 = arith.addf %60, %67 : vector<288x128xf32>
    %c5_71 = arith.constant 5 : index
    %c0_72 = arith.constant 0 : index
    %c0_73 = arith.constant 0 : index
    %69 = vector.load %arg4[%c5_71, %c0_72, %c0_73] : memref<9x4x128xbf16, #tpu.memory_space<vmem>>, vector<1x4x128xbf16>
    %70 = vector.shape_cast %69 : vector<1x4x128xbf16> to vector<4x128xbf16>
    %cst_74 = arith.constant dense<0.000000e+00> : vector<288x128xf32>
    %71 = tpu.matmul %64, %70, %cst_74 {dimension_numbers = #tpu.dot_dimension_numbers<[1], [0], [0], [1], [0, 0, 1, 1], [], []>} : vector<288x4xbf16>, vector<4x128xbf16>, vector<288x128xf32> -> vector<288x128xf32>
    %72 = arith.addf %68, %71 : vector<288x128xf32>
    %c0_75 = arith.constant 0 : index
    %c36 = arith.constant 36 : index
    %c0_76 = arith.constant 0 : index
    %73 = vector.load %arg1[%c0_75, %c36, %c0_76] : memref<1x342x4xbf16, #tpu.memory_space<vmem>>, vector<1x288x4xbf16>
    %74 = vector.shape_cast %73 : vector<1x288x4xbf16> to vector<288x4xbf16>
    %c0_77 = arith.constant 0 : index
    %c36_78 = arith.constant 36 : index
    %c0_79 = arith.constant 0 : index
    %75 = vector.load %arg2[%c0_77, %c36_78, %c0_79] : memref<1x342x4xbf16, #tpu.memory_space<vmem>>, vector<1x288x4xbf16>
    %76 = vector.shape_cast %75 : vector<1x288x4xbf16> to vector<288x4xbf16>
    %c6 = arith.constant 6 : index
    %c0_80 = arith.constant 0 : index
    %c0_81 = arith.constant 0 : index
    %77 = vector.load %arg3[%c6, %c0_80, %c0_81] : memref<9x4x128xbf16, #tpu.memory_space<vmem>>, vector<1x4x128xbf16>
    %78 = vector.shape_cast %77 : vector<1x4x128xbf16> to vector<4x128xbf16>
    %cst_82 = arith.constant dense<0.000000e+00> : vector<288x128xf32>
    %79 = tpu.matmul %74, %78, %cst_82 {dimension_numbers = #tpu.dot_dimension_numbers<[1], [0], [0], [1], [0, 0, 1, 1], [], []>} : vector<288x4xbf16>, vector<4x128xbf16>, vector<288x128xf32> -> vector<288x128xf32>
    %80 = arith.addf %72, %79 : vector<288x128xf32>
    %c6_83 = arith.constant 6 : index
    %c0_84 = arith.constant 0 : index
    %c0_85 = arith.constant 0 : index
    %81 = vector.load %arg4[%c6_83, %c0_84, %c0_85] : memref<9x4x128xbf16, #tpu.memory_space<vmem>>, vector<1x4x128xbf16>
    %82 = vector.shape_cast %81 : vector<1x4x128xbf16> to vector<4x128xbf16>
    %cst_86 = arith.constant dense<0.000000e+00> : vector<288x128xf32>
    %83 = tpu.matmul %76, %82, %cst_86 {dimension_numbers = #tpu.dot_dimension_numbers<[1], [0], [0], [1], [0, 0, 1, 1], [], []>} : vector<288x4xbf16>, vector<4x128xbf16>, vector<288x128xf32> -> vector<288x128xf32>
    %84 = arith.addf %80, %83 : vector<288x128xf32>
    %c0_87 = arith.constant 0 : index
    %c37 = arith.constant 37 : index
    %c0_88 = arith.constant 0 : index
    %85 = vector.load %arg1[%c0_87, %c37, %c0_88] : memref<1x342x4xbf16, #tpu.memory_space<vmem>>, vector<1x288x4xbf16>
    %86 = vector.shape_cast %85 : vector<1x288x4xbf16> to vector<288x4xbf16>
    %c0_89 = arith.constant 0 : index
    %c37_90 = arith.constant 37 : index
    %c0_91 = arith.constant 0 : index
    %87 = vector.load %arg2[%c0_89, %c37_90, %c0_91] : memref<1x342x4xbf16, #tpu.memory_space<vmem>>, vector<1x288x4xbf16>
    %88 = vector.shape_cast %87 : vector<1x288x4xbf16> to vector<288x4xbf16>
    %c7 = arith.constant 7 : index
    %c0_92 = arith.constant 0 : index
    %c0_93 = arith.constant 0 : index
    %89 = vector.load %arg3[%c7, %c0_92, %c0_93] : memref<9x4x128xbf16, #tpu.memory_space<vmem>>, vector<1x4x128xbf16>
    %90 = vector.shape_cast %89 : vector<1x4x128xbf16> to vector<4x128xbf16>
    %cst_94 = arith.constant dense<0.000000e+00> : vector<288x128xf32>
    %91 = tpu.matmul %86, %90, %cst_94 {dimension_numbers = #tpu.dot_dimension_numbers<[1], [0], [0], [1], [0, 0, 1, 1], [], []>} : vector<288x4xbf16>, vector<4x128xbf16>, vector<288x128xf32> -> vector<288x128xf32>
    %92 = arith.addf %84, %91 : vector<288x128xf32>
    %c7_95 = arith.constant 7 : index
    %c0_96 = arith.constant 0 : index
    %c0_97 = arith.constant 0 : index
    %93 = vector.load %arg4[%c7_95, %c0_96, %c0_97] : memref<9x4x128xbf16, #tpu.memory_space<vmem>>, vector<1x4x128xbf16>
    %94 = vector.shape_cast %93 : vector<1x4x128xbf16> to vector<4x128xbf16>
    %cst_98 = arith.constant dense<0.000000e+00> : vector<288x128xf32>
    %95 = tpu.matmul %88, %94, %cst_98 {dimension_numbers = #tpu.dot_dimension_numbers<[1], [0], [0], [1], [0, 0, 1, 1], [], []>} : vector<288x4xbf16>, vector<4x128xbf16>, vector<288x128xf32> -> vector<288x128xf32>
    %96 = arith.addf %92, %95 : vector<288x128xf32>
    %c0_99 = arith.constant 0 : index
    %c38 = arith.constant 38 : index
    %c0_100 = arith.constant 0 : index
    %97 = vector.load %arg1[%c0_99, %c38, %c0_100] : memref<1x342x4xbf16, #tpu.memory_space<vmem>>, vector<1x288x4xbf16>
    %98 = vector.shape_cast %97 : vector<1x288x4xbf16> to vector<288x4xbf16>
    %c0_101 = arith.constant 0 : index
    %c38_102 = arith.constant 38 : index
    %c0_103 = arith.constant 0 : index
    %99 = vector.load %arg2[%c0_101, %c38_102, %c0_103] : memref<1x342x4xbf16, #tpu.memory_space<vmem>>, vector<1x288x4xbf16>
    %100 = vector.shape_cast %99 : vector<1x288x4xbf16> to vector<288x4xbf16>
    %c8 = arith.constant 8 : index
    %c0_104 = arith.constant 0 : index
    %c0_105 = arith.constant 0 : index
    %101 = vector.load %arg3[%c8, %c0_104, %c0_105] : memref<9x4x128xbf16, #tpu.memory_space<vmem>>, vector<1x4x128xbf16>
    %102 = vector.shape_cast %101 : vector<1x4x128xbf16> to vector<4x128xbf16>
    %cst_106 = arith.constant dense<0.000000e+00> : vector<288x128xf32>
    %103 = tpu.matmul %98, %102, %cst_106 {dimension_numbers = #tpu.dot_dimension_numbers<[1], [0], [0], [1], [0, 0, 1, 1], [], []>} : vector<288x4xbf16>, vector<4x128xbf16>, vector<288x128xf32> -> vector<288x128xf32>
    %104 = arith.addf %96, %103 : vector<288x128xf32>
    %c8_107 = arith.constant 8 : index
    %c0_108 = arith.constant 0 : index
    %c0_109 = arith.constant 0 : index
    %105 = vector.load %arg4[%c8_107, %c0_108, %c0_109] : memref<9x4x128xbf16, #tpu.memory_space<vmem>>, vector<1x4x128xbf16>
    %106 = vector.shape_cast %105 : vector<1x4x128xbf16> to vector<4x128xbf16>
    %cst_110 = arith.constant dense<0.000000e+00> : vector<288x128xf32>
    %107 = tpu.matmul %100, %106, %cst_110 {dimension_numbers = #tpu.dot_dimension_numbers<[1], [0], [0], [1], [0, 0, 1, 1], [], []>} : vector<288x4xbf16>, vector<4x128xbf16>, vector<288x128xf32> -> vector<288x128xf32>
    %108 = arith.addf %104, %107 : vector<288x128xf32>
    %109 = vector.extract_strided_slice %108 {offsets = [0, 0], sizes = [288, 2], strides = [1, 1]} : vector<288x128xf32> to vector<288x2xf32>
    %c0_111 = arith.constant 0 : index
    %c0_112 = arith.constant 0 : index
    %c0_113 = arith.constant 0 : index
    %110 = vector.load %arg5[%c0_111, %c0_112, %c0_113] : memref<1x288x2xf32, #tpu.memory_space<vmem>>, vector<1x288x2xf32>
    %111 = vector.shape_cast %110 : vector<1x288x2xf32> to vector<288x2xf32>
    %112 = vector.shape_cast %109 : vector<288x2xf32> to vector<1x288x2xf32>
    tpu.vector_store %arg5[%c0_111, %c0_112, %c0_113], %112 {strides = array<i32>} : memref<1x288x2xf32, #tpu.memory_space<vmem>>, vector<1x288x2xf32>,
    return
  }
  func.func @transform_0(%arg0: i32) -> (i32, i32, i32) {
    %c0_i32 = arith.constant 0 : i32
    %c0_i32_0 = arith.constant 0 : i32
    %c0_i32_1 = arith.constant 0 : i32
    return %arg0, %c0_i32, %c0_i32_0 : i32, i32, i32
  }
  func.func @transform_1(%arg0: i32) -> (i32, i32, i32) {
    %c0_i32 = arith.constant 0 : i32
    %c0_i32_0 = arith.constant 0 : i32
    %c0_i32_1 = arith.constant 0 : i32
    return %arg0, %c0_i32, %c0_i32_0 : i32, i32, i32
  }
  func.func @transform_2(%arg0: i32) -> (i32, i32, i32) {
    %c0_i32 = arith.constant 0 : i32
    %c0_i32_0 = arith.constant 0 : i32
    %c0_i32_1 = arith.constant 0 : i32
    %c0_i32_2 = arith.constant 0 : i32
    return %c0_i32, %c0_i32_0, %c0_i32_1 : i32, i32, i32
  }
  func.func @transform_3(%arg0: i32) -> (i32, i32, i32) {
    %c0_i32 = arith.constant 0 : i32
    %c0_i32_0 = arith.constant 0 : i32
    %c0_i32_1 = arith.constant 0 : i32
    %c0_i32_2 = arith.constant 0 : i32
    return %c0_i32, %c0_i32_0, %c0_i32_1 : i32, i32, i32
  }
  func.func @transform_4(%arg0: i32) -> (i32, i32, i32) {
    %c0_i32 = arith.constant 0 : i32
    %c0_i32_0 = arith.constant 0 : i32
    %c0_i32_1 = arith.constant 0 : i32
    return %arg0, %c0_i32, %c0_i32_0 : i32, i32, i32
  }
}

module attributes {stable_mosaic.version = 11 : i64} {
  func.func @_warp_blend_kernel(%arg0: i32, %arg1: memref<256x4xbf16, #tpu.memory_space<vmem>>, %arg2: memref<4x256x4xbf16, #tpu.memory_space<vmem>>, %arg3: memref<256x4xf32, #tpu.memory_space<vmem>>, %arg4: memref<256x4xf32, #tpu.memory_space<vmem>>, %arg5: memref<256x4xf32, #tpu.memory_space<vmem>>) attributes {dimension_semantics = [#tpu.dimension_semantics<parallel>], iteration_bounds = array<i64: 2>, scalar_prefetch = 0 : i64, scratch_operands = 0 : i64, tpu.core_type = #tpu.core_type<tc>, window_params = [{transform_indices = @transform_0, window_bounds = array<i64: 256, 4>}, {transform_indices = @transform_1, window_bounds = array<i64: 4, 256, 4>}, {transform_indices = @transform_2, window_bounds = array<i64: 256, 4>}, {transform_indices = @transform_3, window_bounds = array<i64: 256, 4>}, {transform_indices = @transform_4, window_bounds = array<i64: 256, 4>}]} {
    %c0 = arith.constant 0 : index
    %c0_0 = arith.constant 0 : index
    %c0_1 = arith.constant 0 : index
    %0 = vector.load %arg2[%c0, %c0_0, %c0_1] : memref<4x256x4xbf16, #tpu.memory_space<vmem>>, vector<1x256x4xbf16>
    %1 = vector.shape_cast %0 : vector<1x256x4xbf16> to vector<256x4xbf16>
    %2 = arith.extf %1 : vector<256x4xbf16> to vector<256x4xf32>
    %c0_2 = arith.constant 0 : index
    %c0_3 = arith.constant 0 : index
    %3 = vector.load %arg3[%c0_2, %c0_3] : memref<256x4xf32, #tpu.memory_space<vmem>>, vector<256x1xf32>
    %4 = vector.broadcast %3 : vector<256x1xf32> to vector<256x4xf32>
    %5 = arith.mulf %2, %4 : vector<256x4xf32>
    %c1 = arith.constant 1 : index
    %c0_4 = arith.constant 0 : index
    %c0_5 = arith.constant 0 : index
    %6 = vector.load %arg2[%c1, %c0_4, %c0_5] : memref<4x256x4xbf16, #tpu.memory_space<vmem>>, vector<1x256x4xbf16>
    %7 = vector.shape_cast %6 : vector<1x256x4xbf16> to vector<256x4xbf16>
    %8 = arith.extf %7 : vector<256x4xbf16> to vector<256x4xf32>
    %c0_6 = arith.constant 0 : index
    %c1_7 = arith.constant 1 : index
    %9 = vector.load %arg3[%c0_6, %c1_7] : memref<256x4xf32, #tpu.memory_space<vmem>>, vector<256x1xf32>
    %10 = vector.broadcast %9 : vector<256x1xf32> to vector<256x4xf32>
    %11 = arith.mulf %8, %10 : vector<256x4xf32>
    %12 = arith.addf %5, %11 : vector<256x4xf32>
    %c2 = arith.constant 2 : index
    %c0_8 = arith.constant 0 : index
    %c0_9 = arith.constant 0 : index
    %13 = vector.load %arg2[%c2, %c0_8, %c0_9] : memref<4x256x4xbf16, #tpu.memory_space<vmem>>, vector<1x256x4xbf16>
    %14 = vector.shape_cast %13 : vector<1x256x4xbf16> to vector<256x4xbf16>
    %15 = arith.extf %14 : vector<256x4xbf16> to vector<256x4xf32>
    %c0_10 = arith.constant 0 : index
    %c2_11 = arith.constant 2 : index
    %16 = vector.load %arg3[%c0_10, %c2_11] : memref<256x4xf32, #tpu.memory_space<vmem>>, vector<256x1xf32>
    %17 = vector.broadcast %16 : vector<256x1xf32> to vector<256x4xf32>
    %18 = arith.mulf %15, %17 : vector<256x4xf32>
    %19 = arith.addf %12, %18 : vector<256x4xf32>
    %c3 = arith.constant 3 : index
    %c0_12 = arith.constant 0 : index
    %c0_13 = arith.constant 0 : index
    %20 = vector.load %arg2[%c3, %c0_12, %c0_13] : memref<4x256x4xbf16, #tpu.memory_space<vmem>>, vector<1x256x4xbf16>
    %21 = vector.shape_cast %20 : vector<1x256x4xbf16> to vector<256x4xbf16>
    %22 = arith.extf %21 : vector<256x4xbf16> to vector<256x4xf32>
    %c0_14 = arith.constant 0 : index
    %c3_15 = arith.constant 3 : index
    %23 = vector.load %arg3[%c0_14, %c3_15] : memref<256x4xf32, #tpu.memory_space<vmem>>, vector<256x1xf32>
    %24 = vector.broadcast %23 : vector<256x1xf32> to vector<256x4xf32>
    %25 = arith.mulf %22, %24 : vector<256x4xf32>
    %26 = arith.addf %19, %25 : vector<256x4xf32>
    %c0_16 = arith.constant 0 : index
    %c0_17 = arith.constant 0 : index
    %27 = vector.load %arg5[%c0_16, %c0_17] : memref<256x4xf32, #tpu.memory_space<vmem>>, vector<256x4xf32>
    tpu.vector_store %arg5[%c0_16, %c0_17], %26 {strides = array<i32>} : memref<256x4xf32, #tpu.memory_space<vmem>>, vector<256x4xf32>,
    %c0_18 = arith.constant 0 : index
    %c0_19 = arith.constant 0 : index
    %28 = vector.load %arg1[%c0_18, %c0_19] : memref<256x4xbf16, #tpu.memory_space<vmem>>, vector<256x4xbf16>
    %29 = arith.extf %28 : vector<256x4xbf16> to vector<256x4xf32>
    %30 = arith.subf %29, %26 : vector<256x4xf32>
    %c0_20 = arith.constant 0 : index
    %c0_21 = arith.constant 0 : index
    %31 = vector.load %arg4[%c0_20, %c0_21] : memref<256x4xf32, #tpu.memory_space<vmem>>, vector<256x4xf32>
    tpu.vector_store %arg4[%c0_20, %c0_21], %30 {strides = array<i32>} : memref<256x4xf32, #tpu.memory_space<vmem>>, vector<256x4xf32>,
    return
  }
  func.func @transform_0(%arg0: i32) -> (i32, i32) {
    %c0_i32 = arith.constant 0 : i32
    %c0_i32_0 = arith.constant 0 : i32
    return %arg0, %c0_i32 : i32, i32
  }
  func.func @transform_1(%arg0: i32) -> (i32, i32, i32) {
    %c0_i32 = arith.constant 0 : i32
    %c0_i32_0 = arith.constant 0 : i32
    %c0_i32_1 = arith.constant 0 : i32
    return %c0_i32, %arg0, %c0_i32_0 : i32, i32, i32
  }
  func.func @transform_2(%arg0: i32) -> (i32, i32) {
    %c0_i32 = arith.constant 0 : i32
    %c0_i32_0 = arith.constant 0 : i32
    return %arg0, %c0_i32 : i32, i32
  }
  func.func @transform_3(%arg0: i32) -> (i32, i32) {
    %c0_i32 = arith.constant 0 : i32
    %c0_i32_0 = arith.constant 0 : i32
    return %arg0, %c0_i32 : i32, i32
  }
  func.func @transform_4(%arg0: i32) -> (i32, i32) {
    %c0_i32 = arith.constant 0 : i32
    %c0_i32_0 = arith.constant 0 : i32
    return %arg0, %c0_i32 : i32, i32
  }
}

</mosaic_0001>

<bundles_post_ra>
// kernel: squeeze_body_edge_high_forward.4
= control target key start
LH: loop header
LB: loop body
LE: loop exit
PB: predicated region body
PF: predicated region fallthrough
CT: control target
= control target key end

     0   :  { %s1008_s24 = smov 0   ;;  %s1224_s0 = inlined_call_operand.vmem [shape: bf16[2,8,8,4], index: 0, kind: input, shape index: {}]   ;;  %s1225_s1 = inlined_call_operand.vmem [shape: bf16[2,8,8,4], index: 1, kind: input, shape index: {}]   ;;  %s1226_s2 = inlined_call_operand.vmem [shape: bf16[2,8,8,4], index: 2, kind: input, shape index: {}]   ;;  %s1227_s3 = inlined_call_operand.vmem [shape: bf16[2,8,8,4], index: 3, kind: input, shape index: {}]   ;;  %s1228_s4 = inlined_call_operand.vmem [shape: f32[9,1,4], index: 4, kind: input, shape index: {}]   ;;  %s1229_s5 = inlined_call_operand.vmem [shape: f32[1,4], index: 5, kind: input, shape index: {}]   ;;  %s1230_s6 = inlined_call_operand.vmem [shape: f32[1,4], index: 6, kind: input, shape index: {}]   ;;  %s1231_s7 = inlined_call_operand.vmem [shape: f32[2,7,7,4], index: 7, kind: output, shape index: {}]  }
   0x1 LB: > { %s812_s25 = sadd.s32 4294967295, %s966_s24   ;;  %p816_p0 = scmp.ge.s32.totalorder %s966_s24, 1  ;;  %s966_s24 = sphi %s1008_s24, %s17_s24  }
   0x2   : > { %p267_p1 = scmp.lt.s32.totalorder %s966_s24, 3 }
   0x4   : > { %p268_p2 = pnand %p816_p0, %p267_p1 }
   0x5   : > { %p314_p3 = scmp.lt.s32.totalorder (!%p268_p2), %s812_s25, 1  ;;  %v1022_v0 = vld [vmem:[%s1228_s4] ss:$0 sm:$0xff] (!%p268_p2)  ;;  %v1027_v1 = vld [vmem:[%s1228_s4 + $0x1] ss:$0 sm:$0xff] (!%p268_p2)  ;;  %vm713_vm0 = vcmask (!%p268_p2), 30720  }
   0x6   : > { %271 = sbr.rel (%p268_p2) target bundleno = 82 (0x52), region = 48  ;;  %v1032_v2 = vld [vmem:[%s1228_s4 + $0x2] ss:$0 sm:$0xff] (!%p268_p2)  ;;  %v1047_v3 = vld [vmem:[%s1228_s4 + $0x3] ss:$0 sm:$0xff] (!%p268_p2) }
   0x7   : > { %v1052_v4 = vld [vmem:[%s1228_s4 + $0x4] ss:$0 sm:$0xff] (!%p268_p2)  ;;  %v1057_v5 = vld [vmem:[%s1228_s4 + $0x5] ss:$0 sm:$0xff] (!%p268_p2)  ;;  %v1062_v6 = vld [vmem:[%s1228_s4 + $0x6] ss:$0 sm:$0xff] (!%p268_p2) }
   0x8   : > { %v1089_v20 = vld [vmem:[%s1228_s4 + $0x8] ss:$0 sm:$0xff] (!%p268_p2)  ;;  %v1097_v25 = vld [vmem:[%s1228_s4 + $0x7] ss:$0 sm:$0xff] (!%p268_p2) }
   0xd   : > { %s1233_s25 = smov (!%p314_p3, %s812_s25), 1 }
   0xe   : > { %s861_s26 = sshll.u32 %s1233_s25, 5  ;;  %s951_s17 = smul.u32 56, %s1233_s25 }
   0xf   : > { %s1037_s12 = scalar_lea.vmem %s1224_s0, %s861_s26  ;;  %s1042_s15 = scalar_lea.vmem %s1225_s1, %s861_s26 }
  0x10   : > { %s1067_s29 = scalar_lea.vmem %s1226_s2, %s861_s26  ;;  %s1072_s9 = scalar_lea.vmem %s1227_s3, %s861_s26  ;;  %v866_v7 = vld [vmem:[%s1037_s12] sm:$0xff]   ;;  %v945_v30 = vld [vmem:[%s1037_s12 + $0x8] sm:$0xff]  }
  0x11   : > { %v878_v8 = vld [vmem:[%s1042_s15] sm:$0xff]   ;;  %v867_v10 = vunpack.c.l.bf16 %v866_v7  ;;  %v868_v16 = vunpack.c.h.bf16 %v866_v7  ;;  %v948_v39 = vld [vmem:[%s1042_s15 + $0x8] sm:$0xff]   ;;  %v915_v43 = vunpack.c.l.bf16 %v945_v30  ;;  %s1156_s21 = scalar_lea.vmem %s1231_s7, %s951_s17 }
  0x12   : > { %v1077_v9 = vld [vmem:[%s1037_s12 + $0x4] ss:$20 sps:$4 sm:$0xff]   ;;  %v879_v11 = vunpack.c.l.bf16 %v878_v8  ;;  %v880_v21 = vunpack.c.h.bf16 %v878_v8  ;;  %v927_v51 = vunpack.c.l.bf16 %v948_v39  ;;  %v941_v52 = vld [vmem:[%s1067_s29 + $0x8] sm:$0xff]  }
  0x13   : > { %v890_v12 = vld [vmem:[%s1067_s29] sm:$0xff]   ;;  %v569_v14 = vunpack.c.l.bf16 %v1077_v9  ;;  %v360_v22 = vmul.f32 %v867_v10, %v1022_v0  ;;  %v411_v24 = vmul.f32 %v867_v10, %v1032_v2  ;;  %v361_v34 = vmul.f32 %v868_v16, %v1022_v0  ;;  %v943_v53 = vld [vmem:[%s1072_s9 + $0x8] sm:$0xff]  }
  0x14   : > { %v902_v13 = vld [vmem:[%s1072_s9] sm:$0xff]   ;;  %v891_v17 = vunpack.c.l.bf16 %v890_v12  ;;  %v389_v23 = vmul.f32 %v879_v11, %v1027_v1  ;;  %v390_v36 = vmul.f32 %v880_v21, %v1027_v1  ;;  %v412_v37 = vmul.f32 %v868_v16, %v1032_v2 }
  0x15   : > { %v1083_v15 = vld [vmem:[%s1042_s15 + $0x4] ss:$20 sps:$4 sm:$0xff]   ;;  %v903_v18 = vunpack.c.l.bf16 %v902_v13  ;;  %v584_v29 = vmul.f32 %v1062_v6, %v569_v14  ;;  %v425_v32 = vrot.slane %v411_v24, 1  ;;  %v643_v33 = vmul.f32 %v1089_v20, %v569_v14 }
  0x16   : > { %v606_v19 = vunpack.c.l.bf16 %v1083_v15  ;;  %v468_v26 = vmul.f32 %v891_v17, %v1047_v3  ;;  %v526_v28 = vmul.f32 %v891_v17, %v1057_v5  ;;  %v396_v31 = vadd.f32 %v389_v23, %v360_v22 }
  0x17   : > { %v504_v27 = vmul.f32 %v903_v18, %v1052_v4  ;;  %v892_v38 = vunpack.c.h.bf16 %v890_v12  ;;  %v904_v42 = vunpack.c.h.bf16 %v902_v13  ;;  %v397_v44 = vadd.f32 %v390_v36, %v361_v34 }
  0x18   : > { %v621_v35 = vmul.f32 %v1097_v25, %v606_v19  ;;  %v439_v40 = vadd.f32 %v425_v32, %v396_v31  ;;  %v540_v41 = vrot.slane %v526_v28, 1  ;;  %v426_v45 = vrot.slane %v412_v37, 1 }
  0x19   : > { %v469_v46 = vmul.f32 %v892_v38, %v1047_v3  ;;  %v527_v47 = vmul.f32 %v892_v38, %v1057_v5  ;;  %v657_v49 = vrot.slane %v643_v33, 1  ;;  %v505_v50 = vmul.f32 %v904_v42, %v1052_v4  ;;  %v1131_v33 = vld [vmem:[%s1229_s5] ss:$0 sm:$0xff] }
  0x1a   : > { %v475_v48 = vadd.f32 %v468_v26, %v439_v40  ;;  %v440_v54 = vadd.f32 %v426_v45, %v397_v44  ;;  %v585_v55 = vmul.f32 %v915_v43, %v1062_v6  ;;  %v644_v56 = vmul.f32 %v915_v43, %v1089_v20  ;;  %v1143_v44 = vld [vmem:[%s1230_s6] ss:$0 sm:$0xff] }
  0x1b   : > { %v362_v57 = vmul.f32 %v915_v43, %v1022_v0  ;;  %v541_v59 = vrot.slane %v527_v47, 1  ;;  %v391_v60 = vmul.f32 %v927_v51, %v1027_v1  ;;  %v413_v61 = vmul.f32 %v915_v43, %v1032_v2  ;;  %v1137_v43 = vld [vmem:[%s1042_s15 + $0x10] sm:$0xff]  }
  0x1c   : > { %v511_v58 = vadd.f32 %v504_v27, %v475_v48  ;;  %v476_v62 = vadd.f32 %v469_v46, %v440_v54  ;;  %v622_v63 = vmul.f32 %v927_v51, %v1097_v25  ;;  %v895_v7 = vunpack.c.l.bf16 %v941_v52 }
  0x1d   : > { %v907_v8 = vunpack.c.l.bf16 %v943_v53  ;;  %v398_v11 = vadd.f32 %v391_v60, %v362_v57  ;;  %v427_v12 = vrot.slane %v413_v61, 1  ;;  %v916_v13 = vunpack.c.h.bf16 %v945_v30  ;;  %v942_v61 = vld [vmem:[%s1067_s29 + $0x10] sm:$0xff]  }
  0x1e   : > { %v554_v10 = vadd.f32 %v540_v41, %v511_v58  ;;  %v512_v14 = vadd.f32 %v505_v50, %v476_v62  ;;  %v658_v16 = vrot.slane %v644_v56, 1  ;;  %v470_v17 = vmul.f32 %v895_v7, %v1047_v3 }
  0x1f   : > { %v528_v18 = vmul.f32 %v895_v7, %v1057_v5  ;;  %v441_v21 = vadd.f32 %v427_v12, %v398_v11  ;;  %v506_v22 = vmul.f32 %v907_v8, %v1052_v4  ;;  %v928_v23 = vunpack.c.h.bf16 %v948_v39  ;;  %v946_v39 = vld [vmem:[%s1037_s12 + $0x10] sm:$0xff]  }
  0x20   : > { %v591_v19 = vadd.f32 %v584_v29, %v554_v10  ;;  %v555_v24 = vadd.f32 %v541_v59, %v512_v14  ;;  %v586_v27 = vmul.f32 %v916_v13, %v1062_v6  ;;  %v363_v28 = vmul.f32 %v916_v13, %v1022_v0  ;;  %v944_v10 = vld [vmem:[%s1072_s9 + $0x10] sm:$0xff]  }
  0x21   : > { %v542_v26 = vrot.slane %v528_v18, 1  ;;  %v477_v31 = vadd.f32 %v470_v17, %v441_v21  ;;  %v645_v32 = vmul.f32 %v916_v13, %v1089_v20  ;;  %v392_v29 = vmul.f32 %v928_v23, %v1027_v1 }
  0x22   : > { %v628_v30 = vadd.f32 %v621_v35, %v591_v19  ;;  %v592_v34 = vadd.f32 %v585_v55, %v555_v24  ;;  %v623_v36 = vmul.f32 %v928_v23, %v1097_v25  ;;  %v414_v37 = vmul.f32 %v916_v13, %v1032_v2 }
  0x23   : > { %v896_v38 = vunpack.c.h.bf16 %v941_v52  ;;  %v513_v41 = vadd.f32 %v506_v22, %v477_v31  ;;  %v399_v35 = vadd.f32 %v392_v29, %v363_v28  ;;  %v908_v42 = vunpack.c.h.bf16 %v943_v53 }
  0x24   : > { %v671_v40 = vadd.f32 %v657_v49, %v628_v30  ;;  %v629_v45 = vadd.f32 %v622_v63, %v592_v34  ;;  %v428_v46 = vrot.slane %v414_v37, 1  ;;  %v659_v51 = vrot.slane %v645_v32, 1 }
  0x25   : > { %v471_v47 = vmul.f32 %v896_v38, %v1047_v3  ;;  %v529_v48 = vmul.f32 %v896_v38, %v1057_v5  ;;  %v556_v50 = vadd.f32 %v542_v26, %v513_v41  ;;  %v919_v52 = vunpack.c.l.bf16 %v946_v39 }
  0x26   : > { %v685_v49 = vmul.f32 %v1131_v33, %v671_v40  ;;  %v672_v53 = vadd.f32 %v658_v16, %v629_v45  ;;  %v442_v54 = vadd.f32 %v428_v46, %v399_v35  ;;  %v507_v55 = vmul.f32 %v908_v42, %v1052_v4 }
  0x27   : > { %v931_v56 = vunpack.c.l.bf16 %v1137_v43  ;;  %v593_v58 = vadd.f32 %v586_v27, %v556_v50  ;;  %v543_v59 = vrot.slane %v529_v48, 1  ;;  %v587_v60 = vmul.f32 %v919_v52, %v1062_v6 }
  0x28   : > { %v699_v57 = vadd.f32 %v1143_v44, %v685_v49  ;;  %v686_v62 = vmul.f32 %v1131_v33, %v672_v53  ;;  %v478_v63 = vadd.f32 %v471_v47, %v442_v54  ;;  %v646_v7 = vmul.f32 %v919_v52, %v1089_v20  ;;  %v947_v54 = vld [vmem:[%s1037_s12 + $0x18] sm:$0xff]  }
  0x29   : > { %v364_v8 = vmul.f32 %v919_v52, %v1022_v0  ;;  %v630_v12 = vadd.f32 %v623_v36, %v593_v58  ;;  %v624_v13 = vmul.f32 %v931_v56, %v1097_v25  ;;  %v393_v14 = vmul.f32 %v931_v56, %v1027_v1 }
  0x2a   : > { %v706_v11 = vmax.f32 %v699_v57, 0.0  ;;  %v700_v16 = vadd.f32 %v1143_v44, %v686_v62  ;;  %v514_v17 = vadd.f32 %v507_v55, %v478_v63  ;;  %v415_v18 = vmul.f32 %v919_v52, %v1032_v2  ;;  %v950_v55 = vld [vmem:[%s1042_s15 + $0x18] sm:$0xff]  }
  0x2b   : > { %v899_v19 = vunpack.c.l.bf16 %v942_v61  ;;  %v673_v21 = vadd.f32 %v659_v51, %v630_v12  ;;  %v400_v22 = vadd.f32 %v393_v14, %v364_v8  ;;  %v911_v23 = vunpack.c.l.bf16 %v944_v10  ;;  %v452_v63 = vld [vmem:[%s1067_s29 + $0x18] sm:$0xf] }
  0x2c   : > { %714 = vst.msk [vmem:[%s1156_s21] sm:$0x7f] %vm713_vm0, %v706_v11  ;;  %v920_v24 = vunpack.c.h.bf16 %v946_v39  ;;  %v707_v26 = vmax.f32 %v700_v16, 0.0  ;;  %v557_v27 = vadd.f32 %v543_v59, %v514_v17  ;;  %v429_v28 = vrot.slane %v415_v18, 1  ;;  %v488_v17 = vld [vmem:[%s1072_s9 + $0x18] sm:$0xf] }
  0x2d   : > { %v472_v30 = vmul.f32 %v899_v19, %v1047_v3  ;;  %v687_v31 = vmul.f32 %v1131_v33, %v673_v21  ;;  %v660_v32 = vrot.slane %v646_v7, 1  ;;  %v530_v29 = vmul.f32 %v899_v19, %v1057_v5 }
  0x2e   : > { %715 = vst.msk [vmem:[%s1156_s21 + $0x8] sm:$0x7f] %vm713_vm0, %v707_v26  ;;  %v594_v34 = vadd.f32 %v587_v60, %v557_v27  ;;  %v443_v36 = vadd.f32 %v429_v28, %v400_v22  ;;  %v508_v37 = vmul.f32 %v911_v23, %v1052_v4  ;;  %v932_v38 = vunpack.c.h.bf16 %v1137_v43 }
  0x2f   : > { %v701_v39 = vadd.f32 %v1143_v44, %v687_v31  ;;  %v365_v40 = vmul.f32 %v920_v24, %v1022_v0  ;;  %v416_v41 = vmul.f32 %v920_v24, %v1032_v2  ;;  %v544_v45 = vrot.slane %v530_v29, 1 }
  0x30   : > { %v631_v35 = vadd.f32 %v624_v13, %v594_v34  ;;  %v479_v42 = vadd.f32 %v472_v30, %v443_v36  ;;  %v647_v46 = vmul.f32 %v920_v24, %v1089_v20  ;;  %v394_v48 = vmul.f32 %v932_v38, %v1027_v1 }
  0x31   : > { %v708_v47 = vmax.f32 %v701_v39, 0.0  ;;  %v430_v49 = vrot.slane %v416_v41, 1  ;;  %v900_v43 = vunpack.c.h.bf16 %v942_v61  ;;  %v588_v52 = vmul.f32 %v920_v24, %v1062_v6 }
  0x32   : > { %v674_v50 = vadd.f32 %v660_v32, %v631_v35  ;;  %v515_v51 = vadd.f32 %v508_v37, %v479_v42  ;;  %v912_v53 = vunpack.c.h.bf16 %v944_v10  ;;  %v401_v56 = vadd.f32 %v394_v48, %v365_v40 }
  0x33   : > { %716 = vst.msk [vmem:[%s1156_s21 + $0x10] sm:$0x7f] %vm713_vm0, %v708_v47  ;;  %v473_v57 = vmul.f32 %v900_v43, %v1047_v3  ;;  %v531_v58 = vmul.f32 %v900_v43, %v1057_v5  ;;  %v625_v61 = vmul.f32 %v932_v38, %v1097_v25  ;;  %v661_v62 = vrot.slane %v647_v46, 1 }
  0x34   : > { %v688_v59 = vmul.f32 %v1131_v33, %v674_v50  ;;  %v558_v60 = vadd.f32 %v544_v45, %v515_v51  ;;  %v444_v7 = vadd.f32 %v430_v49, %v401_v56  ;;  %v509_v8 = vmul.f32 %v912_v53, %v1052_v4 }
  0x35   : > { %v923_v10 = vunpack.c.l.bf16 %v947_v54  ;;  %v935_v11 = vunpack.c.l.bf16 %v950_v55  ;;  %v352_v14 = vunpack.c.h.bf16 %v1077_v9  ;;  %v380_v16 = vunpack.c.h.bf16 %v1083_v15 }
  0x36   : > { %v702_v12 = vadd.f32 %v1143_v44, %v688_v59  ;;  %v595_v13 = vadd.f32 %v588_v52, %v558_v60  ;;  %v480_v18 = vadd.f32 %v473_v57, %v444_v7  ;;  %v545_v19 = vrot.slane %v531_v58, 1 }
  0x37   : > { %v648_v21 = vmul.f32 %v923_v10, %v1089_v20  ;;  %v459_v22 = vunpack.c.l.bf16 %v452_v63  ;;  %v366_v26 = vmul.f32 %v1022_v0, %v352_v14  ;;  %v395_v27 = vmul.f32 %v1027_v1, %v380_v16 }
  0x38   : > { %v709_v23 = vmax.f32 %v702_v12, 0.0  ;;  %v632_v24 = vadd.f32 %v625_v61, %v595_v13  ;;  %v516_v28 = vadd.f32 %v509_v8, %v480_v18  ;;  %v589_v30 = vmul.f32 %v923_v10, %v1062_v6 }
  0x39   : > { %v417_v31 = vmul.f32 %v1032_v2, %v352_v14  ;;  %v495_v9 = vunpack.c.l.bf16 %v488_v17  ;;  %v626_v32 = vmul.f32 %v935_v11, %v1097_v25  ;;  %v402_v29 = vadd.f32 %v395_v27, %v366_v26 }
  0x3a   : > { %717 = vst.msk [vmem:[%s1156_s21 + $0x18] sm:$0x7f] %vm713_vm0, %v709_v23  ;;  %v675_v15 = vadd.f32 %v661_v62, %v632_v24  ;;  %v559_v34 = vadd.f32 %v545_v19, %v516_v28  ;;  %v474_v37 = vmul.f32 %v1047_v3, %v459_v22  ;;  %v532_v0 = vmul.f32 %v1057_v5, %v459_v22 }
  0x3b   : > { %v431_v36 = vrot.slane %v417_v31, 1  ;;  %v662_v38 = vrot.slane %v648_v21, 1  ;;  %v510_v2 = vmul.f32 %v1052_v4, %v495_v9  ;;  %v924_v41 = vunpack.c.h.bf16 %v947_v54 }
  0x3c   : > { %v689_v1 = vmul.f32 %v1131_v33, %v675_v15  ;;  %v596_v39 = vadd.f32 %v589_v30, %v559_v34  ;;  %v546_v46 = vrot.slane %v532_v0, 1  ;;  %v936_v47 = vunpack.c.h.bf16 %v950_v55 }
  0x3d   : > { %v445_v40 = vadd.f32 %v431_v36, %v402_v29  ;;  %v590_v5 = vmul.f32 %v924_v41, %v1062_v6  ;;  %v649_v43 = vmul.f32 %v924_v41, %v1089_v20 }
  0x3e   : > { %v703_v35 = vadd.f32 %v1143_v44, %v689_v1  ;;  %v633_v42 = vadd.f32 %v626_v32, %v596_v39  ;;  %v627_v51 = vmul.f32 %v936_v47, %v1097_v25 }
  0x3f   : > { %v481_v45 = vadd.f32 %v474_v37, %v445_v40  ;;  %v663_v54 = vrot.slane %v649_v43, 1 }
  0x40   : > { %v710_v48 = vmax.f32 %v703_v35, 0.0  ;;  %v676_v3 = vadd.f32 %v662_v38, %v633_v42 }
  0x41   : > { %v517_v49 = vadd.f32 %v510_v2, %v481_v45 }
  0x42   : > { %718 = vst.msk [vmem:[%s1156_s21 + $0x20] sm:$0x7f] %vm713_vm0, %v710_v48  ;;  %v690_v4 = vmul.f32 %v1131_v33, %v676_v3 }
  0x43   : > { %v560_v50 = vadd.f32 %v546_v46, %v517_v49 }
  0x44   : > { %v704_v52 = vadd.f32 %v1143_v44, %v690_v4 }
  0x45   : > { %v597_v53 = vadd.f32 %v590_v5, %v560_v50 }
  0x46   : > { %v711_v55 = vmax.f32 %v704_v52, 0.0 }
  0x47   : > { %v634_v56 = vadd.f32 %v627_v51, %v597_v53 }
  0x48   : > { %719 = vst.msk [vmem:[%s1156_s21 + $0x28] sm:$0x7f] %vm713_vm0, %v711_v55 }
  0x49   : > { %v677_v57 = vadd.f32 %v663_v54, %v634_v56 }
  0x4b   : > { %v691_v6 = vmul.f32 %v1131_v33, %v677_v57 }
  0x4d   : > { %v705_v20 = vadd.f32 %v1143_v44, %v691_v6 }
  0x4f   : > { %v712_v58 = vmax.f32 %v705_v20, 0.0 }
  0x51   : > { %720 = vst.msk [vmem:[%s1156_s21 + $0x30] sm:$0x7f] %vm713_vm0, %v712_v58 }
  0x52 PF: > { %s17_s24 = sadd.s32 1, %s966_s24  }
  0x53   : > { %p14_p4 = scmp.ge.s32.totalorder %s17_s24, 4  }
  0x55   :  { %16 = sbr.rel (!%p14_p4) target bundleno = 1 (0x1), region = 97 }

// kernel: squeeze_body_edge_high_forward.5
= control target key start
LH: loop header
LB: loop body
LE: loop exit
PB: predicated region body
PF: predicated region fallthrough
CT: control target
= control target key end

     0   :  { %s764_s24 = smov 0   ;;  %s843_s0 = inlined_call_operand.vmem [shape: bf16[2,4,4,4], index: 0, kind: input, shape index: {}]   ;;  %s844_s1 = inlined_call_operand.vmem [shape: bf16[2,4,4,4], index: 1, kind: input, shape index: {}]   ;;  %s845_s2 = inlined_call_operand.vmem [shape: bf16[2,4,4,4], index: 2, kind: input, shape index: {}]   ;;  %s846_s3 = inlined_call_operand.vmem [shape: bf16[2,4,4,4], index: 3, kind: input, shape index: {}]   ;;  %s847_s4 = inlined_call_operand.vmem [shape: f32[9,1,4], index: 4, kind: input, shape index: {}]   ;;  %s848_s5 = inlined_call_operand.vmem [shape: f32[1,4], index: 5, kind: input, shape index: {}]   ;;  %s849_s6 = inlined_call_operand.vmem [shape: f32[1,4], index: 6, kind: input, shape index: {}]   ;;  %s850_s7 = inlined_call_operand.vmem [shape: f32[2,3,3,4], index: 7, kind: output, shape index: {}]  }
   0x1 LB: > { %s653_s25 = sadd.s32 4294967295, %s722_s24   ;;  %p657_p0 = scmp.ge.s32.totalorder %s722_s24, 1  ;;  %s722_s24 = sphi %s764_s24, %s17_s24  }
   0x2   : > { %p267_p1 = scmp.lt.s32.totalorder %s722_s24, 3 }
   0x4   : > { %p268_p2 = pnand %p657_p0, %p267_p1 }
   0x5   : > { %p314_p3 = scmp.lt.s32.totalorder (!%p268_p2), %s653_s25, 1  ;;  %v667_v0 = vld [vmem:[%s847_s4] ss:$0 sm:$0xff] (!%p268_p2)  ;;  %v669_v1 = vld [vmem:[%s847_s4 + $0x1] ss:$0 sm:$0xff] (!%p268_p2)  ;;  %vm558_vm0 = vcmask (!%p268_p2), 26624  }
   0x6   : > { %271 = sbr.rel (%p268_p2) target bundleno = 49 (0x31), region = 48  ;;  %v671_v2 = vld [vmem:[%s847_s4 + $0x2] ss:$0 sm:$0xff] (!%p268_p2)  ;;  %v676_v26 = vld [vmem:[%s847_s4 + $0x3] ss:$0 sm:$0xff] (!%p268_p2) }
   0x7   : > { %v680_v38 = vld [vmem:[%s847_s4 + $0x5] ss:$0 sm:$0xff] (!%p268_p2)  ;;  %v678_v43 = vld [vmem:[%s847_s4 + $0x4] ss:$0 sm:$0xff] (!%p268_p2)  ;;  %v688_v63 = vld [vmem:[%s847_s4 + $0x6] ss:$0 sm:$0xff] (!%p268_p2) }
   0xd   : > { %s852_s25 = smov (!%p314_p3, %s653_s25), 1 }
   0xe   : > { %s703_s26 = sshll.u32 %s852_s25, 3 }
   0xf   : > { %s778_s29 = scalar_lea.vmem %s843_s0, %s703_s26  ;;  %s783_s9 = scalar_lea.vmem %s844_s1, %s703_s26 }
  0x10   : > { %s328_s18 = scalar_lea.vmem %s845_s2, %s703_s26  ;;  %v339_v3 = vld [vmem:[%s778_s29] sm:$0x3]  ;;  %v340_v4 = vld [vmem:[%s778_s29 + $0x2] sm:$0x3]  ;;  %v341_v5 = vld [vmem:[%s778_s29 + $0x4] sm:$0x3]  ;;  %s333_s21 = scalar_lea.vmem %s846_s3, %s703_s26 }
  0x11   : > { %v342_v6 = vunpack.c.l.bf16 %v339_v3  ;;  %v343_v7 = vunpack.c.l.bf16 %v340_v4  ;;  %v344_v8 = vunpack.c.l.bf16 %v341_v5  ;;  %v355_v9 = vld [vmem:[%s783_s9] sm:$0x3]  ;;  %v356_v10 = vld [vmem:[%s783_s9 + $0x2] sm:$0x3]  ;;  %v357_v11 = vld [vmem:[%s783_s9 + $0x4] sm:$0x3] }
  0x12   : > { %v358_v12 = vunpack.c.l.bf16 %v355_v9  ;;  %v359_v13 = vunpack.c.l.bf16 %v356_v10  ;;  %v360_v14 = vunpack.c.l.bf16 %v357_v11  ;;  %v401_v15 = vld [vmem:[%s328_s18] sm:$0x3]  ;;  %v402_v16 = vld [vmem:[%s328_s18 + $0x2] sm:$0x3]  ;;  %v403_v25 = vld [vmem:[%s328_s18 + $0x4] sm:$0x3] }
  0x13   : > { %v352_v17 = vmul.f32 %v667_v0, %v342_v6  ;;  %v353_v18 = vmul.f32 %v667_v0, %v343_v7  ;;  %v354_v19 = vmul.f32 %v667_v0, %v344_v8  ;;  %v383_v20 = vmul.f32 %v671_v2, %v342_v6  ;;  %v421_v31 = vld [vmem:[%s333_s21] sm:$0x3]  ;;  %v422_v32 = vld [vmem:[%s333_s21 + $0x2] sm:$0x3]  ;;  %v423_v37 = vld [vmem:[%s333_s21 + $0x4] sm:$0x3] }
  0x14   : > { %v369_v21 = vmul.f32 %v669_v1, %v358_v12  ;;  %v370_v22 = vmul.f32 %v669_v1, %v359_v13  ;;  %v371_v23 = vmul.f32 %v669_v1, %v360_v14  ;;  %v384_v24 = vmul.f32 %v671_v2, %v343_v7  ;;  %v684_v52 = vld [vmem:[%s778_s29 + $0x2] sm:$0x3]  ;;  %v685_v58 = vld [vmem:[%s778_s29 + $0x4] sm:$0x3]  ;;  %v693_v0 = vld [vmem:[%s847_s4 + $0x7] ss:$0 sm:$0xff] }
  0x15   : > { %v385_v27 = vmul.f32 %v671_v2, %v344_v8  ;;  %v672_v28 = vrot.slane %v383_v20, 9  ;;  %v404_v29 = vunpack.c.l.bf16 %v401_v15  ;;  %v405_v30 = vunpack.c.l.bf16 %v402_v16  ;;  %v689_v53 = vld [vmem:[%s783_s9 + $0x2] sm:$0x3]  ;;  %v695_v1 = vld [vmem:[%s847_s4 + $0x8] ss:$0 sm:$0xff] }
  0x16   : > { %v372_v33 = vadd.f32 %v369_v21, %v352_v17  ;;  %v373_v34 = vadd.f32 %v370_v22, %v353_v18  ;;  %v374_v35 = vadd.f32 %v371_v23, %v354_v19  ;;  %v673_v36 = vrot.slane %v384_v24, 9  ;;  %v690_v6 = vld [vmem:[%s783_s9 + $0x4] sm:$0x3]  ;;  %v686_v11 = vld [vmem:[%s778_s29 + $0x6] sm:$0x3] }
  0x17   : > { %v674_v39 = vrot.slane %v385_v27, 9  ;;  %v406_v40 = vunpack.c.l.bf16 %v403_v25  ;;  %v415_v41 = vmul.f32 %v676_v26, %v404_v29  ;;  %v416_v42 = vmul.f32 %v676_v26, %v405_v30  ;;  %v691_v16 = vld [vmem:[%s783_s9 + $0x6] sm:$0x3]  ;;  %s707_s9 = smul.u32 12, %s852_s25 }
  0x18   : > { %v398_v44 = vadd.f32 %v672_v28, %v372_v33  ;;  %v399_v45 = vadd.f32 %v673_v36, %v373_v34  ;;  %v424_v46 = vunpack.c.l.bf16 %v421_v31  ;;  %v425_v47 = vunpack.c.l.bf16 %v422_v32  ;;  %v699_v33 = vld [vmem:[%s848_s5] ss:$0 sm:$0xff] }
  0x19   : > { %v400_v48 = vadd.f32 %v674_v39, %v374_v35  ;;  %v417_v49 = vmul.f32 %v676_v26, %v406_v40  ;;  %v426_v50 = vunpack.c.l.bf16 %v423_v37  ;;  %v449_v51 = vmul.f32 %v680_v38, %v404_v29  ;;  %v700_v39 = vld [vmem:[%s849_s6] ss:$0 sm:$0xff]  ;;  %s338_s20 = scalar_lea.vmem %s850_s7, %s707_s9 }
  0x1a   : > { %v418_v54 = vadd.f32 %v415_v41, %v398_v44  ;;  %v419_v55 = vadd.f32 %v416_v42, %v399_v45  ;;  %v435_v56 = vmul.f32 %v678_v43, %v424_v46  ;;  %v436_v57 = vmul.f32 %v678_v43, %v425_v47 }
  0x1b   : > { %v420_v59 = vadd.f32 %v417_v49, %v400_v48  ;;  %v437_v60 = vmul.f32 %v678_v43, %v426_v50  ;;  %v450_v61 = vmul.f32 %v680_v38, %v405_v30  ;;  %v451_v62 = vmul.f32 %v680_v38, %v406_v40 }
  0x1c   : > { %v438_v2 = vadd.f32 %v435_v56, %v418_v54  ;;  %v681_v3 = vrot.slane %v449_v51, 9  ;;  %v471_v4 = vunpack.c.l.bf16 %v684_v52  ;;  %v492_v5 = vunpack.c.l.bf16 %v689_v53 }
  0x1d   : > { %v682_v7 = vrot.slane %v450_v61, 9  ;;  %v683_v8 = vrot.slane %v451_v62, 9  ;;  %v439_v9 = vadd.f32 %v436_v57, %v419_v55  ;;  %v472_v10 = vunpack.c.l.bf16 %v685_v58 }
  0x1e   : > { %v464_v12 = vadd.f32 %v681_v3, %v438_v2  ;;  %v482_v13 = vmul.f32 %v688_v63, %v471_v4  ;;  %v503_v14 = vmul.f32 %v693_v0, %v492_v5  ;;  %v517_v15 = vmul.f32 %v695_v1, %v471_v4 }
  0x1f   : > { %v465_v17 = vadd.f32 %v682_v7, %v439_v9  ;;  %v483_v18 = vmul.f32 %v688_v63, %v472_v10  ;;  %v493_v19 = vunpack.c.l.bf16 %v690_v6  ;;  %v518_v20 = vmul.f32 %v695_v1, %v472_v10 }
  0x20   : > { %v485_v21 = vadd.f32 %v482_v13, %v464_v12  ;;  %v696_v22 = vrot.slane %v517_v15, 9  ;;  %v440_v23 = vadd.f32 %v437_v60, %v420_v59  ;;  %v473_v24 = vunpack.c.l.bf16 %v686_v11 }
  0x21   : > { %v486_v25 = vadd.f32 %v483_v18, %v465_v17  ;;  %v504_v26 = vmul.f32 %v693_v0, %v493_v19  ;;  %v697_v27 = vrot.slane %v518_v20, 9  ;;  %v494_v28 = vunpack.c.l.bf16 %v691_v16 }
  0x22   : > { %v506_v29 = vadd.f32 %v503_v14, %v485_v21  ;;  %v466_v30 = vadd.f32 %v683_v8, %v440_v23  ;;  %v484_v31 = vmul.f32 %v688_v63, %v473_v24  ;;  %v519_v32 = vmul.f32 %v695_v1, %v473_v24 }
  0x23   : > { %v507_v34 = vadd.f32 %v504_v26, %v486_v25  ;;  %v505_v35 = vmul.f32 %v693_v0, %v494_v28 }
  0x24   : > { %v532_v36 = vadd.f32 %v696_v22, %v506_v29  ;;  %v487_v37 = vadd.f32 %v484_v31, %v466_v30  ;;  %v698_v38 = vrot.slane %v519_v32, 9 }
  0x25   : > { %v533_v40 = vadd.f32 %v697_v27, %v507_v34 }
  0x26   : > { %v542_v41 = vmul.f32 %v699_v33, %v532_v36  ;;  %v508_v42 = vadd.f32 %v505_v35, %v487_v37 }
  0x27   : > { %v543_v43 = vmul.f32 %v699_v33, %v533_v40 }
  0x28   : > { %v552_v44 = vadd.f32 %v700_v39, %v542_v41  ;;  %v534_v45 = vadd.f32 %v698_v38, %v508_v42 }
  0x29   : > { %v553_v46 = vadd.f32 %v700_v39, %v543_v43 }
  0x2a   : > { %v555_v47 = vmax.f32 %v552_v44, 0.0  ;;  %v544_v48 = vmul.f32 %v699_v33, %v534_v45 }
  0x2b   : > { %v556_v49 = vmax.f32 %v553_v46, 0.0 }
  0x2c   : > { %559 = vst.msk [vmem:[%s338_s20] sm:$0x7] %vm558_vm0, %v555_v47  ;;  %v554_v50 = vadd.f32 %v700_v39, %v544_v48 }
  0x2d   : > { %560 = vst.msk [vmem:[%s338_s20 + $0x4] sm:$0x7] %vm558_vm0, %v556_v49 }
  0x2e   : > { %v557_v51 = vmax.f32 %v554_v50, 0.0 }
  0x30   : > { %561 = vst.msk [vmem:[%s338_s20 + $0x8] sm:$0x7] %vm558_vm0, %v557_v51 }
  0x31 PF: > { %s17_s24 = sadd.s32 1, %s722_s24  }
  0x32   : > { %p14_p4 = scmp.ge.s32.totalorder %s17_s24, 4  }
  0x34   :  { %16 = sbr.rel (!%p14_p4) target bundleno = 1 (0x1), region = 97 }

// kernel: squeeze_body_edge_high_forward.7
= control target key start
LH: loop header
LB: loop body
LE: loop exit
PB: predicated region body
PF: predicated region fallthrough
CT: control target
= control target key end

     0   :  { %s2751_s15 = smov 0   ;;  %s2753_s16 = smov 0   ;;  %s4047_s0 = inlined_call_operand.vmem [shape: bf16[512,4], index: 0, kind: input, shape index: {}]   ;;  %s4048_s1 = inlined_call_operand.vmem [shape: bf16[4,512,4], index: 1, kind: input, shape index: {}]   ;;  %s4049_s2 = inlined_call_operand.vmem [shape: f32[512,4], index: 2, kind: input, shape index: {}]   ;;  %s4050_s3 = inlined_call_operand.vmem [shape: f32[512,4], index: 3, kind: output, shape index: {0}]   ;;  %s4051_s4 = inlined_call_operand.vmem [shape: f32[512,4], index: 4, kind: output, shape index: {1}]  }
   0x1   :  { %s2755_s17 = smov 0  }
   0x2 LB: > { %s2148_s18 = sadd.s32 4294967295, %s2720_s17   ;;  %s2768_s19 = sadd.s32 1, %s2720_s17   ;;  %s2720_s17 = sphi %s2755_s17, %s4227_s17   ;;  %s2716_s16 = sphi %s2753_s16, %s4226_s16   ;;  %s2712_s15 = sphi %s2751_s15, %s4225_s15  }
   0x3   : > { %s45_s20 = ssub.s32 %s2720_s17, %s2768_s19  ;;  %s48_s21 = sadd.s32 1, %s2716_s16 }
   0x4   : > { %p46_p0 = scmp.eq.s32.totalorder %s45_s20, 0  ;;  %p55_p1 = scmp.ne.s32.totalorder %s2716_s16, %s2712_s15 }
   0x5   : > { %p56_p2 = scmp.eq.s32.totalorder %s2720_s17, 0  ;;  %p2151_p4 = scmp.ge.s32.totalorder %s2720_s17, 2 }
   0x6   : > { %s2777_s22 = scalar_select %p46_p0, %s2716_s16, %s48_s21  }
   0x7   : > { %p57_p3 = por %p56_p2, %p55_p1  ;;  %159 = sbr.rel (%p2151_p4) target bundleno = 50 (0x32), region = 16 }
   0xe   : > { %171 = sbr.rel (!%p57_p3) target bundleno = 50 (0x32), region = 24  ;;  %s173_s23 = sand.u32 (%p57_p3), 1, %s2716_s16  }
   0xf   : > { %s2263_s24 = sshll.u32 (%p57_p3), %s2720_s17, 7  ;;  %s2152_s25 = sshll.u32 (%p57_p3), %s173_s23, 9 }
  0x10   : > { %s2785_s28 = scalar_lea.vmem (%p57_p3), %s4048_s1, %s2263_s24  ;;  %s2790_s29 = scalar_lea.vmem (%p57_p3), [#allocation2], %s2152_s25 }
  0x11   : > { %v194_v0 = vld [vmem:[%s2785_s28] sm:$0xff] (%p57_p3)   ;;  %v198_v1 = vld [vmem:[%s2785_s28 + $0x8] sm:$0xff] (%p57_p3)   ;;  %v202_v2 = vld [vmem:[%s2785_s28 + $0x10] sm:$0xff] (%p57_p3)  }
  0x12   : > { %195 = vst [vmem:[%s2790_s29] sm:$0xff] (%p57_p3), %v194_v0   ;;  %199 = vst [vmem:[%s2790_s29 + $0x8] sm:$0xff] (%p57_p3), %v198_v1   ;;  %v206_v3 = vld [vmem:[%s2785_s28 + $0x18] sm:$0xff] (%p57_p3)   ;;  %v210_v4 = vld [vmem:[%s2785_s28 + $0x20] sm:$0xff] (%p57_p3)  }
  0x13   : > { %203 = vst [vmem:[%s2790_s29 + $0x10] sm:$0xff] (%p57_p3), %v202_v2   ;;  %v214_v5 = vld [vmem:[%s2785_s28 + $0x28] sm:$0xff] (%p57_p3)   ;;  %207 = vst [vmem:[%s2790_s29 + $0x18] sm:$0xff] (%p57_p3), %v206_v3   ;;  %v218_v6 = vld [vmem:[%s2785_s28 + $0x30] sm:$0xff] (%p57_p3)  }
  0x14   : > { %211 = vst [vmem:[%s2790_s29 + $0x20] sm:$0xff] (%p57_p3), %v210_v4   ;;  %215 = vst [vmem:[%s2790_s29 + $0x28] sm:$0xff] (%p57_p3), %v214_v5   ;;  %v222_v7 = vld [vmem:[%s2785_s28 + $0x38] sm:$0xff] (%p57_p3)   ;;  %v226_v8 = vld [vmem:[%s2785_s28 + $0x40] sm:$0xff] (%p57_p3)  }
  0x15   : > { %219 = vst [vmem:[%s2790_s29 + $0x30] sm:$0xff] %v218_v6   ;;  %223 = vst [vmem:[%s2790_s29 + $0x38] sm:$0xff] %v222_v7   ;;  %v230_v9 = vld [vmem:[%s2785_s28 + $0x48] sm:$0xff]   ;;  %v234_v10 = vld [vmem:[%s2785_s28 + $0x50] sm:$0xff]  }
  0x16   : > { %227 = vst [vmem:[%s2790_s29 + $0x40] sm:$0xff] %v226_v8   ;;  %v238_v11 = vld [vmem:[%s2785_s28 + $0x58] sm:$0xff]   ;;  %231 = vst [vmem:[%s2790_s29 + $0x48] sm:$0xff] %v230_v9   ;;  %v242_v12 = vld [vmem:[%s2785_s28 + $0x60] sm:$0xff]  }
  0x17   : > { %235 = vst [vmem:[%s2790_s29 + $0x50] sm:$0xff] %v234_v10   ;;  %239 = vst [vmem:[%s2790_s29 + $0x58] sm:$0xff] %v238_v11   ;;  %v246_v13 = vld [vmem:[%s2785_s28 + $0x68] sm:$0xff]   ;;  %v250_v14 = vld [vmem:[%s2785_s28 + $0x70] sm:$0xff]  }
  0x18   : > { %243 = vst [vmem:[%s2790_s29 + $0x60] sm:$0xff] %v242_v12   ;;  %247 = vst [vmem:[%s2790_s29 + $0x68] sm:$0xff] %v246_v13   ;;  %v254_v15 = vld [vmem:[%s2785_s28 + $0x78] sm:$0xff]   ;;  %v258_v16 = vld [vmem:[%s2785_s28 + $0x100] sm:$0xff]  }
  0x19   : > { %251 = vst [vmem:[%s2790_s29 + $0x70] sm:$0xff] %v250_v14   ;;  %v262_v17 = vld [vmem:[%s2785_s28 + $0x108] sm:$0xff]   ;;  %255 = vst [vmem:[%s2790_s29 + $0x78] sm:$0xff] %v254_v15   ;;  %v266_v18 = vld [vmem:[%s2785_s28 + $0x110] sm:$0xff]  }
  0x1a   : > { %259 = vst [vmem:[%s2790_s29 + $0x80] sm:$0xff] %v258_v16   ;;  %263 = vst [vmem:[%s2790_s29 + $0x88] sm:$0xff] %v262_v17   ;;  %v270_v19 = vld [vmem:[%s2785_s28 + $0x118] sm:$0xff]   ;;  %v274_v20 = vld [vmem:[%s2785_s28 + $0x120] sm:$0xff]  }
  0x1b   : > { %267 = vst [vmem:[%s2790_s29 + $0x90] sm:$0xff] %v266_v18   ;;  %271 = vst [vmem:[%s2790_s29 + $0x98] sm:$0xff] %v270_v19   ;;  %v278_v21 = vld [vmem:[%s2785_s28 + $0x128] sm:$0xff]   ;;  %v282_v22 = vld [vmem:[%s2785_s28 + $0x130] sm:$0xff]  }
  0x1c   : > { %275 = vst [vmem:[%s2790_s29 + $0xa0] sm:$0xff] %v274_v20   ;;  %v286_v23 = vld [vmem:[%s2785_s28 + $0x138] sm:$0xff]   ;;  %279 = vst [vmem:[%s2790_s29 + $0xa8] sm:$0xff] %v278_v21   ;;  %v290_v24 = vld [vmem:[%s2785_s28 + $0x140] sm:$0xff]  }
  0x1d   : > { %283 = vst [vmem:[%s2790_s29 + $0xb0] sm:$0xff] %v282_v22   ;;  %287 = vst [vmem:[%s2790_s29 + $0xb8] sm:$0xff] %v286_v23   ;;  %v294_v25 = vld [vmem:[%s2785_s28 + $0x148] sm:$0xff]   ;;  %v298_v26 = vld [vmem:[%s2785_s28 + $0x150] sm:$0xff]  }
  0x1e   : > { %291 = vst [vmem:[%s2790_s29 + $0xc0] sm:$0xff] %v290_v24   ;;  %295 = vst [vmem:[%s2790_s29 + $0xc8] sm:$0xff] %v294_v25   ;;  %v302_v27 = vld [vmem:[%s2785_s28 + $0x158] sm:$0xff]   ;;  %v306_v28 = vld [vmem:[%s2785_s28 + $0x160] sm:$0xff]  }
  0x1f   : > { %299 = vst [vmem:[%s2790_s29 + $0xd0] sm:$0xff] %v298_v26   ;;  %v310_v29 = vld [vmem:[%s2785_s28 + $0x168] sm:$0xff]   ;;  %303 = vst [vmem:[%s2790_s29 + $0xd8] sm:$0xff] %v302_v27   ;;  %v314_v30 = vld [vmem:[%s2785_s28 + $0x170] sm:$0xff]  }
  0x20   : > { %307 = vst [vmem:[%s2790_s29 + $0xe0] sm:$0xff] %v306_v28   ;;  %311 = vst [vmem:[%s2790_s29 + $0xe8] sm:$0xff] %v310_v29   ;;  %v318_v31 = vld [vmem:[%s2785_s28 + $0x178] sm:$0xff]   ;;  %v322_v32 = vld [vmem:[%s2785_s28 + $0x200] sm:$0xff]  }
  0x21   : > { %315 = vst [vmem:[%s2790_s29 + $0xf0] sm:$0xff] %v314_v30   ;;  %319 = vst [vmem:[%s2790_s29 + $0xf8] sm:$0xff] %v318_v31   ;;  %v326_v33 = vld [vmem:[%s2785_s28 + $0x208] sm:$0xff]   ;;  %v330_v34 = vld [vmem:[%s2785_s28 + $0x210] sm:$0xff]  }
  0x22   : > { %323 = vst [vmem:[%s2790_s29 + $0x100] sm:$0xff] %v322_v32   ;;  %v334_v35 = vld [vmem:[%s2785_s28 + $0x218] sm:$0xff]   ;;  %327 = vst [vmem:[%s2790_s29 + $0x108] sm:$0xff] %v326_v33   ;;  %v338_v36 = vld [vmem:[%s2785_s28 + $0x220] sm:$0xff]  }
  0x23   : > { %331 = vst [vmem:[%s2790_s29 + $0x110] sm:$0xff] %v330_v34   ;;  %335 = vst [vmem:[%s2790_s29 + $0x118] sm:$0xff] %v334_v35   ;;  %v342_v37 = vld [vmem:[%s2785_s28 + $0x228] sm:$0xff]   ;;  %v346_v38 = vld [vmem:[%s2785_s28 + $0x230] sm:$0xff]  }
  0x24   : > { %339 = vst [vmem:[%s2790_s29 + $0x120] sm:$0xff] %v338_v36   ;;  %343 = vst [vmem:[%s2790_s29 + $0x128] sm:$0xff] %v342_v37   ;;  %v350_v39 = vld [vmem:[%s2785_s28 + $0x238] sm:$0xff]   ;;  %v354_v40 = vld [vmem:[%s2785_s28 + $0x240] sm:$0xff]  }
  0x25   : > { %347 = vst [vmem:[%s2790_s29 + $0x130] sm:$0xff] %v346_v38   ;;  %v358_v41 = vld [vmem:[%s2785_s28 + $0x248] sm:$0xff]   ;;  %351 = vst [vmem:[%s2790_s29 + $0x138] sm:$0xff] %v350_v39   ;;  %v362_v42 = vld [vmem:[%s2785_s28 + $0x250] sm:$0xff]  }
  0x26   : > { %355 = vst [vmem:[%s2790_s29 + $0x140] sm:$0xff] %v354_v40   ;;  %359 = vst [vmem:[%s2790_s29 + $0x148] sm:$0xff] %v358_v41   ;;  %v366_v43 = vld [vmem:[%s2785_s28 + $0x258] sm:$0xff]   ;;  %v370_v44 = vld [vmem:[%s2785_s28 + $0x260] sm:$0xff]  }
  0x27   : > { %363 = vst [vmem:[%s2790_s29 + $0x150] sm:$0xff] %v362_v42   ;;  %367 = vst [vmem:[%s2790_s29 + $0x158] sm:$0xff] %v366_v43   ;;  %v374_v45 = vld [vmem:[%s2785_s28 + $0x268] sm:$0xff]   ;;  %v378_v46 = vld [vmem:[%s2785_s28 + $0x270] sm:$0xff]  }
  0x28   : > { %371 = vst [vmem:[%s2790_s29 + $0x160] sm:$0xff] %v370_v44   ;;  %v382_v47 = vld [vmem:[%s2785_s28 + $0x278] sm:$0xff]   ;;  %375 = vst [vmem:[%s2790_s29 + $0x168] sm:$0xff] %v374_v45   ;;  %v386_v48 = vld [vmem:[%s2785_s28 + $0x300] sm:$0xff]  }
  0x29   : > { %379 = vst [vmem:[%s2790_s29 + $0x170] sm:$0xff] %v378_v46   ;;  %383 = vst [vmem:[%s2790_s29 + $0x178] sm:$0xff] %v382_v47   ;;  %v390_v49 = vld [vmem:[%s2785_s28 + $0x308] sm:$0xff]   ;;  %v394_v50 = vld [vmem:[%s2785_s28 + $0x310] sm:$0xff]  }
  0x2a   : > { %387 = vst [vmem:[%s2790_s29 + $0x180] sm:$0xff] %v386_v48   ;;  %391 = vst [vmem:[%s2790_s29 + $0x188] sm:$0xff] %v390_v49   ;;  %v398_v51 = vld [vmem:[%s2785_s28 + $0x318] sm:$0xff]   ;;  %v402_v52 = vld [vmem:[%s2785_s28 + $0x320] sm:$0xff]  }
  0x2b   : > { %395 = vst [vmem:[%s2790_s29 + $0x190] sm:$0xff] %v394_v50   ;;  %v406_v53 = vld [vmem:[%s2785_s28 + $0x328] sm:$0xff]   ;;  %399 = vst [vmem:[%s2790_s29 + $0x198] sm:$0xff] %v398_v51   ;;  %v410_v54 = vld [vmem:[%s2785_s28 + $0x330] sm:$0xff]  }
  0x2c   : > { %403 = vst [vmem:[%s2790_s29 + $0x1a0] sm:$0xff] %v402_v52   ;;  %407 = vst [vmem:[%s2790_s29 + $0x1a8] sm:$0xff] %v406_v53   ;;  %v414_v55 = vld [vmem:[%s2785_s28 + $0x338] sm:$0xff]   ;;  %v418_v56 = vld [vmem:[%s2785_s28 + $0x340] sm:$0xff]  }
  0x2d   : > { %411 = vst [vmem:[%s2790_s29 + $0x1b0] sm:$0xff] %v410_v54   ;;  %415 = vst [vmem:[%s2790_s29 + $0x1b8] sm:$0xff] %v414_v55   ;;  %v422_v57 = vld [vmem:[%s2785_s28 + $0x348] sm:$0xff]   ;;  %v426_v58 = vld [vmem:[%s2785_s28 + $0x350] sm:$0xff]  }
  0x2e   : > { %419 = vst [vmem:[%s2790_s29 + $0x1c0] sm:$0xff] %v418_v56   ;;  %v430_v59 = vld [vmem:[%s2785_s28 + $0x358] sm:$0xff]   ;;  %423 = vst [vmem:[%s2790_s29 + $0x1c8] sm:$0xff] %v422_v57   ;;  %v434_v60 = vld [vmem:[%s2785_s28 + $0x360] sm:$0xff]  }
  0x2f   : > { %427 = vst [vmem:[%s2790_s29 + $0x1d0] sm:$0xff] %v426_v58   ;;  %431 = vst [vmem:[%s2790_s29 + $0x1d8] sm:$0xff] %v430_v59   ;;  %v438_v61 = vld [vmem:[%s2785_s28 + $0x368] sm:$0xff]   ;;  %v442_v62 = vld [vmem:[%s2785_s28 + $0x370] sm:$0xff]  }
  0x30   : > { %435 = vst [vmem:[%s2790_s29 + $0x1e0] sm:$0xff] %v434_v60   ;;  %439 = vst [vmem:[%s2790_s29 + $0x1e8] sm:$0xff] %v438_v61   ;;  %v446_v63 = vld [vmem:[%s2785_s28 + $0x378] sm:$0xff]  }
  0x31   : > { %443 = vst [vmem:[%s2790_s29 + $0x1f0] sm:$0xff] %v442_v62   ;;  %447 = vst [vmem:[%s2790_s29 + $0x1f8] sm:$0xff] %v446_v63  }
  0x32 PF: > { %p2155_p5 = scmp.ge.s32.totalorder %s2720_s17, 1  ;;  %p736_p6 = scmp.lt.s32.totalorder %s2720_s17, 3 }
  0x34   : > { %p737_p7 = pnand %p2155_p5, %p736_p6 }
  0x36   : > { %740 = sbr.rel (%p737_p7) target bundleno = 462 (0x1ce), region = 69 }
  0x3d   : > { %s2157_s30 = sshll.u32 %s2148_s18, 5  ;;  %v2722_v0 = vmov 0   ;;  %v2723_v33 = vmov 1   ;;  %v2724_v36 = vmov 2   ;;  %s743_s9 = sand.u32 1, %s2712_s15   ;;  %vm1867_vm0 = vcmask 31744  }
  0x3e   : > { %2691 = vset.pattern.permute.xlu1 %v2722_v0  ;;  %2690 = vset.pattern.permute.xlu0 %v2722_v0  ;;  %p784_p8 = scmp.lt.s32.totalorder %s2157_s30, 63  ;;  %s2156_s10 = sshll.u32 %s743_s9, 9 }
  0x3f   : > { %s3265_s11 = scalar_lea.vmem [#allocation2], %s2156_s10 }
  0x40   : > { %s4229_s30 = smov (!%p784_p8, %s2157_s30), 63 }
  0x41   : > { %s2924_s5 = sshll.u32 %s4229_s30, 3  ;;  %s2158_s12 = sshll.u32 %s4229_s30, 2 }
  0x42   : > { %s2930_s8 = scalar_lea.vmem %s4049_s2, %s2924_s5  ;;  %s3586_s15 = scalar_lea.vmem %s4047_s0, %s2158_s12 }
  0x43   : > { %v2933_v1 = vld [vmem:[%s2930_s8 + $0x10] sm:$0xff]  ;;  %v2936_v2 = vld [vmem:[%s2930_s8] sm:$0xff]  ;;  %v2941_v3 = vld [vmem:[%s2930_s8 + $0x18] sm:$0xff]  ;;  %s3640_s20 = scalar_lea.vmem %s4051_s4, %s2924_s5  ;;  %s3653_s24 = scalar_lea.vmem %s4050_s3, %s2924_s5 }
  0x44   : > { %916 = vperm.xlu1 %2691, %v2933_v1   ;;  %906 = vperm.xlu0 %2690, %v2936_v2   ;;  %v2944_v4 = vld [vmem:[%s2930_s8 + $0x8] sm:$0xff]  ;;  %v2952_v6 = vld [vmem:[%s2930_s8 + $0x20] sm:$0xff]  ;;  %v2957_v7 = vld [vmem:[%s2930_s8 + $0x38] sm:$0xff] }
  0x45   : > { %v2949_v5 = vld [vmem:[%s2930_s8 + $0x28] sm:$0xff]  ;;  %v2960_v8 = vld [vmem:[%s2930_s8 + $0x30] sm:$0xff]  ;;  %v2968_v10 = vld [vmem:[%s2930_s8 + $0x40] sm:$0xff] }
  0x46   : > { %v2965_v9 = vld [vmem:[%s2930_s8 + $0x48] sm:$0xff]  ;;  %v2973_v11 = vld [vmem:[%s2930_s8 + $0x58] sm:$0xff]  ;;  %v2976_v12 = vld [vmem:[%s2930_s8 + $0x50] sm:$0xff] }
  0x47   : > { %v2981_v13 = vld [vmem:[%s2930_s8 + $0x68] sm:$0xff]  ;;  %v2984_v14 = vld [vmem:[%s2930_s8 + $0x60] sm:$0xff]  ;;  %v2989_v15 = vld [vmem:[%s2930_s8 + $0x78] sm:$0xff] }
  0x48   : > { %921 = vperm.xlu1 %2691, %v2941_v3   ;;  %911 = vperm.xlu0 %2690, %v2944_v4   ;;  %v2992_v16 = vld [vmem:[%s2930_s8 + $0x70] sm:$0xff]  ;;  %v2997_v17 = vld [vmem:[%s2930_s8 + $0x88] sm:$0xff]  ;;  %v3000_v18 = vld [vmem:[%s2930_s8 + $0x80] sm:$0xff] }
  0x49   : > { %v3005_v19 = vld [vmem:[%s2930_s8 + $0x98] sm:$0xff]  ;;  %v3008_v20 = vld [vmem:[%s2930_s8 + $0x90] sm:$0xff]  ;;  %v3013_v21 = vld [vmem:[%s2930_s8 + $0xa8] sm:$0xff] }
  0x4a   : > { %v3016_v22 = vld [vmem:[%s2930_s8 + $0xa0] sm:$0xff]  ;;  %v3021_v23 = vld [vmem:[%s2930_s8 + $0xb8] sm:$0xff]  ;;  %v3024_v24 = vld [vmem:[%s2930_s8 + $0xb0] sm:$0xff] }
  0x4b   : > { %v3029_v25 = vld [vmem:[%s2930_s8 + $0xc8] sm:$0xff]  ;;  %v3032_v26 = vld [vmem:[%s2930_s8 + $0xc0] sm:$0xff]  ;;  %v3037_v27 = vld [vmem:[%s2930_s8 + $0xd8] sm:$0xff] }
  0x4c   : > { %931 = vperm.xlu1 %2691, %v2949_v5   ;;  %926 = vperm.xlu0 %2690, %v2952_v6   ;;  %v3040_v28 = vld [vmem:[%s2930_s8 + $0xd0] sm:$0xff]  ;;  %v3045_v29 = vld [vmem:[%s2930_s8 + $0xe8] sm:$0xff]  ;;  %v3048_v30 = vld [vmem:[%s2930_s8 + $0xe0] sm:$0xff] }
  0x4d   : > { %v3053_v31 = vld [vmem:[%s2930_s8 + $0xf8] sm:$0xff]  ;;  %v3056_v32 = vld [vmem:[%s2930_s8 + $0xf0] sm:$0xff] }
  0x50   : > { %941 = vperm.xlu1 %2691, %v2957_v7   ;;  %936 = vperm.xlu0 %2690, %v2960_v8  }
  0x54   : > { %951 = vperm.xlu1 %2691, %v2965_v9   ;;  %946 = vperm.xlu0 %2690, %v2968_v10  }
  0x58   : > { %961 = vperm.xlu1 %2691, %v2973_v11   ;;  %956 = vperm.xlu0 %2690, %v2976_v12  }
  0x5c   : > { %971 = vperm.xlu1 %2691, %v2981_v13   ;;  %966 = vperm.xlu0 %2690, %v2984_v14  }
  0x60   : > { %981 = vperm.xlu1 %2691, %v2989_v15   ;;  %976 = vperm.xlu0 %2690, %v2992_v16  }
  0x64   : > { %991 = vperm.xlu1 %2691, %v2997_v17   ;;  %986 = vperm.xlu0 %2690, %v3000_v18  }
  0x68   : > { %1001 = vperm.xlu1 %2691, %v3005_v19   ;;  %996 = vperm.xlu0 %2690, %v3008_v20  }
  0x6c   : > { %1011 = vperm.xlu1 %2691, %v3013_v21   ;;  %1006 = vperm.xlu0 %2690, %v3016_v22  }
  0x70   : > { %1021 = vperm.xlu1 %2691, %v3021_v23   ;;  %1016 = vperm.xlu0 %2690, %v3024_v24  }
  0x74   : > { %1031 = vperm.xlu1 %2691, %v3029_v25   ;;  %1026 = vperm.xlu0 %2690, %v3032_v26  }
  0x78   : > { %1041 = vperm.xlu1 %2691, %v3037_v27   ;;  %1036 = vperm.xlu0 %2690, %v3040_v28  }
  0x7c   : > { %1051 = vperm.xlu1 %2691, %v3045_v29   ;;  %1046 = vperm.xlu0 %2690, %v3048_v30  }
  0x80   : > { %1061 = vperm.xlu1 %2691, %v3053_v31   ;;  %1056 = vperm.xlu0 %2690, %v3056_v32  }
  0x84   : > { %2693 = vset.pattern.permute.xlu1 %v2723_v33  ;;  %2692 = vset.pattern.permute.xlu0 %v2723_v33 }
  0x85   : > { %1166 = vperm.xlu1 %2693, %v2944_v4   ;;  %1162 = vperm.xlu0 %2692, %v2936_v2  }
  0x89   : > { %1170 = vperm.xlu1 %2693, %v2933_v1   ;;  %1174 = vperm.xlu0 %2692, %v2941_v3  }
  0x8d   : > { %1178 = vperm.xlu1 %2693, %v2952_v6   ;;  %1182 = vperm.xlu0 %2692, %v2949_v5  }
  0x91   : > { %1186 = vperm.xlu1 %2693, %v2960_v8   ;;  %1190 = vperm.xlu0 %2692, %v2957_v7  }
  0x95   : > { %1194 = vperm.xlu1 %2693, %v2968_v10   ;;  %1198 = vperm.xlu0 %2692, %v2965_v9  }
  0x99   : > { %1202 = vperm.xlu1 %2693, %v2976_v12   ;;  %1206 = vperm.xlu0 %2692, %v2973_v11  }
  0x9d   : > { %1210 = vperm.xlu1 %2693, %v2984_v14   ;;  %1214 = vperm.xlu0 %2692, %v2981_v13  }
  0xa1   : > { %1218 = vperm.xlu1 %2693, %v2992_v16   ;;  %1222 = vperm.xlu0 %2692, %v2989_v15  }
  0xa5   : > { %1226 = vperm.xlu1 %2693, %v3000_v18   ;;  %1230 = vperm.xlu0 %2692, %v2997_v17  }
  0xa9   : > { %1234 = vperm.xlu1 %2693, %v3008_v20   ;;  %1238 = vperm.xlu0 %2692, %v3005_v19  }
  0xad   : > { %1242 = vperm.xlu1 %2693, %v3016_v22   ;;  %1246 = vperm.xlu0 %2692, %v3013_v21  }
  0xb1   : > { %1250 = vperm.xlu1 %2693, %v3024_v24   ;;  %1254 = vperm.xlu0 %2692, %v3021_v23  }
  0xb5   : > { %1258 = vperm.xlu1 %2693, %v3032_v26   ;;  %1262 = vperm.xlu0 %2692, %v3029_v25  }
  0xb9   : > { %1266 = vperm.xlu1 %2693, %v3040_v28   ;;  %1270 = vperm.xlu0 %2692, %v3037_v27  }
  0xbd   : > { %1274 = vperm.xlu1 %2693, %v3048_v30   ;;  %1278 = vperm.xlu0 %2692, %v3045_v29  }
  0xc1   : > { %1282 = vperm.xlu1 %2693, %v3056_v32   ;;  %1286 = vperm.xlu0 %2692, %v3053_v31  }
  0xc3   : > { %v3092_v34 = vpop.permute.xlu1 %916  ;;  %v3094_v35 = vpop.permute.xlu0 %906 }
  0xc5   : > { %2694 = vset.pattern.permute.xlu1 %v2724_v36  ;;  %2695 = vset.pattern.permute.xlu0 %v2724_v36 }
  0xc6   : > { %1419 = vperm.xlu1 %2694, %v2936_v2   ;;  %1423 = vperm.xlu0 %2695, %v2944_v4  }
  0xc7   : > { %v3098_v37 = vpop.permute.xlu1 %921  ;;  %v3100_v38 = vpop.permute.xlu0 %911 }
  0xc8   : > { %4066 = vst [vmem:[#allocation3_spill] sm:$0xff] %v3098_v37 }
  0xca   : > { %1427 = vperm.xlu1 %2694, %v2933_v1   ;;  %1435 = vperm.xlu0 %2695, %v2952_v6  }
  0xcb   : > { %v3104_v39 = vpop.permute.xlu1 %931  ;;  %v3106_v40 = vpop.permute.xlu0 %926 }
  0xcc   : > { %4067 = vst [vmem:[#allocation4_spill] sm:$0xff] %v3104_v39  ;;  %v3357_v39 = vld [vmem:[%s3265_s11 + $0x118] sm:$0xff]  }
  0xce   : > { %1431 = vperm.xlu1 %2694, %v2941_v3   ;;  %1443 = vperm.xlu0 %2695, %v2960_v8  }
  0xcf   : > { %v3110_v41 = vpop.permute.xlu1 %941  ;;  %v3112_v42 = vpop.permute.xlu0 %936 }
  0xd0   : > { %4068 = vst [vmem:[#allocation5_spill] sm:$0xff] %v3110_v41 }
  0xd2   : > { %1439 = vperm.xlu1 %2694, %v2949_v5   ;;  %1451 = vperm.xlu0 %2695, %v2968_v10  }
  0xd3   : > { %v3116_v43 = vpop.permute.xlu1 %951  ;;  %v3118_v44 = vpop.permute.xlu0 %946 }
  0xd4   : > { %4069 = vst [vmem:[#allocation6_spill] sm:$0xff] %v3116_v43 }
  0xd6   : > { %1447 = vperm.xlu1 %2694, %v2957_v7   ;;  %1459 = vperm.xlu0 %2695, %v2976_v12  }
  0xd7   : > { %v3122_v45 = vpop.permute.xlu1 %961  ;;  %v3124_v46 = vpop.permute.xlu0 %956 }
  0xd8   : > { %4070 = vst [vmem:[#allocation7_spill] sm:$0xff] %v3122_v45 }
  0xda   : > { %1455 = vperm.xlu1 %2694, %v2965_v9   ;;  %1467 = vperm.xlu0 %2695, %v2984_v14  }
  0xdb   : > { %v3128_v47 = vpop.permute.xlu1 %971  ;;  %v3130_v48 = vpop.permute.xlu0 %966 }
  0xdc   : > { %4071 = vst [vmem:[#allocation8_spill] sm:$0xff] %v3128_v47  ;;  %v3302_v47 = vld [vmem:[%s3265_s11 + $0x88] sm:$0xff]  }
  0xde   : > { %1463 = vperm.xlu1 %2694, %v2973_v11   ;;  %1475 = vperm.xlu0 %2695, %v2992_v16  }
  0xdf   : > { %v3134_v49 = vpop.permute.xlu1 %981  ;;  %v3136_v50 = vpop.permute.xlu0 %976 }
  0xe0   : > { %4072 = vst [vmem:[#allocation9_spill] sm:$0xff] %v3134_v49 }
  0xe2   : > { %1471 = vperm.xlu1 %2694, %v2981_v13   ;;  %1483 = vperm.xlu0 %2695, %v3000_v18  }
  0xe3   : > { %v3140_v51 = vpop.permute.xlu1 %991  ;;  %v3142_v52 = vpop.permute.xlu0 %986 }
  0xe4   : > { %4073 = vst [vmem:[#allocation10_spill] sm:$0xff] %v3140_v51 }
  0xe6   : > { %1479 = vperm.xlu1 %2694, %v2989_v15   ;;  %1491 = vperm.xlu0 %2695, %v3008_v20  }
  0xe7   : > { %v3146_v53 = vpop.permute.xlu1 %1001  ;;  %v3148_v54 = vpop.permute.xlu0 %996 }
  0xe8   : > { %4074 = vst [vmem:[#allocation11_spill] sm:$0xff] %v3146_v53 }
  0xea   : > { %1487 = vperm.xlu1 %2694, %v2997_v17   ;;  %1499 = vperm.xlu0 %2695, %v3016_v22  }
  0xeb   : > { %v3152_v55 = vpop.permute.xlu1 %1011  ;;  %v3154_v56 = vpop.permute.xlu0 %1006 }
  0xec   : > { %4075 = vst [vmem:[#allocation12_spill] sm:$0xff] %v3152_v55 }
  0xee   : > { %1495 = vperm.xlu1 %2694, %v3005_v19   ;;  %1507 = vperm.xlu0 %2695, %v3024_v24  }
  0xef   : > { %v3158_v57 = vpop.permute.xlu1 %1021  ;;  %v3160_v58 = vpop.permute.xlu0 %1016 }
  0xf0   : > { %4076 = vst [vmem:[#allocation13_spill] sm:$0xff] %v3158_v57 }
  0xf2   : > { %1503 = vperm.xlu1 %2694, %v3013_v21   ;;  %1515 = vperm.xlu0 %2695, %v3032_v26  }
  0xf3   : > { %v3164_v59 = vpop.permute.xlu1 %1031  ;;  %v3166_v60 = vpop.permute.xlu0 %1026 }
  0xf4   : > { %4077 = vst [vmem:[#allocation14_spill] sm:$0xff] %v3164_v59 }
  0xf6   : > { %1511 = vperm.xlu1 %2694, %v3021_v23   ;;  %1523 = vperm.xlu0 %2695, %v3040_v28  }
  0xf7   : > { %v3170_v61 = vpop.permute.xlu1 %1041  ;;  %v3172_v62 = vpop.permute.xlu0 %1036 }
  0xf8   : > { %4078 = vst [vmem:[#allocation15_spill] sm:$0xff] %v3170_v61  ;;  %v2725_v61 = vmov 3  }
  0xfa   : > { %1519 = vperm.xlu1 %2694, %v3029_v25   ;;  %1531 = vperm.xlu0 %2695, %v3048_v30  }
  0xfb   : > { %v3176_v63 = vpop.permute.xlu1 %1051  ;;  %v3178_v0 = vpop.permute.xlu0 %1046 }
  0xfc   : > { %4079 = vst [vmem:[#allocation16_spill] sm:$0xff] %v3176_v63 }
  0xfe   : > { %1527 = vperm.xlu1 %2694, %v3037_v27   ;;  %1539 = vperm.xlu0 %2695, %v3056_v32  }
  0xff   : > { %v3182_v33 = vpop.permute.xlu1 %1061  ;;  %v3184_v36 = vpop.permute.xlu0 %1056 }
 0x100   : > { %4080 = vst [vmem:[#allocation17_spill] sm:$0xff] %v3182_v33 }
 0x102   : > { %1535 = vperm.xlu1 %2694, %v3045_v29   ;;  %2696 = vset.pattern.permute.xlu0 %v2725_v61 }
 0x103   : > { %1676 = vperm.xlu0 %2696, %v2936_v2  }
 0x104   : > { %v3188_v59 = vpop.permute.xlu1 %1166  ;;  %v3190_v57 = vpop.permute.xlu0 %1162 }
 0x106   : > { %1543 = vperm.xlu1 %2694, %v3053_v31  }
 0x107   : > { %1688 = vperm.xlu0 %2696, %v2941_v3  }
 0x108   : > { %v3194_v63 = vpop.permute.xlu1 %1170  ;;  %v3196_v55 = vpop.permute.xlu0 %1174 }
 0x10a   : > { %2697 = vset.pattern.permute.xlu1 %v2725_v61 }
 0x10b   : > { %1680 = vperm.xlu1 %2697, %v2944_v4   ;;  %1696 = vperm.xlu0 %2696, %v2949_v5  }
 0x10c   : > { %v3200_v33 = vpop.permute.xlu1 %1178  ;;  %v3202_v2 = vpop.permute.xlu0 %1182 }
 0x10d   : > { %4081 = vst [vmem:[#allocation18_spill] sm:$0xff] %v3202_v2  ;;  %v3353_v2 = vld [vmem:[%s3265_s11 + $0xa0] sm:$0xff]  }
 0x10f   : > { %1684 = vperm.xlu1 %2697, %v2933_v1   ;;  %1704 = vperm.xlu0 %2696, %v2957_v7  }
 0x110   : > { %v3206_v53 = vpop.permute.xlu1 %1186  ;;  %v3208_v3 = vpop.permute.xlu0 %1190 }
 0x111   : > { %4082 = vst [vmem:[#allocation19_spill] sm:$0xff] %v3208_v3 }
 0x113   : > { %1692 = vperm.xlu1 %2697, %v2952_v6   ;;  %1712 = vperm.xlu0 %2696, %v2965_v9  }
 0x114   : > { %v3212_v61 = vpop.permute.xlu1 %1194  ;;  %v3214_v4 = vpop.permute.xlu0 %1198 }
 0x115   : > { %4083 = vst [vmem:[#allocation20_spill] sm:$0xff] %v3214_v4  ;;  %v3328_v4 = vld [vmem:[%s3265_s11 + $0x98] sm:$0xff]  }
 0x117   : > { %1700 = vperm.xlu1 %2697, %v2960_v8   ;;  %1720 = vperm.xlu0 %2696, %v2973_v11  }
 0x118   : > { %v3218_v5 = vpop.permute.xlu1 %1202  ;;  %v3220_v1 = vpop.permute.xlu0 %1206 }
 0x119   : > { %4084 = vst [vmem:[#allocation21_spill] sm:$0xff] %v3220_v1  ;;  %v3321_v1 = vld [vmem:[%s3265_s11 + $0x10] sm:$0xff]  }
 0x11b   : > { %1708 = vperm.xlu1 %2697, %v2968_v10   ;;  %1728 = vperm.xlu0 %2696, %v2981_v13  }
 0x11c   : > { %v3224_v7 = vpop.permute.xlu1 %1210  ;;  %v3226_v6 = vpop.permute.xlu0 %1214 }
 0x11d   : > { %4085 = vst [vmem:[#allocation22_spill] sm:$0xff] %v3226_v6 }
 0x11f   : > { %1716 = vperm.xlu1 %2697, %v2976_v12   ;;  %1736 = vperm.xlu0 %2696, %v2989_v15  }
 0x120   : > { %v3230_v8 = vpop.permute.xlu1 %1218  ;;  %v3232_v9 = vpop.permute.xlu0 %1222 }
 0x121   : > { %4086 = vst [vmem:[#allocation23_spill] sm:$0xff] %v3232_v9 }
 0x123   : > { %1724 = vperm.xlu1 %2697, %v2984_v14   ;;  %1744 = vperm.xlu0 %2696, %v2997_v17  }
 0x124   : > { %v3236_v10 = vpop.permute.xlu1 %1226  ;;  %v3238_v11 = vpop.permute.xlu0 %1230 }
 0x125   : > { %4087 = vst [vmem:[#allocation24_spill] sm:$0xff] %v3238_v11 }
 0x127   : > { %1732 = vperm.xlu1 %2697, %v2992_v16   ;;  %1752 = vperm.xlu0 %2696, %v3005_v19  }
 0x128   : > { %v3242_v12 = vpop.permute.xlu1 %1234  ;;  %v3244_v13 = vpop.permute.xlu0 %1238 }
 0x129   : > { %4088 = vst [vmem:[#allocation25_spill] sm:$0xff] %v3244_v13  ;;  %v3288_v13 = vld [vmem:[%s3265_s11 + $0x80] sm:$0xff]  }
 0x12a   : > { %v2331_v6 = vunpack.c.h.bf16 %v3288_v13 }
 0x12b   : > { %1740 = vperm.xlu1 %2697, %v3000_v18   ;;  %1760 = vperm.xlu0 %2696, %v3013_v21   ;;  %v3271_v21 = vld [vmem:[%s3265_s11 + $0xf0] sm:$0xff]  }
 0x12c   : > { %v3248_v15 = vpop.permute.xlu1 %1242  ;;  %v3250_v14 = vpop.permute.xlu0 %1246  ;;  %4092 = vst [vmem:[#allocation29_spill] sm:$0xff] %v3271_v21 }
 0x12d   : > { %4089 = vst [vmem:[#allocation26_spill] sm:$0xff] %v3250_v14  ;;  %v3285_v14 = vld [vmem:[%s3265_s11 + $0xf8] sm:$0xff]  }
 0x12e   : > { %4095 = vst [vmem:[#allocation32_spill] sm:$0xff] %v3285_v14  ;;  %v2390_v49 = vunpack.c.l.bf16 %v3285_v14  ;;  %v3332_v14 = vld [vmem:[%s3265_s11 + $0x108] sm:$0xff]  }
 0x12f   : > { %1748 = vperm.xlu1 %2697, %v3008_v20   ;;  %1768 = vperm.xlu0 %2696, %v3021_v23   ;;  %v3268_v20 = vld [vmem:[%s3265_s11 + $0x70] sm:$0xff]  }
 0x130   : > { %v3255_v16 = vpop.permute.xlu1 %1250  ;;  %v3257_v17 = vpop.permute.xlu0 %1254 }
 0x131   : > { %4090 = vst [vmem:[#allocation27_spill] sm:$0xff] %v3257_v17  ;;  %v3282_v17 = vld [vmem:[%s3265_s11 + $0x78] sm:$0xff]  }
 0x132   : > { %4094 = vst [vmem:[#allocation31_spill] sm:$0xff] %v3282_v17  ;;  %v2326_v51 = vunpack.c.l.bf16 %v3282_v17 }
 0x133   : > { %1756 = vperm.xlu1 %2697, %v3016_v22   ;;  %1776 = vperm.xlu0 %2696, %v3029_v25   ;;  %v2322_v25 = vunpack.c.l.bf16 %v3268_v20 }
 0x134   : > { %v3261_v18 = vpop.permute.xlu1 %1258  ;;  %v3263_v19 = vpop.permute.xlu0 %1262 }
 0x135   : > { %4091 = vst [vmem:[#allocation28_spill] sm:$0xff] %v3263_v19  ;;  %v2386_v19 = vunpack.c.l.bf16 %v3271_v21  ;;  %v1092_v11 = vmul.f32 %v2322_v25, %v3178_v0  ;;  %v3312_v0 = vld [vmem:[%s3265_s11 + $0x100] sm:$0xff]   ;;  %v3315_v25 = vld [vmem:[%s3265_s11 + $0x8] sm:$0xff]  }
 0x136   : > { %v2395_v43 = vunpack.c.h.bf16 %v3312_v0 }
 0x137   : > { %1764 = vperm.xlu1 %2697, %v3024_v24   ;;  %1784 = vperm.xlu0 %2696, %v3037_v27  }
 0x138   : > { %v3275_v22 = vpop.permute.xlu1 %1266  ;;  %v3277_v23 = vpop.permute.xlu0 %1270 }
 0x139   : > { %4093 = vst [vmem:[#allocation30_spill] sm:$0xff] %v3277_v23  ;;  %v3295_v23 = vld [vmem:[%s3265_s11] sm:$0xff]  }
 0x13b   : > { %1772 = vperm.xlu1 %2697, %v3032_v26   ;;  %1792 = vperm.xlu0 %2696, %v3045_v29   ;;  %v3305_v26 = vld [vmem:[%s3265_s11 + $0x90] sm:$0xff]  }
 0x13c   : > { %v1275_v24 = vpop.permute.xlu1 %1274  ;;  %v3292_v27 = vpop.permute.xlu0 %1278  ;;  %v2338_v45 = vunpack.c.l.bf16 %v3305_v26 }
 0x13d   : > { %4096 = vst [vmem:[#allocation33_spill] sm:$0xff] %v3292_v27  ;;  %v1317_v9 = vmul.f32 %v2386_v19, %v1275_v24  ;;  %v2267_v19 = vunpack.c.h.bf16 %v3295_v23 }
 0x13f   : > { %v3307_v29 = vadd.f32 %v1317_v9, %v1092_v11  ;;  %1780 = vperm.xlu1 %2697, %v3040_v28   ;;  %1800 = vperm.xlu0 %2696, %v3053_v31   ;;  %v1094_v9 = vmul.f32 %v2326_v51, %v3184_v36  ;;  %v2334_v11 = vunpack.c.l.bf16 %v3302_v47  ;;  %v1290_v31 = vmul.f32 %v2331_v6, %v3188_v59  ;;  %v3339_v51 = vld [vmem:[%s3265_s11 + $0x110] sm:$0xff]   ;;  %v3344_v36 = vld [vmem:[%s3265_s11 + $0x18] sm:$0xff]  }
 0x140   : > { %v1283_v24 = vpop.permute.xlu1 %1282  ;;  %v3318_v27 = vpop.permute.xlu0 %1286  ;;  %4098 = vst [vmem:[#allocation35_spill] sm:$0xff] %v3339_v51  ;;  %v2274_v59 = vunpack.c.l.bf16 %v3321_v1  ;;  %v2278_v37 = vunpack.c.l.bf16 %v3344_v36 }
 0x141   : > { %4097 = vst [vmem:[#allocation34_spill] sm:$0xff] %v3318_v27  ;;  %v1319_v28 = vmul.f32 %v2390_v49, %v1283_v24  ;;  %v2270_v27 = vunpack.c.l.bf16 %v3315_v25  ;;  %v1065_v49 = vmul.f32 %v2267_v19, %v3100_v38  ;;  %v1291_v6 = vmul.f32 %v2334_v11, %v3194_v63 }
 0x142   : > { %v2342_v24 = vunpack.c.l.bf16 %v3328_v4  ;;  %v2402_v19 = vunpack.c.l.bf16 %v3339_v51  ;;  %v1068_v11 = vmul.f32 %v2274_v59, %v3106_v40  ;;  %v2406_v51 = vunpack.c.l.bf16 %v3357_v39  ;;  %v3375_v59 = vld [vmem:[%s3265_s11 + $0x120] sm:$0xff]  }
 0x143   : > { %v3335_v21 = vadd.f32 %v1319_v28, %v1094_v9  ;;  %1788 = vperm.xlu1 %2697, %v3048_v30   ;;  %v2398_v28 = vunpack.c.l.bf16 %v3332_v14  ;;  %v1322_v41 = vadd.f32 %v1290_v31, %v1065_v49  ;;  %v1293_v30 = vmul.f32 %v2338_v45, %v3200_v33  ;;  %v3366_v45 = vld [vmem:[%s3265_s11 + $0x20] sm:$0xff]   ;;  %4100 = vst [vmem:[#allocation37_spill] sm:$0xff] %v3375_v59 }
 0x144   : > { %v1066_v63 = vmul.f32 %v2270_v27, %v3092_v34  ;;  %v2346_v33 = vunpack.c.l.bf16 %v3353_v2  ;;  %v3372_v27 = vld [vmem:[%s3265_s11 + $0xa8] sm:$0xff]  }
 0x145   : > { %v3348_v3 = vpop.permute.xlu1 %1419  ;;  %v1424_v9 = vpop.permute.xlu0 %1423  ;;  %v1325_v34 = vadd.f32 %v1293_v30, %v1068_v11  ;;  %v3384_v30 = vld [vmem:[%s3265_s11 + $0x28] sm:$0xff]  }
 0x146   : > { %v1547_v38 = vmul.f32 %v2395_v43, %v1424_v9  ;;  %v1323_v43 = vadd.f32 %v1291_v6, %v1066_v63  ;;  %v2282_v6 = vunpack.c.l.bf16 %v3366_v45  ;;  %v1297_v11 = vmul.f32 %v2346_v33, %v3212_v61 }
 0x147   : > { %1796 = vperm.xlu1 %2697, %v3056_v32   ;;  %v1295_v32 = vmul.f32 %v2342_v24, %v3206_v53  ;;  %v2350_v53 = vunpack.c.l.bf16 %v3372_v27 }
 0x148   : > { %v3363_v31 = vadd.f32 %v1547_v38, %v1322_v41  ;;  %v1070_v38 = vmul.f32 %v2278_v37, %v3112_v42  ;;  %v2410_v42 = vunpack.c.l.bf16 %v3375_v59  ;;  %v3528_v59 = vld [vmem:[%s3265_s11 + $0x68] sm:$0xff]  }
 0x149   : > { %v1428_v49 = vpop.permute.xlu1 %1427  ;;  %v1436_v9 = vpop.permute.xlu0 %1435 }
 0x14a   : > { %4099 = vst [vmem:[#allocation36_spill] sm:$0xff] %v3363_v31  ;;  %v1548_v40 = vmul.f32 %v2398_v28, %v1428_v49  ;;  %v1550_v41 = vmul.f32 %v2402_v19, %v1436_v9  ;;  %v1327_v19 = vadd.f32 %v1295_v32, %v1070_v38  ;;  %v3391_v49 = vld [vmem:[%s3265_s11 + $0xb0] sm:$0xff]   ;;  %v1072_v9 = vmul.f32 %v2282_v6, %v3118_v44 }
 0x14b   : > { %v2354_v32 = vunpack.c.l.bf16 %v3391_v49  ;;  %v1299_v38 = vmul.f32 %v2350_v53, %v3218_v5 }
 0x14c   : > { %v3379_v63 = vadd.f32 %v1548_v40, %v1323_v43  ;;  %v3381_v31 = vadd.f32 %v1550_v41, %v1325_v34  ;;  %v3395_v43 = vld [vmem:[%s3265_s11 + $0x128] sm:$0xff]   ;;  %v2286_v34 = vunpack.c.l.bf16 %v3384_v30  ;;  %v3402_v41 = vld [vmem:[%s3265_s11 + $0x30] sm:$0xff]  }
 0x14d   : > { %v3387_v24 = vpop.permute.xlu1 %1431  ;;  %v1444_v28 = vpop.permute.xlu0 %1443  ;;  %4103 = vst [vmem:[#allocation40_spill] sm:$0xff] %v3395_v43  ;;  %v2414_v6 = vunpack.c.l.bf16 %v3395_v43  ;;  %v3431_v43 = vld [vmem:[%s3265_s11 + $0x138] sm:$0xff]  }
 0x14e   : > { %4101 = vst [vmem:[#allocation38_spill] sm:$0xff] %v3379_v63  ;;  %4102 = vst [vmem:[#allocation39_spill] sm:$0xff] %v3381_v31  ;;  %v1552_v37 = vmul.f32 %v2406_v51, %v1444_v28  ;;  %v1329_v51 = vadd.f32 %v1297_v11, %v1072_v9  ;;  %v3409_v28 = vld [vmem:[%s3265_s11 + $0xb8] sm:$0xff]   ;;  %v3413_v31 = vld [vmem:[%s3265_s11 + $0x130] sm:$0xff]   ;;  %v1301_v9 = vmul.f32 %v2354_v32, %v3224_v7 }
 0x14f   : > { %4105 = vst [vmem:[#allocation42_spill] sm:$0xff] %v3413_v31  ;;  %v3420_v63 = vld [vmem:[%s3265_s11 + $0x38] sm:$0xff]   ;;  %v2358_v11 = vunpack.c.l.bf16 %v3409_v28  ;;  %4108 = vst [vmem:[#allocation45_spill] sm:$0xff] %v3431_v43 }
 0x150   : > { %v3399_v40 = vadd.f32 %v1552_v37, %v1327_v19  ;;  %v1074_v19 = vmul.f32 %v2286_v34, %v3124_v46  ;;  %v2290_v37 = vunpack.c.l.bf16 %v3402_v41  ;;  %v2418_v34 = vunpack.c.l.bf16 %v3413_v31  ;;  %v3449_v31 = vld [vmem:[%s3265_s11 + $0x140] sm:$0xff]  }
 0x151   : > { %v3405_v61 = vpop.permute.xlu1 %1439  ;;  %v1452_v33 = vpop.permute.xlu0 %1451  ;;  %4111 = vst [vmem:[#allocation48_spill] sm:$0xff] %v3449_v31 }
 0x152   : > { %4104 = vst [vmem:[#allocation41_spill] sm:$0xff] %v3399_v40  ;;  %v1554_v44 = vmul.f32 %v2410_v42, %v1452_v33  ;;  %v1331_v42 = vadd.f32 %v1299_v38, %v1074_v19  ;;  %v3427_v33 = vld [vmem:[%s3265_s11 + $0xc0] sm:$0xff]   ;;  %v1303_v19 = vmul.f32 %v2358_v11, %v3230_v8 }
 0x153   : > { %v2362_v38 = vunpack.c.l.bf16 %v3427_v33 }
 0x154   : > { %v3417_v40 = vadd.f32 %v1554_v44, %v1329_v51  ;;  %v1076_v51 = vmul.f32 %v2290_v37, %v3130_v48  ;;  %v2294_v44 = vunpack.c.l.bf16 %v3420_v63  ;;  %v2422_v37 = vunpack.c.l.bf16 %v3431_v43  ;;  %v3467_v43 = vld [vmem:[%s3265_s11 + $0x148] sm:$0xff]  }
 0x155   : > { %v3423_v5 = vpop.permute.xlu1 %1447  ;;  %v1460_v53 = vpop.permute.xlu0 %1459  ;;  %4114 = vst [vmem:[#allocation51_spill] sm:$0xff] %v3467_v43 }
 0x156   : > { %4106 = vst [vmem:[#allocation43_spill] sm:$0xff] %v3417_v40  ;;  %4107 = vst [vmem:[#allocation44_spill] sm:$0xff] %v3423_v5  ;;  %v1556_v46 = vmul.f32 %v2414_v6, %v1460_v53  ;;  %v3438_v5 = vld [vmem:[%s3265_s11 + $0x40] sm:$0xff]   ;;  %v1333_v6 = vadd.f32 %v1301_v9, %v1076_v51  ;;  %v3445_v53 = vld [vmem:[%s3265_s11 + $0xc8] sm:$0xff]   ;;  %v1305_v51 = vmul.f32 %v2362_v38, %v3236_v10 }
 0x157   : > { %v2366_v9 = vunpack.c.l.bf16 %v3445_v53 }
 0x158   : > { %v3435_v40 = vadd.f32 %v1556_v46, %v1331_v42  ;;  %v1078_v42 = vmul.f32 %v2294_v44, %v3136_v50  ;;  %v2298_v46 = vunpack.c.l.bf16 %v3438_v5  ;;  %v2426_v44 = vunpack.c.l.bf16 %v3449_v31  ;;  %v3485_v31 = vld [vmem:[%s3265_s11 + $0x150] sm:$0xff]  }
 0x159   : > { %v3441_v7 = vpop.permute.xlu1 %1455  ;;  %v1468_v32 = vpop.permute.xlu0 %1467  ;;  %4117 = vst [vmem:[#allocation54_spill] sm:$0xff] %v3485_v31 }
 0x15a   : > { %4109 = vst [vmem:[#allocation46_spill] sm:$0xff] %v3435_v40  ;;  %4110 = vst [vmem:[#allocation47_spill] sm:$0xff] %v3441_v7  ;;  %v1558_v48 = vmul.f32 %v2418_v34, %v1468_v32  ;;  %v3456_v7 = vld [vmem:[%s3265_s11 + $0x48] sm:$0xff]   ;;  %v1335_v34 = vadd.f32 %v1303_v19, %v1078_v42  ;;  %v3463_v32 = vld [vmem:[%s3265_s11 + $0xd0] sm:$0xff]   ;;  %v1307_v42 = vmul.f32 %v2366_v9, %v3242_v12 }
 0x15b   : > { %v2370_v19 = vunpack.c.l.bf16 %v3463_v32 }
 0x15c   : > { %v3453_v40 = vadd.f32 %v1558_v48, %v1333_v6  ;;  %v1080_v6 = vmul.f32 %v2298_v46, %v3142_v52  ;;  %v2302_v48 = vunpack.c.l.bf16 %v3456_v7  ;;  %v2430_v46 = vunpack.c.l.bf16 %v3467_v43  ;;  %v3503_v43 = vld [vmem:[%s3265_s11 + $0x158] sm:$0xff]  }
 0x15d   : > { %v3459_v8 = vpop.permute.xlu1 %1463  ;;  %v1476_v11 = vpop.permute.xlu0 %1475  ;;  %4120 = vst [vmem:[#allocation57_spill] sm:$0xff] %v3503_v43 }
 0x15e   : > { %4112 = vst [vmem:[#allocation49_spill] sm:$0xff] %v3453_v40  ;;  %4113 = vst [vmem:[#allocation50_spill] sm:$0xff] %v3459_v8  ;;  %v1560_v50 = vmul.f32 %v2422_v37, %v1476_v11  ;;  %v3474_v8 = vld [vmem:[%s3265_s11 + $0x50] sm:$0xff]   ;;  %v1337_v37 = vadd.f32 %v1305_v51, %v1080_v6  ;;  %v3481_v11 = vld [vmem:[%s3265_s11 + $0xd8] sm:$0xff]   ;;  %v1309_v6 = vmul.f32 %v2370_v19, %v3248_v15 }
 0x15f   : > { %v2374_v51 = vunpack.c.l.bf16 %v3481_v11 }
 0x160   : > { %v3471_v40 = vadd.f32 %v1560_v50, %v1335_v34  ;;  %v1082_v34 = vmul.f32 %v2302_v48, %v3148_v54  ;;  %v2306_v50 = vunpack.c.l.bf16 %v3474_v8  ;;  %v2434_v48 = vunpack.c.l.bf16 %v3485_v31 }
 0x161   : > { %v3477_v10 = vpop.permute.xlu1 %1471  ;;  %v1484_v38 = vpop.permute.xlu0 %1483 }
 0x162   : > { %4115 = vst [vmem:[#allocation52_spill] sm:$0xff] %v3471_v40  ;;  %4116 = vst [vmem:[#allocation53_spill] sm:$0xff] %v3477_v10  ;;  %v1562_v52 = vmul.f32 %v2426_v44, %v1484_v38  ;;  %v3492_v10 = vld [vmem:[%s3265_s11 + $0x58] sm:$0xff]   ;;  %v1339_v44 = vadd.f32 %v1307_v42, %v1082_v34  ;;  %v3499_v38 = vld [vmem:[%s3265_s11 + $0xe0] sm:$0xff]  }
 0x163   : > { %v2378_v42 = vunpack.c.l.bf16 %v3499_v38 }
 0x164   : > { %v3489_v40 = vadd.f32 %v1562_v52, %v1337_v37  ;;  %v1084_v37 = vmul.f32 %v2306_v50, %v3154_v56  ;;  %v2310_v52 = vunpack.c.l.bf16 %v3492_v10  ;;  %v2438_v56 = vunpack.c.l.bf16 %v3503_v43  ;;  %v3521_v50 = vld [vmem:[%s3265_s11 + $0x160] sm:$0xff]  }
 0x165   : > { %v3495_v12 = vpop.permute.xlu1 %1479  ;;  %v1492_v9 = vpop.permute.xlu0 %1491  ;;  %v2442_v43 = vunpack.c.l.bf16 %v3521_v50 }
 0x166   : > { %4118 = vst [vmem:[#allocation55_spill] sm:$0xff] %v3489_v40  ;;  %4119 = vst [vmem:[#allocation56_spill] sm:$0xff] %v3495_v12  ;;  %v1564_v54 = vmul.f32 %v2430_v46, %v1492_v9  ;;  %v3510_v12 = vld [vmem:[%s3265_s11 + $0x60] sm:$0xff]   ;;  %v1341_v34 = vadd.f32 %v1309_v6, %v1084_v37  ;;  %v1311_v46 = vmul.f32 %v2374_v51, %v3255_v16  ;;  %v3517_v9 = vld [vmem:[%s3265_s11 + $0xe8] sm:$0xff]  }
 0x167   : > { %v2382_v6 = vunpack.c.l.bf16 %v3517_v9 }
 0x168   : > { %v3507_v40 = vadd.f32 %v1564_v54, %v1339_v44  ;;  %v1086_v44 = vmul.f32 %v2310_v52, %v3160_v58  ;;  %v2314_v54 = vunpack.c.l.bf16 %v3510_v12 }
 0x169   : > { %v3513_v15 = vpop.permute.xlu1 %1487  ;;  %v1500_v19 = vpop.permute.xlu0 %1499 }
 0x16a   : > { %4121 = vst [vmem:[#allocation58_spill] sm:$0xff] %v3507_v40  ;;  %4122 = vst [vmem:[#allocation59_spill] sm:$0xff] %v3513_v15  ;;  %v1566_v31 = vmul.f32 %v2434_v48, %v1500_v19  ;;  %v1343_v51 = vadd.f32 %v1311_v46, %v1086_v44  ;;  %v1313_v48 = vmul.f32 %v2378_v42, %v3261_v18  ;;  %v3536_v15 = vld [vmem:[%s3265_s11 + $0x168] sm:$0xff]   ;;  %v3547_v42 = vld [vmem:[%s3265_s11 + $0x170] sm:$0xff]  }
 0x16b   : > { %v1088_v58 = vmul.f32 %v2314_v54, %v3166_v60  ;;  %v1315_v46 = vmul.f32 %v2382_v6, %v3275_v22  ;;  %v2446_v18 = vunpack.c.l.bf16 %v3536_v15  ;;  %v2266_v22 = vunpack.c.l.bf16 %v3295_v23 }
 0x16c   : > { %v3525_v40 = vadd.f32 %v1566_v31, %v1341_v34  ;;  %v2318_v31 = vunpack.c.l.bf16 %v3528_v59 }
 0x16d   : > { %v3531_v37 = vpop.permute.xlu1 %1495  ;;  %v1508_v16 = vpop.permute.xlu0 %1507 }
 0x16e   : > { %4123 = vst [vmem:[#allocation60_spill] sm:$0xff] %v3525_v40  ;;  %4124 = vst [vmem:[#allocation61_spill] sm:$0xff] %v3531_v37  ;;  %v1568_v19 = vmul.f32 %v2438_v56, %v1508_v16  ;;  %v1345_v37 = vadd.f32 %v1313_v48, %v1088_v58  ;;  %v1090_v56 = vmul.f32 %v2318_v31, %v3172_v62  ;;  %v3556_v48 = vld [vmem:[%s3265_s11 + $0x178] sm:$0xff]   ;;  %v2330_v31 = vunpack.c.l.bf16 %v3288_v13 }
 0x16f   : > { %v2394_v13 = vunpack.c.l.bf16 %v3312_v0  ;;  %v2399_v0 = vunpack.c.h.bf16 %v3332_v14 }
 0x170   : > { %v3540_v52 = vadd.f32 %v1568_v19, %v1343_v51  ;;  %v1347_v51 = vadd.f32 %v1315_v46, %v1090_v56  ;;  %v2454_v56 = vunpack.c.l.bf16 %v3556_v48  ;;  %v1289_v58 = vmul.f32 %v2330_v31, %v3190_v57 }
 0x171   : > { %v3542_v34 = vpop.permute.xlu1 %1503  ;;  %v1516_v40 = vpop.permute.xlu0 %1515 }
 0x172   : > { %4125 = vst [vmem:[#allocation62_spill] sm:$0xff] %v3540_v52  ;;  %v1570_v44 = vmul.f32 %v2442_v43, %v1516_v40  ;;  %v2450_v52 = vunpack.c.l.bf16 %v3547_v42  ;;  %v2271_v43 = vunpack.c.h.bf16 %v3315_v25  ;;  %v1064_v25 = vmul.f32 %v2266_v22, %v3094_v35  ;;  %v3631_v22 = vld [vmem:[%s3265_s11 + $0x190] sm:$0xff]  }
 0x174   : > { %v3550_v16 = vadd.f32 %v1570_v44, %v1345_v37  ;;  %v2335_v37 = vunpack.c.h.bf16 %v3302_v47  ;;  %v3605_v47 = vld [vmem:[%s3586_s15] sm:$0xff]   ;;  %v1321_v35 = vadd.f32 %v1289_v58, %v1064_v25  ;;  %v1549_v58 = vmul.f32 %v2399_v0, %v3387_v24  ;;  %v3628_v25 = vld [vmem:[%s3586_s15 + $0x8] sm:$0xff]  }
 0x175   : > { %v3552_v60 = vpop.permute.xlu1 %1511  ;;  %v1524_v54 = vpop.permute.xlu0 %1523  ;;  %v4133_v24 = vld [vmem:[#allocation4_spill] sm:$0xff]  ;;  %v2527_v14 = vunpack.c.h.bf16 %v3628_v25 }
 0x176   : > { %4126 = vst [vmem:[#allocation63_spill] sm:$0xff] %v3550_v16  ;;  %v1572_v19 = vmul.f32 %v2446_v18, %v1524_v54  ;;  %v4140_v16 = vld [vmem:[#allocation29_spill] sm:$0xff] }
 0x178   : > { %v3561_v6 = vadd.f32 %v1572_v19, %v1347_v51  ;;  %v2343_v19 = vunpack.c.h.bf16 %v3328_v4  ;;  %v2522_v51 = vunpack.c.l.bf16 %v3605_v47 }
 0x179   : > { %v3567_v46 = vpop.permute.xlu1 %1519  ;;  %v1532_v44 = vpop.permute.xlu0 %1531 }
 0x17a   : > { %4127 = vst [vmem:[#allocation64_spill] sm:$0xff] %v3561_v6  ;;  %v1574_v18 = vmul.f32 %v2450_v52, %v1532_v44  ;;  %v3589_v52 = vld [vmem:[%s3265_s11 + $0x180] sm:$0xff]   ;;  %v1546_v44 = vmul.f32 %v2394_v13, %v3348_v3  ;;  %v1292_v3 = vmul.f32 %v2335_v37, %v3196_v55 }
 0x17b   : > { %v2458_v57 = vunpack.c.l.bf16 %v3589_v52  ;;  %v4139_v6 = vld [vmem:[#allocation19_spill] sm:$0xff] }
 0x17c   : > { %v3581_v23 = vadd.f32 %v1574_v18, %v3307_v29  ;;  %v2339_v18 = vunpack.c.h.bf16 %v3305_v26 }
 0x17d   : > { %v3595_v62 = vpop.permute.xlu1 %1527  ;;  %v1540_v29 = vpop.permute.xlu0 %1539 }
 0x17e   : > { %4128 = vst [vmem:[#allocation65_spill] sm:$0xff] %v3581_v23  ;;  %v1576_v54 = vmul.f32 %v2454_v56, %v1540_v29  ;;  %v3614_v56 = vld [vmem:[%s3265_s11 + $0x188] sm:$0xff]   ;;  %v4131_v29 = vld [vmem:[#allocation3_spill] sm:$0xff] }
 0x17f   : > { %v1067_v40 = vmul.f32 %v2271_v43, %v4131_v29  ;;  %v2463_v37 = vunpack.c.h.bf16 %v3614_v56 }
 0x180   : > { %v3611_v4 = vadd.f32 %v1576_v54, %v3335_v21  ;;  %v4132_v21 = vld [vmem:[#allocation35_spill] sm:$0xff] }
 0x181   : > { %v3619_v13 = vpop.permute.xlu1 %1535  ;;  %v2403_v54 = vunpack.c.h.bf16 %v4132_v21  ;;  %v2407_v21 = vunpack.c.h.bf16 %v3357_v39 }
 0x182   : > { %4129 = vst [vmem:[#allocation66_spill] sm:$0xff] %v3611_v4  ;;  %4130 = vst [vmem:[#allocation67_spill] sm:$0xff] %v3619_v13  ;;  %v1677_v31 = vpop.permute.xlu0 %1676  ;;  %v1578_v4 = vadd.f32 %v1546_v44, %v1321_v35  ;;  %v4134_v44 = vunpack.c.h.bf16 %v3321_v1  ;;  %v2459_v1 = vunpack.c.h.bf16 %v3589_v52  ;;  %v1296_v52 = vmul.f32 %v2343_v19, %v4139_v6  ;;  %v4148_v13 = vld [vmem:[#allocation40_spill] sm:$0xff] }
 0x183   : > { %v1803_v55 = vmul.f32 %v2458_v57, %v1677_v31  ;;  %v1324_v57 = vadd.f32 %v1292_v3, %v1067_v40  ;;  %v4135_v31 = vld [vmem:[#allocation18_spill] sm:$0xff]  ;;  %v2467_v40 = vunpack.c.h.bf16 %v3631_v22  ;;  %v2462_v19 = vunpack.c.l.bf16 %v3614_v56  ;;  %v4146_v56 = vld [vmem:[#allocation20_spill] sm:$0xff] }
 0x184   : > { %v1069_v0 = vmul.f32 %v4134_v44, %v4133_v24  ;;  %v1294_v35 = vmul.f32 %v2339_v18, %v4135_v31  ;;  %v1551_v18 = vmul.f32 %v2403_v54, %v3405_v61  ;;  %v3665_v24 = vld [vmem:[%s3265_s11 + $0x198] sm:$0xff]   ;;  %v4137_v44 = vld [vmem:[#allocation5_spill] sm:$0xff]  ;;  %v4138_v31 = vunpack.c.h.bf16 %v3344_v36 }
 0x185   : > { %v1835_v43 = vadd.f32 %v1803_v55, %v1578_v4  ;;  %v3646_v29 = vpop.permute.xlu1 %1543  ;;  %v1581_v3 = vadd.f32 %v1549_v58, %v1324_v57  ;;  %v3662_v55 = vld [vmem:[%s3586_s15 + $0x10] sm:$0xff]   ;;  %v4147_v58 = vunpack.c.h.bf16 %v3353_v2 }
 0x186   : > { %4136 = vst [vmem:[#allocation3_spill] sm:$0xff] %v3646_v29  ;;  %v1689_v26 = vpop.permute.xlu0 %1688  ;;  %v1071_v23 = vmul.f32 %v4138_v31, %v4137_v44  ;;  %v1326_v54 = vadd.f32 %v1294_v35, %v1069_v0  ;;  %v4142_v29 = vld [vmem:[#allocation37_spill] sm:$0xff]  ;;  %v2531_v6 = vunpack.c.h.bf16 %v3662_v55  ;;  %v2471_v31 = vunpack.c.h.bf16 %v3665_v24  ;;  %v3682_v0 = vld [vmem:[%s3586_s15 + $0x18] sm:$0xff]  }
 0x187   : > { %1868 = vst.msk [vmem:[%s3640_s20] sm:$0xff] %vm1867_vm0, %v1835_v43  ;;  %v1964_v4 = vsub.f32 %v2522_v51, %v1835_v43  ;;  %v1806_v39 = vmul.f32 %v2463_v37, %v1689_v26  ;;  %v2411_v51 = vunpack.c.h.bf16 %v4142_v29  ;;  %v2523_v37 = vunpack.c.h.bf16 %v3605_v47  ;;  %v4143_v43 = vld [vmem:[#allocation44_spill] sm:$0xff]  ;;  %v3687_v47 = vld [vmem:[%s3265_s11 + $0x1a0] sm:$0xff]  }
 0x188   : > { %v1553_v36 = vmul.f32 %v2407_v21, %v4143_v43  ;;  %v1583_v29 = vadd.f32 %v1551_v18, %v1326_v54  ;;  %v4144_v21 = vld [vmem:[#allocation6_spill] sm:$0xff]  ;;  %v1328_v61 = vadd.f32 %v1296_v52, %v1071_v23  ;;  %v1298_v57 = vmul.f32 %v4147_v58, %v4146_v56 }
 0x189   : > { %1996 = vst.msk [vmem:[%s3653_s24] sm:$0xff] %vm1867_vm0, %v1964_v4  ;;  %v1838_v26 = vadd.f32 %v1806_v39, %v1581_v3  ;;  %v4145_v39 = vunpack.c.h.bf16 %v3366_v45  ;;  %v2415_v18 = vunpack.c.h.bf16 %v4148_v13  ;;  %v2535_v45 = vunpack.c.h.bf16 %v3682_v0 }
 0x18a   : > { %v1681_v17 = vpop.permute.xlu1 %1680  ;;  %v1697_v44 = vpop.permute.xlu0 %1696  ;;  %v1585_v54 = vadd.f32 %v1553_v36, %v1328_v61  ;;  %v2466_v58 = vunpack.c.l.bf16 %v3631_v22  ;;  %v2475_v13 = vunpack.c.h.bf16 %v3687_v47  ;;  %v3712_v36 = vld [vmem:[%s3265_s11 + $0x1a8] sm:$0xff]  }
 0x18b   : > { %1871 = vst.msk [vmem:[%s3640_s20 + $0x18] sm:$0xff] %vm1867_vm0, %v1838_v26  ;;  %v1967_v35 = vsub.f32 %v2527_v14, %v1838_v26  ;;  %v1804_v3 = vmul.f32 %v2459_v1, %v1681_v17  ;;  %v1808_v4 = vmul.f32 %v2467_v40, %v1697_v44  ;;  %v1073_v43 = vmul.f32 %v4145_v39, %v4144_v21  ;;  %v4149_v17 = vld [vmem:[#allocation36_spill] sm:$0xff]  ;;  %v4150_v26 = vld [vmem:[#allocation47_spill] sm:$0xff]  ;;  %v4153_v21 = vld [vmem:[#allocation21_spill] sm:$0xff] }
 0x18c   : > { %v2526_v40 = vunpack.c.l.bf16 %v3628_v25  ;;  %v1555_v23 = vmul.f32 %v2411_v51, %v4150_v26  ;;  %v3705_v44 = vld [vmem:[%s3586_s15 + $0x20] sm:$0xff]   ;;  %v4154_v39 = vunpack.c.h.bf16 %v3372_v27 }
 0x18d   : > { %1999 = vst.msk [vmem:[%s3653_s24 + $0x18] sm:$0xff] %vm1867_vm0, %v1967_v35  ;;  %v1836_v14 = vadd.f32 %v1804_v3, %v4149_v17  ;;  %v1840_v1 = vadd.f32 %v1808_v4, %v1583_v29  ;;  %v4151_v51 = vld [vmem:[#allocation7_spill] sm:$0xff]  ;;  %v4152_v3 = vunpack.c.h.bf16 %v3384_v30  ;;  %v1330_v22 = vadd.f32 %v1298_v57, %v1073_v43  ;;  %v4155_v17 = vld [vmem:[#allocation42_spill] sm:$0xff] }
 0x18e   : > { %v1685_v52 = vpop.permute.xlu1 %1684  ;;  %v1705_v2 = vpop.permute.xlu0 %1704  ;;  %v1300_v56 = vmul.f32 %v4154_v39, %v4153_v21  ;;  %v2530_v30 = vunpack.c.l.bf16 %v3662_v55  ;;  %v2539_v57 = vunpack.c.h.bf16 %v3705_v44  ;;  %v4162_v39 = vld [vmem:[#allocation45_spill] sm:$0xff] }
 0x18f   : > { %1869 = vst.msk [vmem:[%s3640_s20 + $0x8] sm:$0xff] %vm1867_vm0, %v1836_v14  ;;  %v1965_v29 = vsub.f32 %v2523_v37, %v1836_v14  ;;  %1873 = vst.msk [vmem:[%s3640_s20 + $0x28] sm:$0xff] %vm1867_vm0, %v1840_v1  ;;  %v1969_v25 = vsub.f32 %v2531_v6, %v1840_v1  ;;  %v1805_v35 = vmul.f32 %v2462_v19, %v1685_v52  ;;  %v2419_v37 = vunpack.c.h.bf16 %v4155_v17  ;;  %v4156_v6 = vld [vmem:[#allocation38_spill] sm:$0xff]  ;;  %v4164_v17 = vld [vmem:[#allocation53_spill] sm:$0xff] }
 0x190   : > { %v1810_v61 = vmul.f32 %v2471_v31, %v1705_v2  ;;  %v1075_v4 = vmul.f32 %v4152_v3, %v4151_v51  ;;  %v1587_v43 = vadd.f32 %v1555_v23, %v1330_v22  ;;  %v4157_v14 = vld [vmem:[#allocation50_spill] sm:$0xff]  ;;  %v2470_v52 = vunpack.c.l.bf16 %v3665_v24 }
 0x191   : > { %1997 = vst.msk [vmem:[%s3653_s24 + $0x8] sm:$0xff] %vm1867_vm0, %v1965_v29  ;;  %2001 = vst.msk [vmem:[%s3653_s24 + $0x28] sm:$0xff] %vm1867_vm0, %v1969_v25  ;;  %v1837_v19 = vadd.f32 %v1805_v35, %v4156_v6  ;;  %v1557_v27 = vmul.f32 %v2415_v18, %v4157_v14  ;;  %v2479_v2 = vunpack.c.h.bf16 %v3712_v36  ;;  %v3732_v29 = vld [vmem:[%s3586_s15 + $0x28] sm:$0xff]   ;;  %v3739_v35 = vld [vmem:[%s3265_s11 + $0x1b0] sm:$0xff]   ;;  %v4161_v22 = vunpack.c.h.bf16 %v3391_v49 }
 0x192   : > { %v1842_v31 = vadd.f32 %v1810_v61, %v1585_v54  ;;  %v1693_v1 = vpop.permute.xlu1 %1692  ;;  %v1713_v26 = vpop.permute.xlu0 %1712  ;;  %v4158_v18 = vld [vmem:[#allocation8_spill] sm:$0xff]  ;;  %v4159_v61 = vunpack.c.h.bf16 %v3402_v41  ;;  %v1332_v24 = vadd.f32 %v1300_v56, %v1075_v4  ;;  %v4160_v3 = vld [vmem:[#allocation22_spill] sm:$0xff]  ;;  %v2534_v41 = vunpack.c.l.bf16 %v3682_v0 }
 0x193   : > { %1870 = vst.msk [vmem:[%s3640_s20 + $0x10] sm:$0xff] %vm1867_vm0, %v1837_v19  ;;  %v1966_v54 = vsub.f32 %v2526_v40, %v1837_v19  ;;  %v1807_v25 = vmul.f32 %v2466_v58, %v1693_v1  ;;  %v1812_v23 = vmul.f32 %v2475_v13, %v1713_v26  ;;  %v1302_v21 = vmul.f32 %v4161_v22, %v4160_v3  ;;  %v3759_v1 = vld [vmem:[%s3586_s15 + $0x30] sm:$0xff]   ;;  %v4171_v22 = vld [vmem:[#allocation56_spill] sm:$0xff] }
 0x194   : > { %1875 = vst.msk [vmem:[%s3640_s20 + $0x38] sm:$0xff] %vm1867_vm0, %v1842_v31  ;;  %v1971_v55 = vsub.f32 %v2535_v45, %v1842_v31  ;;  %v1077_v51 = vmul.f32 %v4159_v61, %v4158_v18  ;;  %v2423_v40 = vunpack.c.h.bf16 %v4162_v39  ;;  %v4163_v45 = vld [vmem:[#allocation39_spill] sm:$0xff]  ;;  %v2543_v4 = vunpack.c.h.bf16 %v3732_v29 }
 0x195   : > { %1998 = vst.msk [vmem:[%s3653_s24 + $0x10] sm:$0xff] %vm1867_vm0, %v1966_v54  ;;  %v1839_v58 = vadd.f32 %v1807_v25, %v4163_v45  ;;  %v1844_v13 = vadd.f32 %v1812_v23, %v1587_v43  ;;  %v1589_v56 = vadd.f32 %v1557_v27, %v1332_v24  ;;  %v1559_v49 = vmul.f32 %v2419_v37, %v4164_v17  ;;  %v3766_v54 = vld [vmem:[%s3265_s11 + $0x1b8] sm:$0xff]   ;;  %v4165_v37 = vld [vmem:[#allocation9_spill] sm:$0xff]  ;;  %v4167_v23 = vld [vmem:[#allocation23_spill] sm:$0xff] }
 0x196   : > { %2003 = vst.msk [vmem:[%s3653_s24 + $0x38] sm:$0xff] %vm1867_vm0, %v1971_v55  ;;  %v1701_v6 = vpop.permute.xlu1 %1700  ;;  %v1721_v19 = vpop.permute.xlu0 %1720  ;;  %v2474_v31 = vunpack.c.l.bf16 %v3687_v47  ;;  %v2483_v14 = vunpack.c.h.bf16 %v3739_v35  ;;  %v4166_v55 = vunpack.c.h.bf16 %v3420_v63  ;;  %v1334_v47 = vadd.f32 %v1302_v21, %v1077_v51  ;;  %v4169_v24 = vld [vmem:[#allocation48_spill] sm:$0xff] }
 0x197   : > { %1872 = vst.msk [vmem:[%s3640_s20 + $0x20] sm:$0xff] %vm1867_vm0, %v1839_v58  ;;  %v1968_v43 = vsub.f32 %v2530_v30, %v1839_v58  ;;  %1877 = vst.msk [vmem:[%s3640_s20 + $0x48] sm:$0xff] %vm1867_vm0, %v1844_v13  ;;  %v1973_v0 = vsub.f32 %v2539_v57, %v1844_v13  ;;  %v1809_v26 = vmul.f32 %v2470_v52, %v1701_v6  ;;  %v4168_v18 = vunpack.c.h.bf16 %v3409_v28  ;;  %v4170_v57 = vld [vmem:[#allocation41_spill] sm:$0xff]  ;;  %v3786_v13 = vld [vmem:[%s3586_s15 + $0x38] sm:$0xff]  }
 0x198   : > { %v1814_v27 = vmul.f32 %v2479_v2, %v1721_v19  ;;  %v1079_v25 = vmul.f32 %v4166_v55, %v4165_v37  ;;  %v2427_v30 = vunpack.c.h.bf16 %v4169_v24  ;;  %v2538_v63 = vunpack.c.l.bf16 %v3705_v44  ;;  %v3793_v6 = vld [vmem:[%s3265_s11 + $0x1c0] sm:$0xff]  }
 0x199   : > { %v1304_v61 = vmul.f32 %v4168_v18, %v4167_v23  ;;  %2000 = vst.msk [vmem:[%s3653_s24 + $0x20] sm:$0xff] %vm1867_vm0, %v1968_v43  ;;  %2005 = vst.msk [vmem:[%s3653_s24 + $0x48] sm:$0xff] %vm1867_vm0, %v1973_v0  ;;  %v1841_v52 = vadd.f32 %v1809_v26, %v4170_v57  ;;  %v2547_v51 = vunpack.c.h.bf16 %v3759_v1  ;;  %v1591_v3 = vadd.f32 %v1559_v49, %v1334_v47  ;;  %v4174_v0 = vld [vmem:[#allocation24_spill] sm:$0xff]  ;;  %v4176_v37 = vld [vmem:[#allocation51_spill] sm:$0xff] }
 0x19a   : > { %v1846_v2 = vadd.f32 %v1814_v27, %v1589_v56  ;;  %v1561_v28 = vmul.f32 %v2423_v40, %v4171_v22  ;;  %v1709_v21 = vpop.permute.xlu1 %1708  ;;  %v1729_v39 = vpop.permute.xlu0 %1728  ;;  %v2478_v45 = vunpack.c.l.bf16 %v3712_v36  ;;  %v2487_v58 = vunpack.c.h.bf16 %v3766_v54  ;;  %v4172_v40 = vld [vmem:[#allocation10_spill] sm:$0xff]  ;;  %v4178_v47 = vld [vmem:[#allocation59_spill] sm:$0xff]  ;;  %v3820_v22 = vld [vmem:[%s3265_s11 + $0x1c8] sm:$0xff]  }
 0x19b   : > { %1874 = vst.msk [vmem:[%s3640_s20 + $0x30] sm:$0xff] %vm1867_vm0, %v1841_v52  ;;  %v1970_v56 = vsub.f32 %v2534_v41, %v1841_v52  ;;  %v1811_v17 = vmul.f32 %v2474_v31, %v1709_v21  ;;  %v1816_v49 = vmul.f32 %v2483_v14, %v1729_v39  ;;  %v4173_v19 = vunpack.c.h.bf16 %v3438_v5  ;;  %v3813_v57 = vld [vmem:[%s3586_s15 + $0x40] sm:$0xff]   ;;  %v4181_v39 = vld [vmem:[#allocation25_spill] sm:$0xff] }
 0x19c   : > { %1879 = vst.msk [vmem:[%s3640_s20 + $0x58] sm:$0xff] %vm1867_vm0, %v1846_v2  ;;  %v1975_v44 = vsub.f32 %v2543_v4, %v1846_v2  ;;  %v1336_v36 = vadd.f32 %v1304_v61, %v1079_v25  ;;  %v4175_v26 = vunpack.c.h.bf16 %v3427_v33  ;;  %v2431_v41 = vunpack.c.h.bf16 %v4176_v37  ;;  %v4177_v4 = vld [vmem:[#allocation43_spill] sm:$0xff] }
 0x19d   : > { %v1081_v43 = vmul.f32 %v4173_v19, %v4172_v40  ;;  %2002 = vst.msk [vmem:[%s3653_s24 + $0x30] sm:$0xff] %vm1867_vm0, %v1970_v56  ;;  %v1843_v31 = vadd.f32 %v1811_v17, %v4177_v4  ;;  %v1848_v14 = vadd.f32 %v1816_v49, %v1591_v3  ;;  %v2542_v5 = vunpack.c.l.bf16 %v3732_v29  ;;  %v4183_v17 = vld [vmem:[#allocation54_spill] sm:$0xff]  ;;  %v4185_v19 = vld [vmem:[#allocation61_spill] sm:$0xff] }
 0x19e   : > { %v1306_v27 = vmul.f32 %v4175_v26, %v4174_v0  ;;  %2007 = vst.msk [vmem:[%s3653_s24 + $0x58] sm:$0xff] %vm1867_vm0, %v1975_v44  ;;  %v2551_v55 = vunpack.c.h.bf16 %v3786_v13  ;;  %v1593_v25 = vadd.f32 %v1561_v28, %v1336_v36  ;;  %v1563_v33 = vmul.f32 %v2427_v30, %v4178_v47  ;;  %v1717_v23 = vpop.permute.xlu1 %1716  ;;  %v1737_v18 = vpop.permute.xlu0 %1736  ;;  %v4179_v30 = vld [vmem:[#allocation11_spill] sm:$0xff] }
 0x19f   : > { %v2482_v61 = vunpack.c.l.bf16 %v3739_v35  ;;  %v2491_v24 = vunpack.c.h.bf16 %v3793_v6  ;;  %1876 = vst.msk [vmem:[%s3640_s20 + $0x40] sm:$0xff] %vm1867_vm0, %v1843_v31  ;;  %v1972_v52 = vsub.f32 %v2538_v63, %v1843_v31  ;;  %1881 = vst.msk [vmem:[%s3640_s20 + $0x68] sm:$0xff] %vm1867_vm0, %v1848_v14  ;;  %v1977_v29 = vsub.f32 %v2547_v51, %v1848_v14  ;;  %v4184_v51 = vld [vmem:[#allocation46_spill] sm:$0xff]  ;;  %v3847_v14 = vld [vmem:[%s3265_s11 + $0x1d0] sm:$0xff]  }
 0x1a0   : > { %v1813_v2 = vmul.f32 %v2478_v45, %v1717_v23  ;;  %v1818_v3 = vmul.f32 %v2487_v58, %v1737_v18  ;;  %v4180_v28 = vunpack.c.h.bf16 %v3456_v7  ;;  %v1338_v35 = vadd.f32 %v1306_v27, %v1081_v43  ;;  %v3840_v27 = vld [vmem:[%s3586_s15 + $0x48] sm:$0xff]  }
 0x1a1   : > { %v4182_v56 = vunpack.c.h.bf16 %v3445_v53  ;;  %v2435_v63 = vunpack.c.h.bf16 %v4183_v17  ;;  %2004 = vst.msk [vmem:[%s3653_s24 + $0x40] sm:$0xff] %vm1867_vm0, %v1972_v52  ;;  %2009 = vst.msk [vmem:[%s3653_s24 + $0x68] sm:$0xff] %vm1867_vm0, %v1977_v29  ;;  %v2546_v7 = vunpack.c.l.bf16 %v3759_v1  ;;  %v2555_v49 = vunpack.c.h.bf16 %v3813_v57  ;;  %v4190_v52 = vld [vmem:[#allocation57_spill] sm:$0xff]  ;;  %v3874_v17 = vld [vmem:[%s3265_s11 + $0x1d8] sm:$0xff]  }
 0x1a2   : > { %v1083_v21 = vmul.f32 %v4180_v28, %v4179_v30  ;;  %v1845_v45 = vadd.f32 %v1813_v2, %v4184_v51  ;;  %v1850_v58 = vadd.f32 %v1818_v3, %v1593_v25  ;;  %v1595_v40 = vadd.f32 %v1563_v33, %v1338_v35  ;;  %v1725_v43 = vpop.permute.xlu1 %1724  ;;  %v1745_v36 = vpop.permute.xlu0 %1744  ;;  %v4188_v33 = vld [vmem:[#allocation26_spill] sm:$0xff]  ;;  %v3867_v35 = vld [vmem:[%s3586_s15 + $0x50] sm:$0xff]  }
 0x1a3   : > { %v1308_v44 = vmul.f32 %v4182_v56, %v4181_v39  ;;  %v1565_v53 = vmul.f32 %v2431_v41, %v4185_v19  ;;  %v2486_v0 = vunpack.c.l.bf16 %v3766_v54  ;;  %v2495_v26 = vunpack.c.h.bf16 %v3820_v22  ;;  %v4186_v41 = vld [vmem:[#allocation12_spill] sm:$0xff] }
 0x1a4   : > { %1878 = vst.msk [vmem:[%s3640_s20 + $0x50] sm:$0xff] %vm1867_vm0, %v1845_v45  ;;  %v1974_v37 = vsub.f32 %v2542_v5, %v1845_v45  ;;  %1883 = vst.msk [vmem:[%s3640_s20 + $0x78] sm:$0xff] %vm1867_vm0, %v1850_v58  ;;  %v1979_v1 = vsub.f32 %v2551_v55, %v1850_v58  ;;  %v1815_v4 = vmul.f32 %v2482_v61, %v1725_v43  ;;  %v4187_v25 = vunpack.c.h.bf16 %v3474_v8  ;;  %v4191_v55 = vld [vmem:[#allocation49_spill] sm:$0xff]  ;;  %v4194_v45 = vld [vmem:[#allocation27_spill] sm:$0xff] }
 0x1a5   : > { %v1820_v31 = vmul.f32 %v2491_v24, %v1745_v36  ;;  %v1340_v54 = vadd.f32 %v1308_v44, %v1083_v21  ;;  %v4189_v23 = vunpack.c.h.bf16 %v3463_v32  ;;  %v2439_v5 = vunpack.c.h.bf16 %v4190_v52 }
 0x1a6   : > { %v1085_v47 = vmul.f32 %v4187_v25, %v4186_v41  ;;  %2006 = vst.msk [vmem:[%s3653_s24 + $0x50] sm:$0xff] %vm1867_vm0, %v1974_v37  ;;  %2011 = vst.msk [vmem:[%s3653_s24 + $0x78] sm:$0xff] %vm1867_vm0, %v1979_v1  ;;  %v1847_v61 = vadd.f32 %v1815_v4, %v4191_v55  ;;  %v2550_v8 = vunpack.c.l.bf16 %v3786_v13  ;;  %v2559_v29 = vunpack.c.h.bf16 %v3840_v27  ;;  %v1733_v3 = vpop.permute.xlu1 %1732  ;;  %v1753_v30 = vpop.permute.xlu0 %1752  ;;  %v3894_v1 = vld [vmem:[%s3586_s15 + $0x58] sm:$0xff]   ;;  %v3901_v25 = vld [vmem:[%s3265_s11 + $0x1e0] sm:$0xff]  }
 0x1a7   : > { %v1310_v18 = vmul.f32 %v4189_v23, %v4188_v33  ;;  %v1852_v24 = vadd.f32 %v1820_v31, %v1595_v40  ;;  %v1597_v2 = vadd.f32 %v1565_v53, %v1340_v54  ;;  %v1567_v32 = vmul.f32 %v2435_v63, %v3542_v34  ;;  %v4192_v34 = vld [vmem:[#allocation13_spill] sm:$0xff]  ;;  %v4199_v33 = vld [vmem:[#allocation28_spill] sm:$0xff] }
 0x1a8   : > { %v2490_v28 = vunpack.c.l.bf16 %v3793_v6  ;;  %v2499_v21 = vunpack.c.h.bf16 %v3847_v14  ;;  %1880 = vst.msk [vmem:[%s3640_s20 + $0x60] sm:$0xff] %vm1867_vm0, %v1847_v61  ;;  %v1976_v39 = vsub.f32 %v2546_v7, %v1847_v61  ;;  %v1817_v56 = vmul.f32 %v2486_v0, %v1733_v3  ;;  %v3921_v3 = vld [vmem:[%s3586_s15 + $0x60] sm:$0xff]  }
 0x1a9   : > { %1885 = vst.msk [vmem:[%s3640_s20 + $0x88] sm:$0xff] %vm1867_vm0, %v1852_v24  ;;  %v1981_v13 = vsub.f32 %v2555_v49, %v1852_v24  ;;  %v1822_v44 = vmul.f32 %v2495_v26, %v1753_v30  ;;  %v4193_v63 = vunpack.c.h.bf16 %v3492_v10  ;;  %v1342_v6 = vadd.f32 %v1310_v18, %v1085_v47  ;;  %v4196_v49 = vld [vmem:[#allocation52_spill] sm:$0xff] }
 0x1aa   : > { %v4195_v58 = vunpack.c.h.bf16 %v3481_v11  ;;  %v2443_v7 = vunpack.c.h.bf16 %v3521_v50  ;;  %2008 = vst.msk [vmem:[%s3653_s24 + $0x60] sm:$0xff] %vm1867_vm0, %v1976_v39  ;;  %v1849_v19 = vadd.f32 %v1817_v56, %v4196_v49  ;;  %v2554_v10 = vunpack.c.l.bf16 %v3813_v57  ;;  %v1741_v0 = vpop.permute.xlu1 %1740  ;;  %v1761_v26 = vpop.permute.xlu0 %1760  ;;  %v3928_v39 = vld [vmem:[%s3265_s11 + $0x1e8] sm:$0xff]  }
 0x1ab   : > { %v1087_v51 = vmul.f32 %v4193_v63, %v4192_v34  ;;  %2013 = vst.msk [vmem:[%s3653_s24 + $0x88] sm:$0xff] %vm1867_vm0, %v1981_v13  ;;  %v1854_v53 = vadd.f32 %v1822_v44, %v1597_v2  ;;  %v2563_v43 = vunpack.c.h.bf16 %v3867_v35  ;;  %v1599_v36 = vadd.f32 %v1567_v32, %v1342_v6  ;;  %v4204_v44 = vld [vmem:[#allocation30_spill] sm:$0xff] }
 0x1ac   : > { %v1312_v40 = vmul.f32 %v4195_v58, %v4194_v45  ;;  %v1569_v11 = vmul.f32 %v2439_v5, %v3552_v60  ;;  %v2494_v50 = vunpack.c.l.bf16 %v3820_v22  ;;  %v2503_v37 = vunpack.c.h.bf16 %v3874_v17  ;;  %1882 = vst.msk [vmem:[%s3640_s20 + $0x70] sm:$0xff] %vm1867_vm0, %v1849_v19  ;;  %v4197_v60 = vld [vmem:[#allocation14_spill] sm:$0xff]  ;;  %v4201_v5 = vld [vmem:[#allocation55_spill] sm:$0xff] }
 0x1ad   : > { %v1978_v4 = vsub.f32 %v2550_v8, %v1849_v19  ;;  %1887 = vst.msk [vmem:[%s3640_s20 + $0x98] sm:$0xff] %vm1867_vm0, %v1854_v53  ;;  %v1983_v57 = vsub.f32 %v2559_v29, %v1854_v53  ;;  %v1819_v31 = vmul.f32 %v2490_v28, %v1741_v0  ;;  %v1824_v41 = vmul.f32 %v2499_v21, %v1761_v26  ;;  %v4206_v6 = vld [vmem:[#allocation58_spill] sm:$0xff]  ;;  %v3955_v0 = vld [vmem:[%s3265_s11 + $0x1f0] sm:$0xff]  }
 0x1ae   : > { %v4198_v47 = vunpack.c.h.bf16 %v3510_v12  ;;  %v1344_v22 = vadd.f32 %v1312_v40, %v1087_v51  ;;  %v4200_v23 = vunpack.c.h.bf16 %v3499_v38  ;;  %v2447_v52 = vunpack.c.h.bf16 %v3536_v15  ;;  %v1749_v29 = vpop.permute.xlu1 %1748  ;;  %v1769_v2 = vpop.permute.xlu0 %1768 }
 0x1af   : > { %2010 = vst.msk [vmem:[%s3653_s24 + $0x70] sm:$0xff] %vm1867_vm0, %v1978_v4  ;;  %2015 = vst.msk [vmem:[%s3653_s24 + $0x98] sm:$0xff] %vm1867_vm0, %v1983_v57  ;;  %v1851_v55 = vadd.f32 %v1819_v31, %v4201_v5  ;;  %v1856_v61 = vadd.f32 %v1824_v41, %v1599_v36  ;;  %v2558_v12 = vunpack.c.l.bf16 %v3840_v27  ;;  %v2567_v24 = vunpack.c.h.bf16 %v3894_v1  ;;  %v4211_v41 = vld [vmem:[#allocation60_spill] sm:$0xff]  ;;  %v3975_v5 = vld [vmem:[%s3586_s15 + $0x70] sm:$0xff]  }
 0x1b0   : > { %v1089_v54 = vmul.f32 %v4198_v47, %v4197_v60  ;;  %v1314_v18 = vmul.f32 %v4200_v23, %v4199_v33  ;;  %v1601_v8 = vadd.f32 %v1569_v11, %v1344_v22  ;;  %v1571_v38 = vmul.f32 %v2443_v7, %v3567_v46  ;;  %v4202_v46 = vld [vmem:[#allocation15_spill] sm:$0xff] }
 0x1b1   : > { %v2498_v15 = vunpack.c.l.bf16 %v3847_v14  ;;  %v2507_v32 = vunpack.c.h.bf16 %v3901_v25  ;;  %1884 = vst.msk [vmem:[%s3640_s20 + $0x80] sm:$0xff] %vm1867_vm0, %v1851_v55  ;;  %v1980_v30 = vsub.f32 %v2554_v10, %v1851_v55  ;;  %1889 = vst.msk [vmem:[%s3640_s20 + $0xa8] sm:$0xff] %vm1867_vm0, %v1856_v61  ;;  %v1985_v27 = vsub.f32 %v2563_v43, %v1856_v61  ;;  %v3948_v10 = vld [vmem:[%s3586_s15 + $0x68] sm:$0xff]   ;;  %v4212_v33 = vld [vmem:[#allocation67_spill] sm:$0xff] }
 0x1b2   : > { %v1821_v28 = vmul.f32 %v2494_v50, %v1749_v29  ;;  %v1826_v21 = vmul.f32 %v2503_v37, %v1769_v2  ;;  %v4203_v13 = vunpack.c.h.bf16 %v3528_v59  ;;  %v1346_v14 = vadd.f32 %v1314_v18, %v1089_v54  ;;  %v1757_v49 = vpop.permute.xlu1 %1756  ;;  %v1777_v19 = vpop.permute.xlu0 %1776  ;;  %v4209_v37 = vld [vmem:[#allocation33_spill] sm:$0xff] }
 0x1b3   : > { %v4205_v34 = vunpack.c.h.bf16 %v3517_v9  ;;  %v2451_v51 = vunpack.c.h.bf16 %v3547_v42  ;;  %2012 = vst.msk [vmem:[%s3653_s24 + $0x80] sm:$0xff] %vm1867_vm0, %v1980_v30  ;;  %2017 = vst.msk [vmem:[%s3653_s24 + $0xa8] sm:$0xff] %vm1867_vm0, %v1985_v27  ;;  %v2562_v59 = vunpack.c.l.bf16 %v3867_v35  ;;  %v2571_v40 = vunpack.c.h.bf16 %v3921_v3 }
 0x1b4   : > { %v1091_v56 = vmul.f32 %v4203_v13, %v4202_v46  ;;  %v1853_v45 = vadd.f32 %v1821_v28, %v4206_v6  ;;  %v1858_v58 = vadd.f32 %v1826_v21, %v1601_v8  ;;  %v1603_v7 = vadd.f32 %v1571_v38, %v1346_v14  ;;  %v4213_v8 = vld [vmem:[#allocation17_spill] sm:$0xff]  ;;  %v4214_v38 = vld [vmem:[#allocation31_spill] sm:$0xff]  ;;  %v4219_v28 = vld [vmem:[#allocation62_spill] sm:$0xff] }
 0x1b5   : > { %v1316_v63 = vmul.f32 %v4205_v34, %v4204_v44  ;;  %v1573_v9 = vmul.f32 %v2447_v52, %v3595_v62  ;;  %v2502_v42 = vunpack.c.l.bf16 %v3874_v17  ;;  %v2511_v53 = vunpack.c.h.bf16 %v3928_v39  ;;  %v4207_v62 = vld [vmem:[#allocation16_spill] sm:$0xff]  ;;  %v4220_v44 = vld [vmem:[#allocation3_spill] sm:$0xff] }
 0x1b6   : > { %1886 = vst.msk [vmem:[%s3640_s20 + $0x90] sm:$0xff] %vm1867_vm0, %v1853_v45  ;;  %v1982_v43 = vsub.f32 %v2558_v12, %v1853_v45  ;;  %1891 = vst.msk [vmem:[%s3640_s20 + $0xb8] sm:$0xff] %vm1867_vm0, %v1858_v58  ;;  %v1987_v35 = vsub.f32 %v2567_v24, %v1858_v58  ;;  %v1823_v36 = vmul.f32 %v2498_v15, %v1757_v49  ;;  %v4208_v26 = vunpack.c.h.bf16 %v3268_v20  ;;  %v1765_v23 = vpop.permute.xlu1 %1764  ;;  %v2646_v24 = vld [vmem:[%s3265_s11 + $0x1f8] sm:$0xff]   ;;  %v4221_v49 = vld [vmem:[#allocation63_spill] sm:$0xff] }
 0x1b7   : > { %v1828_v11 = vmul.f32 %v2507_v32, %v1777_v19  ;;  %v1348_v17 = vadd.f32 %v1316_v63, %v1091_v56  ;;  %v4210_v4 = vunpack.c.h.bf16 %v4140_v16  ;;  %v2455_v31 = vunpack.c.h.bf16 %v3556_v48  ;;  %v1785_v48 = vpop.permute.xlu0 %1784  ;;  %v4217_v32 = vld [vmem:[#allocation32_spill] sm:$0xff] }
 0x1b8   : > { %v1093_v50 = vmul.f32 %v4208_v26, %v4207_v62  ;;  %2014 = vst.msk [vmem:[%s3653_s24 + $0x90] sm:$0xff] %vm1867_vm0, %v1982_v43  ;;  %2019 = vst.msk [vmem:[%s3653_s24 + $0xb8] sm:$0xff] %vm1867_vm0, %v1987_v35  ;;  %v1855_v60 = vadd.f32 %v1823_v36, %v4211_v41  ;;  %v2566_v20 = vunpack.c.l.bf16 %v3894_v1  ;;  %v2575_v54 = vunpack.c.h.bf16 %v3948_v10 }
 0x1b9   : > { %v1318_v57 = vmul.f32 %v4210_v4, %v4209_v37  ;;  %v1860_v47 = vadd.f32 %v1828_v11, %v1603_v7  ;;  %v1605_v22 = vadd.f32 %v1573_v9, %v1348_v17  ;;  %v1575_v16 = vmul.f32 %v2451_v51, %v4212_v33  ;;  %v2661_v7 = vld [vmem:[%s3586_s15 + $0x78] sm:$0xff]  }
 0x1ba   : > { %v2506_v18 = vunpack.c.l.bf16 %v3901_v25  ;;  %v2515_v52 = vunpack.c.h.bf16 %v3955_v0  ;;  %1888 = vst.msk [vmem:[%s3640_s20 + $0xa0] sm:$0xff] %vm1867_vm0, %v1855_v60  ;;  %v1984_v55 = vsub.f32 %v2562_v59, %v1855_v60  ;;  %v1825_v61 = vmul.f32 %v2502_v42, %v1765_v23  ;;  %v4216_v25 = vld [vmem:[#allocation34_spill] sm:$0xff]  ;;  %v1773_v63 = vpop.permute.xlu1 %1772 }
 0x1bb   : > { %1893 = vst.msk [vmem:[%s3640_s20 + $0xc8] sm:$0xff] %vm1867_vm0, %v1860_v47  ;;  %v1989_v1 = vsub.f32 %v2571_v40, %v1860_v47  ;;  %v1830_v12 = vmul.f32 %v2511_v53, %v1785_v48  ;;  %v4215_v29 = vunpack.c.h.bf16 %v4214_v38  ;;  %v1350_v15 = vadd.f32 %v1318_v57, %v1093_v50  ;;  %v1793_v51 = vpop.permute.xlu0 %1792  ;;  %v4224_v48 = vld [vmem:[#allocation66_spill] sm:$0xff] }
 0x1bc   : > { %v4218_v30 = vunpack.c.h.bf16 %v4217_v32  ;;  %2016 = vst.msk [vmem:[%s3653_s24 + $0xa0] sm:$0xff] %vm1867_vm0, %v1984_v55  ;;  %v1857_v21 = vadd.f32 %v1825_v61, %v4219_v28  ;;  %v2570_v13 = vunpack.c.l.bf16 %v3921_v3  ;;  %v2579_v56 = vunpack.c.h.bf16 %v3975_v5 }
 0x1bd   : > { %v1095_v2 = vmul.f32 %v4215_v29, %v4213_v8  ;;  %2021 = vst.msk [vmem:[%s3653_s24 + $0xc8] sm:$0xff] %vm1867_vm0, %v1989_v1  ;;  %v1862_v46 = vadd.f32 %v1830_v12, %v1605_v22  ;;  %v1607_v14 = vadd.f32 %v1575_v16, %v1350_v15  ;;  %v1577_v34 = vmul.f32 %v2455_v31, %v4220_v44 }
 0x1be   : > { %v1320_v27 = vmul.f32 %v4218_v30, %v4216_v25  ;;  %v2510_v6 = vunpack.c.l.bf16 %v3928_v39  ;;  %v2519_v45 = vunpack.c.h.bf16 %v2646_v24  ;;  %1890 = vst.msk [vmem:[%s3640_s20 + $0xb0] sm:$0xff] %vm1867_vm0, %v1857_v21  ;;  %v1986_v58 = vsub.f32 %v2566_v20, %v1857_v21  ;;  %v1781_v53 = vpop.permute.xlu1 %1780  ;;  %v4223_v20 = vld [vmem:[#allocation65_spill] sm:$0xff] }
 0x1bf   : > { %1895 = vst.msk [vmem:[%s3640_s20 + $0xd8] sm:$0xff] %vm1867_vm0, %v1862_v46  ;;  %v1991_v59 = vsub.f32 %v2575_v54, %v1862_v46  ;;  %v1827_v3 = vmul.f32 %v2506_v18, %v1773_v63  ;;  %v1832_v40 = vmul.f32 %v2515_v52, %v1793_v51  ;;  %v2574_v43 = vunpack.c.l.bf16 %v3948_v10  ;;  %v1801_v35 = vpop.permute.xlu0 %1800  ;;  %v4222_v10 = vld [vmem:[#allocation64_spill] sm:$0xff] }
 0x1c0   : > { %v1352_v9 = vadd.f32 %v1320_v27, %v1095_v2  ;;  %2018 = vst.msk [vmem:[%s3653_s24 + $0xb0] sm:$0xff] %vm1867_vm0, %v1986_v58  ;;  %v2583_v36 = vunpack.c.h.bf16 %v2661_v7  ;;  %v2514_v11 = vunpack.c.l.bf16 %v3955_v0  ;;  %v1829_v50 = vmul.f32 %v2510_v6, %v1781_v53 }
 0x1c1   : > { %2023 = vst.msk [vmem:[%s3653_s24 + $0xd8] sm:$0xff] %vm1867_vm0, %v1991_v59  ;;  %v1859_v39 = vadd.f32 %v1827_v3, %v4221_v49  ;;  %v1864_v19 = vadd.f32 %v1832_v40, %v1607_v14  ;;  %v1834_v17 = vmul.f32 %v2519_v45, %v1801_v35  ;;  %v2578_v0 = vunpack.c.l.bf16 %v3975_v5 }
 0x1c2   : > { %v1609_v42 = vadd.f32 %v1577_v34, %v1352_v9  ;;  %v1861_v37 = vadd.f32 %v1829_v50, %v4222_v10  ;;  %v1789_v57 = vpop.permute.xlu1 %1788  ;;  %v2518_v47 = vunpack.c.l.bf16 %v2646_v24  ;;  %v2582_v23 = vunpack.c.l.bf16 %v2661_v7 }
 0x1c3   : > { %1892 = vst.msk [vmem:[%s3640_s20 + $0xc0] sm:$0xff] %vm1867_vm0, %v1859_v39  ;;  %v1988_v62 = vsub.f32 %v2570_v13, %v1859_v39  ;;  %1897 = vst.msk [vmem:[%s3640_s20 + $0xe8] sm:$0xff] %vm1867_vm0, %v1864_v19  ;;  %v1993_v26 = vsub.f32 %v2579_v56, %v1864_v19  ;;  %v1831_v60 = vmul.f32 %v2514_v11, %v1789_v57 }
 0x1c4   : > { %v1866_v4 = vadd.f32 %v1834_v17, %v1609_v42  ;;  %1894 = vst.msk [vmem:[%s3640_s20 + $0xd0] sm:$0xff] %vm1867_vm0, %v1861_v37  ;;  %v1990_v31 = vsub.f32 %v2574_v43, %v1861_v37 }
 0x1c5   : > { %2020 = vst.msk [vmem:[%s3653_s24 + $0xc0] sm:$0xff] %vm1867_vm0, %v1988_v62  ;;  %2025 = vst.msk [vmem:[%s3653_s24 + $0xe8] sm:$0xff] %vm1867_vm0, %v1993_v26  ;;  %v1863_v54 = vadd.f32 %v1831_v60, %v4223_v20 }
 0x1c6   : > { %1899 = vst.msk [vmem:[%s3640_s20 + $0xf8] sm:$0xff] %vm1867_vm0, %v1866_v4  ;;  %v1995_v41 = vsub.f32 %v2583_v36, %v1866_v4  ;;  %2022 = vst.msk [vmem:[%s3653_s24 + $0xd0] sm:$0xff] %vm1867_vm0, %v1990_v31  ;;  %v1797_v22 = vpop.permute.xlu1 %1796 }
 0x1c7   : > { %1896 = vst.msk [vmem:[%s3640_s20 + $0xe0] sm:$0xff] %vm1867_vm0, %v1863_v54  ;;  %v1992_v33 = vsub.f32 %v2578_v0, %v1863_v54  ;;  %v1833_v16 = vmul.f32 %v2518_v47, %v1797_v22 }
 0x1c8   : > { %2027 = vst.msk [vmem:[%s3653_s24 + $0xf8] sm:$0xff] %vm1867_vm0, %v1995_v41 }
 0x1c9   : > { %2024 = vst.msk [vmem:[%s3653_s24 + $0xe0] sm:$0xff] %vm1867_vm0, %v1992_v33  ;;  %v1865_v18 = vadd.f32 %v1833_v16, %v4224_v48 }
 0x1cb   : > { %1898 = vst.msk [vmem:[%s3640_s20 + $0xf0] sm:$0xff] %vm1867_vm0, %v1865_v18  ;;  %v1994_v52 = vsub.f32 %v2582_v23, %v1865_v18 }
 0x1cd   : > { %2026 = vst.msk [vmem:[%s3653_s24 + $0xf0] sm:$0xff] %vm1867_vm0, %v1994_v52 }
 0x1ce PF: > { %p12_p9 = scmp.ge.s32.totalorder %s2768_s19, 4   ;;  %s4225_s15 = smov %s2716_s16 }
 0x1cf   : > { %s4226_s16 = smov %s2777_s22  ;;  %s4227_s17 = smov %s2768_s19 }
 0x1d0   :  { %14 = sbr.rel (!%p12_p9) target bundleno = 2 (0x2), region = 129 }

// kernel: squeeze_body_edge_high_forward.6
= control target key start
LH: loop header
LB: loop body
LE: loop exit
PB: predicated region body
PF: predicated region fallthrough
CT: control target
= control target key end

     0   :  { %s10032_s15 = smov 0   ;;  %s11621_s0 = inlined_call_operand.vmem [shape: bf16[2,342,4], index: 0, kind: input, shape index: {}]   ;;  %s11622_s1 = inlined_call_operand.vmem [shape: bf16[2,342,4], index: 1, kind: input, shape index: {}]   ;;  %s11623_s2 = inlined_call_operand.vmem [shape: bf16[9,4,128], index: 2, kind: input, shape index: {}]   ;;  %s11624_s3 = inlined_call_operand.vmem [shape: bf16[9,4,128], index: 3, kind: input, shape index: {}]   ;;  %s11625_s4 = inlined_call_operand.vmem [shape: f32[2,288,2], index: 4, kind: output, shape index: {}]  }
   0x1 LB: > { %s7571_s16 = sadd.s32 4294967295, %s10005_s15   ;;  %p7575_p0 = scmp.ge.s32.totalorder %s10005_s15, 1  ;;  %s10005_s15 = sphi %s10032_s15, %s14_s15  }
   0x2   : > { %p172_p1 = scmp.lt.s32.totalorder %s10005_s15, 3 }
   0x4   : > { %p173_p2 = pnand %p7575_p0, %p172_p1 }
   0x6   : > { %176 = sbr.rel (%p173_p2) target bundleno = 889 (0x379), region = 36 }
   0xd   : > { %v292_v0 = vld [vmem:[%s11624_s3] sm:$0x3]  ;;  %vm438_vm0 = vcmask 1041408   ;;  %p203_p3 = scmp.lt.s32.totalorder %s7571_s16, 1  ;;  %v7863_v2 = vld [vmem:[%s11624_s3 + $0x8] sm:$0x3] }
   0xe   : > { %9719 = vmatprep.subr.msk.bf16.mxu1 %vm438_vm0, %v292_v0  ;;  %v440_v1 = vsel %vm438_vm0, %v292_v0, 0  ;;  %v291_v3 = vld [vmem:[%s11623_s2] sm:$0x3]  ;;  %9728 = vmatprep.subr.msk.bf16.mxu0 %vm438_vm0, %v7863_v2  ;;  %v4227_v4 = vsel %vm438_vm0, %v7863_v2, 0  ;;  %v7883_v5 = vld [vmem:[%s11623_s2 + $0xa] sm:$0x3] }
   0xf   : > { %8424 = vmatpush3.bf16.msra.mxu1 %v440_v1  ;;  %s11660_s16 = smov (!%p203_p3, %s7571_s16), 1  ;;  %8766 = vmatpush3.bf16.msra.mxu0 %v4227_v4  ;;  %vm383_vm1 = vcmask 31744   ;;  %vm3556_vm2 = vsmask.f32 6400  ;;  %v10072_v7 = vld [vmem:[%s11623_s2 + $0x2] sm:$0x3] }
  0x10   : > { %9720 = vmatprep.subr.msk.bf16.mxu1 %vm438_vm0, %v291_v3  ;;  %s9737_s25 = smul.u32 172, %s11660_s16  ;;  %9729 = vmatprep.subr.msk.bf16.mxu0 %vm438_vm0, %v7883_v5  ;;  %v764_v9 = vsel %vm438_vm0, %v291_v3, 0  ;;  %v4542_v40 = vsel %vm438_vm0, %v7883_v5, 0  ;;  %v10103_v44 = vld [vmem:[%s11624_s3 + $0xa] sm:$0x3]  ;;  %vm4449_vm3 = vcmask 1045504  }
  0x11   : > { %vm1112_vm4 = vsmask.f32 7424  ;;  %vm2051_vm5 = vcmask 1046528   ;;  %vm5954_vm6 = vsmask.f32 5376  ;;  %vm6847_vm7 = vcmask 1044480  }
  0x12   : > { %s10066_s28 = scalar_lea.vmem %s11622_s1, %s9737_s25  ;;  %s10150_s9 = scalar_lea.vmem %s11621_s0, %s9737_s25  ;;  %vm7467_vm8 = vcmask 15360  }
  0x13   : > { %v9747_v6 = vld [vmem:[%s10066_s28] sm:$0xff]   ;;  %v9748_v8 = vld [vmem:[%s10066_s28 + $0x8] sm:$0xff]   ;;  %v9750_v13 = vld [vmem:[%s10066_s28 + $0x10] sm:$0xff]  }
  0x14   : > { %8425 = vmatprep.mubr.msk.bf16.mxu1 %vm383_vm1, %v9747_v6  ;;  %v2708_v10 = vld [vmem:[%s10066_s28 + $0x8] sm:$0xe]  ;;  %v2709_v11 = vld [vmem:[%s10066_s28 + $0xc] sm:$0xf]  ;;  %v9751_v14 = vld [vmem:[%s10066_s28 + $0x10] sm:$0xff]   ;;  %v4011_v17 = vshrl.u32 %v9750_v13, 16 }
  0x15   : > { %8426 = vmatmul.mubr.msk.bf16.vlgmr.msra.gmra.mrb[0].mxu1 %vm383_vm1, %v9748_v8  ;;  %v10080_v12 = vcombine.low %v2708_v10, %v2709_v11  ;;  %v4014_v18 = vshll.u32 %v9750_v13, 16  ;;  %v9752_v19 = vld [vmem:[%s10066_s28 + $0x18] sm:$0xff]   ;;  %v9754_v25 = vld [vmem:[%s10066_s28 + $0x20] sm:$0xff]   ;;  %v9756_v35 = vld [vmem:[%s10066_s28 + $0x28] sm:$0xff]  }
  0x16   : > { %8462 = vmatpush3.bf16.msra.mxu1 %v764_v9  ;;  %8429 = vmatprep.mubr.msk.bf16.mxu1 %vm383_vm1, %v9751_v14  ;;  %v4013_v22 = vrot.slane %v4011_v17, 1  ;;  %v9753_v24 = vld [vmem:[%s10066_s28 + $0x18] sm:$0xff]   ;;  %v4020_v26 = vshrl.u32 %v9752_v19, 16  ;;  %v4023_v27 = vshll.u32 %v9752_v19, 16  ;;  %v4029_v30 = vshrl.u32 %v9754_v25, 16  ;;  %v9755_v34 = vld [vmem:[%s10066_s28 + $0x20] sm:$0xff]  }
  0x17   : > { %11639 = vst [vmem:[#allocation2_spill] sm:$0xff] %v10080_v12  ;;  %v4003_v15 = vshrl.u32 %v10080_v12, 16  ;;  %v4006_v16 = vshll.u32 %v10080_v12, 16  ;;  %9721 = vmatprep.subr.msk.bf16.mxu1 %vm438_vm0, %v10072_v7  ;;  %v4016_v23 = vrot.slane %v4014_v18, 2  ;;  %v4032_v31 = vshll.u32 %v9754_v25, 16  ;;  %v9758_v43 = vld [vmem:[%s10066_s28 + $0x30] sm:$0xff]  }
  0x18   : > { %v4022_v32 = vrot.slane %v4020_v26, 1  ;;  %v4025_v33 = vrot.slane %v4023_v27, 2  ;;  %v4031_v37 = vrot.slane %v4029_v30, 1  ;;  %v4038_v41 = vshrl.u32 %v9756_v35, 16  ;;  %v9757_v49 = vld [vmem:[%s10066_s28 + $0x28] sm:$0xff]   ;;  %v9760_v53 = vld [vmem:[%s10066_s28 + $0x38] sm:$0xff]  }
  0x19   : > { %v4005_v20 = vrot.slane %v4003_v15, 1  ;;  %v4008_v21 = vrot.slane %v4006_v16, 2  ;;  %v4017_v29 = vor.u32 %v4016_v23, %v4013_v22  ;;  %v4034_v38 = vrot.slane %v4032_v31, 2  ;;  %v9759_v56 = vld [vmem:[%s10066_s28 + $0x30] sm:$0xff]   ;;  %v9762_v60 = vld [vmem:[%s10066_s28 + $0x40] sm:$0xff]   ;;  %v9764_v3 = vld [vmem:[%s10066_s28 + $0x48] sm:$0xff]  }
  0x1a   : > { %v4026_v39 = vor.u32 %v4025_v33, %v4022_v32  ;;  %v4041_v42 = vshll.u32 %v9756_v35, 16  ;;  %v4040_v47 = vrot.slane %v4038_v41, 1  ;;  %v4047_v50 = vshrl.u32 %v9758_v43, 16  ;;  %v9761_v6 = vld [vmem:[%s10066_s28 + $0x38] sm:$0xff]   ;;  %v9766_v9 = vld [vmem:[%s10066_s28 + $0x50] sm:$0xff]   ;;  %v9763_v14 = vld [vmem:[%s10066_s28 + $0x40] sm:$0xff]  }
  0x1b   : > { %v4009_v28 = vor.u32 %v4008_v21, %v4005_v20  ;;  %v4035_v45 = vor.u32 %v4034_v38, %v4031_v37  ;;  %v4050_v52 = vshll.u32 %v9758_v43, 16  ;;  %v4056_v58 = vshrl.u32 %v9760_v53, 16  ;;  %v9768_v20 = vld [vmem:[%s10066_s28 + $0x58] sm:$0xff]   ;;  %v9770_v22 = vld [vmem:[%s10066_s28 + $0x60] sm:$0xff]   ;;  %v9765_v26 = vld [vmem:[%s10066_s28 + $0x48] sm:$0xff]  }
  0x1c   : > { %v4027_v46 = vsel %vm3556_vm2, %v4017_v29, %v4026_v39  ;;  %v4043_v48 = vrot.slane %v4041_v42, 2  ;;  %v4049_v55 = vrot.slane %v4047_v50, 1  ;;  %v4059_v59 = vshll.u32 %v9760_v53, 16  ;;  %v9772_v38 = vld [vmem:[%s10066_s28 + $0x68] sm:$0xff]   ;;  %v9774_v41 = vld [vmem:[%s10066_s28 + $0x70] sm:$0xff]   ;;  %v9769_v42 = vld [vmem:[%s10066_s28 + $0x58] sm:$0xff]  }
  0x1d   : > { %v4018_v36 = vsel %vm3556_vm2, %v4009_v28, %v4017_v29  ;;  %8430 = vmatmul.mubr.msk.bf16.gmra.mrb[4].mxu1 %vm383_vm1, %v9753_v24  ;;  %v4036_v51 = vsel %vm3556_vm2, %v4026_v39, %v4035_v45  ;;  %v4052_v57 = vrot.slane %v4050_v52, 2  ;;  %v4058_v62 = vrot.slane %v4056_v58, 1  ;;  %v9767_v28 = vld [vmem:[%s10066_s28 + $0x50] sm:$0xff]   ;;  %v10674_v12 = vld [vmem:[%s10066_s28 + $0x78] sm:$0xff]  }
  0x1e   : > { %8767 = vmatprep.mubr.msk.bf16.mxu0 %vm383_vm1, %v4018_v36  ;;  %8433 = vmatprep.mubr.msk.bf16.mxu1 %vm383_vm1, %v9755_v34  ;;  %v4044_v54 = vor.u32 %v4043_v48, %v4040_v47  ;;  %v4061_v63 = vrot.slane %v4059_v59, 2  ;;  %v4065_v0 = vshrl.u32 %v9762_v60, 16  ;;  %v4068_v2 = vshll.u32 %v9762_v60, 16  ;;  %v9773_v60 = vld [vmem:[%s10066_s28 + $0x68] sm:$0xff]   ;;  %11644 = vst [vmem:[#allocation7_spill] sm:$0xff] %v10674_v12 }
  0x1f   : > { %8768 = vmatmul.mubr.msk.bf16.vlgmr.msra.gmra.mrb[0].mxu0 %vm383_vm1, %v4027_v46  ;;  %v4053_v61 = vor.u32 %v4052_v57, %v4049_v55  ;;  %v4074_v10 = vshrl.u32 %v9764_v3, 16  ;;  %v4077_v11 = vshll.u32 %v9764_v3, 16  ;;  %v4083_v16 = vshrl.u32 %v9766_v9, 16  ;;  %v9778_v55 = vld [vmem:[%s10066_s28 + $0x80] sm:$0xff]  }
  0x20   : > { %8804 = vmatpush3.bf16.msra.mxu0 %v4542_v40  ;;  %8771 = vmatprep.mubr.msk.bf16.mxu0 %vm383_vm1, %v4036_v51  ;;  %v4045_v1 = vsel %vm3556_vm2, %v4035_v45, %v4044_v54  ;;  %v4067_v5 = vrot.slane %v4065_v0, 1  ;;  %v4070_v8 = vrot.slane %v4068_v2, 2  ;;  %v4062_v13 = vor.u32 %v4061_v63, %v4058_v62  ;;  %v9771_v45 = vld [vmem:[%s10066_s28 + $0x60] sm:$0xff]   ;;  %v9776_v51 = vld [vmem:[%s10066_s28 + $0x78] sm:$0xff]  }
  0x21   : > { %9730 = vmatprep.subr.msk.bf16.mxu0 %vm438_vm0, %v10103_v44  ;;  %v4054_v4 = vsel %vm3556_vm2, %v4044_v54, %v4053_v61  ;;  %v4086_v17 = vshll.u32 %v9766_v9, 16  ;;  %v4076_v18 = vrot.slane %v4074_v10, 1  ;;  %v4079_v19 = vrot.slane %v4077_v11, 2  ;;  %v9782_v11 = vld [vmem:[%s10066_s28 + $0x90] sm:$0xff]  }
  0x22   : > { %v4071_v15 = vor.u32 %v4070_v8, %v4067_v5  ;;  %v4063_v21 = vsel %vm3556_vm2, %v4053_v61, %v4062_v13  ;;  %v4085_v24 = vrot.slane %v4083_v16, 1  ;;  %v4092_v29 = vshrl.u32 %v9768_v20, 16  ;;  %v9775_v61 = vld [vmem:[%s10066_s28 + $0x70] sm:$0xff]  }
  0x23   : > { %v4088_v25 = vrot.slane %v4086_v17, 2  ;;  %v4080_v27 = vor.u32 %v4079_v19, %v4076_v18  ;;  %v4095_v30 = vshll.u32 %v9768_v20, 16  ;;  %v4101_v31 = vshrl.u32 %v9770_v22, 16 }
  0x24   : > { %v4072_v23 = vsel %vm3556_vm2, %v4062_v13, %v4071_v15  ;;  %v4104_v32 = vshll.u32 %v9770_v22, 16  ;;  %v4094_v35 = vrot.slane %v4092_v29, 1  ;;  %v4110_v46 = vshrl.u32 %v9772_v38, 16  ;;  %v9777_v13 = vld [vmem:[%s10066_s28 + $0x78] sm:$0xff]   ;;  %v9783_v29 = vld [vmem:[%s10150_s9] sm:$0xff]  }
  0x25   : > { %8434 = vmatmul.mubr.msk.bf16.gmra.mrb[8].mxu1 %vm383_vm1, %v9757_v49  ;;  %v4089_v33 = vor.u32 %v4088_v25, %v4085_v24  ;;  %v4081_v34 = vsel %vm3556_vm2, %v4071_v15, %v4080_v27  ;;  %v4097_v36 = vrot.slane %v4095_v30, 2  ;;  %v4103_v37 = vrot.slane %v4101_v31, 1 }
  0x26   : > { %8437 = vmatprep.mubr.msk.bf16.mxu1 %vm383_vm1, %v9759_v56  ;;  %v4106_v40 = vrot.slane %v4104_v32, 2  ;;  %v4113_v47 = vshll.u32 %v9772_v38, 16  ;;  %v4119_v49 = vshrl.u32 %v9774_v41, 16  ;;  %v4122_v50 = vshll.u32 %v9774_v41, 16 }
  0x27   : > { %8772 = vmatmul.mubr.msk.bf16.gmra.mrb[4].mxu0 %vm383_vm1, %v4045_v1  ;;  %v4090_v39 = vsel %vm3556_vm2, %v4080_v27, %v4089_v33  ;;  %v4098_v43 = vor.u32 %v4097_v36, %v4094_v35  ;;  %v4112_v53 = vrot.slane %v4110_v46, 1  ;;  %v4128_v59 = vshrl.u32 %v9776_v51, 16  ;;  %v4442_v35 = vld [vmem:[%s10150_s9 + $0x8] sm:$0xc] }
  0x28   : > { %8775 = vmatprep.mubr.msk.bf16.mxu0 %vm383_vm1, %v4054_v4  ;;  %v4107_v48 = vor.u32 %v4106_v40, %v4103_v37  ;;  %v4115_v54 = vrot.slane %v4113_v47, 2  ;;  %v4121_v57 = vrot.slane %v4119_v49, 1  ;;  %v4124_v58 = vrot.slane %v4122_v50, 2  ;;  %v9780_v4 = vld [vmem:[%s10066_s28 + $0x88] sm:$0xff]   ;;  %v9787_v40 = vld [vmem:[%s10150_s9 + $0x10] sm:$0xff]   ;;  %v9790_v50 = vld [vmem:[%s10150_s9 + $0x18] sm:$0xff]  }
  0x29   : > { %v4099_v52 = vsel %vm3556_vm2, %v4089_v33, %v4098_v43  ;;  %v4131_v63 = vshll.u32 %v9776_v51, 16  ;;  %v4137_v0 = vshrl.u32 %v9778_v55, 16  ;;  %v4140_v2 = vshll.u32 %v9778_v55, 16 }
  0x2a   : > { %v4108_v56 = vsel %vm3556_vm2, %v4098_v43, %v4107_v48  ;;  %v4116_v62 = vor.u32 %v4115_v54, %v4112_v53  ;;  %v4125_v1 = vor.u32 %v4124_v58, %v4121_v57  ;;  %v4130_v3 = vrot.slane %v4128_v59, 1  ;;  %v9791_v53 = vld [vmem:[%s10150_s9 + $0x18] sm:$0xff]   ;;  %v9793_v54 = vld [vmem:[%s10150_s9 + $0x20] sm:$0xff]   ;;  %v9794_v57 = vld [vmem:[%s10150_s9 + $0x28] sm:$0xff]  }
  0x2b   : > { %v4139_v8 = vrot.slane %v4137_v0, 1  ;;  %v4142_v10 = vrot.slane %v4140_v2, 2  ;;  %v4146_v16 = vshrl.u32 %v9780_v4, 16  ;;  %v4149_v17 = vshll.u32 %v9780_v4, 16  ;;  %v10211_v58 = vld [vmem:[%s11624_s3 + $0x2] sm:$0x3] }
  0x2c   : > { %v4117_v5 = vsel %vm3556_vm2, %v4107_v48, %v4116_v62  ;;  %v4126_v9 = vsel %vm3556_vm2, %v4116_v62, %v4125_v1  ;;  %v4155_v19 = vshrl.u32 %v9782_v11, 16  ;;  %v4158_v20 = vshll.u32 %v9782_v11, 16  ;;  %v10222_v62 = vld [vmem:[%s11623_s2 + $0xc] sm:$0x3]  ;;  %v9797_v0 = vld [vmem:[%s10150_s9 + $0x30] sm:$0xff]  }
  0x2d   : > { %8438 = vmatmul.mubr.msk.bf16.gmra.mrb[12].mxu1 %vm383_vm1, %v9761_v6  ;;  %v4133_v6 = vrot.slane %v4131_v63, 2  ;;  %v4143_v18 = vor.u32 %v4142_v10, %v4139_v8  ;;  %v4151_v24 = vrot.slane %v4149_v17, 2  ;;  %v1316_v46 = vsel %vm438_vm0, %v10072_v7, 0  ;;  %v9795_v63 = vld [vmem:[%s10150_s9 + $0x28] sm:$0xff]  }
  0x2e   : > { %8441 = vmatprep.mubr.msk.bf16.mxu1 %vm383_vm1, %v9763_v14  ;;  %v9779_v14 = vld [vmem:[%s10066_s28 + $0x80] sm:$0xff]   ;;  %v4160_v27 = vrot.slane %v4158_v20, 2  ;;  %v4451_v48 = vrot.slane %v9787_v40, 2  ;;  %v4453_v7 = vrot.slane %v9790_v50, 2  ;;  %v4854_v59 = vsel %vm438_vm0, %v10103_v44, 0  ;;  %v9814_v40 = vld [vmem:[%s10150_s9 + $0x78] sm:$0xff]  }
  0x2f   : > { %8776 = vmatmul.mubr.msk.bf16.gmra.mrb[8].mxu0 %vm383_vm1, %v4063_v21  ;;  %v4134_v15 = vor.u32 %v4133_v6, %v4130_v3  ;;  %v9784_v21 = vld [vmem:[%s10066_s28 + $0x98] ss:$0 sps:$4 sm:$0x33]   ;;  %v4457_v44 = vrot.slane %v9794_v57, 2  ;;  %v9819_v57 = vld [vmem:[%s10150_s9 + $0x88] sm:$0xff]  }
  0x30   : > { %8779 = vmatprep.mubr.msk.bf16.mxu0 %vm383_vm1, %v4072_v23  ;;  %v4148_v23 = vrot.slane %v4146_v16, 1  ;;  %v4164_v31 = vshrl.u32 %v9784_v21, 16  ;;  %v4167_v32 = vshll.u32 %v9784_v21, 16  ;;  %v9798_v3 = vld [vmem:[%s10150_s9 + $0x38] sm:$0xff]   ;;  %v9803_v16 = vld [vmem:[%s10150_s9 + $0x48] sm:$0xff]  }
  0x31   : > { %v4135_v22 = vsel %vm3556_vm2, %v4125_v1, %v4134_v15  ;;  %v4144_v25 = vsel %vm3556_vm2, %v4134_v15, %v4143_v18  ;;  %v9799_v6 = vld [vmem:[%s10150_s9 + $0x38] sm:$0xff]   ;;  %v4461_v8 = vrot.slane %v9798_v3, 2  ;;  %v9804_v15 = vld [vmem:[%s10150_s9 + $0x50] sm:$0xff]  }
  0x32   : > { %v4152_v30 = vor.u32 %v4151_v24, %v4148_v23  ;;  %v4166_v37 = vrot.slane %v4164_v31, 1  ;;  %v4169_v38 = vrot.slane %v4167_v32, 2  ;;  %v9806_v21 = vld [vmem:[%s10150_s9 + $0x58] sm:$0xff]   ;;  %v9808_v23 = vld [vmem:[%s10150_s9 + $0x60] sm:$0xff]   ;;  %v9812_v31 = vld [vmem:[%s10150_s9 + $0x70] sm:$0xff]  }
  0x33   : > { %v9807_v24 = vld [vmem:[%s10150_s9 + $0x58] sm:$0xff]   ;;  %v943_v32 = vld [vmem:[%s10150_s9] sm:$0xf] }
  0x34   : > { %v4153_v36 = vsel %vm3556_vm2, %v4143_v18, %v4152_v30  ;;  %v4170_v43 = vor.u32 %v4169_v38, %v4166_v37  ;;  %v9805_v18 = vld [vmem:[%s10150_s9 + $0x50] sm:$0xff]   ;;  %v4475_v37 = vrot.slane %v9812_v31, 2  ;;  %v10336_v31 = vld [vmem:[%s11623_s2 + $0x4] sm:$0x3] }
  0x35   : > { %8442 = vmatmul.mubr.msk.bf16.gmra.mrb[16].mxu1 %vm383_vm1, %v9765_v26  ;;  %v4157_v26 = vrot.slane %v4155_v19, 1  ;;  %v4467_v19 = vrot.slane %v9804_v15, 2 }
  0x36   : > { %8445 = vmatprep.mubr.msk.bf16.mxu1 %vm383_vm1, %v9767_v28  ;;  %v9781_v28 = vld [vmem:[%s10066_s28 + $0x88] sm:$0xff]  }
  0x37   : > { %8780 = vmatmul.mubr.msk.bf16.gmra.mrb[12].mxu0 %vm383_vm1, %v4081_v34  ;;  %v4161_v33 = vor.u32 %v4160_v27, %v4157_v26  ;;  %v2672_v34 = vld [vmem:[%s10150_s9 + $0xc] sm:$0xf]  ;;  %v9809_v26 = vld [vmem:[%s10150_s9 + $0x60] sm:$0xff]   ;;  %v4471_v27 = vrot.slane %v9808_v23, 2 }
  0x38   : > { %8783 = vmatprep.mubr.msk.bf16.mxu0 %vm383_vm1, %v4090_v39  ;;  %v7884_v41 = vcombine.low %v4442_v35, %v2672_v34  ;;  %v9811_v34 = vld [vmem:[%s10150_s9 + $0x68] sm:$0xff]  }
  0x39   : > { %v4162_v39 = vsel %vm3556_vm2, %v4152_v30, %v4161_v33  ;;  %v4171_v49 = vsel %vm3556_vm2, %v4161_v33, %v4170_v43  ;;  %v944_v33 = vld [vmem:[%s10150_s9 + $0x4] sm:$0xf]  ;;  %v10279_v43 = vld [vmem:[%s10150_s9 + $0x8] sm:$0xff]  }
  0x3a   : > { %v4450_v47 = vrot.slane %v7884_v41, 2  ;;  %v7652_v38 = vcombine.low %v943_v32, %v944_v33  ;;  %v9816_v41 = vld [vmem:[%s10150_s9 + $0x80] sm:$0xff]  }
  0x3c   : > { %v4452_v51 = vsel %vm4449_vm3, %v4450_v47, %v4451_v48  ;;  %v4477_v47 = vrot.slane %v9814_v40, 2  ;;  %v1114_v50 = vshrl.u32 %v7652_v38, 16  ;;  %v9909_v40 = vld [vmem:[%s10066_s28 + $0x18] sm:$0xff]  }
  0x3d   : > { %8446 = vmatmul.mubr.msk.bf16.gmra.mrb[20].mxu1 %vm383_vm1, %v9769_v42  ;;  %v9785_v42 = vld [vmem:[%s10150_s9 + $0x8] sm:$0xff]  }
  0x3e   : > { %8449 = vmatprep.mubr.msk.bf16.mxu1 %vm383_vm1, %v9771_v45  ;;  %v9789_v45 = vld [vmem:[%s10150_s9 + $0x10] sm:$0xff]  }
  0x3f   : > { %8784 = vmatmul.mubr.msk.bf16.gmra.mrb[16].mxu0 %vm383_vm1, %v4099_v52  ;;  %v9792_v52 = vld [vmem:[%s10150_s9 + $0x20] sm:$0xff]  }
  0x40   : > { %8787 = vmatprep.mubr.msk.bf16.mxu0 %vm383_vm1, %v4108_v56  ;;  %v4455_v55 = vrot.slane %v9792_v52, 2  ;;  %v4454_v56 = vsel %vm4449_vm3, %v4451_v48, %v4453_v7  ;;  %v9817_v48 = vld [vmem:[%s10150_s9 + $0x80] sm:$0xff]   ;;  %v1121_v52 = vshll.u32 %v10279_v43, 16 }
  0x42   : > { %v4458_v2 = vsel %vm4449_vm3, %v4455_v55, %v4457_v44 }
  0x45   : > { %8450 = vmatmul.mubr.msk.bf16.gmra.mrb[24].mxu1 %vm383_vm1, %v9773_v60  ;;  %v4456_v60 = vsel %vm4449_vm3, %v4453_v7, %v4455_v55  ;;  %v10289_v7 = vld [vmem:[%s10150_s9 + $0x10] sm:$0xff]  }
  0x46   : > { %8453 = vmatprep.mubr.msk.bf16.mxu1 %vm383_vm1, %v9775_v61  ;;  %v9796_v61 = vld [vmem:[%s10150_s9 + $0x30] sm:$0xff]  }
  0x47   : > { %8788 = vmatmul.mubr.msk.bf16.gmra.mrb[20].mxu0 %vm383_vm1, %v4117_v5  ;;  %v4459_v1 = vrot.slane %v9796_v61, 2  ;;  %v9800_v5 = vld [vmem:[%s10150_s9 + $0x40] sm:$0xff]   ;;  %v9820_v55 = vld [vmem:[%s10150_s9 + $0x90] sm:$0xff]   ;;  %v10297_v61 = vld [vmem:[%s10150_s9 + $0x18] sm:$0xff]  }
  0x48   : > { %8791 = vmatprep.mubr.msk.bf16.mxu0 %vm383_vm1, %v4126_v9  ;;  %v9801_v9 = vld [vmem:[%s10150_s9 + $0x40] sm:$0xff]   ;;  %v4463_v10 = vrot.slane %v9800_v5, 2  ;;  %v1137_v5 = vshll.u32 %v10297_v61, 16 }
  0x49   : > { %v4460_v4 = vsel %vm4449_vm3, %v4457_v44, %v4459_v1  ;;  %v4462_v11 = vsel %vm4449_vm3, %v4459_v1, %v4461_v8  ;;  %v1129_v44 = vshll.u32 %v10289_v7, 16  ;;  %v1125_v1 = vshrl.u32 %v10279_v43, 16 }
  0x4d   : > { %8454 = vmatmul.mubr.msk.bf16.gmra.mrb[28].mxu1 %vm383_vm1, %v9777_v13  ;;  %v9802_v13 = vld [vmem:[%s10150_s9 + $0x48] sm:$0xff]  }
  0x4e   : > { %8457 = vmatprep.mubr.msk.bf16.mxu1 %vm383_vm1, %v9779_v14  ;;  %v4464_v14 = vsel %vm4449_vm3, %v4461_v8, %v4463_v10  ;;  %v4465_v17 = vrot.slane %v9802_v13, 2  ;;  %v1131_v8 = vrot.slane %v1129_v44, 1  ;;  %v9907_v13 = vld [vmem:[%s10066_s28 + $0xc] sm:$0xf] }
  0x4f   : > { %8792 = vmatmul.mubr.msk.bf16.gmra.mrb[24].mxu0 %vm383_vm1, %v4135_v22 }
  0x50   : > { %8795 = vmatprep.mubr.msk.bf16.mxu0 %vm383_vm1, %v4144_v25  ;;  %v4466_v20 = vsel %vm4449_vm3, %v4463_v10, %v4465_v17  ;;  %v4468_v22 = vsel %vm4449_vm3, %v4465_v17, %v4467_v19  ;;  %v4469_v25 = vrot.slane %v9806_v21, 2  ;;  %v1139_v17 = vrot.slane %v1137_v5, 1 }
  0x52   : > { %v4472_v30 = vsel %vm4449_vm3, %v4469_v25, %v4471_v27 }
  0x55   : > { %8458 = vmatmul.mubr.msk.bf16.gmra.mrb[32].mxu1 %vm383_vm1, %v9781_v28  ;;  %v4470_v28 = vsel %vm4449_vm3, %v4467_v19, %v4469_v25  ;;  %v9908_v19 = vld [vmem:[%s10066_s28 + $0x10] sm:$0xff]   ;;  %v1829_v25 = vsel %vm438_vm0, %v10211_v58, 0 }
  0x56   : > { %8463 = vmatprep.mubr.msk.bf16.mxu1 %vm383_vm1, %v9783_v29  ;;  %v9810_v29 = vld [vmem:[%s10150_s9 + $0x68] sm:$0xff]  }
  0x57   : > { %8796 = vmatmul.mubr.msk.bf16.gmra.mrb[28].mxu0 %vm383_vm1, %v4153_v36  ;;  %v4473_v35 = vrot.slane %v9810_v29, 2  ;;  %v9813_v36 = vld [vmem:[%s10150_s9 + $0x70] sm:$0xff]  }
  0x58   : > { %8799 = vmatprep.mubr.msk.bf16.mxu0 %vm383_vm1, %v4162_v39 }
  0x59   : > { %v4474_v39 = vsel %vm4449_vm3, %v4471_v27, %v4473_v35 }
  0x5d   : > { %8464 = vmatmul.mubr.msk.bf16.vlgmr.msra.gmra.mrb[0].mxu1 %vm383_vm1, %v9785_v42  ;;  %v4476_v42 = vsel %vm4449_vm3, %v4473_v35, %v4475_v37 }
  0x5e   : > { %8467 = vmatprep.mubr.msk.bf16.mxu1 %vm383_vm1, %v9789_v45  ;;  %8500 = vmatpush3.bf16.msra.mxu1 %v1316_v46  ;;  %v1116_v45 = vshll.u32 %v7652_v38, 16  ;;  %v9815_v46 = vld [vmem:[%s10150_s9 + $0x78] sm:$0xff]  }
  0x5f   : > { %8800 = vmatmul.mubr.msk.bf16.gmra.mrb[32].mxu0 %vm383_vm1, %v4171_v49  ;;  %9722 = vmatprep.subr.msk.bf16.mxu1 %vm438_vm0, %v10211_v58  ;;  %v4479_v49 = vrot.slane %v9816_v41, 2  ;;  %v10340_v58 = vld [vmem:[%s10150_s9 + $0x38] sm:$0xff]   ;;  %v4765_v41 = vrot.slane %v9909_v40, 2  ;;  %v9915_v40 = vld [vmem:[%s10066_s28 + $0x48] sm:$0xff]  }
  0x60   : > { %8805 = vmatprep.mubr.msk.bf16.mxu0 %vm383_vm1, %v4452_v51  ;;  %v1118_v51 = vrot.slane %v1116_v45, 1 }
  0x65   : > { %8468 = vmatmul.mubr.msk.bf16.gmra.mrb[4].mxu1 %vm383_vm1, %v9791_v53  ;;  %v9818_v53 = vld [vmem:[%s10150_s9 + $0x88] sm:$0xff]  }
  0x66   : > { %8471 = vmatprep.mubr.msk.bf16.mxu1 %vm383_vm1, %v9793_v54  ;;  %v4478_v54 = vsel %vm4449_vm3, %v4475_v37, %v4477_v47 }
  0x67   : > { %8806 = vmatmul.mubr.msk.bf16.vlgmr.msra.gmra.mrb[0].mxu0 %vm383_vm1, %v4454_v56  ;;  %v4480_v56 = vsel %vm4449_vm3, %v4477_v47, %v4479_v49 }
  0x68   : > { %8842 = vmatpush3.bf16.msra.mxu0 %v4854_v59  ;;  %8809 = vmatprep.mubr.msk.bf16.mxu0 %vm383_vm1, %v4456_v60  ;;  %v1119_v59 = vor.u32 %v1118_v51, %v1114_v50  ;;  %v1123_v60 = vrot.slane %v1121_v52, 1  ;;  %v5330_v50 = vsel %vm438_vm0, %v10222_v62, 0  ;;  %v10360_v51 = vld [vmem:[%s10150_s9 + $0x40] sm:$0xff]   ;;  %v10363_v52 = vld [vmem:[%s10150_s9 + $0x48] sm:$0xff]  }
  0x69   : > { %9731 = vmatprep.subr.msk.bf16.mxu0 %vm438_vm0, %v10222_v62  ;;  %v10372_v62 = vld [vmem:[%s11624_s3 + $0xc] sm:$0x3] }
  0x6a   : > { %v1124_v3 = vsel %vm1112_vm4, %v1119_v59, %v1123_v60 }
  0x6d   : > { %8472 = vmatmul.mubr.msk.bf16.gmra.mrb[8].mxu1 %vm383_vm1, %v9795_v63  ;;  %v4481_v63 = vrot.slane %v9818_v53, 2 }
  0x6e   : > { %8475 = vmatprep.mubr.msk.bf16.mxu1 %vm383_vm1, %v9797_v0  ;;  %v4483_v0 = vrot.slane %v9820_v55, 2 }
  0x6f   : > { %8810 = vmatmul.mubr.msk.bf16.gmra.mrb[4].mxu0 %vm383_vm1, %v4458_v2  ;;  %v4443_v2 = vld [vmem:[%s10066_s28 + $0x8] sm:$0xc]  ;;  %v4482_v10 = vsel %vm4449_vm3, %v4479_v49, %v4481_v63 }
  0x70   : > { %8813 = vmatprep.mubr.msk.bf16.mxu0 %vm383_vm1, %v4460_v4  ;;  %v1133_v4 = vshrl.u32 %v10289_v7, 16  ;;  %v4484_v15 = vsel %vm4449_vm3, %v4481_v63, %v4483_v0  ;;  %v9911_v63 = vld [vmem:[%s10066_s28 + $0x28] sm:$0xff]  }
  0x71   : > { %v4769_v44 = vrot.slane %v9911_v63, 2  ;;  %v10434_v63 = vld [vmem:[%s10150_s9 + $0x78] sm:$0xff]  }
  0x75   : > { %8476 = vmatmul.mubr.msk.bf16.gmra.mrb[12].mxu1 %vm383_vm1, %v9799_v6  ;;  %v9823_v6 = vld [vmem:[%s10150_s9 + $0x98] ss:$0 sps:$4 sm:$0x33]  }
  0x76   : > { %8479 = vmatprep.mubr.msk.bf16.mxu1 %vm383_vm1, %v9801_v9  ;;  %v10310_v9 = vld [vmem:[%s10150_s9 + $0x20] sm:$0xff]   ;;  %v4485_v21 = vrot.slane %v9823_v6, 2  ;;  %v1181_v6 = vshrl.u32 %v10360_v51, 16 }
  0x77   : > { %8814 = vmatmul.mubr.msk.bf16.gmra.mrb[8].mxu0 %vm383_vm1, %v4462_v11  ;;  %v1127_v11 = vor.u32 %v1125_v1, %v1123_v60  ;;  %v1177_v60 = vshll.u32 %v10360_v51, 16  ;;  %v1173_v1 = vshrl.u32 %v10340_v58, 16 }
  0x78   : > { %8817 = vmatprep.mubr.msk.bf16.mxu0 %vm383_vm1, %v4464_v14  ;;  %v7904_v14 = vcombine.low %v4443_v2, %v9907_v13  ;;  %v4486_v33 = vsel %vm4449_vm3, %v4483_v0, %v4485_v21  ;;  %v1185_v2 = vshll.u32 %v10363_v52, 16  ;;  %v9914_v21 = vld [vmem:[%s10066_s28 + $0x40] sm:$0xff]  }
  0x79   : > { %v1132_v23 = vsel %vm1112_vm4, %v1127_v11, %v1131_v8 }
  0x7d   : > { %8480 = vmatmul.mubr.msk.bf16.gmra.mrb[16].mxu1 %vm383_vm1, %v9803_v16  ;;  %v1135_v16 = vor.u32 %v1133_v4, %v1131_v8  ;;  %v1179_v8 = vrot.slane %v1177_v60, 1 }
  0x7e   : > { %8483 = vmatprep.mubr.msk.bf16.mxu1 %vm383_vm1, %v9805_v18  ;;  %v10317_v18 = vld [vmem:[%s10150_s9 + $0x28] sm:$0xff]  }
  0x7f   : > { %8818 = vmatmul.mubr.msk.bf16.gmra.mrb[12].mxu0 %vm383_vm1, %v4466_v20  ;;  %v4763_v20 = vrot.slane %v9908_v19, 2  ;;  %v1140_v27 = vsel %vm1112_vm4, %v1135_v16, %v1139_v17  ;;  %v1153_v29 = vshll.u32 %v10317_v18, 16  ;;  %v1157_v45 = vshrl.u32 %v10317_v18, 16  ;;  %v9913_v19 = vld [vmem:[%s10066_s28 + $0x38] sm:$0xff]  }
  0x80   : > { %8821 = vmatprep.mubr.msk.bf16.mxu0 %vm383_vm1, %v4468_v22  ;;  %v1145_v22 = vshll.u32 %v10310_v9, 16 }
  0x81   : > { %v1155_v37 = vrot.slane %v1153_v29, 1  ;;  %v4766_v55 = vsel %vm4449_vm3, %v4763_v20, %v4765_v41 }
  0x82   : > { %v1147_v32 = vrot.slane %v1145_v22, 1  ;;  %v4775_v22 = vrot.slane %v9914_v21, 2 }
  0x85   : > { %8484 = vmatmul.mubr.msk.bf16.gmra.mrb[20].mxu1 %vm383_vm1, %v9807_v24  ;;  %v4762_v24 = vrot.slane %v7904_v14, 2  ;;  %v1187_v14 = vrot.slane %v1185_v2, 1 }
  0x86   : > { %8487 = vmatprep.mubr.msk.bf16.mxu1 %vm383_vm1, %v9809_v26  ;;  %v1141_v26 = vshrl.u32 %v10297_v61, 16 }
  0x87   : > { %8822 = vmatmul.mubr.msk.bf16.gmra.mrb[16].mxu0 %vm383_vm1, %v4470_v28  ;;  %v1149_v28 = vshrl.u32 %v10310_v9, 16  ;;  %v4764_v35 = vsel %vm4449_vm3, %v4762_v24, %v4763_v20  ;;  %v4773_v20 = vrot.slane %v9913_v19, 2 }
  0x88   : > { %8825 = vmatprep.mubr.msk.bf16.mxu0 %vm383_vm1, %v4472_v30  ;;  %v10331_v30 = vld [vmem:[%s10150_s9 + $0x30] sm:$0xff]  }
  0x89   : > { %v1161_v38 = vshll.u32 %v10331_v30, 16  ;;  %v1165_v49 = vshrl.u32 %v10331_v30, 16 }
  0x8b   : > { %v1163_v53 = vrot.slane %v1161_v38, 1  ;;  %v10414_v38 = vld [vmem:[%s10150_s9 + $0x68] sm:$0xff]  }
  0x8d   : > { %8488 = vmatmul.mubr.msk.bf16.gmra.mrb[24].mxu1 %vm383_vm1, %v9811_v34  ;;  %v1143_v34 = vor.u32 %v1141_v26, %v1139_v17  ;;  %v1167_v59 = vor.u32 %v1165_v49, %v1163_v53  ;;  %v1183_v17 = vor.u32 %v1181_v6, %v1179_v8 }
  0x8e   : > { %8491 = vmatprep.mubr.msk.bf16.mxu1 %vm383_vm1, %v9813_v36  ;;  %v1151_v36 = vor.u32 %v1149_v28, %v1147_v32 }
  0x8f   : > { %8826 = vmatmul.mubr.msk.bf16.gmra.mrb[20].mxu0 %vm383_vm1, %v4474_v39  ;;  %v1169_v39 = vshll.u32 %v10340_v58, 16  ;;  %v1188_v28 = vsel %vm1112_vm4, %v1183_v17, %v1187_v14 }
  0x90   : > { %8829 = vmatprep.mubr.msk.bf16.mxu0 %vm383_vm1, %v4476_v42  ;;  %v1148_v42 = vsel %vm1112_vm4, %v1143_v34, %v1147_v32  ;;  %v10408_v32 = vld [vmem:[%s10150_s9 + $0x60] sm:$0xff]  }
  0x91   : > { %v1213_v49 = vshrl.u32 %v10408_v32, 16 }
  0x95   : > { %8492 = vmatmul.mubr.msk.bf16.gmra.mrb[28].mxu1 %vm383_vm1, %v9815_v46  ;;  %v9910_v46 = vld [vmem:[%s10066_s28 + $0x20] sm:$0xff]  }
  0x96   : > { %8495 = vmatprep.mubr.msk.bf16.mxu1 %vm383_vm1, %v9817_v48  ;;  %v4767_v47 = vrot.slane %v9910_v46, 2  ;;  %v1156_v48 = vsel %vm1112_vm4, %v1151_v36, %v1155_v37  ;;  %v9916_v46 = vld [vmem:[%s10066_s28 + $0x50] sm:$0xff]  }
  0x97   : > { %8830 = vmatmul.mubr.msk.bf16.gmra.mrb[24].mxu0 %vm383_vm1, %v4478_v54  ;;  %v1171_v54 = vrot.slane %v1169_v39, 1  ;;  %v1209_v39 = vshll.u32 %v10408_v32, 16 }
  0x98   : > { %8833 = vmatprep.mubr.msk.bf16.mxu0 %vm383_vm1, %v4480_v56  ;;  %v1159_v56 = vor.u32 %v1157_v45, %v1155_v37  ;;  %v4770_v11 = vsel %vm4449_vm3, %v4767_v47, %v4769_v44 }
  0x99   : > { %v1172_v5 = vsel %vm1112_vm4, %v1167_v59, %v1171_v54  ;;  %v1175_v13 = vor.u32 %v1173_v1, %v1171_v54  ;;  %v10428_v54 = vld [vmem:[%s10150_s9 + $0x70] sm:$0xff]  }
  0x9a   : > { %v1164_v0 = vsel %vm1112_vm4, %v1159_v56, %v1163_v53  ;;  %v1211_v53 = vrot.slane %v1209_v39, 1 }
  0x9b   : > { %v1180_v24 = vsel %vm1112_vm4, %v1175_v13, %v1179_v8  ;;  %v1229_v8 = vshrl.u32 %v10428_v54, 16 }
  0x9c   : > { %v1215_v59 = vor.u32 %v1213_v49, %v1211_v53  ;;  %v10479_v49 = vld [vmem:[%s10066_s28 + $0x8] sm:$0xff]  }
  0x9d   : > { %8496 = vmatmul.mubr.msk.bf16.gmra.mrb[32].mxu1 %vm383_vm1, %v9819_v57  ;;  %v4768_v57 = vsel %vm4449_vm3, %v4765_v41, %v4767_v47  ;;  %v4777_v41 = vrot.slane %v9915_v40, 2  ;;  %v4779_v47 = vrot.slane %v9916_v46, 2 }
  0x9e   : > { %8501 = vmatprep.mubr.msk.bf16.mxu1 %vm383_vm1, %v1124_v3  ;;  %v9912_v3 = vld [vmem:[%s10066_s28 + $0x30] sm:$0xff]  }
  0x9f   : > { %8834 = vmatmul.mubr.msk.bf16.gmra.mrb[28].mxu0 %vm383_vm1, %v4482_v10  ;;  %v4771_v4 = vrot.slane %v9912_v3, 2  ;;  %v10388_v10 = vld [vmem:[%s10150_s9 + $0x50] sm:$0xff]   ;;  %v1221_v3 = vshrl.u32 %v10414_v38, 16 }
  0xa0   : > { %8837 = vmatprep.mubr.msk.bf16.mxu0 %vm383_vm1, %v4484_v15  ;;  %v10393_v15 = vld [vmem:[%s10150_s9 + $0x58] sm:$0xff]   ;;  %v1197_v26 = vshrl.u32 %v10388_v10, 16 }
  0xa1   : > { %v4772_v16 = vsel %vm4449_vm3, %v4769_v44, %v4771_v4  ;;  %v1205_v45 = vshrl.u32 %v10393_v15, 16  ;;  %v1225_v44 = vshll.u32 %v10428_v54, 16 }
  0xa3   : > { %v1227_v13 = vrot.slane %v1225_v44, 1 }
  0xa5   : > { %8502 = vmatmul.mubr.msk.bf16.vlgmr.msra.gmra.mrb[0].mxu1 %vm383_vm1, %v1132_v23  ;;  %v1193_v23 = vshll.u32 %v10388_v10, 16 }
  0xa6   : > { %8505 = vmatprep.mubr.msk.bf16.mxu1 %vm383_vm1, %v1140_v27  ;;  %8538 = vmatpush3.bf16.msra.mxu1 %v1829_v25  ;;  %v1189_v25 = vshrl.u32 %v10363_v52, 16  ;;  %v1201_v27 = vshll.u32 %v10393_v15, 16 }
  0xa7   : > { %9723 = vmatprep.subr.msk.bf16.mxu1 %vm438_vm0, %v10336_v31  ;;  %8838 = vmatmul.mubr.msk.bf16.gmra.mrb[32].mxu0 %vm383_vm1, %v4486_v33  ;;  %v1195_v29 = vrot.slane %v1193_v23, 1  ;;  %v4774_v33 = vsel %vm4449_vm3, %v4771_v4, %v4773_v20  ;;  %v9918_v4 = vld [vmem:[%s10066_s28 + $0x60] sm:$0xff]  }
  0xa8   : > { %8843 = vmatprep.mubr.msk.bf16.mxu0 %vm383_vm1, %v4764_v35  ;;  %v1191_v34 = vor.u32 %v1189_v25, %v1187_v14  ;;  %v4776_v35 = vsel %vm4449_vm3, %v4773_v20, %v4775_v22  ;;  %v1203_v37 = vrot.slane %v1201_v27, 1  ;;  %v10448_v14 = vld [vmem:[%s10150_s9 + $0x80] sm:$0xff]   ;;  %v1231_v20 = vor.u32 %v1229_v8, %v1227_v13 }
  0xa9   : > { %v1199_v36 = vor.u32 %v1197_v26, %v1195_v29  ;;  %v980_v23 = vld [vmem:[%s10066_s28] sm:$0xf]  ;;  %v1241_v25 = vshll.u32 %v10448_v14, 16  ;;  %v9919_v26 = vld [vmem:[%s10066_s28 + $0x68] sm:$0xff]  }
  0xaa   : > { %v1207_v56 = vor.u32 %v1205_v45, %v1203_v37  ;;  %v4785_v27 = vrot.slane %v9919_v26, 2  ;;  %v10475_v45 = vld [vmem:[%s10150_s9 + $0x90] ss:$0 sps:$4 sm:$0x11]  }
  0xab   : > { %v1243_v40 = vrot.slane %v1241_v25, 1  ;;  %v1257_v44 = vshll.u32 %v10475_v45, 16  ;;  %v9924_v25 = vld [vmem:[%s10066_s28 + $0x90] sm:$0xff]  }
  0xac   : > { %v1212_v2 = vsel %vm1112_vm4, %v1207_v56, %v1211_v53  ;;  %v9921_v53 = vld [vmem:[%s10066_s28 + $0x78] sm:$0xff]   ;;  %v4795_v26 = vrot.slane %v9924_v25, 2 }
  0xad   : > { %8506 = vmatmul.mubr.msk.bf16.gmra.mrb[4].mxu1 %vm383_vm1, %v1148_v42  ;;  %v1196_v42 = vsel %vm1112_vm4, %v1191_v34, %v1195_v29  ;;  %v9920_v29 = vld [vmem:[%s10066_s28 + $0x70] sm:$0xff]   ;;  %v1237_v34 = vshrl.u32 %v10434_v63, 16  ;;  %v1259_v8 = vrot.slane %v1257_v44, 1 }
  0xae   : > { %8509 = vmatprep.mubr.msk.bf16.mxu1 %vm383_vm1, %v1156_v48  ;;  %v1204_v48 = vsel %vm1112_vm4, %v1199_v36, %v1203_v37  ;;  %v1245_v36 = vshrl.u32 %v10448_v14, 16 }
  0xaf   : > { %8844 = vmatmul.mubr.msk.bf16.vlgmr.msra.gmra.mrb[0].mxu0 %vm383_vm1, %v4766_v55  ;;  %v4778_v55 = vsel %vm4449_vm3, %v4775_v22, %v4777_v41  ;;  %v10454_v22 = vld [vmem:[%s10150_s9 + $0x88] sm:$0xff]  }
  0xb0   : > { %8880 = vmatpush3.bf16.msra.mxu0 %v5330_v50  ;;  %8847 = vmatprep.mubr.msk.bf16.mxu0 %vm383_vm1, %v4768_v57  ;;  %v1217_v50 = vshll.u32 %v10414_v38, 16  ;;  %v4780_v57 = vsel %vm4449_vm3, %v4777_v41, %v4779_v47  ;;  %v1249_v37 = vshll.u32 %v10454_v22, 16 }
  0xb1   : > { %9732 = vmatprep.subr.msk.bf16.mxu0 %vm438_vm0, %v10372_v62 }
  0xb2   : > { %v1219_v60 = vrot.slane %v1217_v50, 1 }
  0xb4   : > { %v1220_v6 = vsel %vm1112_vm4, %v1215_v59, %v1219_v60  ;;  %v1223_v17 = vor.u32 %v1221_v3, %v1219_v60  ;;  %v1253_v60 = vshrl.u32 %v10454_v22, 16  ;;  %v1634_v3 = vshll.u32 %v10479_v49, 16 }
  0xb5   : > { %8510 = vmatmul.mubr.msk.bf16.gmra.mrb[8].mxu1 %vm383_vm1, %v1164_v0  ;;  %v9917_v0 = vld [vmem:[%s10066_s28 + $0x58] sm:$0xff]  }
  0xb6   : > { %8513 = vmatprep.mubr.msk.bf16.mxu1 %vm383_vm1, %v1172_v5  ;;  %v4781_v1 = vrot.slane %v9917_v0, 2  ;;  %v4783_v5 = vrot.slane %v9918_v4, 2  ;;  %v10492_v4 = vld [vmem:[%s10066_s28 + $0x10] sm:$0xff]  }
  0xb7   : > { %8848 = vmatmul.mubr.msk.bf16.gmra.mrb[4].mxu0 %vm383_vm1, %v4770_v11  ;;  %v1233_v11 = vshll.u32 %v10434_v63, 16 }
  0xb8   : > { %8851 = vmatprep.mubr.msk.bf16.mxu0 %vm383_vm1, %v4772_v16  ;;  %v4782_v16 = vsel %vm4449_vm3, %v4779_v47, %v4781_v1  ;;  %v4784_v19 = vsel %vm4449_vm3, %v4781_v1, %v4783_v5  ;;  %v4786_v41 = vsel %vm4449_vm3, %v4783_v5, %v4785_v27  ;;  %v1247_v47 = vor.u32 %v1245_v36, %v1243_v40 }
  0xb9   : > { %v1235_v21 = vrot.slane %v1233_v11, 1 }
  0xbd   : > { %8514 = vmatmul.mubr.msk.bf16.gmra.mrb[12].mxu1 %vm383_vm1, %v1180_v24  ;;  %v10458_v24 = vld [vmem:[%s10066_s28 + $0x4] sm:$0xf] }
  0xbe   : > { %8517 = vmatprep.mubr.msk.bf16.mxu1 %vm383_vm1, %v1188_v28  ;;  %v1228_v28 = vsel %vm1112_vm4, %v1223_v17, %v1227_v13  ;;  %v7690_v39 = vcombine.low %v980_v23, %v10458_v24  ;;  %v10498_v17 = vld [vmem:[%s10066_s28 + $0x18] sm:$0xff]  }
  0xbf   : > { %8852 = vmatmul.mubr.msk.bf16.gmra.mrb[8].mxu0 %vm383_vm1, %v4774_v33  ;;  %v4787_v33 = vrot.slane %v9920_v29, 2  ;;  %v5069_v29 = vld [vmem:[%s10150_s9 + $0x10] sm:$0xc]  ;;  %v1654_v44 = vshrl.u32 %v10498_v17, 16 }
  0xc0   : > { %8855 = vmatprep.mubr.msk.bf16.mxu0 %vm383_vm1, %v4776_v35  ;;  %v1236_v35 = vsel %vm1112_vm4, %v1231_v20, %v1235_v21  ;;  %v1629_v50 = vshll.u32 %v7690_v39, 16  ;;  %v1627_v1 = vshrl.u32 %v7690_v39, 16  ;;  %v9923_v20 = vld [vmem:[%s10066_s28 + $0x88] sm:$0xff]  }
  0xc1   : > { %v4788_v46 = vsel %vm4449_vm3, %v4785_v27, %v4787_v33  ;;  %v1638_v27 = vshrl.u32 %v10479_v49, 16 }
  0xc5   : > { %8518 = vmatmul.mubr.msk.bf16.gmra.mrb[16].mxu1 %vm383_vm1, %v1196_v42  ;;  %v1239_v42 = vor.u32 %v1237_v34, %v1235_v21  ;;  %v4793_v21 = vrot.slane %v9923_v20, 2  ;;  %v1646_v34 = vshrl.u32 %v10492_v4, 16 }
  0xc6   : > { %8521 = vmatprep.mubr.msk.bf16.mxu1 %vm383_vm1, %v1204_v48  ;;  %v1251_v48 = vrot.slane %v1249_v37, 1  ;;  %v10514_v37 = vld [vmem:[%s10066_s28 + $0x20] sm:$0xff]  }
  0xc7   : > { %8856 = vmatmul.mubr.msk.bf16.gmra.mrb[12].mxu0 %vm383_vm1, %v4778_v55  ;;  %v4789_v55 = vrot.slane %v9921_v53, 2  ;;  %v1244_v56 = vsel %vm1112_vm4, %v1239_v42, %v1243_v40  ;;  %v10521_v42 = vld [vmem:[%s10150_s9 + $0x18] sm:$0xff]  }
  0xc8   : > { %8859 = vmatprep.mubr.msk.bf16.mxu0 %vm383_vm1, %v4780_v57  ;;  %v9922_v57 = vld [vmem:[%s10066_s28 + $0x80] sm:$0xff]   ;;  %v1252_v0 = vsel %vm1112_vm4, %v1247_v47, %v1251_v48  ;;  %v9925_v53 = vld [vmem:[%s10066_s28 + $0x98] ss:$0 sps:$4 sm:$0x33]  }
  0xc9   : > { %v4791_v59 = vrot.slane %v9922_v57, 2  ;;  %v4790_v5 = vsel %vm4449_vm3, %v4787_v33, %v4789_v55  ;;  %v5070_v33 = vld [vmem:[%s10150_s9 + $0x14] sm:$0xf] }
  0xcb   : > { %v4792_v11 = vsel %vm4449_vm3, %v4789_v55, %v4791_v59  ;;  %v4794_v39 = vsel %vm4449_vm3, %v4791_v59, %v4793_v21  ;;  %v4797_v55 = vrot.slane %v9925_v53, 2 }
  0xcd   : > { %8522 = vmatmul.mubr.msk.bf16.gmra.mrb[20].mxu1 %vm383_vm1, %v1212_v2  ;;  %v1631_v2 = vrot.slane %v1629_v50, 1  ;;  %v10525_v50 = vld [vmem:[%s10066_s28 + $0x28] sm:$0xff]  }
  0xce   : > { %8525 = vmatprep.mubr.msk.bf16.mxu1 %vm383_vm1, %v1220_v6  ;;  %v1255_v6 = vor.u32 %v1253_v60, %v1251_v48  ;;  %v5239_v60 = vrot.slane %v10521_v42, 2 }
  0xcf   : > { %8860 = vmatmul.mubr.msk.bf16.gmra.mrb[16].mxu0 %vm383_vm1, %v4782_v16  ;;  %v1632_v13 = vor.u32 %v1631_v2, %v1627_v1  ;;  %v1636_v16 = vrot.slane %v1634_v3, 1  ;;  %v2144_v1 = vsel %vm438_vm0, %v10336_v31, 0  ;;  %v1662_v2 = vshrl.u32 %v10514_v37, 16  ;;  %v10552_v31 = vld [vmem:[%s10150_s9 + $0x20] sm:$0xff]  }
  0xd0   : > { %8863 = vmatprep.mubr.msk.bf16.mxu0 %vm383_vm1, %v4784_v19  ;;  %v1642_v19 = vshll.u32 %v10492_v4, 16  ;;  %v1260_v23 = vsel %vm1112_vm4, %v1255_v6, %v1259_v8  ;;  %v1666_v3 = vshll.u32 %v10525_v50, 16  ;;  %v10547_v8 = vld [vmem:[%s10066_s28 + $0x30] sm:$0xff]  }
  0xd1   : > { %v1640_v40 = vor.u32 %v1638_v27, %v1636_v16  ;;  %v1674_v25 = vshll.u32 %v10547_v8, 16 }
  0xd2   : > { %v1644_v36 = vrot.slane %v1642_v19, 1  ;;  %v10556_v19 = vld [vmem:[%s10150_s9 + $0x28] sm:$0xff]  }
  0xd4   : > { %v1648_v47 = vor.u32 %v1646_v34, %v1644_v36  ;;  %v1645_v57 = vsel %vm1112_vm4, %v1640_v40, %v1644_v36  ;;  %v1678_v34 = vshrl.u32 %v10547_v8, 16  ;;  %v1676_v36 = vrot.slane %v1674_v25, 1 }
  0xd5   : > { %8526 = vmatmul.mubr.msk.bf16.gmra.mrb[24].mxu1 %vm383_vm1, %v1228_v28  ;;  %v1637_v28 = vsel %vm1112_vm4, %v1632_v13, %v1636_v16 }
  0xd6   : > { %8529 = vmatprep.mubr.msk.bf16.mxu1 %vm383_vm1, %v1236_v35  ;;  %v1650_v35 = vshll.u32 %v10498_v17, 16 }
  0xd7   : > { %8864 = vmatmul.mubr.msk.bf16.gmra.mrb[20].mxu0 %vm383_vm1, %v4786_v41  ;;  %v10518_v41 = vcombine.low %v5069_v29, %v5070_v33  ;;  %v5243_v29 = vrot.slane %v10556_v19, 2 }
  0xd8   : > { %8867 = vmatprep.mubr.msk.bf16.mxu0 %vm383_vm1, %v4788_v46  ;;  %v4796_v46 = vsel %vm4449_vm3, %v4793_v21, %v4795_v26  ;;  %v1652_v48 = vrot.slane %v1650_v35, 1  ;;  %v1668_v21 = vrot.slane %v1666_v3, 1 }
  0xd9   : > { %v5238_v59 = vrot.slane %v10518_v41, 2 }
  0xda   : > { %v1656_v13 = vor.u32 %v1654_v44, %v1652_v48 }
  0xdb   : > { %v5240_v16 = vsel %vm4449_vm3, %v5238_v59, %v5239_v60  ;;  %v10589_v59 = vld [vmem:[%s10066_s28 + $0x48] sm:$0xff]  }
  0xdd   : > { %8530 = vmatmul.mubr.msk.bf16.gmra.mrb[28].mxu1 %vm383_vm1, %v1244_v56  ;;  %v1658_v56 = vshll.u32 %v10514_v37, 16 }
  0xde   : > { %8533 = vmatprep.mubr.msk.bf16.mxu1 %vm383_vm1, %v1252_v0  ;;  %v1653_v0 = vsel %vm1112_vm4, %v1648_v47, %v1652_v48  ;;  %v5732_v48 = vsel %vm438_vm0, %v10372_v62, 0 }
  0xdf   : > { %8868 = vmatmul.mubr.msk.bf16.gmra.mrb[24].mxu0 %vm383_vm1, %v4790_v5  ;;  %v10543_v5 = vld [vmem:[%s11624_s3 + $0x4] sm:$0x3]  ;;  %v1660_v6 = vrot.slane %v1658_v56, 1  ;;  %v1680_v56 = vor.u32 %v1678_v34, %v1676_v36  ;;  %v10622_v34 = vld [vmem:[%s10066_s28 + $0x58] sm:$0xff]  }
  0xe0   : > { %8871 = vmatprep.mubr.msk.bf16.mxu0 %vm383_vm1, %v4792_v11  ;;  %v4798_v11 = vsel %vm4449_vm3, %v4795_v26, %v4797_v55  ;;  %v5241_v26 = vrot.slane %v10552_v31, 2  ;;  %v10586_v55 = vld [vmem:[%s10150_s9 + $0x38] sm:$0xff]  }
  0xe1   : > { %v1664_v20 = vor.u32 %v1662_v2, %v1660_v6  ;;  %v1661_v27 = vsel %vm1112_vm4, %v1656_v13, %v1660_v6  ;;  %v5247_v2 = vrot.slane %v10586_v55, 2 }
  0xe2   : > { %v5242_v40 = vsel %vm4449_vm3, %v5239_v60, %v5241_v26  ;;  %v5244_v53 = vsel %vm4449_vm3, %v5241_v26, %v5243_v29  ;;  %v10594_v60 = vld [vmem:[%s11623_s2 + $0xe] sm:$0x3] }
  0xe3   : > { %v1669_v33 = vsel %vm1112_vm4, %v1664_v20, %v1668_v21 }
  0xe5   : > { %8534 = vmatmul.mubr.msk.bf16.gmra.mrb[32].mxu1 %vm383_vm1, %v1260_v23  ;;  %v10559_v23 = vld [vmem:[%s10066_s28 + $0x38] sm:$0xff]  }
  0xe6   : > { %8539 = vmatprep.mubr.msk.bf16.mxu1 %vm383_vm1, %v1637_v28  ;;  %v1670_v28 = vshrl.u32 %v10525_v50, 16  ;;  %v1682_v35 = vshll.u32 %v10559_v23, 16 }
  0xe7   : > { %8872 = vmatmul.mubr.msk.bf16.gmra.mrb[28].mxu0 %vm383_vm1, %v4794_v39  ;;  %v10575_v39 = vld [vmem:[%s10066_s28 + $0x40] sm:$0xff]  }
  0xe8   : > { %8875 = vmatprep.mubr.msk.bf16.mxu0 %vm383_vm1, %v4796_v46  ;;  %v10580_v46 = vld [vmem:[%s10150_s9 + $0x30] sm:$0xff]   ;;  %v1672_v47 = vor.u32 %v1670_v28, %v1668_v21  ;;  %v1690_v44 = vshll.u32 %v10575_v39, 16  ;;  %v1694_v6 = vshrl.u32 %v10575_v39, 16  ;;  %v10615_v21 = vld [vmem:[%s10150_s9 + $0x40] sm:$0xff]  }
  0xe9   : > { %v5245_v62 = vrot.slane %v10580_v46, 2 }
  0xea   : > { %v1692_v13 = vrot.slane %v1690_v44, 1  ;;  %v10636_v44 = vld [vmem:[%s10066_s28 + $0x60] sm:$0xff]  }
  0xeb   : > { %v5246_v20 = vsel %vm4449_vm3, %v5243_v29, %v5245_v62  ;;  %v5248_v26 = vsel %vm4449_vm3, %v5245_v62, %v5247_v2  ;;  %v5249_v29 = vrot.slane %v10615_v21, 2  ;;  %11640 = vst [vmem:[#allocation3_spill] sm:$0xff] %v10636_v44 }
  0xec   : > { %v1696_v28 = vor.u32 %v1694_v6, %v1692_v13  ;;  %v10645_v6 = vld [vmem:[%s10150_s9 + $0x58] sm:$0xff]  }
  0xed   : > { %8540 = vmatmul.mubr.msk.bf16.vlgmr.msra.gmra.mrb[0].mxu1 %vm383_vm1, %v1645_v57  ;;  %v1684_v57 = vrot.slane %v1682_v35, 1  ;;  %v5250_v62 = vsel %vm4449_vm3, %v5247_v2, %v5249_v29 }
  0xee   : > { %8543 = vmatprep.mubr.msk.bf16.mxu1 %vm383_vm1, %v1653_v0  ;;  %8576 = vmatpush3.bf16.msra.mxu1 %v2144_v1  ;;  %v1677_v0 = vsel %vm1112_vm4, %v1672_v47, %v1676_v36  ;;  %v1686_v1 = vshrl.u32 %v10559_v23, 16 }
  0xef   : > { %9724 = vmatprep.subr.msk.bf16.mxu1 %vm438_vm0, %v10543_v5  ;;  %8876 = vmatmul.mubr.msk.bf16.gmra.mrb[32].mxu0 %vm383_vm1, %v4798_v11  ;;  %v1685_v3 = vsel %vm1112_vm4, %v1680_v56, %v1684_v57  ;;  %v1698_v11 = vshll.u32 %v10589_v59, 16  ;;  %v1714_v56 = vshll.u32 %v10622_v34, 16 }
  0xf0   : > { %8881 = vmatprep.mubr.msk.bf16.mxu0 %vm383_vm1, %v5240_v16  ;;  %v10610_v16 = vld [vmem:[%s10066_s28 + $0x50] sm:$0xff]   ;;  %v1688_v25 = vor.u32 %v1686_v1, %v1684_v57 }
  0xf1   : > { %v1706_v35 = vshll.u32 %v10610_v16, 16 }
  0xf2   : > { %v1693_v36 = vsel %vm1112_vm4, %v1688_v25, %v1692_v13  ;;  %v1716_v13 = vrot.slane %v1714_v56, 1  ;;  %v1722_v25 = vshll.u32 %v10636_v44, 16  ;;  %v10667_v56 = vld [vmem:[%s10150_s9 + $0x60] sm:$0xff]  }
  0xf3   : > { %v1708_v57 = vrot.slane %v1706_v35, 1 }
  0xf5   : > { %8544 = vmatmul.mubr.msk.bf16.gmra.mrb[4].mxu1 %vm383_vm1, %v1661_v27  ;;  %v10619_v27 = vld [vmem:[%s10150_s9 + $0x48] sm:$0xff]  }
  0xf6   : > { %8547 = vmatprep.mubr.msk.bf16.mxu1 %vm383_vm1, %v1669_v33  ;;  %v1700_v33 = vrot.slane %v1698_v11, 1  ;;  %v5251_v47 = vrot.slane %v10619_v27, 2 }
  0xf7   : > { %8882 = vmatmul.mubr.msk.bf16.vlgmr.msra.gmra.mrb[0].mxu0 %vm383_vm1, %v5242_v40  ;;  %v1702_v40 = vshrl.u32 %v10589_v59, 16 }
  0xf8   : > { %8918 = vmatpush3.bf16.msra.mxu0 %v5732_v48  ;;  %8885 = vmatprep.mubr.msk.bf16.mxu0 %vm383_vm1, %v5244_v53  ;;  %v1701_v48 = vsel %vm1112_vm4, %v1696_v28, %v1700_v33  ;;  %v1710_v53 = vshrl.u32 %v10610_v16, 16  ;;  %v1718_v28 = vshrl.u32 %v10622_v34, 16 }
  0xf9   : > { %9733 = vmatprep.subr.msk.bf16.mxu0 %vm438_vm0, %v10594_v60  ;;  %v1704_v1 = vor.u32 %v1702_v40, %v1700_v33  ;;  %v5255_v33 = vrot.slane %v10645_v6, 2  ;;  %v1724_v40 = vrot.slane %v1722_v25, 1 }
  0xfa   : > { %v1712_v11 = vor.u32 %v1710_v53, %v1708_v57 }
  0xfc   : > { %v1717_v35 = vsel %vm1112_vm4, %v1712_v11, %v1716_v13 }
  0xfd   : > { %8548 = vmatmul.mubr.msk.bf16.gmra.mrb[8].mxu1 %vm383_vm1, %v1677_v0  ;;  %v10641_v0 = vld [vmem:[%s10150_s9 + $0x50] sm:$0xff]  }
  0xfe   : > { %8551 = vmatprep.mubr.msk.bf16.mxu1 %vm383_vm1, %v1685_v3  ;;  %v5252_v3 = vsel %vm4449_vm3, %v5249_v29, %v5251_v47  ;;  %v5253_v2 = vrot.slane %v10641_v0, 2  ;;  %v1726_v29 = vshrl.u32 %v10636_v44, 16  ;;  %v10697_v44 = vld [vmem:[%s10150_s9 + $0x78] sm:$0xff]  }
  0xff   : > { %8886 = vmatmul.mubr.msk.bf16.gmra.mrb[4].mxu0 %vm383_vm1, %v5246_v20  ;;  %v10648_v20 = vld [vmem:[%s10066_s28 + $0x68] sm:$0xff]   ;;  %11647 = vst [vmem:[#allocation10_spill] sm:$0xff] %v10697_v44 }
 0x100   : > { %8889 = vmatprep.mubr.msk.bf16.mxu0 %vm383_vm1, %v5248_v26  ;;  %11641 = vst [vmem:[#allocation4_spill] sm:$0xff] %v10648_v20  ;;  %v1709_v26 = vsel %vm1112_vm4, %v1704_v1, %v1708_v57  ;;  %v5254_v53 = vsel %vm4449_vm3, %v5251_v47, %v5253_v2  ;;  %v1720_v57 = vor.u32 %v1718_v28, %v1716_v13  ;;  %v10671_v1 = vld [vmem:[%s10150_s9 + $0x68] sm:$0xff]   ;;  %v5257_v47 = vrot.slane %v10667_v56, 2 }
 0x101   : > { %11643 = vst [vmem:[#allocation6_spill] sm:$0xff] %v10671_v1 }
 0x102   : > { %v1725_v13 = vsel %vm1112_vm4, %v1720_v57, %v1724_v40 }
 0x105   : > { %8552 = vmatmul.mubr.msk.bf16.gmra.mrb[12].mxu1 %vm383_vm1, %v1693_v36  ;;  %v1730_v36 = vshll.u32 %v10648_v20, 16 }
 0x106   : > { %8555 = vmatprep.mubr.msk.bf16.mxu1 %vm383_vm1, %v1701_v48  ;;  %v10662_v48 = vld [vmem:[%s10066_s28 + $0x70] sm:$0xff]  }
 0x107   : > { %8890 = vmatmul.mubr.msk.bf16.gmra.mrb[8].mxu0 %vm383_vm1, %v5250_v62  ;;  %11642 = vst [vmem:[#allocation5_spill] sm:$0xff] %v10662_v48  ;;  %v5256_v62 = vsel %vm4449_vm3, %v5253_v2, %v5255_v33  ;;  %v1732_v11 = vrot.slane %v1730_v36, 1  ;;  %v1738_v25 = vshll.u32 %v10662_v48, 16  ;;  %v1734_v2 = vshrl.u32 %v10648_v20, 16 }
 0x108   : > { %8893 = vmatprep.mubr.msk.bf16.mxu0 %vm383_vm1, %v5252_v3  ;;  %v1728_v3 = vor.u32 %v1726_v29, %v1724_v40  ;;  %v1746_v29 = vshll.u32 %v10674_v12, 16  ;;  %v10693_v40 = vld [vmem:[%s10150_s9 + $0x70] sm:$0xff]  }
 0x109   : > { %v1740_v36 = vrot.slane %v1738_v25, 1  ;;  %11646 = vst [vmem:[#allocation9_spill] sm:$0xff] %v10693_v40  ;;  %v1736_v57 = vor.u32 %v1734_v2, %v1732_v11 }
 0x10a   : > { %v1733_v28 = vsel %vm1112_vm4, %v1728_v3, %v1732_v11 }
 0x10b   : > { %v1741_v11 = vsel %vm1112_vm4, %v1736_v57, %v1740_v36  ;;  %v10719_v57 = vld [vmem:[%s10066_s28 + $0x90] ss:$0 sps:$4 sm:$0x11]  }
 0x10c   : > { %11648 = vst [vmem:[#allocation11_spill] sm:$0xff] %v10719_v57 }
 0x10d   : > { %8556 = vmatmul.mubr.msk.bf16.gmra.mrb[16].mxu1 %vm383_vm1, %v1709_v26  ;;  %v5259_v26 = vrot.slane %v10671_v1, 2  ;;  %v10700_v1 = vld [vmem:[%s10066_s28 + $0x88] sm:$0xff]  }
 0x10e   : > { %8559 = vmatprep.mubr.msk.bf16.mxu1 %vm383_vm1, %v1717_v35  ;;  %v1742_v35 = vshrl.u32 %v10662_v48, 16  ;;  %v1748_v48 = vrot.slane %v1746_v29, 1 }
 0x10f   : > { %8894 = vmatmul.mubr.msk.bf16.gmra.mrb[12].mxu0 %vm383_vm1, %v5254_v53  ;;  %v10688_v53 = vld [vmem:[%s10066_s28 + $0x80] sm:$0xff]   ;;  %v5260_v20 = vsel %vm4449_vm3, %v5257_v47, %v5259_v26 }
 0x110   : > { %8897 = vmatprep.mubr.msk.bf16.mxu0 %vm383_vm1, %v5256_v62  ;;  %11645 = vst [vmem:[#allocation8_spill] sm:$0xff] %v10688_v53  ;;  %v5258_v62 = vsel %vm4449_vm3, %v5255_v33, %v5257_v47  ;;  %v1744_v3 = vor.u32 %v1742_v35, %v1740_v36  ;;  %v1754_v25 = vshll.u32 %v10688_v53, 16  ;;  %v5261_v33 = vrot.slane %v10693_v40, 2  ;;  %v2044_v40 = vld [vmem:[%s10150_s9] sm:$0xe] }
 0x111   : > { %v1750_v47 = vshrl.u32 %v10674_v12, 16  ;;  %v1762_v35 = vshll.u32 %v10700_v1, 16 }
 0x112   : > { %v1749_v2 = vsel %vm1112_vm4, %v1744_v3, %v1748_v48  ;;  %v1756_v29 = vrot.slane %v1754_v25, 1  ;;  %v10723_v3 = vld [vmem:[%s10150_s9 + $0x88] sm:$0xff]  }
 0x113   : > { %v1752_v36 = vor.u32 %v1750_v47, %v1748_v48  ;;  %v1766_v48 = vshrl.u32 %v10700_v1, 16 }
 0x115   : > { %8560 = vmatmul.mubr.msk.bf16.gmra.mrb[20].mxu1 %vm383_vm1, %v1725_v13  ;;  %v5263_v13 = vrot.slane %v10697_v44, 2  ;;  %v1764_v44 = vrot.slane %v1762_v35, 1  ;;  %v1757_v25 = vsel %vm1112_vm4, %v1752_v36, %v1756_v29 }
 0x116   : > { %8563 = vmatprep.mubr.msk.bf16.mxu1 %vm383_vm1, %v1733_v28  ;;  %v1758_v28 = vshrl.u32 %v10688_v53, 16 }
 0x117   : > { %8898 = vmatmul.mubr.msk.bf16.gmra.mrb[16].mxu0 %vm383_vm1, %v5258_v62  ;;  %v10716_v62 = vld [vmem:[%s10150_s9 + $0x80] sm:$0xff]   ;;  %v5264_v12 = vsel %vm4449_vm3, %v5261_v33, %v5263_v13 }
 0x118   : > { %8901 = vmatprep.mubr.msk.bf16.mxu0 %vm383_vm1, %v5260_v20  ;;  %v5262_v20 = vsel %vm4449_vm3, %v5259_v26, %v5261_v33  ;;  %v1760_v53 = vor.u32 %v1758_v28, %v1756_v29  ;;  %v5265_v26 = vrot.slane %v10716_v62, 2  ;;  %v5267_v33 = vrot.slane %v10723_v3, 2 }
 0x119   : > { %v1768_v29 = vor.u32 %v1766_v48, %v1764_v44  ;;  %v5106_v48 = vld [vmem:[%s10066_s28 + $0x10] sm:$0xc] }
 0x11a   : > { %v1765_v47 = vsel %vm1112_vm4, %v1760_v53, %v1764_v44  ;;  %v5266_v35 = vsel %vm4449_vm3, %v5263_v13, %v5265_v26  ;;  %v5268_v36 = vsel %vm4449_vm3, %v5265_v26, %v5267_v33 }
 0x11d   : > { %8564 = vmatmul.mubr.msk.bf16.gmra.mrb[24].mxu1 %vm383_vm1, %v1741_v11  ;;  %v1770_v11 = vshll.u32 %v10719_v57, 16  ;;  %v10743_v57 = vld [vmem:[%s10150_s9 + $0x98] sm:$0xff]  }
 0x11e   : > { %8567 = vmatprep.mubr.msk.bf16.mxu1 %vm383_vm1, %v1749_v2  ;;  %v9926_v2 = vld [vmem:[%s10150_s9 + $0x4] sm:$0xf]  ;;  %v5271_v44 = vrot.slane %v10743_v57, 2 }
 0x11f   : > { %8902 = vmatmul.mubr.msk.bf16.gmra.mrb[20].mxu0 %vm383_vm1, %v5262_v20  ;;  %v7728_v28 = vcombine.low %v2044_v40, %v9926_v2  ;;  %v1772_v20 = vrot.slane %v1770_v11, 1  ;;  %v2053_v40 = vrot.slane %v10279_v43, 1  ;;  %v5107_v11 = vld [vmem:[%s10066_s28 + $0x14] sm:$0xf]  ;;  %v2055_v2 = vrot.slane %v10289_v7, 1 }
 0x120   : > { %8905 = vmatprep.mubr.msk.bf16.mxu0 %vm383_vm1, %v5264_v12  ;;  %v10739_v12 = vld [vmem:[%s10150_s9 + $0x90] sm:$0xff]  }
 0x121   : > { %v2052_v53 = vrot.slane %v7728_v28, 1  ;;  %v5269_v13 = vrot.slane %v10739_v12, 2 }
 0x123   : > { %v2054_v26 = vsel %vm2051_vm5, %v2052_v53, %v2053_v40  ;;  %v5270_v43 = vsel %vm4449_vm3, %v5267_v33, %v5269_v13  ;;  %v5272_v28 = vsel %vm4449_vm3, %v5269_v13, %v5271_v44 }
 0x125   : > { %8568 = vmatmul.mubr.msk.bf16.gmra.mrb[28].mxu1 %vm383_vm1, %v1757_v25  ;;  %v1773_v25 = vsel %vm1112_vm4, %v1768_v29, %v1772_v20  ;;  %v10763_v29 = vld [vmem:[%s10066_s28 + $0x18] sm:$0xff]   ;;  %v2057_v20 = vrot.slane %v10297_v61, 1  ;;  %v10777_v61 = vld [vmem:[%s11623_s2 + $0x6] sm:$0x3] }
 0x126   : > { %8571 = vmatprep.mubr.msk.bf16.mxu1 %vm383_vm1, %v1765_v47  ;;  %v9880_v47 = vld [vmem:[%s10150_s9 + $0xa0] ss:$0 sps:$4 sm:$0x33]   ;;  %v5641_v7 = vrot.slane %v10763_v29, 2 }
 0x127   : > { %8906 = vmatmul.mubr.msk.bf16.gmra.mrb[24].mxu0 %vm383_vm1, %v5266_v35  ;;  %v10760_v35 = vcombine.low %v5106_v48, %v5107_v11  ;;  %v5273_v33 = vrot.slane %v9880_v47, 2  ;;  %v2058_v13 = vsel %vm2051_vm5, %v2055_v2, %v2057_v20  ;;  %v2059_v48 = vrot.slane %v10310_v9, 1 }
 0x128   : > { %8909 = vmatprep.mubr.msk.bf16.mxu0 %vm383_vm1, %v5268_v36  ;;  %v2056_v36 = vsel %vm2051_vm5, %v2053_v40, %v2055_v2  ;;  %v10783_v40 = vld [vmem:[%s10066_s28 + $0x20] sm:$0xff]  }
 0x129   : > { %v5640_v53 = vrot.slane %v10760_v35, 2  ;;  %v2060_v47 = vsel %vm2051_vm5, %v2057_v20, %v2059_v48 }
 0x12b   : > { %v5642_v11 = vsel %vm4449_vm3, %v5640_v53, %v5641_v7  ;;  %v10810_v53 = vld [vmem:[%s10066_s28 + $0x38] sm:$0xff]  }
 0x12d   : > { %8572 = vmatmul.mubr.msk.bf16.gmra.mrb[32].mxu1 %vm383_vm1, %v1773_v25  ;;  %v2456_v25 = vsel %vm438_vm0, %v10543_v5, 0  ;;  %v10788_v5 = vld [vmem:[%s10066_s28 + $0x28] sm:$0xff]  }
 0x12e   : > { %8577 = vmatprep.mubr.msk.bf16.mxu1 %vm383_vm1, %v2054_v26  ;;  %v5274_v26 = vsel %vm4449_vm3, %v5271_v44, %v5273_v33  ;;  %v5643_v44 = vrot.slane %v10783_v40, 2  ;;  %v5645_v9 = vrot.slane %v10788_v5, 2  ;;  %v2063_v33 = vrot.slane %v10331_v30, 1 }
 0x12f   : > { %8910 = vmatmul.mubr.msk.bf16.gmra.mrb[28].mxu0 %vm383_vm1, %v5270_v43  ;;  %v2061_v43 = vrot.slane %v10317_v18, 1  ;;  %v10803_v18 = vld [vmem:[%s10066_s28 + $0x30] sm:$0xff]  }
 0x130   : > { %8913 = vmatprep.mubr.msk.bf16.mxu0 %vm383_vm1, %v5272_v28  ;;  %v5644_v28 = vsel %vm4449_vm3, %v5641_v7, %v5643_v44  ;;  %v5646_v20 = vsel %vm4449_vm3, %v5643_v44, %v5645_v9  ;;  %v10816_v7 = vld [vmem:[%s11624_s3 + $0xe] sm:$0x3]  ;;  %v5647_v30 = vrot.slane %v10803_v18, 2 }
 0x131   : > { %v2062_v2 = vsel %vm2051_vm5, %v2059_v48, %v2061_v43  ;;  %v10830_v48 = vld [vmem:[%s10066_s28 + $0x40] sm:$0xff]   ;;  %v10835_v44 = vld [vmem:[%s10066_s28 + $0x48] sm:$0xff]  }
 0x135   : > { %8578 = vmatmul.mubr.msk.bf16.vlgmr.msra.gmra.mrb[0].mxu1 %vm383_vm1, %v2056_v36  ;;  %v6180_v36 = vsel %vm438_vm0, %v10594_v60, 0  ;;  %v2064_v60 = vsel %vm2051_vm5, %v2061_v43, %v2063_v33 }
 0x136   : > { %8581 = vmatprep.mubr.msk.bf16.mxu1 %vm383_vm1, %v2058_v13  ;;  %8614 = vmatpush3.bf16.msra.mxu1 %v2456_v25  ;;  %v2065_v13 = vrot.slane %v10340_v58, 1  ;;  %v5649_v25 = vrot.slane %v10810_v53, 2  ;;  %v5648_v58 = vsel %vm4449_vm3, %v5645_v9, %v5647_v30  ;;  %v5651_v9 = vrot.slane %v10830_v48, 2 }
 0x137   : > { %9725 = vmatprep.subr.msk.bf16.mxu1 %vm438_vm0, %v10777_v61  ;;  %8914 = vmatmul.mubr.msk.bf16.gmra.mrb[32].mxu0 %vm383_vm1, %v5274_v26 }
 0x138   : > { %8919 = vmatprep.mubr.msk.bf16.mxu0 %vm383_vm1, %v5642_v11  ;;  %v2066_v26 = vsel %vm2051_vm5, %v2063_v33, %v2065_v13  ;;  %v2067_v11 = vrot.slane %v10360_v51, 1  ;;  %v5650_v43 = vsel %vm4449_vm3, %v5647_v30, %v5649_v25  ;;  %v5652_v51 = vsel %vm4449_vm3, %v5649_v25, %v5651_v9  ;;  %v10853_v30 = vld [vmem:[%s10066_s28 + $0x58] sm:$0xff]  }
 0x13d   : > { %8582 = vmatmul.mubr.msk.bf16.gmra.mrb[4].mxu1 %vm383_vm1, %v2060_v47  ;;  %v2069_v47 = vrot.slane %v10363_v52, 1  ;;  %v10848_v52 = vld [vmem:[%s10066_s28 + $0x50] sm:$0xff]  }
 0x13e   : > { %8585 = vmatprep.mubr.msk.bf16.mxu1 %vm383_vm1, %v2062_v2  ;;  %v2068_v2 = vsel %vm2051_vm5, %v2065_v13, %v2067_v11  ;;  %v2073_v13 = vrot.slane %v10393_v15, 1  ;;  %v10866_v15 = vld [vmem:[%s10066_s28 + $0x60] sm:$0xff]  }
 0x13f   : > { %8920 = vmatmul.mubr.msk.bf16.vlgmr.msra.gmra.mrb[0].mxu0 %vm383_vm1, %v5644_v28  ;;  %v5653_v28 = vrot.slane %v10835_v44, 2  ;;  %v2070_v33 = vsel %vm2051_vm5, %v2067_v11, %v2069_v47  ;;  %v2075_v11 = vrot.slane %v10408_v32, 1 }
 0x140   : > { %8956 = vmatpush3.bf16.msra.mxu0 %v6180_v36  ;;  %8923 = vmatprep.mubr.msk.bf16.mxu0 %vm383_vm1, %v5646_v20  ;;  %v2071_v36 = vrot.slane %v10388_v10, 1 }
 0x141   : > { %9734 = vmatprep.subr.msk.bf16.mxu0 %vm438_vm0, %v10816_v7  ;;  %v5654_v20 = vsel %vm4449_vm3, %v5651_v9, %v5653_v28  ;;  %v10871_v9 = vld [vmem:[%s10066_s28 + $0x68] sm:$0xff]  }
 0x142   : > { %v2072_v25 = vsel %vm2051_vm5, %v2069_v47, %v2071_v36  ;;  %v2077_v47 = vrot.slane %v10414_v38, 1  ;;  %v10884_v38 = vld [vmem:[%s10066_s28 + $0x70] sm:$0xff]  }
 0x145   : > { %8586 = vmatmul.mubr.msk.bf16.gmra.mrb[8].mxu1 %vm383_vm1, %v2064_v60  ;;  %v5655_v60 = vrot.slane %v10848_v52, 2 }
 0x146   : > { %8589 = vmatprep.mubr.msk.bf16.mxu1 %vm383_vm1, %v2066_v26  ;;  %v5657_v26 = vrot.slane %v10853_v30, 2 }
 0x147   : > { %8924 = vmatmul.mubr.msk.bf16.gmra.mrb[4].mxu0 %vm383_vm1, %v5648_v58  ;;  %v2074_v58 = vsel %vm2051_vm5, %v2071_v36, %v2073_v13  ;;  %v5656_v10 = vsel %vm4449_vm3, %v5653_v28, %v5655_v60  ;;  %v2076_v28 = vsel %vm2051_vm5, %v2073_v13, %v2075_v11  ;;  %v2079_v36 = vrot.slane %v10428_v54, 1 }
 0x148   : > { %8927 = vmatprep.mubr.msk.bf16.mxu0 %vm383_vm1, %v5650_v43  ;;  %v5658_v43 = vsel %vm4449_vm3, %v5655_v60, %v5657_v26  ;;  %v10889_v60 = vld [vmem:[%s10066_s28 + $0x78] sm:$0xff]   ;;  %v2081_v13 = vrot.slane %v10434_v63, 1  ;;  %v2083_v63 = vrot.slane %v10448_v14, 1 }
 0x14a   : > { %v2082_v54 = vsel %vm2051_vm5, %v2079_v36, %v2081_v13 }
 0x14d   : > { %8590 = vmatmul.mubr.msk.bf16.gmra.mrb[12].mxu1 %vm383_vm1, %v2068_v2  ;;  %v5659_v2 = vrot.slane %v10866_v15, 2 }
 0x14e   : > { %8593 = vmatprep.mubr.msk.bf16.mxu1 %vm383_vm1, %v2070_v33  ;;  %v5661_v33 = vrot.slane %v10871_v9, 2 }
 0x14f   : > { %8928 = vmatmul.mubr.msk.bf16.gmra.mrb[8].mxu0 %vm383_vm1, %v5652_v51  ;;  %v2078_v51 = vsel %vm2051_vm5, %v2075_v11, %v2077_v47  ;;  %v5660_v32 = vsel %vm4449_vm3, %v5657_v26, %v5659_v2  ;;  %v2080_v26 = vsel %vm2051_vm5, %v2077_v47, %v2079_v36  ;;  %v10902_v11 = vld [vmem:[%s10066_s28 + $0x80] sm:$0xff]   ;;  %v2085_v47 = vrot.slane %v10454_v22, 1  ;;  %v10922_v22 = vld [vmem:[%s10066_s28 + $0x90] sm:$0xff]  }
 0x150   : > { %8931 = vmatprep.mubr.msk.bf16.mxu0 %vm383_vm1, %v5654_v20  ;;  %v5662_v20 = vsel %vm4449_vm3, %v5659_v2, %v5661_v33  ;;  %v10907_v2 = vld [vmem:[%s10066_s28 + $0x88] sm:$0xff]  }
 0x151   : > { %v5669_v14 = vrot.slane %v10907_v2, 2  ;;  %v2086_v36 = vsel %vm2051_vm5, %v2083_v63, %v2085_v47 }
 0x155   : > { %8594 = vmatmul.mubr.msk.bf16.gmra.mrb[16].mxu1 %vm383_vm1, %v2072_v25  ;;  %v5663_v25 = vrot.slane %v10884_v38, 2 }
 0x156   : > { %8597 = vmatprep.mubr.msk.bf16.mxu1 %vm383_vm1, %v2074_v58  ;;  %v5665_v58 = vrot.slane %v10889_v60, 2 }
 0x157   : > { %8932 = vmatmul.mubr.msk.bf16.gmra.mrb[12].mxu0 %vm383_vm1, %v5656_v10  ;;  %v5664_v10 = vsel %vm4449_vm3, %v5661_v33, %v5663_v25  ;;  %v5667_v33 = vrot.slane %v10902_v11, 2 }
 0x158   : > { %8935 = vmatprep.mubr.msk.bf16.mxu0 %vm383_vm1, %v5658_v43  ;;  %v5666_v43 = vsel %vm4449_vm3, %v5663_v25, %v5665_v58  ;;  %v2087_v25 = vrot.slane %v10475_v45, 1 }
 0x15d   : > { %8598 = vmatmul.mubr.msk.bf16.gmra.mrb[20].mxu1 %vm383_vm1, %v2076_v28  ;;  %v2045_v28 = vld [vmem:[%s10066_s28] sm:$0xe] }
 0x15e   : > { %8601 = vmatprep.mubr.msk.bf16.mxu1 %vm383_vm1, %v2078_v51  ;;  %v2084_v51 = vsel %vm2051_vm5, %v2081_v13, %v2083_v63  ;;  %v2365_v13 = vrot.slane %v10479_v49, 1  ;;  %v5964_v49 = vshrl.u32 %v10521_v42, 16 }
 0x15f   : > { %8936 = vmatmul.mubr.msk.bf16.gmra.mrb[16].mxu0 %vm383_vm1, %v5660_v32  ;;  %v7748_v32 = vcombine.low %v2045_v28, %v10458_v24  ;;  %v5670_v24 = vsel %vm4449_vm3, %v5667_v33, %v5669_v14  ;;  %v5959_v28 = vshll.u32 %v10518_v41, 16 }
 0x160   : > { %8939 = vmatprep.mubr.msk.bf16.mxu0 %vm383_vm1, %v5662_v20  ;;  %v5668_v20 = vsel %vm4449_vm3, %v5665_v58, %v5667_v33  ;;  %v5671_v58 = vrot.slane %v10922_v22, 2  ;;  %v5967_v33 = vshll.u32 %v10521_v42, 16  ;;  %v5973_v42 = vshrl.u32 %v10552_v31, 16 }
 0x165   : > { %8602 = vmatmul.mubr.msk.bf16.gmra.mrb[24].mxu1 %vm383_vm1, %v2080_v26  ;;  %v10926_v26 = vld [vmem:[%s10066_s28 + $0x98] sm:$0xff]  }
 0x166   : > { %8605 = vmatprep.mubr.msk.bf16.mxu1 %vm383_vm1, %v2082_v54  ;;  %v2364_v54 = vrot.slane %v7748_v32, 1  ;;  %v5673_v63 = vrot.slane %v10926_v26, 2 }
 0x167   : > { %8940 = vmatmul.mubr.msk.bf16.gmra.mrb[20].mxu0 %vm383_vm1, %v5664_v10  ;;  %v2088_v10 = vsel %vm2051_vm5, %v2085_v47, %v2087_v25  ;;  %v9900_v47 = vld [vmem:[%s10066_s28 + $0xa0] ss:$0 sps:$4 sm:$0x33]  }
 0x168   : > { %8943 = vmatprep.mubr.msk.bf16.mxu0 %vm383_vm1, %v5666_v43  ;;  %v2366_v45 = vsel %vm2051_vm5, %v2364_v54, %v2365_v13  ;;  %v5956_v43 = vshrl.u32 %v10518_v41, 16  ;;  %v5674_v32 = vsel %vm4449_vm3, %v5671_v58, %v5673_v63  ;;  %v5961_v54 = vrot.slane %v5959_v28, 3 }
 0x169   : > { %v5966_v41 = vrot.slane %v5964_v49, 2  ;;  %v5982_v28 = vshrl.u32 %v10556_v19, 16  ;;  %v5985_v49 = vshll.u32 %v10556_v19, 16 }
 0x16a   : > { %v5958_v25 = vrot.slane %v5956_v43, 2 }
 0x16b   : > { %v5984_v19 = vrot.slane %v5982_v28, 2  ;;  %v2377_v28 = vrot.slane %v10559_v23, 1 }
 0x16d   : > { %8606 = vmatmul.mubr.msk.bf16.gmra.mrb[28].mxu1 %vm383_vm1, %v2084_v51  ;;  %v5672_v51 = vsel %vm4449_vm3, %v5669_v14, %v5671_v58  ;;  %v5675_v14 = vrot.slane %v9900_v47, 2  ;;  %v5987_v47 = vrot.slane %v5985_v49, 3  ;;  %v6012_v49 = vshll.u32 %v10615_v21, 16 }
 0x16e   : > { %8609 = vmatprep.mubr.msk.bf16.mxu1 %vm383_vm1, %v2086_v36  ;;  %v2367_v36 = vrot.slane %v10492_v4, 1  ;;  %v2932_v4 = vsel %vm438_vm0, %v10777_v61, 0  ;;  %v2371_v61 = vrot.slane %v10514_v37, 1  ;;  %v5994_v37 = vshll.u32 %v10580_v46, 16 }
 0x16f   : > { %8944 = vmatmul.mubr.msk.bf16.gmra.mrb[24].mxu0 %vm383_vm1, %v5668_v20  ;;  %v2369_v20 = vrot.slane %v10498_v17, 1  ;;  %v5962_v17 = vor.u32 %v5961_v54, %v5958_v25  ;;  %v5991_v54 = vshrl.u32 %v10580_v46, 16  ;;  %v2375_v46 = vrot.slane %v10547_v8, 1 }
 0x170   : > { %8947 = vmatprep.mubr.msk.bf16.mxu0 %vm383_vm1, %v5670_v24  ;;  %v5969_v24 = vrot.slane %v5967_v33, 3  ;;  %v2368_v58 = vsel %vm2051_vm5, %v2365_v13, %v2367_v36  ;;  %v5975_v13 = vrot.slane %v5973_v42, 2  ;;  %v6000_v42 = vshrl.u32 %v10586_v55, 16 }
 0x171   : > { %v6009_v8 = vshrl.u32 %v10615_v21, 16  ;;  %v2378_v23 = vsel %vm2051_vm5, %v2375_v46, %v2377_v28  ;;  %v2379_v21 = vrot.slane %v10575_v39, 1 }
 0x172   : > { %v5970_v43 = vor.u32 %v5969_v24, %v5966_v41  ;;  %v5988_v41 = vor.u32 %v5987_v47, %v5984_v19  ;;  %v6014_v19 = vrot.slane %v6012_v49, 3 }
 0x175   : > { %8610 = vmatmul.mubr.msk.bf16.gmra.mrb[32].mxu1 %vm383_vm1, %v2088_v10  ;;  %v5976_v10 = vshll.u32 %v10552_v31, 16  ;;  %v10960_v31 = vld [vmem:[%s11624_s3 + $0x6] sm:$0x3] }
 0x176   : > { %8615 = vmatprep.mubr.msk.bf16.mxu1 %vm383_vm1, %v2366_v45  ;;  %v2370_v45 = vsel %vm2051_vm5, %v2367_v36, %v2369_v20  ;;  %v2373_v36 = vrot.slane %v10525_v50, 1  ;;  %v6003_v50 = vshll.u32 %v10586_v55, 16  ;;  %v10989_v55 = vld [vmem:[%s11623_s2 + $0x10] sm:$0x3] }
 0x177   : > { %8948 = vmatmul.mubr.msk.bf16.gmra.mrb[28].mxu0 %vm383_vm1, %v5672_v51  ;;  %v5978_v33 = vrot.slane %v5976_v10, 3  ;;  %v5676_v51 = vsel %vm4449_vm3, %v5673_v63, %v5675_v14  ;;  %v2372_v63 = vsel %vm2051_vm5, %v2369_v20, %v2371_v61  ;;  %v6625_v14 = vsel %vm438_vm0, %v10816_v7, 0 }
 0x178   : > { %8951 = vmatprep.mubr.msk.bf16.mxu0 %vm383_vm1, %v5674_v32  ;;  %v5971_v32 = vsel %vm5954_vm6, %v5962_v17, %v5970_v43  ;;  %v2374_v24 = vsel %vm2051_vm5, %v2371_v61, %v2373_v36  ;;  %v5993_v20 = vrot.slane %v5991_v54, 2  ;;  %v6005_v17 = vrot.slane %v6003_v50, 3 }
 0x179   : > { %v5979_v25 = vor.u32 %v5978_v33, %v5975_v13  ;;  %v6018_v33 = vshrl.u32 %v10619_v27, 16  ;;  %v2380_v54 = vsel %vm2051_vm5, %v2377_v28, %v2379_v21  ;;  %v6039_v50 = vshll.u32 %v10645_v6, 16 }
 0x17a   : > { %v6048_v28 = vshll.u32 %v10667_v56, 16 }
 0x17b   : > { %v5980_v10 = vsel %vm5954_vm6, %v5970_v43, %v5979_v25  ;;  %v2376_v43 = vsel %vm2051_vm5, %v2373_v36, %v2375_v46  ;;  %v6020_v36 = vrot.slane %v6018_v33, 2  ;;  %v6041_v46 = vrot.slane %v6039_v50, 3  ;;  %v11650_v33 = vld [vmem:[#allocation3_spill] sm:$0xff] }
 0x17d   : > { %8616 = vmatmul.mubr.msk.bf16.vlgmr.msra.gmra.mrb[0].mxu1 %vm383_vm1, %v2368_v58  ;;  %v5996_v58 = vrot.slane %v5994_v37, 3  ;;  %v6027_v37 = vshrl.u32 %v10641_v0, 16 }
 0x17e   : > { %8619 = vmatprep.mubr.msk.bf16.mxu1 %vm383_vm1, %v2370_v45  ;;  %8652 = vmatpush3.bf16.msra.mxu1 %v2932_v4  ;;  %v5989_v45 = vsel %vm5954_vm6, %v5979_v25, %v5988_v41  ;;  %v6002_v4 = vrot.slane %v6000_v42, 2  ;;  %v6036_v42 = vshrl.u32 %v10645_v6, 16 }
 0x17f   : > { %9726 = vmatprep.subr.msk.bf16.mxu1 %vm438_vm0, %v10960_v31  ;;  %8952 = vmatmul.mubr.msk.bf16.gmra.mrb[32].mxu0 %vm383_vm1, %v5676_v51  ;;  %v5997_v7 = vor.u32 %v5996_v58, %v5993_v20  ;;  %v6021_v51 = vshll.u32 %v10619_v27, 16  ;;  %v2383_v20 = vrot.slane %v10610_v16, 1 }
 0x180   : > { %8957 = vmatprep.mubr.msk.bf16.mxu0 %vm383_vm1, %v5971_v32  ;;  %v6006_v13 = vor.u32 %v6005_v17, %v6002_v4  ;;  %v6011_v32 = vrot.slane %v6009_v8, 2  ;;  %v6045_v17 = vshrl.u32 %v10667_v56, 16 }
 0x181   : > { %v5998_v61 = vsel %vm5954_vm6, %v5988_v41, %v5997_v7  ;;  %v6023_v25 = vrot.slane %v6021_v51, 3  ;;  %v6030_v41 = vshll.u32 %v10641_v0, 16  ;;  %v6038_v0 = vrot.slane %v6036_v42, 2 }
 0x182   : > { %v6007_v47 = vsel %vm5954_vm6, %v5997_v7, %v6006_v13  ;;  %v6015_v27 = vor.u32 %v6014_v19, %v6011_v32  ;;  %v2387_v51 = vrot.slane %v11650_v33, 1  ;;  %v11651_v19 = vld [vmem:[#allocation4_spill] sm:$0xff]  ;;  %v2671_v33 = vld [vmem:[%s10150_s9 + $0x8] sm:$0xe] }
 0x183   : > { %v6042_v7 = vor.u32 %v6041_v46, %v6038_v0  ;;  %v11655_v46 = vld [vmem:[#allocation7_spill] sm:$0xff] }
 0x185   : > { %8620 = vmatmul.mubr.msk.bf16.gmra.mrb[4].mxu1 %vm383_vm1, %v2372_v63  ;;  %v2381_v63 = vrot.slane %v10589_v59, 1  ;;  %v6016_v59 = vsel %vm5954_vm6, %v6006_v13, %v6015_v27  ;;  %v6047_v13 = vrot.slane %v6045_v17, 2 }
 0x186   : > { %8623 = vmatprep.mubr.msk.bf16.mxu1 %vm383_vm1, %v2374_v24  ;;  %v6024_v24 = vor.u32 %v6023_v25, %v6020_v36  ;;  %v11652_v25 = vld [vmem:[#allocation9_spill] sm:$0xff] }
 0x187   : > { %8958 = vmatmul.mubr.msk.bf16.vlgmr.msra.gmra.mrb[0].mxu0 %vm383_vm1, %v5980_v10  ;;  %v2382_v39 = vsel %vm2051_vm5, %v2379_v21, %v2381_v63  ;;  %v6029_v10 = vrot.slane %v6027_v37, 2  ;;  %v2384_v4 = vsel %vm2051_vm5, %v2381_v63, %v2383_v20  ;;  %v2389_v21 = vrot.slane %v11651_v19, 1 }
 0x188   : > { %8994 = vmatpush3.bf16.msra.mxu0 %v6625_v14  ;;  %8961 = vmatprep.mubr.msk.bf16.mxu0 %vm383_vm1, %v5989_v45  ;;  %v6032_v14 = vrot.slane %v6030_v41, 3  ;;  %v6025_v58 = vsel %vm5954_vm6, %v6015_v27, %v6024_v24  ;;  %v2385_v45 = vrot.slane %v10622_v34, 1  ;;  %v6063_v63 = vshrl.u32 %v11652_v25, 16  ;;  %v11653_v41 = vld [vmem:[#allocation10_spill] sm:$0xff] }
 0x189   : > { %9735 = vmatprep.subr.msk.bf16.mxu0 %vm438_vm0, %v10989_v55  ;;  %v6066_v27 = vshll.u32 %v11652_v25, 16  ;;  %v2390_v37 = vsel %vm2051_vm5, %v2387_v51, %v2389_v21  ;;  %v6099_v19 = vshrl.u32 %v10739_v12, 16 }
 0x18a   : > { %v6033_v6 = vor.u32 %v6032_v14, %v6029_v10  ;;  %v2386_v16 = vsel %vm2051_vm5, %v2383_v20, %v2385_v45  ;;  %v2388_v36 = vsel %vm2051_vm5, %v2385_v45, %v2387_v51  ;;  %v6065_v50 = vrot.slane %v6063_v63, 2  ;;  %v11654_v10 = vld [vmem:[#allocation5_spill] sm:$0xff] }
 0x18b   : > { %v2391_v14 = vrot.slane %v11654_v10, 1  ;;  %v2393_v45 = vrot.slane %v11655_v46, 1  ;;  %v6108_v63 = vshrl.u32 %v10743_v57, 16 }
 0x18c   : > { %v6034_v34 = vsel %vm5954_vm6, %v6024_v24, %v6033_v6  ;;  %v6072_v24 = vshrl.u32 %v11653_v41, 16 }
 0x18d   : > { %8624 = vmatmul.mubr.msk.bf16.gmra.mrb[8].mxu1 %vm383_vm1, %v2376_v43  ;;  %v11649_v43 = vld [vmem:[#allocation6_spill] sm:$0xff] }
 0x18e   : > { %8627 = vmatprep.mubr.msk.bf16.mxu1 %vm383_vm1, %v2378_v23  ;;  %v6054_v8 = vshrl.u32 %v11649_v43, 16  ;;  %v6057_v49 = vshll.u32 %v11649_v43, 16  ;;  %v6050_v23 = vrot.slane %v6048_v28, 3  ;;  %v2392_v28 = vsel %vm2051_vm5, %v2389_v21, %v2391_v14 }
 0x18f   : > { %8962 = vmatmul.mubr.msk.bf16.gmra.mrb[4].mxu0 %vm383_vm1, %v5998_v61  ;;  %v6043_v61 = vsel %vm5954_vm6, %v6033_v6, %v6042_v7  ;;  %v6081_v6 = vshrl.u32 %v10716_v62, 16  ;;  %v6090_v43 = vshrl.u32 %v10723_v3, 16  ;;  %v6102_v21 = vshll.u32 %v10739_v12, 16 }
 0x190   : > { %8965 = vmatprep.mubr.msk.bf16.mxu0 %vm383_vm1, %v6007_v47  ;;  %v6056_v56 = vrot.slane %v6054_v8, 2  ;;  %v6059_v32 = vrot.slane %v6057_v49, 3  ;;  %v6051_v47 = vor.u32 %v6050_v23, %v6047_v13  ;;  %v6093_v8 = vshll.u32 %v10723_v3, 16 }
 0x191   : > { %v6083_v49 = vrot.slane %v6081_v6, 2  ;;  %v6101_v12 = vrot.slane %v6099_v19, 2 }
 0x192   : > { %v6052_v42 = vsel %vm5954_vm6, %v6042_v7, %v6051_v47 }
 0x195   : > { %8628 = vmatmul.mubr.msk.bf16.gmra.mrb[12].mxu1 %vm383_vm1, %v2380_v54  ;;  %v6060_v54 = vor.u32 %v6059_v32, %v6056_v56  ;;  %v6095_v56 = vrot.slane %v6093_v8, 3  ;;  %v2397_v32 = vrot.slane %v10700_v1, 1  ;;  %v6111_v1 = vshll.u32 %v10743_v57, 16  ;;  %v11084_v57 = vld [vmem:[%s10150_s9 + $0x10] sm:$0xff]  }
 0x196   : > { %8631 = vmatprep.mubr.msk.bf16.mxu1 %vm383_vm1, %v2382_v39  ;;  %v6075_v39 = vshll.u32 %v11653_v41, 16  ;;  %v6104_v41 = vrot.slane %v6102_v21, 3 }
 0x197   : > { %8966 = vmatmul.mubr.msk.bf16.gmra.mrb[8].mxu0 %vm383_vm1, %v6016_v59  ;;  %v6068_v59 = vrot.slane %v6066_v27, 3  ;;  %v6061_v20 = vsel %vm5954_vm6, %v6051_v47, %v6060_v54  ;;  %v9927_v47 = vld [vmem:[%s10150_s9 + $0xc] sm:$0xf] }
 0x198   : > { %8969 = vmatprep.mubr.msk.bf16.mxu0 %vm383_vm1, %v6025_v58  ;;  %v6074_v58 = vrot.slane %v6072_v24, 2  ;;  %v6077_v0 = vrot.slane %v6075_v39, 3  ;;  %v11657_v24 = vld [vmem:[#allocation11_spill] sm:$0xff] }
 0x199   : > { %v6069_v17 = vor.u32 %v6068_v59, %v6065_v50  ;;  %v2399_v39 = vrot.slane %v11657_v24, 1  ;;  %v6110_v50 = vrot.slane %v6108_v63, 2  ;;  %v6113_v59 = vrot.slane %v6111_v1, 3 }
 0x19a   : > { %v6078_v7 = vor.u32 %v6077_v0, %v6074_v58  ;;  %v6105_v58 = vor.u32 %v6104_v41, %v6101_v12  ;;  %v6427_v1 = vshrl.u32 %v10788_v5, 16 }
 0x19b   : > { %v6070_v13 = vsel %vm5954_vm6, %v6060_v54, %v6069_v17  ;;  %v2400_v46 = vsel %vm2051_vm5, %v2397_v32, %v2399_v39 }
 0x19c   : > { %v6079_v51 = vsel %vm5954_vm6, %v6069_v17, %v6078_v7  ;;  %v6401_v17 = vshrl.u32 %v10760_v35, 16  ;;  %v6429_v24 = vrot.slane %v6427_v1, 2 }
 0x19d   : > { %8632 = vmatmul.mubr.msk.bf16.gmra.mrb[16].mxu1 %vm383_vm1, %v2384_v4  ;;  %v6084_v4 = vshll.u32 %v10716_v62, 16  ;;  %v11656_v62 = vld [vmem:[#allocation8_spill] sm:$0xff] }
 0x19e   : > { %8635 = vmatprep.mubr.msk.bf16.mxu1 %vm383_vm1, %v2386_v16  ;;  %v2394_v16 = vsel %vm2051_vm5, %v2391_v14, %v2393_v45  ;;  %v2395_v23 = vrot.slane %v11656_v62, 1  ;;  %v2841_v14 = vrot.slane %v11084_v57, 1 }
 0x19f   : > { %8970 = vmatmul.mubr.msk.bf16.gmra.mrb[12].mxu0 %vm383_vm1, %v6034_v34  ;;  %v6086_v34 = vrot.slane %v6084_v4, 3 }
 0x1a0   : > { %8973 = vmatprep.mubr.msk.bf16.mxu0 %vm383_vm1, %v6043_v61  ;;  %v6092_v61 = vrot.slane %v6090_v43, 2  ;;  %v2396_v25 = vsel %vm2051_vm5, %v2393_v45, %v2395_v23  ;;  %v2398_v54 = vsel %vm2051_vm5, %v2395_v23, %v2397_v32  ;;  %v6114_v45 = vor.u32 %v6113_v59, %v6110_v50  ;;  %v11107_v23 = vld [vmem:[%s10150_s9 + $0x20] sm:$0xff]   ;;  %v11134_v50 = vld [vmem:[%s10150_s9 + $0x30] sm:$0xff]  }
 0x1a1   : > { %v6087_v3 = vor.u32 %v6086_v34, %v6083_v49  ;;  %v6421_v32 = vshll.u32 %v10783_v40, 16  ;;  %v2849_v59 = vrot.slane %v11134_v50, 1 }
 0x1a2   : > { %v6096_v27 = vor.u32 %v6095_v56, %v6092_v61  ;;  %v6115_v49 = vsel %vm5954_vm6, %v6105_v58, %v6114_v45  ;;  %v6418_v56 = vshrl.u32 %v10783_v40, 16  ;;  %v11123_v40 = vld [vmem:[%s11623_s2 + $0x8] sm:$0x3] }
 0x1a4   : > { %v6106_v43 = vsel %vm5954_vm6, %v6096_v27, %v6105_v58  ;;  %v6439_v58 = vshll.u32 %v10803_v18, 16 }
 0x1a5   : > { %8636 = vmatmul.mubr.msk.bf16.gmra.mrb[20].mxu1 %vm383_vm1, %v2388_v36  ;;  %v11068_v36 = vcombine.low %v2671_v33, %v9927_v47  ;;  %v6403_v33 = vrot.slane %v6401_v17, 2  ;;  %v3334_v47 = vsel %vm438_vm0, %v10960_v31, 0  ;;  %v11129_v31 = vld [vmem:[%s10150_s9 + $0x28] sm:$0xff]   ;;  %v6940_v17 = vsel %vm438_vm0, %v10989_v55, 0  ;;  %v11164_v55 = vld [vmem:[%s11624_s3 + $0x10] sm:$0x3] }
 0x1a6   : > { %8639 = vmatprep.mubr.msk.bf16.mxu1 %vm383_vm1, %v2390_v37  ;;  %v6088_v37 = vsel %vm5954_vm6, %v6078_v7, %v6087_v3  ;;  %v6409_v7 = vshrl.u32 %v10763_v29, 16  ;;  %v2847_v41 = vrot.slane %v11129_v31, 1 }
 0x1a7   : > { %8974 = vmatmul.mubr.msk.bf16.gmra.mrb[16].mxu0 %vm383_vm1, %v6052_v42  ;;  %v11079_v42 = vld [vmem:[%s10150_s9 + $0xa0] ss:$0 sps:$4 sm:$0x77]   ;;  %v2840_v10 = vrot.slane %v11068_v36, 1 }
 0x1a8   : > { %8977 = vmatprep.mubr.msk.bf16.mxu0 %vm383_vm1, %v6061_v20  ;;  %v6097_v20 = vsel %vm5954_vm6, %v6087_v3, %v6096_v27  ;;  %v6117_v0 = vshrl.u32 %v11079_v42, 16  ;;  %v6120_v4 = vshll.u32 %v11079_v42, 16  ;;  %v6430_v27 = vshll.u32 %v10788_v5, 16 }
 0x1a9   : > { %v2842_v6 = vsel %vm2051_vm5, %v2840_v10, %v2841_v14 }
 0x1aa   : > { %v6119_v8 = vrot.slane %v6117_v0, 2  ;;  %v6122_v34 = vrot.slane %v6120_v4, 3  ;;  %v6432_v39 = vrot.slane %v6430_v27, 3 }
 0x1ac   : > { %v6123_v3 = vor.u32 %v6122_v34, %v6119_v8  ;;  %v6433_v0 = vor.u32 %v6432_v39, %v6429_v24  ;;  %v6481_v39 = vshrl.u32 %v10853_v30, 16 }
 0x1ad   : > { %8640 = vmatmul.mubr.msk.bf16.gmra.mrb[24].mxu1 %vm383_vm1, %v2392_v28  ;;  %v6404_v28 = vshll.u32 %v10760_v35, 16  ;;  %v2845_v35 = vrot.slane %v11107_v23, 1 }
 0x1ae   : > { %8643 = vmatprep.mubr.msk.bf16.mxu1 %vm383_vm1, %v2394_v16  ;;  %v6412_v16 = vshll.u32 %v10763_v29, 16  ;;  %v6124_v12 = vsel %vm5954_vm6, %v6114_v45, %v6123_v3  ;;  %v6445_v45 = vshrl.u32 %v10810_v53, 16 }
 0x1af   : > { %8978 = vmatmul.mubr.msk.bf16.gmra.mrb[20].mxu0 %vm383_vm1, %v6070_v13  ;;  %v11103_v13 = vld [vmem:[%s10150_s9 + $0x18] sm:$0xff]   ;;  %v6406_v29 = vrot.slane %v6404_v28, 3 }
 0x1b0   : > { %8981 = vmatprep.mubr.msk.bf16.mxu0 %vm383_vm1, %v6079_v51  ;;  %v2843_v62 = vrot.slane %v11103_v13, 1  ;;  %v6411_v51 = vrot.slane %v6409_v7, 2  ;;  %v6414_v61 = vrot.slane %v6412_v16, 3  ;;  %v6441_v7 = vrot.slane %v6439_v58, 3  ;;  %v11200_v58 = vld [vmem:[%s10150_s9 + $0x58] sm:$0xff]  }
 0x1b1   : > { %v6447_v8 = vrot.slane %v6445_v45, 2 }
 0x1b2   : > { %v2844_v19 = vsel %vm2051_vm5, %v2841_v14, %v2843_v62  ;;  %v2846_v21 = vsel %vm2051_vm5, %v2843_v62, %v2845_v35  ;;  %v6415_v63 = vor.u32 %v6414_v61, %v6411_v51  ;;  %v2848_v14 = vsel %vm2051_vm5, %v2845_v35, %v2847_v41 }
 0x1b5   : > { %8644 = vmatmul.mubr.msk.bf16.gmra.mrb[28].mxu1 %vm383_vm1, %v2396_v25  ;;  %v6407_v25 = vor.u32 %v6406_v29, %v6403_v33  ;;  %v6454_v33 = vshrl.u32 %v10830_v48, 16  ;;  %v6457_v29 = vshll.u32 %v10830_v48, 16  ;;  %v11180_v48 = vld [vmem:[%s10150_s9 + $0x48] sm:$0xff]  }
 0x1b6   : > { %8647 = vmatprep.mubr.msk.bf16.mxu1 %vm383_vm1, %v2398_v54  ;;  %v6420_v54 = vrot.slane %v6418_v56, 2  ;;  %v6463_v56 = vshrl.u32 %v10835_v44, 16 }
 0x1b7   : > { %8982 = vmatmul.mubr.msk.bf16.gmra.mrb[24].mxu0 %vm383_vm1, %v6088_v37  ;;  %v6423_v37 = vrot.slane %v6421_v32, 3  ;;  %v6416_v5 = vsel %vm5954_vm6, %v6407_v25, %v6415_v63  ;;  %v6466_v32 = vshll.u32 %v10835_v44, 16  ;;  %v11185_v44 = vld [vmem:[%s10150_s9 + $0x50] sm:$0xff]  }
 0x1b8   : > { %8985 = vmatprep.mubr.msk.bf16.mxu0 %vm383_vm1, %v6097_v20  ;;  %v6436_v20 = vshrl.u32 %v10803_v18, 16  ;;  %v11153_v18 = vld [vmem:[%s10150_s9 + $0x38] sm:$0xff]   ;;  %v2857_v27 = vrot.slane %v11185_v44, 1 }
 0x1b9   : > { %v6424_v10 = vor.u32 %v6423_v37, %v6420_v54  ;;  %v2851_v16 = vrot.slane %v11153_v18, 1  ;;  %v6468_v1 = vrot.slane %v6466_v32, 3 }
 0x1ba   : > { %v6438_v28 = vrot.slane %v6436_v20, 2 }
 0x1bb   : > { %v6425_v4 = vsel %vm5954_vm6, %v6415_v63, %v6424_v10  ;;  %v2852_v35 = vsel %vm2051_vm5, %v2849_v59, %v2851_v16  ;;  %v6465_v63 = vrot.slane %v6463_v56, 2  ;;  %v11225_v56 = vld [vmem:[%s10150_s9 + $0x70] sm:$0xff]  }
 0x1bc   : > { %v6442_v62 = vor.u32 %v6441_v7, %v6438_v28  ;;  %v6490_v28 = vshrl.u32 %v10866_v15, 16  ;;  %v6493_v7 = vshll.u32 %v10866_v15, 16 }
 0x1bd   : > { %8648 = vmatmul.mubr.msk.bf16.gmra.mrb[32].mxu1 %vm383_vm1, %v2400_v46  ;;  %v2850_v46 = vsel %vm2051_vm5, %v2847_v41, %v2849_v59  ;;  %v6475_v41 = vshll.u32 %v10848_v52, 16  ;;  %v6484_v59 = vshll.u32 %v10853_v30, 16 }
 0x1be   : > { %8653 = vmatprep.mubr.msk.bf16.mxu1 %vm383_vm1, %v2842_v6  ;;  %v6448_v6 = vshll.u32 %v10810_v53, 16  ;;  %v11158_v53 = vld [vmem:[%s10150_s9 + $0x40] sm:$0xff]   ;;  %v6443_v3 = vsel %vm5954_vm6, %v6433_v0, %v6442_v62 }
 0x1bf   : > { %8986 = vmatmul.mubr.msk.bf16.gmra.mrb[28].mxu0 %vm383_vm1, %v6106_v43  ;;  %v6434_v43 = vsel %vm5954_vm6, %v6424_v10, %v6433_v0  ;;  %v2853_v34 = vrot.slane %v11158_v53, 1  ;;  %v6477_v20 = vrot.slane %v6475_v41, 3  ;;  %v2859_v0 = vrot.slane %v11200_v58, 1 }
 0x1c0   : > { %8989 = vmatprep.mubr.msk.bf16.mxu0 %vm383_vm1, %v6115_v49  ;;  %v6450_v49 = vrot.slane %v6448_v6, 3  ;;  %v6486_v45 = vrot.slane %v6484_v59, 3  ;;  %v11205_v6 = vld [vmem:[%s10150_s9 + $0x60] sm:$0xff]   ;;  %v6526_v59 = vshrl.u32 %v10902_v11, 16 }
 0x1c1   : > { %v2854_v61 = vsel %vm2051_vm5, %v2851_v16, %v2853_v34  ;;  %v2861_v30 = vrot.slane %v11205_v6, 1 }
 0x1c2   : > { %v6451_v51 = vor.u32 %v6450_v49, %v6447_v8  ;;  %v6499_v8 = vshrl.u32 %v10871_v9, 16  ;;  %v6502_v49 = vshll.u32 %v10871_v9, 16  ;;  %v2865_v9 = vrot.slane %v11225_v56, 1 }
 0x1c4   : > { %v6452_v25 = vsel %vm5954_vm6, %v6442_v62, %v6451_v51  ;;  %v6492_v62 = vrot.slane %v6490_v28, 2 }
 0x1c5   : > { %8654 = vmatmul.mubr.msk.bf16.vlgmr.msra.gmra.mrb[0].mxu1 %vm383_vm1, %v2844_v19  ;;  %v6456_v19 = vrot.slane %v6454_v33, 2  ;;  %v11220_v33 = vld [vmem:[%s10150_s9 + $0x68] sm:$0xff]  }
 0x1c6   : > { %8657 = vmatprep.mubr.msk.bf16.mxu1 %vm383_vm1, %v2846_v21  ;;  %8690 = vmatpush3.bf16.msra.mxu1 %v3334_v47  ;;  %v6459_v21 = vrot.slane %v6457_v29, 3  ;;  %v2855_v47 = vrot.slane %v11180_v48, 1  ;;  %v2863_v29 = vrot.slane %v11220_v33, 1 }
 0x1c7   : > { %9727 = vmatprep.subr.msk.bf16.mxu1 %vm438_vm0, %v11123_v40  ;;  %8990 = vmatmul.mubr.msk.bf16.gmra.mrb[32].mxu0 %vm383_vm1, %v6124_v12  ;;  %v6472_v12 = vshrl.u32 %v10848_v52, 16 }
 0x1c8   : > { %8995 = vmatprep.mubr.msk.bf16.mxu0 %vm383_vm1, %v6416_v5  ;;  %v6460_v54 = vor.u32 %v6459_v21, %v6456_v19  ;;  %v2856_v37 = vsel %vm2051_vm5, %v2853_v34, %v2855_v47  ;;  %v6469_v5 = vor.u32 %v6468_v1, %v6465_v63  ;;  %v2858_v24 = vsel %vm2051_vm5, %v2855_v47, %v2857_v27 }
 0x1c9   : > { %v6508_v19 = vshrl.u32 %v10884_v38, 16  ;;  %v6511_v21 = vshll.u32 %v10884_v38, 16  ;;  %v6517_v63 = vshrl.u32 %v10889_v60, 16  ;;  %v6520_v1 = vshll.u32 %v10889_v60, 16 }
 0x1ca   : > { %v6461_v10 = vsel %vm5954_vm6, %v6451_v51, %v6460_v54  ;;  %v6470_v52 = vsel %vm5954_vm6, %v6460_v54, %v6469_v5  ;;  %v6501_v51 = vrot.slane %v6499_v8, 2 }
 0x1cb   : > { %v6510_v54 = vrot.slane %v6508_v19, 2 }
 0x1cd   : > { %8658 = vmatmul.mubr.msk.bf16.gmra.mrb[4].mxu1 %vm383_vm1, %v2848_v14  ;;  %v6474_v14 = vrot.slane %v6472_v12, 2  ;;  %v11240_v12 = vld [vmem:[%s10150_s9 + $0x78] sm:$0xff]  }
 0x1ce   : > { %8661 = vmatprep.mubr.msk.bf16.mxu1 %vm383_vm1, %v2850_v46  ;;  %v6483_v46 = vrot.slane %v6481_v39, 2  ;;  %v2867_v41 = vrot.slane %v11240_v12, 1  ;;  %v11245_v39 = vld [vmem:[%s10150_s9 + $0x80] sm:$0xff]  }
 0x1cf   : > { %8996 = vmatmul.mubr.msk.bf16.vlgmr.msra.gmra.mrb[0].mxu0 %vm383_vm1, %v6425_v4  ;;  %v6478_v4 = vor.u32 %v6477_v20, %v6474_v14  ;;  %v2869_v60 = vrot.slane %v11245_v39, 1 }
 0x1d0   : > { %9032 = vmatpush3.bf16.msra.mxu0 %v6940_v17  ;;  %8999 = vmatprep.mubr.msk.bf16.mxu0 %vm383_vm1, %v6434_v43  ;;  %v2860_v17 = vsel %vm2051_vm5, %v2857_v27, %v2859_v0  ;;  %v6487_v16 = vor.u32 %v6486_v45, %v6483_v46  ;;  %v2862_v43 = vsel %vm2051_vm5, %v2859_v0, %v2861_v30  ;;  %v6535_v0 = vshrl.u32 %v10907_v2, 16 }
 0x1d1   : > { %9736 = vmatprep.subr.msk.bf16.mxu0 %vm438_vm0, %v11164_v55  ;;  %v6479_v34 = vsel %vm5954_vm6, %v6469_v5, %v6478_v4  ;;  %v6519_v5 = vrot.slane %v6517_v63, 2  ;;  %v2868_v20 = vsel %vm2051_vm5, %v2865_v9, %v2867_v41  ;;  %v2870_v45 = vsel %vm2051_vm5, %v2867_v41, %v2869_v60 }
 0x1d2   : > { %v6488_v15 = vsel %vm5954_vm6, %v6478_v4, %v6487_v16 }
 0x1d5   : > { %8662 = vmatmul.mubr.msk.bf16.gmra.mrb[8].mxu1 %vm383_vm1, %v2852_v35  ;;  %v6495_v35 = vrot.slane %v6493_v7, 3  ;;  %v6537_v7 = vrot.slane %v6535_v0, 2  ;;  %v9946_v0 = vld [vmem:[%s10066_s28 + $0x18] sm:$0xff]  }
 0x1d6   : > { %8665 = vmatprep.mubr.msk.bf16.mxu1 %vm383_vm1, %v2854_v61  ;;  %v6504_v61 = vrot.slane %v6502_v49, 3 }
 0x1d7   : > { %9000 = vmatmul.mubr.msk.bf16.gmra.mrb[4].mxu0 %vm383_vm1, %v6443_v3  ;;  %v6496_v32 = vor.u32 %v6495_v35, %v6492_v62  ;;  %v2864_v3 = vsel %vm2051_vm5, %v2861_v30, %v2863_v29  ;;  %v6528_v30 = vrot.slane %v6526_v59, 2  ;;  %v6544_v35 = vshrl.u32 %v10922_v22, 16  ;;  %v6840_v59 = vld [vmem:[%s10150_s9 + $0x10] sm:$0x8] }
 0x1d8   : > { %9003 = vmatprep.mubr.msk.bf16.mxu0 %vm383_vm1, %v6452_v25  ;;  %v6505_v47 = vor.u32 %v6504_v61, %v6501_v51  ;;  %v2866_v25 = vsel %vm2051_vm5, %v2863_v29, %v2865_v9  ;;  %v6547_v29 = vshll.u32 %v10922_v22, 16  ;;  %v6553_v61 = vshrl.u32 %v10926_v26, 16 }
 0x1d9   : > { %v6497_v27 = vsel %vm5954_vm6, %v6487_v16, %v6496_v32  ;;  %v6556_v9 = vshll.u32 %v10926_v26, 16  ;;  %v6546_v19 = vrot.slane %v6544_v35, 2  ;;  %v9950_v35 = vld [vmem:[%s10066_s28 + $0x28] sm:$0xff]  }
 0x1da   : > { %v6506_v38 = vsel %vm5954_vm6, %v6496_v32, %v6505_v47 }
 0x1db   : > { %v6558_v63 = vrot.slane %v6556_v9, 3 }
 0x1dd   : > { %8666 = vmatmul.mubr.msk.bf16.gmra.mrb[12].mxu1 %vm383_vm1, %v2856_v37  ;;  %v6513_v37 = vrot.slane %v6511_v21, 3  ;;  %v6549_v21 = vrot.slane %v6547_v29, 3  ;;  %v3249_v29 = vrot.slane %v9950_v35, 1 }
 0x1de   : > { %8669 = vmatprep.mubr.msk.bf16.mxu1 %vm383_vm1, %v2858_v24  ;;  %v6522_v24 = vrot.slane %v6520_v1, 3  ;;  %v11658_v1 = vld [vmem:[#allocation2_spill] sm:$0xff] }
 0x1df   : > { %9004 = vmatmul.mubr.msk.bf16.gmra.mrb[8].mxu0 %vm383_vm1, %v6461_v10  ;;  %v6529_v10 = vshll.u32 %v10902_v11, 16  ;;  %v6514_v14 = vor.u32 %v6513_v37, %v6510_v54  ;;  %v11260_v11 = vld [vmem:[%s10150_s9 + $0x88] sm:$0xff]   ;;  %v9945_v54 = vld [vmem:[%s10066_s28 + $0x10] sm:$0xff]   ;;  %v6550_v37 = vor.u32 %v6549_v21, %v6546_v19 }
 0x1e0   : > { %9007 = vmatprep.mubr.msk.bf16.mxu0 %vm383_vm1, %v6470_v52  ;;  %v6538_v52 = vshll.u32 %v10907_v2, 16  ;;  %v6523_v46 = vor.u32 %v6522_v24, %v6519_v5  ;;  %v2871_v28 = vrot.slane %v11260_v11, 1  ;;  %v3243_v26 = vrot.slane %v9945_v54, 1  ;;  %v9955_v54 = vld [vmem:[%s10066_s28 + $0x40] sm:$0xff]  }
 0x1e1   : > { %v6531_v4 = vrot.slane %v6529_v10, 3 }
 0x1e2   : > { %v6540_v16 = vrot.slane %v6538_v52, 3  ;;  %v6524_v2 = vsel %vm5954_vm6, %v6514_v14, %v6523_v46  ;;  %v3245_v52 = vrot.slane %v9946_v0, 1 }
 0x1e3   : > { %v6532_v49 = vor.u32 %v6531_v4, %v6528_v30  ;;  %v9948_v4 = vld [vmem:[%s10066_s28 + $0x20] sm:$0xff]  }
 0x1e4   : > { %v6541_v62 = vor.u32 %v6540_v16, %v6537_v7  ;;  %v3246_v7 = vsel %vm2051_vm5, %v3243_v26, %v3245_v52 }
 0x1e5   : > { %8670 = vmatmul.mubr.msk.bf16.gmra.mrb[16].mxu1 %vm383_vm1, %v2860_v17  ;;  %v6515_v17 = vsel %vm5954_vm6, %v6505_v47, %v6514_v14  ;;  %v6533_v32 = vsel %vm5954_vm6, %v6523_v46, %v6532_v49  ;;  %v11282_v47 = vld [vmem:[%s10066_s28 + $0xa0] ss:$0 sps:$4 sm:$0x77]  }
 0x1e6   : > { %8673 = vmatprep.mubr.msk.bf16.mxu1 %vm383_vm1, %v2862_v43  ;;  %v11265_v43 = vld [vmem:[%s10150_s9 + $0x90] sm:$0xff]   ;;  %v6565_v5 = vshll.u32 %v11282_v47, 16  ;;  %v6551_v10 = vsel %vm5954_vm6, %v6541_v62, %v6550_v37 }
 0x1e7   : > { %9008 = vmatmul.mubr.msk.bf16.gmra.mrb[12].mxu0 %vm383_vm1, %v6479_v34  ;;  %v2873_v8 = vrot.slane %v11265_v43, 1  ;;  %v2872_v34 = vsel %vm2051_vm5, %v2869_v60, %v2871_v28 }
 0x1e8   : > { %9011 = vmatprep.mubr.msk.bf16.mxu0 %vm383_vm1, %v6488_v15  ;;  %v9902_v15 = vld [vmem:[%s10150_s9 + $0x98] ss:$0 sps:$4 sm:$0x11]  }
 0x1e9   : > { %v2874_v51 = vsel %vm2051_vm5, %v2871_v28, %v2873_v8  ;;  %v2875_v22 = vrot.slane %v9902_v15, 1 }
 0x1eb   : > { %v2876_v41 = vsel %vm2051_vm5, %v2873_v8, %v2875_v22 }
 0x1ed   : > { %8674 = vmatmul.mubr.msk.bf16.gmra.mrb[20].mxu1 %vm383_vm1, %v2864_v3  ;;  %v6542_v3 = vsel %vm5954_vm6, %v6532_v49, %v6541_v62 }
 0x1ee   : > { %8677 = vmatprep.mubr.msk.bf16.mxu1 %vm383_vm1, %v2866_v25  ;;  %v6555_v25 = vrot.slane %v6553_v61, 2 }
 0x1ef   : > { %9012 = vmatmul.mubr.msk.bf16.gmra.mrb[16].mxu0 %vm383_vm1, %v6497_v27  ;;  %v3242_v27 = vrot.slane %v11658_v1, 1  ;;  %v7252_v1 = vsel %vm438_vm0, %v11164_v55, 0 }
 0x1f0   : > { %9015 = vmatprep.mubr.msk.bf16.mxu0 %vm383_vm1, %v6506_v38  ;;  %v6562_v38 = vshrl.u32 %v11282_v47, 16  ;;  %v6559_v24 = vor.u32 %v6558_v63, %v6555_v25  ;;  %v9954_v25 = vld [vmem:[%s10066_s28 + $0x38] sm:$0xff]  }
 0x1f1   : > { %v3244_v60 = vsel %vm2051_vm5, %v3242_v27, %v3243_v26  ;;  %v3253_v63 = vrot.slane %v9954_v25, 1  ;;  %v3255_v26 = vrot.slane %v9955_v54, 1 }
 0x1f2   : > { %v6564_v14 = vrot.slane %v6562_v38, 2  ;;  %v6560_v46 = vsel %vm5954_vm6, %v6550_v37, %v6559_v24  ;;  %v9956_v37 = vld [vmem:[%s10150_s9 + $0x30] sm:$0xff]  }
 0x1f3   : > { %v3256_v55 = vsel %vm2051_vm5, %v3253_v63, %v3255_v26 }
 0x1f5   : > { %8678 = vmatmul.mubr.msk.bf16.gmra.mrb[24].mxu1 %vm383_vm1, %v2868_v20  ;;  %v6567_v20 = vrot.slane %v6565_v5, 3  ;;  %v9957_v5 = vld [vmem:[%s10150_s9 + $0x38] sm:$0xff]  }
 0x1f6   : > { %8681 = vmatprep.mubr.msk.bf16.mxu1 %vm383_vm1, %v2870_v45  ;;  %v9947_v45 = vld [vmem:[%s10150_s9 + $0x14] sm:$0xf] }
 0x1f7   : > { %9016 = vmatmul.mubr.msk.bf16.gmra.mrb[20].mxu0 %vm383_vm1, %v6515_v17  ;;  %v8040_v30 = vcombine.low %v6840_v59, %v9947_v45  ;;  %v3247_v17 = vrot.slane %v9948_v4, 1  ;;  %v6568_v28 = vor.u32 %v6567_v20, %v6564_v14  ;;  %v9958_v59 = vld [vmem:[%s10066_s28 + $0x48] sm:$0xff]   ;;  %v9959_v20 = vld [vmem:[%s10066_s28 + $0x50] sm:$0xff]  }
 0x1f8   : > { %9019 = vmatprep.mubr.msk.bf16.mxu0 %vm383_vm1, %v6524_v2  ;;  %v9949_v2 = vld [vmem:[%s10150_s9 + $0x18] sm:$0xff]   ;;  %v3259_v0 = vrot.slane %v9959_v20, 1 }
 0x1f9   : > { %v6848_v16 = vrot.slane %v8040_v30, 3  ;;  %v6849_v8 = vrot.slane %v9949_v2, 3  ;;  %v3248_v49 = vsel %vm2051_vm5, %v3245_v52, %v3247_v17  ;;  %v6569_v62 = vsel %vm5954_vm6, %v6559_v24, %v6568_v28  ;;  %v9960_v52 = vld [vmem:[%s10150_s9 + $0x40] sm:$0xff]   ;;  %v9961_v30 = vld [vmem:[%s10150_s9 + $0x48] sm:$0xff]  }
 0x1fa   : > { %v6857_v24 = vrot.slane %v9957_v5, 3  ;;  %v6861_v4 = vrot.slane %v9961_v30, 3 }
 0x1fb   : > { %v6850_v15 = vsel %vm6847_vm7, %v6848_v16, %v6849_v8 }
 0x1fd   : > { %8682 = vmatmul.mubr.msk.bf16.gmra.mrb[28].mxu1 %vm383_vm1, %v2872_v34  ;;  %v3782_v34 = vsel %vm438_vm0, %v11123_v40, 0  ;;  %v9952_v40 = vld [vmem:[%s10150_s9 + $0x20] sm:$0xff]  }
 0x1fe   : > { %8685 = vmatprep.mubr.msk.bf16.mxu1 %vm383_vm1, %v2874_v51  ;;  %v9951_v51 = vld [vmem:[%s10066_s28 + $0x30] sm:$0xff]   ;;  %v6851_v9 = vrot.slane %v9952_v40, 3  ;;  %v9966_v40 = vld [vmem:[%s10066_s28 + $0x68] sm:$0xff]  }
 0x1ff   : > { %9020 = vmatmul.mubr.msk.bf16.gmra.mrb[24].mxu0 %vm383_vm1, %v6533_v32  ;;  %v3251_v61 = vrot.slane %v9951_v51, 1  ;;  %v3250_v32 = vsel %vm2051_vm5, %v3247_v17, %v3249_v29 }
 0x200   : > { %9023 = vmatprep.mubr.msk.bf16.mxu0 %vm383_vm1, %v6542_v3  ;;  %v9953_v3 = vld [vmem:[%s10150_s9 + $0x28] sm:$0xff]   ;;  %v6852_v22 = vsel %vm6847_vm7, %v6849_v8, %v6851_v9  ;;  %v9963_v8 = vld [vmem:[%s10066_s28 + $0x60] sm:$0xff]  }
 0x201   : > { %v6853_v19 = vrot.slane %v9953_v3, 3  ;;  %v3252_v21 = vsel %vm2051_vm5, %v3249_v29, %v3251_v61  ;;  %v3254_v38 = vsel %vm2051_vm5, %v3251_v61, %v3253_v63  ;;  %v9965_v29 = vld [vmem:[%s10150_s9 + $0x58] sm:$0xff]   ;;  %v9967_v3 = vld [vmem:[%s10066_s28 + $0x70] sm:$0xff]   ;;  %v9969_v63 = vld [vmem:[%s10150_s9 + $0x68] sm:$0xff]  }
 0x203   : > { %v6854_v27 = vsel %vm6847_vm7, %v6851_v9, %v6853_v19  ;;  %v3265_v9 = vrot.slane %v9966_v40, 1 }
 0x205   : > { %8686 = vmatmul.mubr.msk.bf16.gmra.mrb[32].mxu1 %vm383_vm1, %v2876_v41  ;;  %v6855_v41 = vrot.slane %v9956_v37, 3 }
 0x206   : > { %8691 = vmatprep.mubr.msk.bf16.mxu1 %vm383_vm1, %v3244_v60 }
 0x207   : > { %9024 = vmatmul.mubr.msk.bf16.gmra.mrb[28].mxu0 %vm383_vm1, %v6551_v10  ;;  %v6856_v60 = vsel %vm6847_vm7, %v6853_v19, %v6855_v41  ;;  %v3257_v10 = vrot.slane %v9958_v59, 1  ;;  %v6858_v14 = vsel %vm6847_vm7, %v6855_v41, %v6857_v24  ;;  %v3267_v19 = vrot.slane %v9967_v3, 1  ;;  %v9973_v59 = vld [vmem:[%s10150_s9 + $0x78] sm:$0xff]  }
 0x208   : > { %9027 = vmatprep.mubr.msk.bf16.mxu0 %vm383_vm1, %v6560_v46  ;;  %v6859_v46 = vrot.slane %v9960_v52, 3  ;;  %v9974_v52 = vld [vmem:[%s10066_s28 + $0x88] sm:$0xff]  }
 0x209   : > { %v3258_v45 = vsel %vm2051_vm5, %v3255_v26, %v3257_v10  ;;  %v3260_v17 = vsel %vm2051_vm5, %v3257_v10, %v3259_v0  ;;  %v9970_v26 = vld [vmem:[%s10066_s28 + $0x78] sm:$0xff]   ;;  %v6873_v10 = vrot.slane %v9973_v59, 3  ;;  %v3596_v59 = vshll.u32 %v11129_v31, 16 }
 0x20a   : > { %v6860_v28 = vsel %vm6847_vm7, %v6857_v24, %v6859_v46  ;;  %v6862_v2 = vsel %vm6847_vm7, %v6859_v46, %v6861_v4  ;;  %v3269_v37 = vrot.slane %v9970_v26, 1  ;;  %v9972_v24 = vld [vmem:[%s10150_s9 + $0x70] sm:$0xff]   ;;  %v3273_v46 = vrot.slane %v9974_v52, 1 }
 0x20b   : > { %v3605_v52 = vshll.u32 %v11134_v50, 16 }
 0x20d   : > { %8692 = vmatmul.mubr.msk.bf16.vlgmr.msra.gmra.mrb[0].mxu1 %vm383_vm1, %v3246_v7  ;;  %v9962_v7 = vld [vmem:[%s10066_s28 + $0x58] sm:$0xff]  }
 0x20e   : > { %8695 = vmatprep.mubr.msk.bf16.mxu1 %vm383_vm1, %v3248_v49  ;;  %8728 = vmatpush3.bf16.msra.mxu1 %v3782_v34  ;;  %v3261_v16 = vrot.slane %v9962_v7, 1  ;;  %v3263_v49 = vrot.slane %v9963_v8, 1  ;;  %v9964_v34 = vld [vmem:[%s10150_s9 + $0x50] sm:$0xff]   ;;  %v3569_v7 = vshll.u32 %v11084_v57, 16 }
 0x20f   : > { %9028 = vmatmul.mubr.msk.bf16.gmra.mrb[32].mxu0 %vm383_vm1, %v6569_v62  ;;  %v6863_v62 = vrot.slane %v9964_v34, 3 }
 0x210   : > { %9033 = vmatprep.mubr.msk.bf16.mxu0 %vm383_vm1, %v6850_v15  ;;  %v3262_v35 = vsel %vm2051_vm5, %v3259_v0, %v3261_v16  ;;  %v6865_v15 = vrot.slane %v9965_v29, 3  ;;  %v3264_v51 = vsel %vm2051_vm5, %v3261_v16, %v3263_v49  ;;  %v3266_v25 = vsel %vm2051_vm5, %v3263_v49, %v3265_v9  ;;  %v9976_v16 = vld [vmem:[%s10150_s9 + $0x80] sm:$0xff]   ;;  %v9977_v49 = vld [vmem:[%s10150_s9 + $0x88] sm:$0xff]  }
 0x211   : > { %v6864_v61 = vsel %vm6847_vm7, %v6861_v4, %v6863_v62  ;;  %v3558_v4 = vshrl.u32 %v11068_v36, 16  ;;  %v6877_v34 = vrot.slane %v9977_v49, 3  ;;  %v3614_v49 = vshll.u32 %v11153_v18, 16 }
 0x213   : > { %v3560_v29 = vrot.slane %v3558_v4, 1 }
 0x215   : > { %8696 = vmatmul.mubr.msk.bf16.gmra.mrb[4].mxu1 %vm383_vm1, %v3250_v32  ;;  %v6866_v32 = vsel %vm6847_vm7, %v6863_v62, %v6865_v15 }
 0x216   : > { %8699 = vmatprep.mubr.msk.bf16.mxu1 %vm383_vm1, %v3252_v21  ;;  %v9968_v21 = vld [vmem:[%s10150_s9 + $0x60] sm:$0xff]  }
 0x217   : > { %9034 = vmatmul.mubr.msk.bf16.vlgmr.msra.gmra.mrb[0].mxu0 %vm383_vm1, %v6852_v22  ;;  %v6867_v22 = vrot.slane %v9968_v21, 3  ;;  %v3584_v21 = vshrl.u32 %v11107_v23, 16 }
 0x218   : > { %9070 = vmatpush3.bf16.msra.mxu0 %v7252_v1  ;;  %9037 = vmatprep.mubr.msk.bf16.mxu0 %vm383_vm1, %v6854_v27  ;;  %v6869_v1 = vrot.slane %v9969_v63, 3  ;;  %v3268_v27 = vsel %vm2051_vm5, %v3265_v9, %v3267_v19  ;;  %v3575_v9 = vshrl.u32 %v11103_v13, 16 }
 0x219   : > { %v6868_v54 = vsel %vm6847_vm7, %v6865_v15, %v6867_v22 }
 0x21a   : > { %v6870_v41 = vsel %vm6847_vm7, %v6867_v22, %v6869_v1  ;;  %v3587_v22 = vshll.u32 %v11107_v23, 16  ;;  %v3577_v26 = vrot.slane %v3575_v9, 1 }
 0x21d   : > { %8700 = vmatmul.mubr.msk.bf16.gmra.mrb[8].mxu1 %vm383_vm1, %v3254_v38  ;;  %v9971_v38 = vld [vmem:[%s10066_s28 + $0x80] sm:$0xff]  }
 0x21e   : > { %8703 = vmatprep.mubr.msk.bf16.mxu1 %vm383_vm1, %v3256_v55  ;;  %v3271_v5 = vrot.slane %v9971_v38, 1  ;;  %v6871_v55 = vrot.slane %v9972_v24, 3  ;;  %v3589_v38 = vrot.slane %v3587_v22, 2  ;;  %v3632_v22 = vshll.u32 %v11180_v48, 16 }
 0x21f   : > { %9038 = vmatmul.mubr.msk.bf16.gmra.mrb[4].mxu0 %vm383_vm1, %v6856_v60  ;;  %v3270_v60 = vsel %vm2051_vm5, %v3267_v19, %v3269_v37 }
 0x220   : > { %9041 = vmatprep.mubr.msk.bf16.mxu0 %vm383_vm1, %v6858_v14  ;;  %v3272_v14 = vsel %vm2051_vm5, %v3269_v37, %v3271_v5  ;;  %v6872_v20 = vsel %vm6847_vm7, %v6869_v1, %v6871_v55  ;;  %v6874_v0 = vsel %vm6847_vm7, %v6871_v55, %v6873_v10  ;;  %v3274_v8 = vsel %vm2051_vm5, %v3271_v5, %v3273_v46  ;;  %v6841_v5 = vld [vmem:[%s10066_s28 + $0x10] sm:$0x8] }
 0x225   : > { %8704 = vmatmul.mubr.msk.bf16.gmra.mrb[12].mxu1 %vm383_vm1, %v3258_v45  ;;  %v9975_v45 = vld [vmem:[%s10066_s28 + $0x90] sm:$0xff]  }
 0x226   : > { %8707 = vmatprep.mubr.msk.bf16.mxu1 %vm383_vm1, %v3260_v17  ;;  %v3275_v30 = vrot.slane %v9975_v45, 1  ;;  %v3561_v17 = vshll.u32 %v11068_v36, 16 }
 0x227   : > { %9042 = vmatmul.mubr.msk.bf16.gmra.mrb[8].mxu0 %vm383_vm1, %v6860_v28  ;;  %v3566_v28 = vshrl.u32 %v11084_v57, 16 }
 0x228   : > { %9045 = vmatprep.mubr.msk.bf16.mxu0 %vm383_vm1, %v6862_v2  ;;  %v6875_v2 = vrot.slane %v9976_v16, 3  ;;  %v3276_v62 = vsel %vm2051_vm5, %v3273_v46, %v3275_v30  ;;  %v3563_v36 = vrot.slane %v3561_v17, 2  ;;  %v6883_v46 = vrot.slane %v11079_v42, 3 }
 0x229   : > { %v3568_v15 = vrot.slane %v3566_v28, 1  ;;  %v3598_v28 = vrot.slane %v3596_v59, 2  ;;  %v3650_v59 = vshll.u32 %v11200_v58, 16 }
 0x22a   : > { %v6876_v57 = vsel %vm6847_vm7, %v6873_v10, %v6875_v2  ;;  %v3564_v3 = vor.u32 %v3563_v36, %v3560_v29  ;;  %v9980_v10 = vld [vmem:[%s10066_s28 + $0x14] sm:$0xf]  ;;  %v3623_v29 = vshll.u32 %v11158_v53, 16  ;;  %v9982_v36 = vld [vmem:[%s10066_s28 + $0x20] sm:$0xff]  }
 0x22d   : > { %8708 = vmatmul.mubr.msk.bf16.gmra.mrb[16].mxu1 %vm383_vm1, %v3262_v35  ;;  %v9905_v35 = vld [vmem:[%s10066_s28 + $0x98] ss:$0 sps:$4 sm:$0x11]  }
 0x22e   : > { %8711 = vmatprep.mubr.msk.bf16.mxu1 %vm383_vm1, %v3264_v51  ;;  %v3571_v51 = vrot.slane %v3569_v7, 2  ;;  %v3277_v40 = vrot.slane %v9905_v35, 1  ;;  %v3620_v35 = vshrl.u32 %v11158_v53, 16 }
 0x22f   : > { %9046 = vmatmul.mubr.msk.bf16.gmra.mrb[12].mxu0 %vm383_vm1, %v6864_v61  ;;  %v6878_v61 = vsel %vm6847_vm7, %v6875_v2, %v6877_v34  ;;  %v3607_v2 = vrot.slane %v3605_v52, 2  ;;  %v9986_v52 = vld [vmem:[%s10066_s28 + $0x40] sm:$0xff]  }
 0x230   : > { %9049 = vmatprep.mubr.msk.bf16.mxu0 %vm383_vm1, %v6866_v32  ;;  %v3578_v32 = vshll.u32 %v11103_v13, 16  ;;  %v3572_v19 = vor.u32 %v3571_v51, %v3568_v15  ;;  %v3278_v1 = vsel %vm2051_vm5, %v3275_v30, %v3277_v40  ;;  %v9981_v30 = vld [vmem:[%s10066_s28 + $0x18] sm:$0xff]   ;;  %v7163_v15 = vrot.slane %v9982_v36, 3  ;;  %v9983_v40 = vld [vmem:[%s10066_s28 + $0x28] sm:$0xff]  }
 0x231   : > { %v7161_v4 = vrot.slane %v9981_v30, 3  ;;  %v7165_v9 = vrot.slane %v9983_v40, 3 }
 0x232   : > { %v3580_v13 = vrot.slane %v3578_v32, 2  ;;  %v3573_v37 = vsel %vm3556_vm2, %v3564_v3, %v3572_v19  ;;  %v3622_v32 = vrot.slane %v3620_v35, 1  ;;  %v3625_v3 = vrot.slane %v3623_v29, 2 }
 0x233   : > { %v7164_v53 = vsel %vm6847_vm7, %v7161_v4, %v7163_v15 }
 0x234   : > { %v3581_v55 = vor.u32 %v3580_v13, %v3577_v26 }
 0x235   : > { %8712 = vmatmul.mubr.msk.bf16.gmra.mrb[20].mxu1 %vm383_vm1, %v3266_v25  ;;  %v9978_v25 = vld [vmem:[%s10150_s9 + $0x90] sm:$0xff]  }
 0x236   : > { %8715 = vmatprep.mubr.msk.bf16.mxu1 %vm383_vm1, %v3268_v27  ;;  %v6879_v63 = vrot.slane %v9978_v25, 3  ;;  %v9979_v27 = vld [vmem:[%s10150_s9 + $0x98] sm:$0xff]   ;;  %v3582_v45 = vsel %vm3556_vm2, %v3572_v19, %v3581_v55  ;;  %v7166_v25 = vsel %vm6847_vm7, %v7163_v15, %v7165_v9 }
 0x237   : > { %9050 = vmatmul.mubr.msk.bf16.gmra.mrb[16].mxu0 %vm383_vm1, %v6868_v54  ;;  %v6881_v54 = vrot.slane %v9979_v27, 3  ;;  %v3641_v27 = vshll.u32 %v11185_v44, 16 }
 0x238   : > { %9053 = vmatprep.mubr.msk.bf16.mxu0 %vm383_vm1, %v6870_v41  ;;  %v3586_v41 = vrot.slane %v3584_v21, 1  ;;  %v6880_v23 = vsel %vm6847_vm7, %v6877_v34, %v6879_v63  ;;  %v3629_v21 = vshrl.u32 %v11180_v48, 16 }
 0x239   : > { %v6882_v24 = vsel %vm6847_vm7, %v6879_v63, %v6881_v54  ;;  %v3626_v63 = vor.u32 %v3625_v3, %v3622_v32  ;;  %v3686_v32 = vshll.u32 %v11240_v12, 16 }
 0x23d   : > { %8716 = vmatmul.mubr.msk.bf16.gmra.mrb[24].mxu1 %vm383_vm1, %v3270_v60  ;;  %v3593_v60 = vshrl.u32 %v11129_v31, 16 }
 0x23e   : > { %8719 = vmatprep.mubr.msk.bf16.mxu1 %vm383_vm1, %v3272_v14  ;;  %v8060_v14 = vcombine.low %v6841_v5, %v9980_v10 }
 0x23f   : > { %9054 = vmatmul.mubr.msk.bf16.gmra.mrb[20].mxu0 %vm383_vm1, %v6872_v20  ;;  %v3590_v20 = vor.u32 %v3589_v38, %v3586_v41  ;;  %v3595_v17 = vrot.slane %v3593_v60, 1  ;;  %v3634_v41 = vrot.slane %v3632_v22, 2  ;;  %v9985_v38 = vld [vmem:[%s10066_s28 + $0x38] sm:$0xff]   ;;  %v3647_v60 = vshrl.u32 %v11200_v58, 16  ;;  %v9990_v22 = vld [vmem:[%s10066_s28 + $0x60] sm:$0xff]  }
 0x240   : > { %9057 = vmatprep.mubr.msk.bf16.mxu0 %vm383_vm1, %v6874_v0  ;;  %v3602_v0 = vshrl.u32 %v11134_v50, 16  ;;  %v7160_v31 = vrot.slane %v8060_v14, 3  ;;  %v6884_v50 = vsel %vm6847_vm7, %v6881_v54, %v6883_v46  ;;  %v9984_v54 = vld [vmem:[%s10066_s28 + $0x30] sm:$0xff]   ;;  %v7169_v5 = vrot.slane %v9985_v38, 3 }
 0x241   : > { %v3591_v7 = vsel %vm3556_vm2, %v3581_v55, %v3590_v20  ;;  %v3599_v42 = vor.u32 %v3598_v28, %v3595_v17  ;;  %v7167_v26 = vrot.slane %v9984_v54, 3  ;;  %v7171_v46 = vrot.slane %v9986_v52, 3  ;;  %v9987_v17 = vld [vmem:[%s10066_s28 + $0x48] sm:$0xff]  }
 0x242   : > { %v3604_v16 = vrot.slane %v3602_v0, 1  ;;  %v7162_v34 = vsel %vm6847_vm7, %v7160_v31, %v7161_v4  ;;  %v3659_v0 = vshll.u32 %v11205_v6, 16  ;;  %v3649_v30 = vrot.slane %v3647_v60, 1  ;;  %v9991_v54 = vld [vmem:[%s10066_s28 + $0x68] sm:$0xff]  }
 0x243   : > { %v3600_v51 = vsel %vm3556_vm2, %v3590_v20, %v3599_v42  ;;  %v7170_v10 = vsel %vm6847_vm7, %v7167_v26, %v7169_v5  ;;  %v3656_v20 = vshrl.u32 %v11205_v6, 16  ;;  %v3652_v4 = vrot.slane %v3650_v59, 2 }
 0x244   : > { %v7173_v28 = vrot.slane %v9987_v17, 3  ;;  %v7172_v6 = vsel %vm6847_vm7, %v7169_v5, %v7171_v46  ;;  %v3701_v38 = vshrl.u32 %v11260_v11, 16  ;;  %v3704_v5 = vshll.u32 %v11260_v11, 16 }
 0x245   : > { %8720 = vmatmul.mubr.msk.bf16.gmra.mrb[28].mxu1 %vm383_vm1, %v3274_v8  ;;  %v3611_v8 = vshrl.u32 %v11153_v18, 16  ;;  %v3658_v31 = vrot.slane %v3656_v20, 1  ;;  %v9993_v20 = vld [vmem:[%s10066_s28 + $0x78] sm:$0xff]  }
 0x246   : > { %8723 = vmatprep.mubr.msk.bf16.mxu1 %vm383_vm1, %v3276_v62  ;;  %v3608_v62 = vor.u32 %v3607_v2, %v3604_v16  ;;  %v3653_v16 = vor.u32 %v3652_v4, %v3649_v30  ;;  %v3665_v2 = vshrl.u32 %v11220_v33, 16  ;;  %v7185_v11 = vrot.slane %v9993_v20, 3  ;;  %v9994_v30 = vld [vmem:[%s10150_s9 + $0x98] ss:$0 sps:$4 sm:$0x33]  }
 0x247   : > { %9058 = vmatmul.mubr.msk.bf16.gmra.mrb[24].mxu0 %vm383_vm1, %v6876_v57  ;;  %v3613_v57 = vrot.slane %v3611_v8, 1  ;;  %v3719_v4 = vshrl.u32 %v9994_v30, 16  ;;  %v3722_v17 = vshll.u32 %v9994_v30, 16 }
 0x248   : > { %9061 = vmatprep.mubr.msk.bf16.mxu0 %vm383_vm1, %v6878_v61  ;;  %v3616_v61 = vrot.slane %v3614_v49, 2  ;;  %v3609_v18 = vsel %vm3556_vm2, %v3599_v42, %v3608_v62  ;;  %v7174_v42 = vsel %vm6847_vm7, %v7171_v46, %v7173_v28  ;;  %v3674_v49 = vshrl.u32 %v11225_v56, 16 }
 0x249   : > { %v3667_v36 = vrot.slane %v3665_v2, 1  ;;  %v3724_v2 = vrot.slane %v3722_v17, 2 }
 0x24a   : > { %v3617_v19 = vor.u32 %v3616_v61, %v3613_v57  ;;  %v3676_v61 = vrot.slane %v3674_v49, 1 }
 0x24c   : > { %v3618_v13 = vsel %vm3556_vm2, %v3608_v62, %v3617_v19  ;;  %v3627_v48 = vsel %vm3556_vm2, %v3617_v19, %v3626_v63  ;;  %v9988_v62 = vld [vmem:[%s10066_s28 + $0x50] sm:$0xff]   ;;  %v3692_v19 = vshrl.u32 %v11245_v39, 16 }
 0x24d   : > { %8724 = vmatmul.mubr.msk.bf16.gmra.mrb[32].mxu1 %vm383_vm1, %v3278_v1  ;;  %v3638_v1 = vshrl.u32 %v11185_v44, 16  ;;  %v7168_v44 = vsel %vm6847_vm7, %v7165_v9, %v7167_v26  ;;  %v7175_v35 = vrot.slane %v9988_v62, 3  ;;  %v7181_v26 = vrot.slane %v9991_v54, 3 }
 0x24e   : > { %8729 = vmatprep.mubr.msk.bf16.mxu1 %vm383_vm1, %v3573_v37  ;;  %v3631_v37 = vrot.slane %v3629_v21, 1  ;;  %v3695_v21 = vshll.u32 %v11245_v39, 16 }
 0x24f   : > { %9062 = vmatmul.mubr.msk.bf16.gmra.mrb[28].mxu0 %vm383_vm1, %v6880_v23  ;;  %v3640_v23 = vrot.slane %v3638_v1, 1 }
 0x250   : > { %9065 = vmatprep.mubr.msk.bf16.mxu0 %vm383_vm1, %v6882_v24  ;;  %v3643_v24 = vrot.slane %v3641_v27, 2  ;;  %v3635_v55 = vor.u32 %v3634_v41, %v3631_v37  ;;  %v3688_v27 = vrot.slane %v3686_v32, 2  ;;  %v3697_v37 = vrot.slane %v3695_v21, 2 }
 0x252   : > { %v3644_v14 = vor.u32 %v3643_v24, %v3640_v23  ;;  %v3710_v24 = vshrl.u32 %v11265_v43, 16 }
 0x254   : > { %v3645_v58 = vsel %vm3556_vm2, %v3635_v55, %v3644_v14  ;;  %v3654_v29 = vsel %vm3556_vm2, %v3644_v14, %v3653_v16  ;;  %v3706_v14 = vrot.slane %v3704_v5, 2  ;;  %v3712_v52 = vrot.slane %v3710_v24, 1 }
 0x255   : > { %8730 = vmatmul.mubr.msk.bf16.vlgmr.msra.gmra.mrb[0].mxu1 %vm383_vm1, %v3582_v45  ;;  %v3636_v45 = vsel %vm3556_vm2, %v3626_v63, %v3635_v55  ;;  %v9992_v55 = vld [vmem:[%s10066_s28 + $0x70] sm:$0xff]  }
 0x256   : > { %8733 = vmatprep.mubr.msk.bf16.mxu1 %vm383_vm1, %v3591_v7  ;;  %v3661_v7 = vrot.slane %v3659_v0, 2  ;;  %v7183_v60 = vrot.slane %v9992_v55, 3 }
 0x257   : > { %9066 = vmatmul.mubr.msk.bf16.gmra.mrb[32].mxu0 %vm383_vm1, %v6884_v50  ;;  %v3668_v50 = vshll.u32 %v11220_v33, 16 }
 0x258   : > { %9071 = vmatprep.mubr.msk.bf16.mxu0 %vm383_vm1, %v7162_v34  ;;  %v3662_v8 = vor.u32 %v3661_v7, %v3658_v31  ;;  %v3677_v34 = vshll.u32 %v11225_v56, 16  ;;  %v7176_v56 = vsel %vm6847_vm7, %v7173_v28, %v7175_v35  ;;  %v7186_v28 = vsel %vm6847_vm7, %v7183_v60, %v7185_v11  ;;  %v9995_v31 = vld [vmem:[%s10066_s28 + $0x80] sm:$0xff]  }
 0x259   : > { %v3670_v15 = vrot.slane %v3668_v50, 2  ;;  %v7187_v7 = vrot.slane %v9995_v31, 3  ;;  %v9996_v50 = vld [vmem:[%s10066_s28 + $0x88] sm:$0xff]  }
 0x25a   : > { %v3663_v33 = vsel %vm3556_vm2, %v3653_v16, %v3662_v8  ;;  %v3679_v40 = vrot.slane %v3677_v34, 2  ;;  %v3721_v16 = vrot.slane %v3719_v4, 1 }
 0x25b   : > { %v3671_v9 = vor.u32 %v3670_v15, %v3667_v36  ;;  %v7188_v49 = vsel %vm6847_vm7, %v7185_v11, %v7187_v7  ;;  %v9998_v15 = vld [vmem:[%s10066_s28 + $0x98] sm:$0xff]  }
 0x25c   : > { %v3725_v34 = vor.u32 %v3724_v2, %v3721_v16 }
 0x25d   : > { %8734 = vmatmul.mubr.msk.bf16.gmra.mrb[4].mxu1 %vm383_vm1, %v3600_v51  ;;  %v9989_v51 = vld [vmem:[%s10066_s28 + $0x58] sm:$0xff]   ;;  %v3672_v63 = vsel %vm3556_vm2, %v3662_v8, %v3671_v9 }
 0x25e   : > { %8737 = vmatprep.mubr.msk.bf16.mxu1 %vm383_vm1, %v3609_v18  ;;  %v7177_v57 = vrot.slane %v9989_v51, 3  ;;  %v3683_v18 = vshrl.u32 %v11240_v12, 16  ;;  %v7193_v51 = vrot.slane %v9998_v15, 3 }
 0x25f   : > { %9072 = vmatmul.mubr.msk.bf16.vlgmr.msra.gmra.mrb[0].mxu0 %vm383_vm1, %v7164_v53  ;;  %v3680_v53 = vor.u32 %v3679_v40, %v3676_v61  ;;  %v7195_v61 = vrot.slane %v11282_v47, 3 }
 0x260   : > { %9075 = vmatprep.mubr.msk.bf16.mxu0 %vm383_vm1, %v7166_v25  ;;  %v7178_v3 = vsel %vm6847_vm7, %v7175_v35, %v7177_v57  ;;  %v7179_v25 = vrot.slane %v9990_v22, 3  ;;  %v3685_v1 = vrot.slane %v3683_v18, 1  ;;  %v9997_v35 = vld [vmem:[%s10066_s28 + $0x90] sm:$0xff]   ;;  %s9738_s28 = smul.u32 288, %s11660_s16 }
 0x261   : > { %v3681_v12 = vsel %vm3556_vm2, %v3671_v9, %v3680_v53  ;;  %v7196_v40 = vsel %vm6847_vm7, %v7193_v51, %v7195_v61 }
 0x262   : > { %v7180_v39 = vsel %vm6847_vm7, %v7177_v57, %v7179_v25  ;;  %v3689_v41 = vor.u32 %v3688_v27, %v3685_v1  ;;  %s11544_s13 = scalar_lea.vmem %s11625_s4, %s9738_s28 }
 0x264   : > { %v3690_v59 = vsel %vm3556_vm2, %v3680_v53, %v3689_v41 }
 0x265   : > { %8738 = vmatmul.mubr.msk.bf16.gmra.mrb[8].mxu1 %vm383_vm1, %v3618_v13  ;;  %v3694_v13 = vrot.slane %v3692_v19, 1 }
 0x266   : > { %8741 = vmatprep.mubr.msk.bf16.mxu1 %vm383_vm1, %v3627_v48  ;;  %v7182_v48 = vsel %vm6847_vm7, %v7179_v25, %v7181_v26 }
 0x267   : > { %9076 = vmatmul.mubr.msk.bf16.gmra.mrb[4].mxu0 %vm383_vm1, %v7168_v44  ;;  %v3698_v23 = vor.u32 %v3697_v37, %v3694_v13  ;;  %v3713_v44 = vshll.u32 %v11265_v43, 16  ;;  %v7184_v43 = vsel %vm6847_vm7, %v7181_v26, %v7183_v60 }
 0x268   : > { %9079 = vmatprep.mubr.msk.bf16.mxu0 %vm383_vm1, %v7170_v10  ;;  %v3703_v10 = vrot.slane %v3701_v38, 1 }
 0x269   : > { %v3699_v0 = vsel %vm3556_vm2, %v3689_v41, %v3698_v23  ;;  %v3715_v46 = vrot.slane %v3713_v44, 2 }
 0x26d   : > { %8742 = vmatmul.mubr.msk.bf16.gmra.mrb[12].mxu1 %vm383_vm1, %v3636_v45  ;;  %v3707_v45 = vor.u32 %v3706_v14, %v3703_v10 }
 0x26e   : > { %8745 = vmatprep.mubr.msk.bf16.mxu1 %vm383_vm1, %v3645_v58  ;;  %v3716_v58 = vor.u32 %v3715_v46, %v3712_v52 }
 0x26f   : > { %9080 = vmatmul.mubr.msk.bf16.gmra.mrb[8].mxu0 %vm383_vm1, %v7172_v6  ;;  %v3708_v6 = vsel %vm3556_vm2, %v3698_v23, %v3707_v45 }
 0x270   : > { %9083 = vmatprep.mubr.msk.bf16.mxu0 %vm383_vm1, %v7174_v42  ;;  %v7189_v42 = vrot.slane %v9996_v50, 3  ;;  %v3717_v8 = vsel %vm3556_vm2, %v3707_v45, %v3716_v58  ;;  %v3726_v36 = vsel %vm3556_vm2, %v3716_v58, %v3725_v34 }
 0x272   : > { %v7190_v62 = vsel %vm6847_vm7, %v7187_v7, %v7189_v42 }
 0x275   : > { %8746 = vmatmul.mubr.msk.bf16.gmra.mrb[16].mxu1 %vm383_vm1, %v3654_v29  ;;  %v7191_v29 = vrot.slane %v9997_v35, 3 }
 0x276   : > { %8749 = vmatprep.mubr.msk.bf16.mxu1 %vm383_vm1, %v3663_v33 }
 0x277   : > { %9084 = vmatmul.mubr.msk.bf16.gmra.mrb[12].mxu0 %vm383_vm1, %v7176_v56  ;;  %v7192_v57 = vsel %vm6847_vm7, %v7189_v42, %v7191_v29  ;;  %v7194_v33 = vsel %vm6847_vm7, %v7191_v29, %v7193_v51 }
 0x278   : > { %9087 = vmatprep.mubr.msk.bf16.mxu0 %vm383_vm1, %v7178_v3 }
 0x27d   : > { %8750 = vmatmul.mubr.msk.bf16.gmra.mrb[20].mxu1 %vm383_vm1, %v3672_v63 }
 0x27e   : > { %8753 = vmatprep.mubr.msk.bf16.mxu1 %vm383_vm1, %v3681_v12 }
 0x27f   : > { %9088 = vmatmul.mubr.msk.bf16.gmra.mrb[16].mxu0 %vm383_vm1, %v7180_v39 }
 0x280   : > { %9091 = vmatprep.mubr.msk.bf16.mxu0 %vm383_vm1, %v7182_v48 }
 0x285   : > { %8754 = vmatmul.mubr.msk.bf16.gmra.mrb[24].mxu1 %vm383_vm1, %v3690_v59 }
 0x286   : > { %8757 = vmatprep.mubr.msk.bf16.mxu1 %vm383_vm1, %v3699_v0 }
 0x287   : > { %9092 = vmatmul.mubr.msk.bf16.gmra.mrb[20].mxu0 %vm383_vm1, %v7184_v43 }
 0x288   : > { %9095 = vmatprep.mubr.msk.bf16.mxu0 %vm383_vm1, %v7186_v28 }
 0x28d   : > { %8758 = vmatmul.mubr.msk.bf16.gmra.mrb[28].mxu1 %vm383_vm1, %v3708_v6 }
 0x28e   : > { %8761 = vmatprep.mubr.msk.bf16.mxu1 %vm383_vm1, %v3717_v8 }
 0x28f   : > { %9096 = vmatmul.mubr.msk.bf16.gmra.mrb[24].mxu0 %vm383_vm1, %v7188_v49 }
 0x290   : > { %9099 = vmatprep.mubr.msk.bf16.mxu0 %vm383_vm1, %v7190_v62 }
 0x295   : > { %8762 = vmatmul.mubr.msk.bf16.gmra.mrb[32].mxu1 %vm383_vm1, %v3726_v36 }
 0x297   : > { %9100 = vmatmul.mubr.msk.bf16.gmra.mrb[28].mxu0 %vm383_vm1, %v7192_v57 }
 0x298   : > { %9103 = vmatprep.mubr.msk.bf16.mxu0 %vm383_vm1, %v7194_v33 }
 0x29f   : > { %9104 = vmatmul.mubr.msk.bf16.gmra.mrb[32].mxu0 %vm383_vm1, %v7196_v40 }
 0x328   : > { %v8731_v56 = vpop.f32.mrb[0].mxu1 }
 0x329   : > { %v3818_v9 = vpop.f32.mrb[1].mxu1 }
 0x32a   : > { %v8732_v18 = vpop.f32.mrb[2].mxu1 }
 0x32b   : > { %v3821_v32 = vpop.f32.mrb[3].mxu1 }
 0x330   : > { %v8735_v3 = vpop.f32.mrb[4].mxu1 }
 0x331   : > { %v3834_v53 = vpop.f32.mrb[5].mxu1 }
 0x332   : > { %v8736_v19 = vpop.f32.mrb[6].mxu1  ;;  %v9073_v47 = vpop.f32.mrb[0].mxu0 }
 0x333   : > { %v3837_v21 = vpop.f32.mrb[7].mxu1  ;;  %v9107_v22 = vadd.f32 %v9073_v47, %v8731_v56  ;;  %v7288_v25 = vpop.f32.mrb[1].mxu0 }
 0x334   : > { %v9108_v63 = vadd.f32 %v7288_v25, %v3818_v9  ;;  %v9074_v1 = vpop.f32.mrb[2].mxu0 }
 0x335   : > { %7470 = vst.msk [vmem:[%s11544_s13 + $0x10] sm:$0xff] %vm7467_vm8, %v9107_v22  ;;  %v9109_v27 = vadd.f32 %v9074_v1, %v8732_v18  ;;  %v7291_v54 = vpop.f32.mrb[3].mxu0 }
 0x336   : > { %7468 = vst.msk [vmem:[%s11544_s13] sm:$0xff] %vm7467_vm8, %v9108_v63  ;;  %v9110_v26 = vadd.f32 %v7291_v54, %v3821_v32 }
 0x337   : > { %7471 = vst.msk [vmem:[%s11544_s13 + $0x18] sm:$0xff] %vm7467_vm8, %v9109_v27 }
 0x338   : > { %v8739_v12 = vpop.f32.mrb[8].mxu1  ;;  %7469 = vst.msk [vmem:[%s11544_s13 + $0x8] sm:$0xff] %vm7467_vm8, %v9110_v26 }
 0x339   : > { %v3850_v13 = vpop.f32.mrb[9].mxu1 }
 0x33a   : > { %v8740_v37 = vpop.f32.mrb[10].mxu1  ;;  %v9077_v41 = vpop.f32.mrb[4].mxu0 }
 0x33b   : > { %v3853_v39 = vpop.f32.mrb[11].mxu1  ;;  %v9111_v38 = vadd.f32 %v9077_v41, %v8735_v3  ;;  %v7304_v5 = vpop.f32.mrb[5].mxu0 }
 0x33c   : > { %v9112_v48 = vadd.f32 %v7304_v5, %v3834_v53  ;;  %v9078_v23 = vpop.f32.mrb[6].mxu0 }
 0x33d   : > { %7474 = vst.msk [vmem:[%s11544_s13 + $0x30] sm:$0xff] %vm7467_vm8, %v9111_v38  ;;  %v9113_v24 = vadd.f32 %v9078_v23, %v8736_v19  ;;  %v7307_v44 = vpop.f32.mrb[7].mxu0 }
 0x33e   : > { %7472 = vst.msk [vmem:[%s11544_s13 + $0x20] sm:$0xff] %vm7467_vm8, %v9112_v48  ;;  %v9114_v55 = vadd.f32 %v7307_v44, %v3837_v21 }
 0x33f   : > { %7475 = vst.msk [vmem:[%s11544_s13 + $0x38] sm:$0xff] %vm7467_vm8, %v9113_v24 }
 0x340   : > { %v8743_v60 = vpop.f32.mrb[12].mxu1  ;;  %7473 = vst.msk [vmem:[%s11544_s13 + $0x28] sm:$0xff] %vm7467_vm8, %v9114_v55 }
 0x341   : > { %v3866_v59 = vpop.f32.mrb[13].mxu1 }
 0x342   : > { %v8744_v10 = vpop.f32.mrb[14].mxu1  ;;  %v9081_v20 = vpop.f32.mrb[8].mxu0 }
 0x343   : > { %v3869_v14 = vpop.f32.mrb[15].mxu1  ;;  %v9115_v11 = vadd.f32 %v9081_v20, %v8739_v12  ;;  %v7320_v0 = vpop.f32.mrb[9].mxu0 }
 0x344   : > { %v9116_v52 = vadd.f32 %v7320_v0, %v3850_v13  ;;  %v9082_v46 = vpop.f32.mrb[10].mxu0 }
 0x345   : > { %7478 = vst.msk [vmem:[%s11544_s13 + $0x50] sm:$0xff] %vm7467_vm8, %v9115_v11  ;;  %v9117_v43 = vadd.f32 %v9082_v46, %v8740_v37  ;;  %v7323_v45 = vpop.f32.mrb[11].mxu0 }
 0x346   : > { %7476 = vst.msk [vmem:[%s11544_s13 + $0x40] sm:$0xff] %vm7467_vm8, %v9116_v52  ;;  %v9118_v30 = vadd.f32 %v7323_v45, %v3853_v39 }
 0x347   : > { %7479 = vst.msk [vmem:[%s11544_s13 + $0x58] sm:$0xff] %vm7467_vm8, %v9117_v43 }
 0x348   : > { %v8747_v4 = vpop.f32.mrb[16].mxu1  ;;  %7477 = vst.msk [vmem:[%s11544_s13 + $0x48] sm:$0xff] %vm7467_vm8, %v9118_v30 }
 0x349   : > { %v3882_v17 = vpop.f32.mrb[17].mxu1 }
 0x34a   : > { %v8748_v28 = vpop.f32.mrb[18].mxu1  ;;  %v9085_v31 = vpop.f32.mrb[12].mxu0 }
 0x34b   : > { %v3885_v58 = vpop.f32.mrb[19].mxu1  ;;  %v9119_v7 = vadd.f32 %v9085_v31, %v8743_v60  ;;  %v7336_v6 = vpop.f32.mrb[13].mxu0 }
 0x34c   : > { %v9120_v16 = vadd.f32 %v7336_v6, %v3866_v59  ;;  %v9086_v2 = vpop.f32.mrb[14].mxu0 }
 0x34d   : > { %7482 = vst.msk [vmem:[%s11544_s13 + $0x70] sm:$0xff] %vm7467_vm8, %v9119_v7  ;;  %v9121_v50 = vadd.f32 %v9086_v2, %v8744_v10  ;;  %v7339_v42 = vpop.f32.mrb[15].mxu0 }
 0x34e   : > { %7480 = vst.msk [vmem:[%s11544_s13 + $0x60] sm:$0xff] %vm7467_vm8, %v9120_v16  ;;  %v9122_v8 = vadd.f32 %v7339_v42, %v3869_v14 }
 0x34f   : > { %7483 = vst.msk [vmem:[%s11544_s13 + $0x78] sm:$0xff] %vm7467_vm8, %v9121_v50 }
 0x350   : > { %v8751_v49 = vpop.f32.mrb[20].mxu1  ;;  %7481 = vst.msk [vmem:[%s11544_s13 + $0x68] sm:$0xff] %vm7467_vm8, %v9122_v8 }
 0x351   : > { %v3898_v34 = vpop.f32.mrb[21].mxu1 }
 0x352   : > { %v8752_v62 = vpop.f32.mrb[22].mxu1  ;;  %v9089_v29 = vpop.f32.mrb[16].mxu0 }
 0x353   : > { %v3901_v35 = vpop.f32.mrb[23].mxu1  ;;  %v9123_v36 = vadd.f32 %v9089_v29, %v8747_v4  ;;  %v7352_v15 = vpop.f32.mrb[17].mxu0 }
 0x354   : > { %v9124_v51 = vadd.f32 %v7352_v15, %v3882_v17  ;;  %v9090_v57 = vpop.f32.mrb[18].mxu0 }
 0x355   : > { %7486 = vst.msk [vmem:[%s11544_s13 + $0x90] sm:$0xff] %vm7467_vm8, %v9123_v36  ;;  %v9125_v33 = vadd.f32 %v9090_v57, %v8748_v28  ;;  %v7355_v61 = vpop.f32.mrb[19].mxu0 }
 0x356   : > { %7484 = vst.msk [vmem:[%s11544_s13 + $0x80] sm:$0xff] %vm7467_vm8, %v9124_v51  ;;  %v9126_v40 = vadd.f32 %v7355_v61, %v3885_v58 }
 0x357   : > { %7487 = vst.msk [vmem:[%s11544_s13 + $0x98] sm:$0xff] %vm7467_vm8, %v9125_v33 }
 0x358   : > { %v8755_v56 = vpop.f32.mrb[24].mxu1  ;;  %7485 = vst.msk [vmem:[%s11544_s13 + $0x88] sm:$0xff] %vm7467_vm8, %v9126_v40 }
 0x359   : > { %v3914_v9 = vpop.f32.mrb[25].mxu1 }
 0x35a   : > { %v8756_v18 = vpop.f32.mrb[26].mxu1  ;;  %v9093_v3 = vpop.f32.mrb[20].mxu0 }
 0x35b   : > { %v3917_v32 = vpop.f32.mrb[27].mxu1  ;;  %v9127_v53 = vadd.f32 %v9093_v3, %v8751_v49  ;;  %v7368_v19 = vpop.f32.mrb[21].mxu0 }
 0x35c   : > { %v9128_v21 = vadd.f32 %v7368_v19, %v3898_v34  ;;  %v9094_v47 = vpop.f32.mrb[22].mxu0 }
 0x35d   : > { %7490 = vst.msk [vmem:[%s11544_s13 + $0xb0] sm:$0xff] %vm7467_vm8, %v9127_v53  ;;  %v9129_v22 = vadd.f32 %v9094_v47, %v8752_v62  ;;  %v7371_v25 = vpop.f32.mrb[23].mxu0 }
 0x35e   : > { %7488 = vst.msk [vmem:[%s11544_s13 + $0xa0] sm:$0xff] %vm7467_vm8, %v9128_v21  ;;  %v9130_v63 = vadd.f32 %v7371_v25, %v3901_v35 }
 0x35f   : > { %7491 = vst.msk [vmem:[%s11544_s13 + $0xb8] sm:$0xff] %vm7467_vm8, %v9129_v22 }
 0x360   : > { %v8759_v1 = vpop.f32.mrb[28].mxu1  ;;  %7489 = vst.msk [vmem:[%s11544_s13 + $0xa8] sm:$0xff] %vm7467_vm8, %v9130_v63 }
 0x361   : > { %v3930_v27 = vpop.f32.mrb[29].mxu1 }
 0x362   : > { %v8760_v54 = vpop.f32.mrb[30].mxu1  ;;  %v9097_v12 = vpop.f32.mrb[24].mxu0 }
 0x363   : > { %v3933_v26 = vpop.f32.mrb[31].mxu1  ;;  %v9131_v13 = vadd.f32 %v9097_v12, %v8755_v56  ;;  %v7384_v37 = vpop.f32.mrb[25].mxu0 }
 0x364   : > { %v9132_v39 = vadd.f32 %v7384_v37, %v3914_v9  ;;  %v9098_v41 = vpop.f32.mrb[26].mxu0 }
 0x365   : > { %7494 = vst.msk [vmem:[%s11544_s13 + $0xd0] sm:$0xff] %vm7467_vm8, %v9131_v13  ;;  %v9133_v38 = vadd.f32 %v9098_v41, %v8756_v18  ;;  %v7387_v5 = vpop.f32.mrb[27].mxu0 }
 0x366   : > { %7492 = vst.msk [vmem:[%s11544_s13 + $0xc0] sm:$0xff] %vm7467_vm8, %v9132_v39  ;;  %v9134_v48 = vadd.f32 %v7387_v5, %v3917_v32 }
 0x367   : > { %7495 = vst.msk [vmem:[%s11544_s13 + $0xd8] sm:$0xff] %vm7467_vm8, %v9133_v38 }
 0x368   : > { %v8763_v23 = vpop.f32.mrb[32].mxu1  ;;  %7493 = vst.msk [vmem:[%s11544_s13 + $0xc8] sm:$0xff] %vm7467_vm8, %v9134_v48 }
 0x369   : > { %v3946_v24 = vpop.f32.mrb[33].mxu1 }
 0x36a   : > { %v8764_v44 = vpop.f32.mrb[34].mxu1  ;;  %v9101_v60 = vpop.f32.mrb[28].mxu0 }
 0x36b   : > { %v3949_v55 = vpop.f32.mrb[35].mxu1  ;;  %v9135_v59 = vadd.f32 %v9101_v60, %v8759_v1  ;;  %v7400_v10 = vpop.f32.mrb[29].mxu0 }
 0x36c   : > { %v9136_v14 = vadd.f32 %v7400_v10, %v3930_v27  ;;  %v9102_v20 = vpop.f32.mrb[30].mxu0 }
 0x36d   : > { %7498 = vst.msk [vmem:[%s11544_s13 + $0xf0] sm:$0xff] %vm7467_vm8, %v9135_v59  ;;  %v9137_v11 = vadd.f32 %v9102_v20, %v8760_v54  ;;  %v7403_v0 = vpop.f32.mrb[31].mxu0 }
 0x36e   : > { %7496 = vst.msk [vmem:[%s11544_s13 + $0xe0] sm:$0xff] %vm7467_vm8, %v9136_v14  ;;  %v9138_v52 = vadd.f32 %v7403_v0, %v3933_v26 }
 0x36f   : > { %7499 = vst.msk [vmem:[%s11544_s13 + $0xf8] sm:$0xff] %vm7467_vm8, %v9137_v11 }
 0x370   : > { %7497 = vst.msk [vmem:[%s11544_s13 + $0xe8] sm:$0xff] %vm7467_vm8, %v9138_v52 }
 0x372   : > { %v9105_v46 = vpop.f32.mrb[32].mxu0 }
 0x373   : > { %v9139_v43 = vadd.f32 %v9105_v46, %v8763_v23  ;;  %v7416_v45 = vpop.f32.mrb[33].mxu0 }
 0x374   : > { %v9140_v30 = vadd.f32 %v7416_v45, %v3946_v24  ;;  %v9106_v4 = vpop.f32.mrb[34].mxu0 }
 0x375   : > { %7502 = vst.msk [vmem:[%s11544_s13 + $0x110] sm:$0xff] %vm7467_vm8, %v9139_v43  ;;  %v9141_v17 = vadd.f32 %v9106_v4, %v8764_v44  ;;  %v7419_v28 = vpop.f32.mrb[35].mxu0 }
 0x376   : > { %7500 = vst.msk [vmem:[%s11544_s13 + $0x100] sm:$0xff] %vm7467_vm8, %v9140_v30  ;;  %v9142_v58 = vadd.f32 %v7419_v28, %v3949_v55 }
 0x377   : > { %7503 = vst.msk [vmem:[%s11544_s13 + $0x118] sm:$0xff] %vm7467_vm8, %v9141_v17 }
 0x378   : > { %7501 = vst.msk [vmem:[%s11544_s13 + $0x108] sm:$0xff] %vm7467_vm8, %v9142_v58 }
 0x379 PF: > { %s14_s15 = sadd.s32 1, %s10005_s15  }
 0x37a   : > { %p11_p4 = scmp.ge.s32.totalorder %s14_s15, 4  }
 0x37c   :  { %13 = sbr.rel (!%p11_p4) target bundleno = 1 (0x1), region = 85 }

</bundles_post_ra>
